<compile_context>
chip_gen: v6e
topology: v6e:2x2x1
jax: 0.10.0
libtpu: 0.0.40
codegen_flags: <defaults>
</compile_context>

<pallas_src>
import math
from functools import partial

import numpy as np
import jax
import jax.numpy as jnp
from jax import lax
from jax.experimental import pallas as pl
from jax.experimental.pallas import tpu as pltpu


# ----------------------------- in-kernel helpers -----------------------------

def _erf(x):
    # Abramowitz & Stegun 7.1.26 (max abs err ~1.5e-7); lowering-safe on Mosaic.
    a1, a2, a3, a4, a5 = 0.254829592, -0.284496736, 1.421413741, -1.453152027, 1.061405429
    p = 0.3275911
    sgn = jnp.where(x < 0.0, -1.0, 1.0)
    ax = jnp.abs(x)
    t = 1.0 / (1.0 + p * ax)
    poly = ((((a5 * t + a4) * t + a3) * t + a2) * t + a1) * t
    return sgn * (1.0 - poly * jnp.exp(-ax * ax))


def _gelu_exact(x):
    # PyTorch nn.GELU() default: 0.5*x*(1+erf(x/sqrt(2)))
    return 0.5 * x * (1.0 + _erf(x * (1.0 / math.sqrt(2.0))))


# ------------------------------ fused Pallas kernel ---------------------------

def _wa_block_kernel(x_ref, bias_ref, wcc_ref, w3_ref, bvec_ref, o_ref,
                     *, H, W, num_heads, head_dim):
    """One batch image: full WABlock forward, everything resident in VMEM.

    x_ref    : (1, H*W, C)  f32   input pixels (row-major H,W), C in lanes
    bias_ref : (H*W, H*W)   f32   window-block-diagonal additive attention bias
    wcc_ref  : (5, C, C)    bf16  [Wq, Wk, Wv, Wproj, W1x1]
    w3_ref   : (9*C, C)     bf16  3x3 conv weight, im2col layout (dy,dx,cin)xcout
    bvec_ref : (6, C)       f32   [bq, bk, bv, bproj, b1x1, b3x3]
    o_ref    : (1, H*W, C)  f32
    """
    HW = H * W
    x = x_ref[0]                                    # (HW, C) f32
    C = x.shape[-1]
    xb = x.astype(jnp.bfloat16)

    wq, wk, wv = wcc_ref[0], wcc_ref[1], wcc_ref[2]
    wproj, w1 = wcc_ref[3], wcc_ref[4]
    bq = bvec_ref[0:1, :]
    bk = bvec_ref[1:2, :]
    bv = bvec_ref[2:3, :]
    bproj = bvec_ref[3:4, :]
    b1 = bvec_ref[4:5, :]
    b3 = bvec_ref[5:6, :]

    # ---- qkv projections (bf16 MXU, f32 accumulate) ----
    q = jnp.dot(xb, wq, preferred_element_type=jnp.float32) + bq      # (HW, C)
    k = jnp.dot(xb, wk, preferred_element_type=jnp.float32) + bk
    v = jnp.dot(xb, wv, preferred_element_type=jnp.float32) + bv
    kb = k.astype(jnp.bfloat16)
    vb = v.astype(jnp.bfloat16)

    bias = bias_ref[...]                                              # (HW, HW)
    scale = 1.0 / math.sqrt(head_dim)

    lane = lax.broadcasted_iota(jnp.int32, (1, C), 1)                 # q-channel mask
    row = lax.broadcasted_iota(jnp.int32, (C, C), 0)                  # Wproj-row mask

    attn = jnp.zeros((HW, C), jnp.float32)
    for h in range(num_heads):
        lo, hi = h * head_dim, (h + 1) * head_dim
        # head-masked q keeps the contraction full-C wide but only mixes head h
        qh = jnp.where((lane >= lo) & (lane < hi), q, 0.0).astype(jnp.bfloat16)
        s = lax.dot_general(qh, kb, (((1,), (1,)), ((), ())),
                            preferred_element_type=jnp.float32)       # (HW, HW)
        s = s * scale + bias
        m = jnp.max(s, axis=-1, keepdims=True)
        p = jnp.exp(s - m)
        denom = jnp.sum(p, axis=-1, keepdims=True)
        p = p * pl.reciprocal(denom, approx=True)
        # fold head h's slice of the output projection: v @ (row-masked Wproj)
        wproj_h = jnp.where((row >= lo) & (row < hi), wproj, jnp.zeros_like(wproj))
        vp = jnp.dot(vb, wproj_h, preferred_element_type=jnp.float32) # (HW, C)
        attn = attn + jnp.dot(p.astype(jnp.bfloat16), vp.astype(jnp.bfloat16),
                              preferred_element_type=jnp.float32)
    y = x + attn + bproj                                              # x + mha(x)

    # ---- 1x1 conv + exact GELU ----
    h1 = jnp.dot(y.astype(jnp.bfloat16), w1, preferred_element_type=jnp.float32) + b1
    hg = _gelu_exact(h1)                                              # (HW, C) f32

    # ---- replication pad (1,1,1,1) built in-register ----
    h3 = hg.reshape(H, W, C)
    mid = jnp.concatenate([h3[:, :1, :], h3, h3[:, W - 1:, :]], axis=1)   # (H, W+2, C)
    hp = jnp.concatenate([mid[:1], mid, mid[H - 1:]], axis=0)             # (H+2, W+2, C)

    # ---- 3x3 conv as a single im2col matmul (K = 9*C) ----
    cols = [hp[dy:dy + H, dx:dx + W, :] for dy in range(3) for dx in range(3)]
    col = jnp.concatenate(cols, axis=-1).reshape(HW, 9 * C)               # (HW, 9C)
    z = jnp.dot(col.astype(jnp.bfloat16), w3_ref[...],
                preferred_element_type=jnp.float32) + b3
    z = jnp.where(z >= 0.0, z, 0.1 * z)                                   # LeakyReLU(0.1)

    o_ref[0] = y + z


# --------------------------------- glue / API ---------------------------------

def _relative_position_index(wh, ww):
    coords = np.stack(np.meshgrid(np.arange(wh), np.arange(ww), indexing="ij"))
    cf = coords.reshape(2, -1)
    rel = (cf[:, :, None] - cf[:, None, :]).transpose(1, 2, 0).copy()
    rel[:, :, 0] += wh - 1
    rel[:, :, 1] += ww - 1
    rel[:, :, 0] *= 2 * ww - 1
    return rel.sum(-1)                                    # (N, N) int


def init_params(key, C, window_size, num_heads=2):
    wh, ww = window_size
    assert C % num_heads == 0
    ks = jax.random.split(key, 9)
    s = 0.1
    return {
        # WindowMHA2d: qkv_proj (C -> 3C), head_proj (C -> C); weights (Cin, Cout)
        "wqkv": jax.random.normal(ks[0], (C, 3 * C), jnp.float32) * s,
        "bqkv": jax.random.normal(ks[1], (1, 3 * C), jnp.float32) * s,
        "wproj": jax.random.normal(ks[2], (C, C), jnp.float32) * s,
        "bproj": jax.random.normal(ks[3], (1, C), jnp.float32) * s,
        # conv_mlp: 1x1 conv then 3x3 conv; 3x3 weight stored (kh, kw, Cin, Cout)
        "w1": jax.random.normal(ks[4], (C, C), jnp.float32) * s,
        "b1": jax.random.normal(ks[5], (1, C), jnp.float32) * s,
        "w3": jax.random.normal(ks[6], (3, 3, C, C), jnp.float32) * s,
        "b3": jax.random.normal(ks[7], (1, C), jnp.float32) * s,
        # WindowScoreBias: relative-position bias table (shared across heads)
        "bias_table": jax.random.normal(ks[8], ((2 * wh - 1) * (2 * ww - 1),), jnp.float32) * 0.02,
        "rel_idx": jnp.asarray(_relative_position_index(wh, ww), jnp.int32),
    }


def wa_block_forward(x_nchw, params, window_size, num_heads=2):
    B, C, H, W = x_nchw.shape
    wh, ww = window_size
    assert H % wh == 0 and W % ww == 0 and C % num_heads == 0
    HW = H * W
    head_dim = C // num_heads
    x = jnp.transpose(x_nchw, (0, 2, 3, 1)).astype(jnp.float32).reshape(B, HW, C)

    # Window relative-position bias -> full-image block-diagonal bias matrix.
    # Inside a window: Swin-style bias; across windows: -1e9 (masked out).
    bias_win = jnp.take(params["bias_table"],
                        params["rel_idx"].reshape(-1)).reshape(wh * ww, wh * ww)
    ii = jnp.arange(HW)
    pi, pj = ii // W, ii % W
    wid = (pi // wh) * (W // ww) + (pj // ww)
    tok = (pi % wh) * ww + (pj % ww)
    bias_full = jnp.where(wid[:, None] == wid[None, :],
                          bias_win[tok[:, None], tok[None, :]],
                          jnp.float32(-1e9))                       # (HW, HW)

    # Pack weights (bf16 MXU inputs) and biases (f32) into VMEM-resident refs.
    wqkv = params["wqkv"]
    wq, wk, wv = wqkv[:, :C], wqkv[:, C:2 * C], wqkv[:, 2 * C:]
    wcc = jnp.stack([wq, wk, wv, params["wproj"], params["w1"]], 0).astype(jnp.bfloat16)
    w3f = params["w3"].reshape(9 * C, C).astype(jnp.bfloat16)       # (dy,dx,cin) x cout
    bvec = jnp.concatenate([params["bqkv"].reshape(3, C),
                            params["bproj"].reshape(1, C),
                            params["b1"].reshape(1, C),
                            params["b3"].reshape(1, C)], axis=0).astype(jnp.float32)

    out_flat = pl.pallas_call(
        partial(_wa_block_kernel, H=H, W=W, num_heads=num_heads, head_dim=head_dim),
        out_shape=jax.ShapeDtypeStruct((B, HW, C), jnp.float32),
        grid=(B,),
        in_specs=[
            pl.BlockSpec((1, HW, C), lambda b: (b, 0, 0)),
            pl.BlockSpec((HW, HW), lambda b: (0, 0)),
            pl.BlockSpec((5, C, C), lambda b: (0, 0, 0)),
            pl.BlockSpec((9 * C, C), lambda b: (0, 0)),
            pl.BlockSpec((6, C), lambda b: (0, 0)),
        ],
        out_specs=pl.BlockSpec((1, HW, C), lambda b: (b, 0, 0)),
        compiler_params=pltpu.CompilerParams(dimension_semantics=("parallel",)),
    )(x, bias_full, wcc, w3f, bvec)

    out = out_flat.reshape(B, H, W, C)
    return jnp.transpose(out, (0, 3, 1, 2))                          # back to NCHW


# ----------------------------- pure-JAX reference -----------------------------

def _window_partition(x, wh, ww):
    B, H, W, C = x.shape
    x = x.reshape(B, H // wh, wh, W // ww, ww, C)
    return x.transpose(0, 1, 3, 2, 4, 5).reshape(B * (H // wh) * (W // ww), wh * ww, C)


def _window_merge(xw, B, H, W, wh, ww, C):
    x = xw.reshape(B, H // wh, W // ww, wh, ww, C)
    return x.transpose(0, 1, 3, 2, 4, 5).reshape(B, H, W, C)


def _reference_forward(x_nchw, params, window_size, num_heads=2):
    B, C, H, W = x_nchw.shape
    wh, ww = window_size
    N = wh * ww
    d = C // num_heads
    x = jnp.transpose(x_nchw, (0, 2, 3, 1)).astype(jnp.float32)

    bias = jnp.take(params["bias_table"], params["rel_idx"].reshape(-1)).reshape(N, N)

    xw = _window_partition(x, wh, ww)                                 # (BW, N, C)
    BW = xw.shape[0]
    qkv = xw @ params["wqkv"] + params["bqkv"]
    q, k, v = qkv[..., :C], qkv[..., C:2 * C], qkv[..., 2 * C:]
    qh = q.reshape(BW, N, num_heads, d).transpose(0, 2, 1, 3)
    kh = k.reshape(BW, N, num_heads, d).transpose(0, 2, 1, 3)
    vh = v.reshape(BW, N, num_heads, d).transpose(0, 2, 1, 3)
    s = jnp.einsum("bhnd,bhmd->bhnm", qh, kh) / math.sqrt(d) + bias
    p = jax.nn.softmax(s, axis=-1)
    o = jnp.einsum("bhnm,bhmd->bhnd", p, vh).transpose(0, 2, 1, 3).reshape(BW, N, C)
    o = o @ params["wproj"] + params["bproj"]
    y = x + _window_merge(o, B, H, W, wh, ww, C)                      # x + mha(x)

    h1 = y.reshape(B, H * W, C) @ params["w1"] + params["b1"]
    hg = jax.nn.gelu(h1, approximate=False).reshape(B, H, W, C)
    hp = jnp.pad(hg, ((0, 0), (1, 1), (1, 1), (0, 0)), mode="edge")
    z = jnp.zeros((B, H, W, C), jnp.float32)
    for dy in range(3):
        for dx in range(3):
            z = z + hp[:, dy:dy + H, dx:dx + W, :] @ params["w3"][dy, dx]
    z = z + params["b3"]
    z = jnp.where(z >= 0.0, z, 0.1 * z)
    out = y + z
    return jnp.transpose(out, (0, 3, 1, 2))


if __name__ == "__main__":
    B, C, H, W = 2, 16, 16, 16
    window_size = (4, 4)

    key = jax.random.PRNGKey(0)
    kx, kp = jax.random.split(key)
    x = jax.random.normal(kx, (B, C, H, W), jnp.float32)
    params = init_params(kp, C, window_size, num_heads=2)

    fwd = jax.jit(lambda xx, pp: wa_block_forward(xx, pp, window_size, num_heads=2))
    out = jax.block_until_ready(fwd(x, params))
    assert out.shape == (B, C, H, W) and out.dtype == jnp.float32
    assert bool(jnp.all(jnp.isfinite(out)))

    # correctness check against f32 pure-JAX reference (kernel uses bf16 matmuls)
    ref = _reference_forward(x, params, window_size, num_heads=2)
    max_diff = float(jnp.max(jnp.abs(out - ref)))
    assert max_diff < 0.15, f"max_diff={max_diff}"

    print("KERNEL_OK")
</pallas_src>

<mosaic_0001>
module attributes {stable_mosaic.version = 11 : i64} {
  func.func @_wa_block_kernel(%arg0: i32, %arg1: memref<1x256x16xf32, #tpu.memory_space<vmem>>, %arg2: memref<256x256xf32, #tpu.memory_space<vmem>>, %arg3: memref<5x16x16xbf16, #tpu.memory_space<vmem>>, %arg4: memref<144x16xbf16, #tpu.memory_space<vmem>>, %arg5: memref<6x16xf32, #tpu.memory_space<vmem>>, %arg6: memref<1x256x16xf32, #tpu.memory_space<vmem>>) attributes {dimension_semantics = [#tpu.dimension_semantics<parallel>], iteration_bounds = array<i64: 2>, scalar_prefetch = 0 : i64, scratch_operands = 0 : i64, tpu.core_type = #tpu.core_type<tc>, window_params = [{transform_indices = @transform_0, window_bounds = array<i64: 1, 256, 16>}, {pipeline_mode = #tpu.pipeline_mode<synchronous>, transform_indices = @transform_1, window_bounds = array<i64: 256, 256>}, {pipeline_mode = #tpu.pipeline_mode<synchronous>, transform_indices = @transform_2, window_bounds = array<i64: 5, 16, 16>}, {pipeline_mode = #tpu.pipeline_mode<synchronous>, transform_indices = @transform_3, window_bounds = array<i64: 144, 16>}, {pipeline_mode = #tpu.pipeline_mode<synchronous>, transform_indices = @transform_4, window_bounds = array<i64: 6, 16>}, {transform_indices = @transform_5, window_bounds = array<i64: 1, 256, 16>}]} {
    %c0 = arith.constant 0 : index
    %c0_0 = arith.constant 0 : index
    %c0_1 = arith.constant 0 : index
    %0 = vector.load %arg1[%c0, %c0_0, %c0_1] : memref<1x256x16xf32, #tpu.memory_space<vmem>>, vector<1x256x16xf32>
    %1 = vector.shape_cast %0 : vector<1x256x16xf32> to vector<256x16xf32>
    %2 = arith.truncf %1 : vector<256x16xf32> to vector<256x16xbf16>
    %c0_2 = arith.constant 0 : index
    %c0_3 = arith.constant 0 : index
    %c0_4 = arith.constant 0 : index
    %3 = vector.load %arg3[%c0_2, %c0_3, %c0_4] : memref<5x16x16xbf16, #tpu.memory_space<vmem>>, vector<1x16x16xbf16>
    %4 = vector.shape_cast %3 : vector<1x16x16xbf16> to vector<16x16xbf16>
    %c1 = arith.constant 1 : index
    %c0_5 = arith.constant 0 : index
    %c0_6 = arith.constant 0 : index
    %5 = vector.load %arg3[%c1, %c0_5, %c0_6] : memref<5x16x16xbf16, #tpu.memory_space<vmem>>, vector<1x16x16xbf16>
    %6 = vector.shape_cast %5 : vector<1x16x16xbf16> to vector<16x16xbf16>
    %c2 = arith.constant 2 : index
    %c0_7 = arith.constant 0 : index
    %c0_8 = arith.constant 0 : index
    %7 = vector.load %arg3[%c2, %c0_7, %c0_8] : memref<5x16x16xbf16, #tpu.memory_space<vmem>>, vector<1x16x16xbf16>
    %8 = vector.shape_cast %7 : vector<1x16x16xbf16> to vector<16x16xbf16>
    %c3 = arith.constant 3 : index
    %c0_9 = arith.constant 0 : index
    %c0_10 = arith.constant 0 : index
    %9 = vector.load %arg3[%c3, %c0_9, %c0_10] : memref<5x16x16xbf16, #tpu.memory_space<vmem>>, vector<1x16x16xbf16>
    %10 = vector.shape_cast %9 : vector<1x16x16xbf16> to vector<16x16xbf16>
    %c4 = arith.constant 4 : index
    %c0_11 = arith.constant 0 : index
    %c0_12 = arith.constant 0 : index
    %11 = vector.load %arg3[%c4, %c0_11, %c0_12] : memref<5x16x16xbf16, #tpu.memory_space<vmem>>, vector<1x16x16xbf16>
    %12 = vector.shape_cast %11 : vector<1x16x16xbf16> to vector<16x16xbf16>
    %c0_13 = arith.constant 0 : index
    %c0_14 = arith.constant 0 : index
    %13 = vector.load %arg5[%c0_13, %c0_14] : memref<6x16xf32, #tpu.memory_space<vmem>>, vector<1x16xf32>
    %c1_15 = arith.constant 1 : index
    %c0_16 = arith.constant 0 : index
    %14 = vector.load %arg5[%c1_15, %c0_16] : memref<6x16xf32, #tpu.memory_space<vmem>>, vector<1x16xf32>
    %c2_17 = arith.constant 2 : index
    %c0_18 = arith.constant 0 : index
    %15 = vector.load %arg5[%c2_17, %c0_18] : memref<6x16xf32, #tpu.memory_space<vmem>>, vector<1x16xf32>
    %c3_19 = arith.constant 3 : index
    %c0_20 = arith.constant 0 : index
    %16 = vector.load %arg5[%c3_19, %c0_20] : memref<6x16xf32, #tpu.memory_space<vmem>>, vector<1x16xf32>
    %c4_21 = arith.constant 4 : index
    %c0_22 = arith.constant 0 : index
    %17 = vector.load %arg5[%c4_21, %c0_22] : memref<6x16xf32, #tpu.memory_space<vmem>>, vector<1x16xf32>
    %c5 = arith.constant 5 : index
    %c0_23 = arith.constant 0 : index
    %18 = vector.load %arg5[%c5, %c0_23] : memref<6x16xf32, #tpu.memory_space<vmem>>, vector<1x16xf32>
    %cst = arith.constant dense<0.000000e+00> : vector<256x16xf32>
    %19 = tpu.matmul %2, %4, %cst {dimension_numbers = #tpu.dot_dimension_numbers<[1], [0], [0], [1], [0, 0, 1, 1], [], []>} : vector<256x16xbf16>, vector<16x16xbf16>, vector<256x16xf32> -> vector<256x16xf32>
    %20 = vector.broadcast %13 : vector<1x16xf32> to vector<256x16xf32>
    %21 = arith.addf %19, %20 : vector<256x16xf32>
    %cst_24 = arith.constant dense<0.000000e+00> : vector<256x16xf32>
    %22 = tpu.matmul %2, %6, %cst_24 {dimension_numbers = #tpu.dot_dimension_numbers<[1], [0], [0], [1], [0, 0, 1, 1], [], []>} : vector<256x16xbf16>, vector<16x16xbf16>, vector<256x16xf32> -> vector<256x16xf32>
    %23 = vector.broadcast %14 : vector<1x16xf32> to vector<256x16xf32>
    %24 = arith.addf %22, %23 : vector<256x16xf32>
    %cst_25 = arith.constant dense<0.000000e+00> : vector<256x16xf32>
    %25 = tpu.matmul %2, %8, %cst_25 {dimension_numbers = #tpu.dot_dimension_numbers<[1], [0], [0], [1], [0, 0, 1, 1], [], []>} : vector<256x16xbf16>, vector<16x16xbf16>, vector<256x16xf32> -> vector<256x16xf32>
    %26 = vector.broadcast %15 : vector<1x16xf32> to vector<256x16xf32>
    %27 = arith.addf %25, %26 : vector<256x16xf32>
    %28 = arith.truncf %24 : vector<256x16xf32> to vector<256x16xbf16>
    %29 = arith.truncf %27 : vector<256x16xf32> to vector<256x16xbf16>
    %c0_26 = arith.constant 0 : index
    %c0_27 = arith.constant 0 : index
    %30 = vector.load %arg2[%c0_26, %c0_27] : memref<256x256xf32, #tpu.memory_space<vmem>>, vector<256x256xf32>
    %31 = tpu.iota {dimensions = array<i32: 1>} : vector<1x16xi32>
    %32 = tpu.iota {dimensions = array<i32: 0>} : vector<16x16xi32>
    %cst_28 = arith.constant 0.000000e+00 : f32
    %33 = vector.broadcast %cst_28 : f32 to vector<256x16xf32>
    %c0_i32 = arith.constant 0 : i32
    %34 = vector.broadcast %c0_i32 : i32 to vector<1x16xi32>
    %35 = arith.cmpi sge, %31, %34 : vector<1x16xi32>
    %c8_i32 = arith.constant 8 : i32
    %36 = vector.broadcast %c8_i32 : i32 to vector<1x16xi32>
    %37 = arith.cmpi slt, %31, %36 : vector<1x16xi32>
    %38 = arith.andi %35, %37 : vector<1x16xi1>
    %cst_29 = arith.constant 0.000000e+00 : f32
    %39 = vector.shape_cast %38 : vector<1x16xi1> to vector<1x16xi1>
    %40 = vector.broadcast %39 : vector<1x16xi1> to vector<256x16xi1>
    %41 = vector.broadcast %cst_29 : f32 to vector<256x16xf32>
    %42 = arith.select %40, %21, %41 : vector<256x16xi1>, vector<256x16xf32>
    %43 = arith.truncf %42 : vector<256x16xf32> to vector<256x16xbf16>
    %cst_30 = arith.constant dense<0.000000e+00> : vector<256x256xf32>
    %44 = tpu.matmul %43, %28, %cst_30 {dimension_numbers = #tpu.dot_dimension_numbers<[1], [1], [0], [0], [0, 0, 1, 0], [], []>} : vector<256x16xbf16>, vector<256x16xbf16>, vector<256x256xf32> -> vector<256x256xf32>
    %cst_31 = arith.constant 0.353553385 : f32
    %45 = vector.broadcast %cst_31 : f32 to vector<256x256xf32>
    %46 = arith.mulf %44, %45 : vector<256x256xf32>
    %47 = arith.addf %46, %30 : vector<256x256xf32>
    %cst_32 = arith.constant dense<0xFF800000> : vector<256xf32>
    %48 = vector.multi_reduction <maximumf>, %47, %cst_32 [1] : vector<256x256xf32> to vector<256xf32>
    %49 = vector.shape_cast %48 : vector<256xf32> to vector<256x1xf32>
    %50 = vector.broadcast %49 : vector<256x1xf32> to vector<256x256xf32>
    %51 = arith.subf %47, %50 : vector<256x256xf32>
    %52 = math.exp %51 : vector<256x256xf32>
    %cst_33 = arith.constant dense<0.000000e+00> : vector<256xf32>
    %53 = vector.multi_reduction <add>, %52, %cst_33 [1] : vector<256x256xf32> to vector<256xf32>
    %54 = vector.shape_cast %53 : vector<256xf32> to vector<256x1xf32>
    %55 = tpu.reciprocal %54 {approx = true} : vector<256x1xf32> -> vector<256x1xf32>
    %56 = vector.broadcast %55 : vector<256x1xf32> to vector<256x256xf32>
    %57 = arith.mulf %52, %56 : vector<256x256xf32>
    %c0_i32_34 = arith.constant 0 : i32
    %58 = vector.broadcast %c0_i32_34 : i32 to vector<16x16xi32>
    %59 = arith.cmpi sge, %32, %58 : vector<16x16xi32>
    %c8_i32_35 = arith.constant 8 : i32
    %60 = vector.broadcast %c8_i32_35 : i32 to vector<16x16xi32>
    %61 = arith.cmpi slt, %32, %60 : vector<16x16xi32>
    %62 = arith.andi %59, %61 : vector<16x16xi1>
    %cst_36 = arith.constant 0.000000e+00 : bf16
    %63 = vector.broadcast %cst_36 : bf16 to vector<16x16xbf16>
    %64 = arith.select %62, %10, %63 : vector<16x16xi1>, vector<16x16xbf16>
    %cst_37 = arith.constant dense<0.000000e+00> : vector<256x16xf32>
    %65 = tpu.matmul %29, %64, %cst_37 {dimension_numbers = #tpu.dot_dimension_numbers<[1], [0], [0], [1], [0, 0, 1, 1], [], []>} : vector<256x16xbf16>, vector<16x16xbf16>, vector<256x16xf32> -> vector<256x16xf32>
    %66 = arith.truncf %57 : vector<256x256xf32> to vector<256x256xbf16>
    %67 = arith.truncf %65 : vector<256x16xf32> to vector<256x16xbf16>
    %cst_38 = arith.constant dense<0.000000e+00> : vector<256x16xf32>
    %68 = tpu.matmul %66, %67, %cst_38 {dimension_numbers = #tpu.dot_dimension_numbers<[1], [0], [0], [1], [0, 0, 1, 1], [], []>} : vector<256x256xbf16>, vector<256x16xbf16>, vector<256x16xf32> -> vector<256x16xf32>
    %69 = arith.addf %33, %68 : vector<256x16xf32>
    %c8_i32_39 = arith.constant 8 : i32
    %70 = vector.broadcast %c8_i32_39 : i32 to vector<1x16xi32>
    %71 = arith.cmpi sge, %31, %70 : vector<1x16xi32>
    %c16_i32 = arith.constant 16 : i32
    %72 = vector.broadcast %c16_i32 : i32 to vector<1x16xi32>
    %73 = arith.cmpi slt, %31, %72 : vector<1x16xi32>
    %74 = arith.andi %71, %73 : vector<1x16xi1>
    %cst_40 = arith.constant 0.000000e+00 : f32
    %75 = vector.shape_cast %74 : vector<1x16xi1> to vector<1x16xi1>
    %76 = vector.broadcast %75 : vector<1x16xi1> to vector<256x16xi1>
    %77 = vector.broadcast %cst_40 : f32 to vector<256x16xf32>
    %78 = arith.select %76, %21, %77 : vector<256x16xi1>, vector<256x16xf32>
    %79 = arith.truncf %78 : vector<256x16xf32> to vector<256x16xbf16>
    %cst_41 = arith.constant dense<0.000000e+00> : vector<256x256xf32>
    %80 = tpu.matmul %79, %28, %cst_41 {dimension_numbers = #tpu.dot_dimension_numbers<[1], [1], [0], [0], [0, 0, 1, 0], [], []>} : vector<256x16xbf16>, vector<256x16xbf16>, vector<256x256xf32> -> vector<256x256xf32>
    %cst_42 = arith.constant 0.353553385 : f32
    %81 = vector.broadcast %cst_42 : f32 to vector<256x256xf32>
    %82 = arith.mulf %80, %81 : vector<256x256xf32>
    %83 = arith.addf %82, %30 : vector<256x256xf32>
    %cst_43 = arith.constant dense<0xFF800000> : vector<256xf32>
    %84 = vector.multi_reduction <maximumf>, %83, %cst_43 [1] : vector<256x256xf32> to vector<256xf32>
    %85 = vector.shape_cast %84 : vector<256xf32> to vector<256x1xf32>
    %86 = vector.broadcast %85 : vector<256x1xf32> to vector<256x256xf32>
    %87 = arith.subf %83, %86 : vector<256x256xf32>
    %88 = math.exp %87 : vector<256x256xf32>
    %cst_44 = arith.constant dense<0.000000e+00> : vector<256xf32>
    %89 = vector.multi_reduction <add>, %88, %cst_44 [1] : vector<256x256xf32> to vector<256xf32>
    %90 = vector.shape_cast %89 : vector<256xf32> to vector<256x1xf32>
    %91 = tpu.reciprocal %90 {approx = true} : vector<256x1xf32> -> vector<256x1xf32>
    %92 = vector.broadcast %91 : vector<256x1xf32> to vector<256x256xf32>
    %93 = arith.mulf %88, %92 : vector<256x256xf32>
    %c8_i32_45 = arith.constant 8 : i32
    %94 = vector.broadcast %c8_i32_45 : i32 to vector<16x16xi32>
    %95 = arith.cmpi sge, %32, %94 : vector<16x16xi32>
    %c16_i32_46 = arith.constant 16 : i32
    %96 = vector.broadcast %c16_i32_46 : i32 to vector<16x16xi32>
    %97 = arith.cmpi slt, %32, %96 : vector<16x16xi32>
    %98 = arith.andi %95, %97 : vector<16x16xi1>
    %cst_47 = arith.constant 0.000000e+00 : bf16
    %99 = vector.broadcast %cst_47 : bf16 to vector<16x16xbf16>
    %100 = arith.select %98, %10, %99 : vector<16x16xi1>, vector<16x16xbf16>
    %cst_48 = arith.constant dense<0.000000e+00> : vector<256x16xf32>
    %101 = tpu.matmul %29, %100, %cst_48 {dimension_numbers = #tpu.dot_dimension_numbers<[1], [0], [0], [1], [0, 0, 1, 1], [], []>} : vector<256x16xbf16>, vector<16x16xbf16>, vector<256x16xf32> -> vector<256x16xf32>
    %102 = arith.truncf %93 : vector<256x256xf32> to vector<256x256xbf16>
    %103 = arith.truncf %101 : vector<256x16xf32> to vector<256x16xbf16>
    %cst_49 = arith.constant dense<0.000000e+00> : vector<256x16xf32>
    %104 = tpu.matmul %102, %103, %cst_49 {dimension_numbers = #tpu.dot_dimension_numbers<[1], [0], [0], [1], [0, 0, 1, 1], [], []>} : vector<256x256xbf16>, vector<256x16xbf16>, vector<256x16xf32> -> vector<256x16xf32>
    %105 = arith.addf %69, %104 : vector<256x16xf32>
    %106 = arith.addf %1, %105 : vector<256x16xf32>
    %107 = vector.broadcast %16 : vector<1x16xf32> to vector<256x16xf32>
    %108 = arith.addf %106, %107 : vector<256x16xf32>
    %109 = arith.truncf %108 : vector<256x16xf32> to vector<256x16xbf16>
    %cst_50 = arith.constant dense<0.000000e+00> : vector<256x16xf32>
    %110 = tpu.matmul %109, %12, %cst_50 {dimension_numbers = #tpu.dot_dimension_numbers<[1], [0], [0], [1], [0, 0, 1, 1], [], []>} : vector<256x16xbf16>, vector<16x16xbf16>, vector<256x16xf32> -> vector<256x16xf32>
    %111 = vector.broadcast %17 : vector<1x16xf32> to vector<256x16xf32>
    %112 = arith.addf %110, %111 : vector<256x16xf32>
    %cst_51 = arith.constant 5.000000e-01 : f32
    %113 = vector.broadcast %cst_51 : f32 to vector<256x16xf32>
    %114 = arith.mulf %113, %112 : vector<256x16xf32>
    %cst_52 = arith.constant 0.707106769 : f32
    %115 = vector.broadcast %cst_52 : f32 to vector<256x16xf32>
    %116 = arith.mulf %112, %115 : vector<256x16xf32>
    %cst_53 = arith.constant 0.000000e+00 : f32
    %117 = vector.broadcast %cst_53 : f32 to vector<256x16xf32>
    %118 = arith.cmpf olt, %116, %117 : vector<256x16xf32>
    %cst_54 = arith.constant -1.000000e+00 : f32
    %cst_55 = arith.constant 1.000000e+00 : f32
    %119 = vector.broadcast %cst_54 : f32 to vector<256x16xf32>
    %120 = vector.broadcast %cst_55 : f32 to vector<256x16xf32>
    %121 = arith.select %118, %119, %120 : vector<256x16xi1>, vector<256x16xf32>
    %122 = math.absf %116 : vector<256x16xf32>
    %cst_56 = arith.constant 0.327591091 : f32
    %123 = vector.broadcast %cst_56 : f32 to vector<256x16xf32>
    %124 = arith.mulf %123, %122 : vector<256x16xf32>
    %cst_57 = arith.constant 1.000000e+00 : f32
    %125 = vector.broadcast %cst_57 : f32 to vector<256x16xf32>
    %126 = arith.addf %125, %124 : vector<256x16xf32>
    %cst_58 = arith.constant 1.000000e+00 : f32
    %127 = vector.broadcast %cst_58 : f32 to vector<256x16xf32>
    %128 = arith.divf %127, %126 : vector<256x16xf32>
    %cst_59 = arith.constant 1.06140542 : f32
    %129 = vector.broadcast %cst_59 : f32 to vector<256x16xf32>
    %130 = arith.mulf %129, %128 : vector<256x16xf32>
    %cst_60 = arith.constant -1.45315206 : f32
    %131 = vector.broadcast %cst_60 : f32 to vector<256x16xf32>
    %132 = arith.addf %130, %131 : vector<256x16xf32>
    %133 = arith.mulf %132, %128 : vector<256x16xf32>
    %cst_61 = arith.constant 1.42141378 : f32
    %134 = vector.broadcast %cst_61 : f32 to vector<256x16xf32>
    %135 = arith.addf %133, %134 : vector<256x16xf32>
    %136 = arith.mulf %135, %128 : vector<256x16xf32>
    %cst_62 = arith.constant -0.284496725 : f32
    %137 = vector.broadcast %cst_62 : f32 to vector<256x16xf32>
    %138 = arith.addf %136, %137 : vector<256x16xf32>
    %139 = arith.mulf %138, %128 : vector<256x16xf32>
    %cst_63 = arith.constant 0.254829586 : f32
    %140 = vector.broadcast %cst_63 : f32 to vector<256x16xf32>
    %141 = arith.addf %139, %140 : vector<256x16xf32>
    %142 = arith.mulf %141, %128 : vector<256x16xf32>
    %cst_64 = arith.constant 0.000000e+00 : f32
    %143 = vector.broadcast %cst_64 : f32 to vector<256x16xf32>
    %144 = arith.subf %143, %122 : vector<256x16xf32>
    %145 = arith.mulf %144, %122 : vector<256x16xf32>
    %146 = math.exp %145 : vector<256x16xf32>
    %147 = arith.mulf %142, %146 : vector<256x16xf32>
    %cst_65 = arith.constant 1.000000e+00 : f32
    %148 = vector.broadcast %cst_65 : f32 to vector<256x16xf32>
    %149 = arith.subf %148, %147 : vector<256x16xf32>
    %150 = arith.mulf %121, %149 : vector<256x16xf32>
    %cst_66 = arith.constant 1.000000e+00 : f32
    %151 = vector.broadcast %cst_66 : f32 to vector<256x16xf32>
    %152 = arith.addf %151, %150 : vector<256x16xf32>
    %153 = arith.mulf %114, %152 : vector<256x16xf32>
    %154 = vector.shape_cast %153 : vector<256x16xf32> to vector<16x16x16xf32>
    %155 = vector.extract_strided_slice %154 {offsets = [0, 0, 0], sizes = [16, 1, 16], strides = [1, 1, 1]} : vector<16x16x16xf32> to vector<16x1x16xf32>
    %156 = vector.extract_strided_slice %154 {offsets = [0, 15, 0], sizes = [16, 1, 16], strides = [1, 1, 1]} : vector<16x16x16xf32> to vector<16x1x16xf32>
    %157 = tpu.concatenate %155, %154, %156 in 1 : vector<16x1x16xf32>, vector<16x16x16xf32>, vector<16x1x16xf32> -> vector<16x18x16xf32>
    %158 = vector.extract_strided_slice %157 {offsets = [0, 0, 0], sizes = [1, 18, 16], strides = [1, 1, 1]} : vector<16x18x16xf32> to vector<1x18x16xf32>
    %159 = vector.extract_strided_slice %157 {offsets = [15, 0, 0], sizes = [1, 18, 16], strides = [1, 1, 1]} : vector<16x18x16xf32> to vector<1x18x16xf32>
    %160 = tpu.concatenate %158, %157, %159 in 0 : vector<1x18x16xf32>, vector<16x18x16xf32>, vector<1x18x16xf32> -> vector<18x18x16xf32>
    %161 = vector.extract_strided_slice %160 {offsets = [0, 0, 0], sizes = [16, 16, 16], strides = [1, 1, 1]} : vector<18x18x16xf32> to vector<16x16x16xf32>
    %162 = vector.extract_strided_slice %160 {offsets = [0, 1, 0], sizes = [16, 16, 16], strides = [1, 1, 1]} : vector<18x18x16xf32> to vector<16x16x16xf32>
    %163 = vector.extract_strided_slice %160 {offsets = [0, 2, 0], sizes = [16, 16, 16], strides = [1, 1, 1]} : vector<18x18x16xf32> to vector<16x16x16xf32>
    %164 = vector.extract_strided_slice %160 {offsets = [1, 0, 0], sizes = [16, 16, 16], strides = [1, 1, 1]} : vector<18x18x16xf32> to vector<16x16x16xf32>
    %165 = vector.extract_strided_slice %160 {offsets = [1, 1, 0], sizes = [16, 16, 16], strides = [1, 1, 1]} : vector<18x18x16xf32> to vector<16x16x16xf32>
    %166 = vector.extract_strided_slice %160 {offsets = [1, 2, 0], sizes = [16, 16, 16], strides = [1, 1, 1]} : vector<18x18x16xf32> to vector<16x16x16xf32>
    %167 = vector.extract_strided_slice %160 {offsets = [2, 0, 0], sizes = [16, 16, 16], strides = [1, 1, 1]} : vector<18x18x16xf32> to vector<16x16x16xf32>
    %168 = vector.extract_strided_slice %160 {offsets = [2, 1, 0], sizes = [16, 16, 16], strides = [1, 1, 1]} : vector<18x18x16xf32> to vector<16x16x16xf32>
    %169 = vector.extract_strided_slice %160 {offsets = [2, 2, 0], sizes = [16, 16, 16], strides = [1, 1, 1]} : vector<18x18x16xf32> to vector<16x16x16xf32>
    %170 = tpu.concatenate %161, %162, %163, %164, %165, %166, %167, %168, %169 in 2 : vector<16x16x16xf32>, vector<16x16x16xf32>, vector<16x16x16xf32>, vector<16x16x16xf32>, vector<16x16x16xf32>, vector<16x16x16xf32>, vector<16x16x16xf32>, vector<16x16x16xf32>, vector<16x16x16xf32> -> vector<16x16x144xf32>
    %171 = vector.shape_cast %170 : vector<16x16x144xf32> to vector<256x144xf32>
    %172 = arith.truncf %171 : vector<256x144xf32> to vector<256x144xbf16>
    %c0_67 = arith.constant 0 : index
    %c0_68 = arith.constant 0 : index
    %173 = vector.load %arg4[%c0_67, %c0_68] : memref<144x16xbf16, #tpu.memory_space<vmem>>, vector<144x16xbf16>
    %cst_69 = arith.constant dense<0.000000e+00> : vector<256x16xf32>
    %174 = tpu.matmul %172, %173, %cst_69 {dimension_numbers = #tpu.dot_dimension_numbers<[1], [0], [0], [1], [0, 0, 1, 1], [], []>} : vector<256x144xbf16>, vector<144x16xbf16>, vector<256x16xf32> -> vector<256x16xf32>
    %175 = vector.broadcast %18 : vector<1x16xf32> to vector<256x16xf32>
    %176 = arith.addf %174, %175 : vector<256x16xf32>
    %cst_70 = arith.constant 0.000000e+00 : f32
    %177 = vector.broadcast %cst_70 : f32 to vector<256x16xf32>
    %178 = arith.cmpf oge, %176, %177 : vector<256x16xf32>
    %cst_71 = arith.constant 1.000000e-01 : f32
    %179 = vector.broadcast %cst_71 : f32 to vector<256x16xf32>
    %180 = arith.mulf %179, %176 : vector<256x16xf32>
    %181 = arith.select %178, %176, %180 : vector<256x16xi1>, vector<256x16xf32>
    %182 = arith.addf %108, %181 : vector<256x16xf32>
    %c0_72 = arith.constant 0 : index
    %c0_73 = arith.constant 0 : index
    %c0_74 = arith.constant 0 : index
    %183 = vector.load %arg6[%c0_72, %c0_73, %c0_74] : memref<1x256x16xf32, #tpu.memory_space<vmem>>, vector<1x256x16xf32>
    %184 = vector.shape_cast %183 : vector<1x256x16xf32> to vector<256x16xf32>
    %185 = vector.shape_cast %182 : vector<256x16xf32> to vector<1x256x16xf32>
    tpu.vector_store %arg6[%c0_72, %c0_73, %c0_74], %185 {strides = array<i32>} : memref<1x256x16xf32, #tpu.memory_space<vmem>>, vector<1x256x16xf32>,
    return
  }
  func.func @transform_0(%arg0: i32) -> (i32, i32, i32) {
    %c0_i32 = arith.constant 0 : i32
    %c0_i32_0 = arith.constant 0 : i32
    %c0_i32_1 = arith.constant 0 : i32
    return %arg0, %c0_i32, %c0_i32_0 : i32, i32, i32
  }
  func.func @transform_1(%arg0: i32) -> (i32, i32) {
    %c0_i32 = arith.constant 0 : i32
    %c0_i32_0 = arith.constant 0 : i32
    %c0_i32_1 = arith.constant 0 : i32
    return %c0_i32, %c0_i32_0 : i32, i32
  }
  func.func @transform_2(%arg0: i32) -> (i32, i32, i32) {
    %c0_i32 = arith.constant 0 : i32
    %c0_i32_0 = arith.constant 0 : i32
    %c0_i32_1 = arith.constant 0 : i32
    %c0_i32_2 = arith.constant 0 : i32
    return %c0_i32, %c0_i32_0, %c0_i32_1 : i32, i32, i32
  }
  func.func @transform_3(%arg0: i32) -> (i32, i32) {
    %c0_i32 = arith.constant 0 : i32
    %c0_i32_0 = arith.constant 0 : i32
    %c0_i32_1 = arith.constant 0 : i32
    return %c0_i32, %c0_i32_0 : i32, i32
  }
  func.func @transform_4(%arg0: i32) -> (i32, i32) {
    %c0_i32 = arith.constant 0 : i32
    %c0_i32_0 = arith.constant 0 : i32
    %c0_i32_1 = arith.constant 0 : i32
    return %c0_i32, %c0_i32_0 : i32, i32
  }
  func.func @transform_5(%arg0: i32) -> (i32, i32, i32) {
    %c0_i32 = arith.constant 0 : i32
    %c0_i32_0 = arith.constant 0 : i32
    %c0_i32_1 = arith.constant 0 : i32
    return %arg0, %c0_i32, %c0_i32_0 : i32, i32, i32
  }
}

</mosaic_0001>

<bundles_post_ra>
// kernel: _lambda_.1
= control target key start
LH: loop header
LB: loop body
LE: loop exit
PB: predicated region body
PF: predicated region fallthrough
CT: control target
= control target key end

     0   :  { %s8608_s18 = smov 0   ;;  %s13355_s0 = inlined_call_operand.vmem [shape: f32[2,256,16], index: 0, kind: input, shape index: {}]   ;;  %s13356_s1 = inlined_call_operand.vmem [shape: f32[256,256], index: 1, kind: input, shape index: {}]   ;;  %s13357_s2 = inlined_call_operand.vmem [shape: bf16[5,16,16], index: 2, kind: input, shape index: {}]   ;;  %s13358_s3 = inlined_call_operand.vmem [shape: bf16[144,16], index: 3, kind: input, shape index: {}]   ;;  %s13359_s4 = inlined_call_operand.vmem [shape: f32[6,16], index: 4, kind: input, shape index: {}]   ;;  %s13360_s5 = inlined_call_operand.vmem [shape: f32[2,256,16], index: 5, kind: output, shape index: {}]  }
   0x1 LB: > { %s6614_s19 = sadd.s32 4294967295, %s8565_s18   ;;  %p6618_p0 = scmp.ge.s32.totalorder %s8565_s18, 1  ;;  %s8565_s18 = sphi %s8608_s18, %s15_s18  }
   0x2   : > { %p187_p1 = scmp.lt.s32.totalorder %s8565_s18, 3 }
   0x4   : > { %p188_p2 = pnand %p6618_p0, %p187_p1 }
   0x6   : > { %191 = sbr.rel (%p188_p2) target bundleno = 2057 (0x809), region = 40 }
   0xb   : > { %v8001_v0 = vld [vmem:[%s13357_s2] sm:$0xff]   ;;  %p215_p3 = scmp.lt.s32.totalorder %s6614_s19, 1  ;;  %v8002_v1 = vld [vmem:[%s13357_s2 + $0x10] sm:$0xff]   ;;  %v8003_v2 = vld [vmem:[%s13357_s2 + $0x8] sm:$0xff]   ;;  %vm304_vm0 = vcmask 130048   ;;  %vm8567_vm1 = vmmov 1   ;;  %v952_v58 = vlaneseq }
   0xc   : > { %7222 = vmatprep.subr.bf16.mxu1 %v8001_v0  ;;  %7290 = vmatprep.subr.bf16.mxu0 %v8002_v1  ;;  %v8736_v51 = vld [vmem:[%s13357_s2 + $0x18] sm:$0xf]  ;;  %v8741_v52 = vld [vmem:[%s13357_s2 + $0x1c] sm:$0xf]  ;;  %vm8743_vm2 = vmpackc.low %vm8567_vm1, %vm8567_vm1  ;;  %vm8568_vm3 = vmmov 0   ;;  %vm4828_vm1 = vcmask 1040384  }
   0xd   : > { %s14284_s19 = smov (!%p215_p3, %s6614_s19), 1  ;;  %7223 = vmatpush3.bf16.msra.mxu1 %v8001_v0  ;;  %7291 = vmatpush3.bf16.msra.mxu0 %v8002_v1  ;;  %vm8747_vm4 = vmpackc.low %vm8568_vm3, %vm8568_vm3  ;;  %v1915_v55 = vsel %vm8743_vm2, %v8736_v51, 0  ;;  %v8774_v59 = vand.u32 127, %v952_v58  ;;  %v8781_v60 = vld [vmem:[%s13359_s4] ss:$0 sm:$0xff]  ;;  %s8571_s25 = smov 48  }
   0xe   : > { %s6798_s26 = sshll.u32 %s14284_s19, 8  ;;  %7256 = vmatprep.subr.bf16.mxu1 %v8003_v2  ;;  %v1916_v56 = vsel %vm8747_vm4, %v8741_v52, 0  ;;  %v8792_v1 = vld [vmem:[%s13359_s4 + $0x2] ss:$0 sm:$0xff]  ;;  %s8572_s27 = smov 112  }
   0xf   : > { %s8633_s29 = scalar_lea.vmem %s13355_s0, %s6798_s26  ;;  %v6701_v57 = vcombine.low %v1915_v55, %v1916_v56  ;;  %vm2180_vm5 = vcmp.ge.s32.totalorder %v8774_v59, 8  ;;  %vm2181_vm6 = vcmp.lt.s32.totalorder %v8774_v59, 16  ;;  %vm958_vm7 = vcmp.lt.s32.totalorder %v8774_v59, 8  ;;  %s8573_s28 = smov 16  }
  0x10   : > { %v226_v3 = vld [vmem:[%s8633_s29] sm:$0xff]  ;;  %v227_v4 = vld [vmem:[%s8633_s29 + $0x8] sm:$0xff]  ;;  %v228_v5 = vld [vmem:[%s8633_s29 + $0x10] sm:$0xff]  ;;  %s8574_s30 = smov 64   ;;  %s8575_s6 = smov 80  }
  0x11   : > { %v8638_v6 = vpack.c.bf16 %v227_v4, %v226_v3  ;;  %v229_v7 = vld [vmem:[%s8633_s29 + $0x18] sm:$0xff]  ;;  %v230_v8 = vld [vmem:[%s8633_s29 + $0x20] sm:$0xff]  ;;  %v231_v9 = vld [vmem:[%s8633_s29 + $0x28] sm:$0xff]  ;;  %7324 = vmatprep.subr.bf16.mxu0 %v6701_v57  ;;  %s8576_s7 = smov 32  }
  0x12   : > { %v8643_v10 = vpack.c.bf16 %v229_v7, %v228_v5  ;;  %v8645_v11 = vpack.c.bf16 %v231_v9, %v230_v8  ;;  %v232_v12 = vld [vmem:[%s8633_s29 + $0x30] sm:$0xff]  ;;  %v233_v13 = vld [vmem:[%s8633_s29 + $0x38] sm:$0xff]  ;;  %v234_v14 = vld [vmem:[%s8633_s29 + $0x40] sm:$0xff] }
  0x13   : > { %7224 = vmatprep.mubr.msk.bf16.mxu1 %vm304_vm0, %v8638_v6  ;;  %7292 = vmatprep.mubr.msk.bf16.mxu0 %vm304_vm0, %v8638_v6  ;;  %v235_v15 = vld [vmem:[%s8633_s29 + $0x48] sm:$0xff]  ;;  %v8663_v16 = vpack.c.bf16 %v233_v13, %v232_v12  ;;  %v236_v18 = vld [vmem:[%s8633_s29 + $0x50] sm:$0xff]  ;;  %v237_v19 = vld [vmem:[%s8633_s29 + $0x58] sm:$0xff] }
  0x14   : > { %7225 = vmatmul.mubr.msk.bf16.vlgmr.msra.gmra.mxu1 %vm304_vm0, %v8643_v10  ;;  %7293 = vmatmul.mubr.msk.bf16.vlgmr.msra.gmra.mxu0 %vm304_vm0, %v8643_v10  ;;  %v8665_v17 = vpack.c.bf16 %v235_v15, %v234_v14  ;;  %v238_v20 = vld [vmem:[%s8633_s29 + $0x60] sm:$0xff]  ;;  %v239_v21 = vld [vmem:[%s8633_s29 + $0x68] sm:$0xff]  ;;  %v8679_v22 = vpack.c.bf16 %v237_v19, %v236_v18  ;;  %v240_v24 = vld [vmem:[%s8633_s29 + $0x70] sm:$0xff] }
  0x15   : > { %7257 = vmatpush3.bf16.msra.mxu1 %v8003_v2  ;;  %7228 = vmatprep.mubr.msk.bf16.mxu1 %vm304_vm0, %v8645_v11  ;;  %v8681_v23 = vpack.c.bf16 %v239_v21, %v238_v20  ;;  %v241_v25 = vld [vmem:[%s8633_s29 + $0x78] sm:$0xff]  ;;  %v242_v26 = vld [vmem:[%s8633_s29 + $0x80] sm:$0xff]  ;;  %v243_v27 = vld [vmem:[%s8633_s29 + $0x88] sm:$0xff] }
  0x16   : > { %7296 = vmatprep.mubr.msk.bf16.mxu0 %vm304_vm0, %v8645_v11  ;;  %v265_v28 = vpack.c.bf16 %v241_v25, %v240_v24  ;;  %v266_v29 = vpack.c.bf16 %v243_v27, %v242_v26  ;;  %v244_v30 = vld [vmem:[%s8633_s29 + $0x90] sm:$0xff]  ;;  %v245_v31 = vld [vmem:[%s8633_s29 + $0x98] sm:$0xff]  ;;  %v246_v32 = vld [vmem:[%s8633_s29 + $0xa0] sm:$0xff]  ;;  %7325 = vmatpush3.bf16.msra.mxu0 %v6701_v57 }
  0x17   : > { %v247_v33 = vld [vmem:[%s8633_s29 + $0xa8] sm:$0xff]  ;;  %v267_v34 = vpack.c.bf16 %v245_v31, %v244_v30  ;;  %v248_v36 = vld [vmem:[%s8633_s29 + $0xb0] sm:$0xff]  ;;  %v249_v37 = vld [vmem:[%s8633_s29 + $0xb8] sm:$0xff] }
  0x18   : > { %v268_v35 = vpack.c.bf16 %v247_v33, %v246_v32  ;;  %v250_v38 = vld [vmem:[%s8633_s29 + $0xc0] sm:$0xff]  ;;  %v251_v39 = vld [vmem:[%s8633_s29 + $0xc8] sm:$0xff]  ;;  %v269_v40 = vpack.c.bf16 %v249_v37, %v248_v36  ;;  %v252_v42 = vld [vmem:[%s8633_s29 + $0xd0] sm:$0xff] }
  0x19   : > { %v270_v41 = vpack.c.bf16 %v251_v39, %v250_v38  ;;  %v253_v43 = vld [vmem:[%s8633_s29 + $0xd8] sm:$0xff]  ;;  %v254_v44 = vld [vmem:[%s8633_s29 + $0xe0] sm:$0xff]  ;;  %v255_v45 = vld [vmem:[%s8633_s29 + $0xe8] sm:$0xff] }
  0x1a   : > { %v271_v46 = vpack.c.bf16 %v253_v43, %v252_v42  ;;  %v272_v47 = vpack.c.bf16 %v255_v45, %v254_v44  ;;  %v256_v48 = vld [vmem:[%s8633_s29 + $0xf0] sm:$0xff]  ;;  %v257_v49 = vld [vmem:[%s8633_s29 + $0xf8] sm:$0xff]  ;;  %vm8784_vm8 = vmand %vm2180_vm5, %vm2181_vm6  ;;  %vm5184_vm5 = vcmask 1045504  }
  0x1b   : > { %v273_v50 = vpack.c.bf16 %v257_v49, %v256_v48 }
  0x1c   : > { %7229 = vmatmul.mubr.msk.bf16.gmra.mxu1 %vm304_vm0, %v8663_v16  ;;  %7297 = vmatmul.mubr.msk.bf16.gmra.mxu0 %vm304_vm0, %v8663_v16 }
  0x1d   : > { %7232 = vmatprep.mubr.msk.bf16.mxu1 %vm304_vm0, %v8665_v17  ;;  %7300 = vmatprep.mubr.msk.bf16.mxu0 %vm304_vm0, %v8665_v17 }
  0x24   : > { %7233 = vmatmul.mubr.msk.bf16.gmra.mxu1 %vm304_vm0, %v8679_v22  ;;  %7301 = vmatmul.mubr.msk.bf16.gmra.mxu0 %vm304_vm0, %v8679_v22 }
  0x25   : > { %7236 = vmatprep.mubr.msk.bf16.mxu1 %vm304_vm0, %v8681_v23  ;;  %7304 = vmatprep.mubr.msk.bf16.mxu0 %vm304_vm0, %v8681_v23 }
  0x2c   : > { %7237 = vmatmul.mubr.msk.bf16.gmra.mxu1 %vm304_vm0, %v265_v28  ;;  %7305 = vmatmul.mubr.msk.bf16.gmra.mxu0 %vm304_vm0, %v265_v28 }
  0x2d   : > { %7240 = vmatprep.mubr.msk.bf16.mxu1 %vm304_vm0, %v266_v29  ;;  %7308 = vmatprep.mubr.msk.bf16.mxu0 %vm304_vm0, %v266_v29 }
  0x34   : > { %7241 = vmatmul.mubr.msk.bf16.gmra.mxu1 %vm304_vm0, %v267_v34  ;;  %7309 = vmatmul.mubr.msk.bf16.gmra.mxu0 %vm304_vm0, %v267_v34 }
  0x35   : > { %7244 = vmatprep.mubr.msk.bf16.mxu1 %vm304_vm0, %v268_v35  ;;  %7312 = vmatprep.mubr.msk.bf16.mxu0 %vm304_vm0, %v268_v35 }
  0x3c   : > { %7245 = vmatmul.mubr.msk.bf16.gmra.mxu1 %vm304_vm0, %v269_v40  ;;  %7313 = vmatmul.mubr.msk.bf16.gmra.mxu0 %vm304_vm0, %v269_v40 }
  0x3d   : > { %7248 = vmatprep.mubr.msk.bf16.mxu1 %vm304_vm0, %v270_v41  ;;  %7316 = vmatprep.mubr.msk.bf16.mxu0 %vm304_vm0, %v270_v41 }
  0x44   : > { %7249 = vmatmul.mubr.msk.bf16.gmra.mxu1 %vm304_vm0, %v271_v46  ;;  %7317 = vmatmul.mubr.msk.bf16.gmra.mxu0 %vm304_vm0, %v271_v46 }
  0x45   : > { %7252 = vmatprep.mubr.msk.bf16.mxu1 %vm304_vm0, %v272_v47  ;;  %7320 = vmatprep.mubr.msk.bf16.mxu0 %vm304_vm0, %v272_v47 }
  0x4c   : > { %7253 = vmatmul.mubr.msk.bf16.gmra.mxu1 %vm304_vm0, %v273_v50  ;;  %7321 = vmatmul.mubr.msk.bf16.gmra.mxu0 %vm304_vm0, %v273_v50 }
  0x4d   : > { %7258 = vmatprep.mubr.msk.bf16.mxu1 %vm304_vm0, %v8638_v6 }
  0x54   : > { %7259 = vmatmul.mubr.msk.bf16.vlgmr.msra.gmra.mxu1 %vm304_vm0, %v8643_v10 }
  0x55   : > { %7262 = vmatprep.mubr.msk.bf16.mxu1 %vm304_vm0, %v8645_v11 }
  0x5c   : > { %7263 = vmatmul.mubr.msk.bf16.gmra.mxu1 %vm304_vm0, %v8663_v16 }
  0x5d   : > { %7266 = vmatprep.mubr.msk.bf16.mxu1 %vm304_vm0, %v8665_v17 }
  0x64   : > { %7267 = vmatmul.mubr.msk.bf16.gmra.mxu1 %vm304_vm0, %v8679_v22 }
  0x65   : > { %7270 = vmatprep.mubr.msk.bf16.mxu1 %vm304_vm0, %v8681_v23 }
  0x6c   : > { %7271 = vmatmul.mubr.msk.bf16.gmra.mxu1 %vm304_vm0, %v265_v28 }
  0x6d   : > { %7274 = vmatprep.mubr.msk.bf16.mxu1 %vm304_vm0, %v266_v29 }
  0x74   : > { %7275 = vmatmul.mubr.msk.bf16.gmra.mxu1 %vm304_vm0, %v267_v34 }
  0x75   : > { %7278 = vmatprep.mubr.msk.bf16.mxu1 %vm304_vm0, %v268_v35 }
  0x7c   : > { %7279 = vmatmul.mubr.msk.bf16.gmra.mxu1 %vm304_vm0, %v269_v40 }
  0x7d   : > { %7282 = vmatprep.mubr.msk.bf16.mxu1 %vm304_vm0, %v270_v41 }
  0x84   : > { %7283 = vmatmul.mubr.msk.bf16.gmra.mxu1 %vm304_vm0, %v271_v46 }
  0x85   : > { %7286 = vmatprep.mubr.msk.bf16.mxu1 %vm304_vm0, %v272_v47 }
  0x8c   : > { %7287 = vmatmul.mubr.msk.bf16.gmra.mxu1 %vm304_vm0, %v273_v50 }
  0xd4   : > { %v7226_v61 = vpop.f32.mrf.mxu1  ;;  %v7294_v63 = vpop.f32.mrf.mxu0 }
  0xd5   : > { %v396_v0 = vadd.f32 %v7226_v61, %v8781_v60  ;;  %v738_v8 = vadd.f32 %v7294_v63, %v8792_v1 }
  0xd6   : > { %v387_v2 = vpop.f32.mrf.mxu1  ;;  %v729_v3 = vpop.f32.mrf.mxu0 }
  0xd7   : > { %v964_v4 = vsel %vm958_vm7, %v396_v0, 0.0  ;;  %v2187_v5 = vsel %vm8784_vm8, %v396_v0, 0.0  ;;  %v8800_v9 = vadd.f32 %v8781_v60, %v387_v2  ;;  %v730_v12 = vadd.f32 %v8792_v1, %v729_v3 }
  0xd8   : > { %v7227_v6 = vpop.f32.mrf.mxu1  ;;  %v7295_v7 = vpop.f32.mrf.mxu0 }
  0xd9   : > { %v399_v10 = vadd.f32 %v7227_v6, %v8781_v60  ;;  %v741_v11 = vadd.f32 %v7295_v7, %v8792_v1  ;;  %v962_v23 = vsel %vm958_vm7, %v8800_v9, 0.0  ;;  %v2185_v59 = vsel %vm8784_vm8, %v8800_v9, 0.0 }
  0xda   : > { %v390_v13 = vpop.f32.mrf.mxu1  ;;  %v732_v14 = vpop.f32.mrf.mxu0 }
  0xdb   : > { %v965_v15 = vsel %vm958_vm7, %v399_v10, 0.0  ;;  %v2188_v16 = vsel %vm8784_vm8, %v399_v10, 0.0  ;;  %v8810_v17 = vadd.f32 %v8781_v60, %v390_v13  ;;  %v733_v20 = vadd.f32 %v8792_v1, %v732_v14 }
  0xdc   : > { %v8812_v18 = vpack.c.bf16 %v965_v15, %v964_v4  ;;  %v8814_v19 = vpack.c.bf16 %v2188_v16, %v2187_v5  ;;  %v7230_v21 = vpop.f32.mrf.mxu1  ;;  %v7298_v22 = vpop.f32.mrf.mxu0  ;;  %v8820_v24 = vpack.c.bf16 %v741_v11, %v738_v8 }
  0xdd   : > { %v963_v25 = vsel %vm958_vm7, %v8810_v17, 0.0  ;;  %v412_v26 = vadd.f32 %v7230_v21, %v8781_v60  ;;  %v8828_v28 = vpack.c.bf16 %v733_v20, %v730_v12  ;;  %v754_v34 = vadd.f32 %v7298_v22, %v8792_v1 }
  0xde   : > { %13663 = vst [vmem:[#allocation2_spill] sm:$0xff] %v8820_v24  ;;  %v8826_v27 = vpack.c.bf16 %v963_v25, %v962_v23  ;;  %v403_v29 = vpop.f32.mrf.mxu1  ;;  %v745_v30 = vpop.f32.mrf.mxu0 }
  0xdf   : > { %13664 = vst [vmem:[#allocation3_spill] sm:$0xff] %v8828_v28  ;;  %v968_v31 = vsel %vm958_vm7, %v412_v26, 0.0  ;;  %v2191_v32 = vsel %vm8784_vm8, %v412_v26, 0.0  ;;  %v404_v33 = vadd.f32 %v8781_v60, %v403_v29  ;;  %7326 = vmatprep.mubr.msk.bf16.mxu0 %vm304_vm0, %v8828_v28  ;;  %v746_v41 = vadd.f32 %v8792_v1, %v745_v30 }
  0xe0   : > { %v7231_v35 = vpop.f32.mrf.mxu1  ;;  %v7299_v36 = vpop.f32.mrf.mxu0  ;;  %6867 = vmatprep.mubr.msk.bf16.mxu1 %vm304_vm0, %v8826_v27  ;;  %7327 = vmatmul.mubr.msk.bf16.vlgmr.msra.gmra.mxu0 %vm304_vm0, %v8820_v24 }
  0xe1   : > { %v966_v37 = vsel %vm958_vm7, %v404_v33, 0.0  ;;  %v2189_v38 = vsel %vm8784_vm8, %v404_v33, 0.0  ;;  %v415_v39 = vadd.f32 %v7231_v35, %v8781_v60  ;;  %v757_v40 = vadd.f32 %v7299_v36, %v8792_v1 }
  0xe2   : > { %v406_v42 = vpop.f32.mrf.mxu1  ;;  %v748_v43 = vpop.f32.mrf.mxu0 }
  0xe3   : > { %v969_v44 = vsel %vm958_vm7, %v415_v39, 0.0  ;;  %v2192_v45 = vsel %vm8784_vm8, %v415_v39, 0.0  ;;  %v407_v46 = vadd.f32 %v8781_v60, %v406_v42  ;;  %v749_v49 = vadd.f32 %v8792_v1, %v748_v43 }
  0xe4   : > { %v8854_v47 = vpack.c.bf16 %v969_v44, %v968_v31  ;;  %v8856_v48 = vpack.c.bf16 %v2192_v45, %v2191_v32  ;;  %v7234_v50 = vpop.f32.mrf.mxu1  ;;  %v7302_v55 = vpop.f32.mrf.mxu0  ;;  %v8859_v56 = vpack.c.bf16 %v757_v40, %v754_v34 }
  0xe5   : > { %v967_v57 = vsel %vm958_vm7, %v407_v46, 0.0  ;;  %v2190_v58 = vsel %vm8784_vm8, %v407_v46, 0.0  ;;  %v428_v61 = vadd.f32 %v7234_v50, %v8781_v60  ;;  %v8870_v2 = vpack.c.bf16 %v749_v49, %v746_v41 }
  0xe6   : > { %13665 = vst [vmem:[#allocation4_spill] sm:$0xff] %v8859_v56  ;;  %v8866_v63 = vpack.c.bf16 %v967_v57, %v966_v37  ;;  %v8868_v0 = vpack.c.bf16 %v2190_v58, %v2189_v38  ;;  %v419_v3 = vpop.f32.mrf.mxu1  ;;  %v761_v4 = vpop.f32.mrf.mxu0  ;;  %v770_v8 = vadd.f32 %v7302_v55, %v8792_v1 }
  0xe7   : > { %13666 = vst [vmem:[#allocation5_spill] sm:$0xff] %v8870_v2  ;;  %v972_v5 = vsel %vm958_vm7, %v428_v61, 0.0  ;;  %v2195_v6 = vsel %vm8784_vm8, %v428_v61, 0.0  ;;  %v420_v7 = vadd.f32 %v8781_v60, %v419_v3  ;;  %7330 = vmatprep.mubr.msk.bf16.mxu0 %vm304_vm0, %v8870_v2  ;;  %v762_v16 = vadd.f32 %v8792_v1, %v761_v4 }
  0xe8   : > { %v7235_v10 = vpop.f32.mrf.mxu1  ;;  %v7303_v11 = vpop.f32.mrf.mxu0  ;;  %7331 = vmatmul.mubr.msk.bf16.gmra.mxu0 %vm304_vm0, %v8859_v56 }
  0xe9   : > { %v970_v12 = vsel %vm958_vm7, %v420_v7, 0.0  ;;  %v2193_v13 = vsel %vm8784_vm8, %v420_v7, 0.0  ;;  %v431_v14 = vadd.f32 %v7235_v10, %v8781_v60  ;;  %v773_v15 = vadd.f32 %v7303_v11, %v8792_v1 }
  0xea   : > { %v422_v20 = vpop.f32.mrf.mxu1  ;;  %v764_v21 = vpop.f32.mrf.mxu0 }
  0xeb   : > { %v973_v22 = vsel %vm958_vm7, %v431_v14, 0.0  ;;  %v2196_v23 = vsel %vm8784_vm8, %v431_v14, 0.0  ;;  %v423_v25 = vadd.f32 %v8781_v60, %v422_v20  ;;  %v765_v30 = vadd.f32 %v8792_v1, %v764_v21 }
  0xec   : > { %v8894_v26 = vpack.c.bf16 %v973_v22, %v972_v5  ;;  %v8896_v29 = vpack.c.bf16 %v2196_v23, %v2195_v6  ;;  %v7238_v31 = vpop.f32.mrf.mxu1  ;;  %v7306_v32 = vpop.f32.mrf.mxu0  ;;  %v8899_v33 = vpack.c.bf16 %v773_v15, %v770_v8 }
  0xed   : > { %v971_v34 = vsel %vm958_vm7, %v423_v25, 0.0  ;;  %v2194_v35 = vsel %vm8784_vm8, %v423_v25, 0.0  ;;  %v444_v36 = vadd.f32 %v7238_v31, %v8781_v60  ;;  %v8910_v39 = vpack.c.bf16 %v765_v30, %v762_v16 }
  0xee   : > { %13667 = vst [vmem:[#allocation6_spill] sm:$0xff] %v8899_v33  ;;  %v8906_v37 = vpack.c.bf16 %v971_v34, %v970_v12  ;;  %v8908_v38 = vpack.c.bf16 %v2194_v35, %v2193_v13  ;;  %v435_v40 = vpop.f32.mrf.mxu1  ;;  %v777_v41 = vpop.f32.mrf.mxu0  ;;  %v786_v45 = vadd.f32 %v7306_v32, %v8792_v1 }
  0xef   : > { %13668 = vst [vmem:[#allocation7_spill] sm:$0xff] %v8910_v39  ;;  %v976_v42 = vsel %vm958_vm7, %v444_v36, 0.0  ;;  %v2199_v43 = vsel %vm8784_vm8, %v444_v36, 0.0  ;;  %v436_v44 = vadd.f32 %v8781_v60, %v435_v40  ;;  %7334 = vmatprep.mubr.msk.bf16.mxu0 %vm304_vm0, %v8910_v39  ;;  %v778_v61 = vadd.f32 %v8792_v1, %v777_v41 }
  0xf0   : > { %v7239_v46 = vpop.f32.mrf.mxu1  ;;  %v7307_v49 = vpop.f32.mrf.mxu0  ;;  %7335 = vmatmul.mubr.msk.bf16.gmra.mxu0 %vm304_vm0, %v8899_v33 }
  0xf1   : > { %v974_v50 = vsel %vm958_vm7, %v436_v44, 0.0  ;;  %v2197_v55 = vsel %vm8784_vm8, %v436_v44, 0.0  ;;  %v447_v57 = vadd.f32 %v7239_v46, %v8781_v60  ;;  %v789_v58 = vadd.f32 %v7307_v49, %v8792_v1 }
  0xf2   : > { %v438_v3 = vpop.f32.mrf.mxu1  ;;  %v780_v4 = vpop.f32.mrf.mxu0 }
  0xf3   : > { %v977_v5 = vsel %vm958_vm7, %v447_v57, 0.0  ;;  %v2200_v6 = vsel %vm8784_vm8, %v447_v57, 0.0  ;;  %v439_v7 = vadd.f32 %v8781_v60, %v438_v3  ;;  %v781_v11 = vadd.f32 %v8792_v1, %v780_v4 }
  0xf4   : > { %v8934_v8 = vpack.c.bf16 %v977_v5, %v976_v42  ;;  %v8936_v10 = vpack.c.bf16 %v2200_v6, %v2199_v43  ;;  %v7242_v12 = vpop.f32.mrf.mxu1  ;;  %v7310_v13 = vpop.f32.mrf.mxu0  ;;  %v8939_v14 = vpack.c.bf16 %v789_v58, %v786_v45 }
  0xf5   : > { %v975_v15 = vsel %vm958_vm7, %v439_v7, 0.0  ;;  %v2198_v16 = vsel %vm8784_vm8, %v439_v7, 0.0  ;;  %v460_v20 = vadd.f32 %v7242_v12, %v8781_v60  ;;  %v8950_v23 = vpack.c.bf16 %v781_v11, %v778_v61 }
  0xf6   : > { %13669 = vst [vmem:[#allocation8_spill] sm:$0xff] %v8939_v14  ;;  %v8946_v21 = vpack.c.bf16 %v975_v15, %v974_v50  ;;  %v8948_v22 = vpack.c.bf16 %v2198_v16, %v2197_v55  ;;  %v451_v25 = vpop.f32.mrf.mxu1  ;;  %v793_v30 = vpop.f32.mrf.mxu0  ;;  %v802_v35 = vadd.f32 %v7310_v13, %v8792_v1 }
  0xf7   : > { %13670 = vst [vmem:[#allocation9_spill] sm:$0xff] %v8950_v23  ;;  %v980_v31 = vsel %vm958_vm7, %v460_v20, 0.0  ;;  %v2203_v32 = vsel %vm8784_vm8, %v460_v20, 0.0  ;;  %v452_v34 = vadd.f32 %v8781_v60, %v451_v25  ;;  %7338 = vmatprep.mubr.msk.bf16.mxu0 %vm304_vm0, %v8950_v23  ;;  %v794_v45 = vadd.f32 %v8792_v1, %v793_v30 }
  0xf8   : > { %v7243_v36 = vpop.f32.mrf.mxu1  ;;  %v7311_v40 = vpop.f32.mrf.mxu0  ;;  %7339 = vmatmul.mubr.msk.bf16.gmra.mxu0 %vm304_vm0, %v8939_v14 }
  0xf9   : > { %v978_v41 = vsel %vm958_vm7, %v452_v34, 0.0  ;;  %v2201_v42 = vsel %vm8784_vm8, %v452_v34, 0.0  ;;  %v463_v43 = vadd.f32 %v7243_v36, %v8781_v60  ;;  %v805_v44 = vadd.f32 %v7311_v40, %v8792_v1 }
  0xfa   : > { %v454_v46 = vpop.f32.mrf.mxu1  ;;  %v796_v49 = vpop.f32.mrf.mxu0 }
  0xfb   : > { %v981_v50 = vsel %vm958_vm7, %v463_v43, 0.0  ;;  %v2204_v55 = vsel %vm8784_vm8, %v463_v43, 0.0  ;;  %v455_v57 = vadd.f32 %v8781_v60, %v454_v46  ;;  %v797_v3 = vadd.f32 %v8792_v1, %v796_v49 }
  0xfc   : > { %v8974_v58 = vpack.c.bf16 %v981_v50, %v980_v31  ;;  %v8976_v61 = vpack.c.bf16 %v2204_v55, %v2203_v32  ;;  %v7246_v4 = vpop.f32.mrf.mxu1  ;;  %v7314_v5 = vpop.f32.mrf.mxu0  ;;  %v8979_v6 = vpack.c.bf16 %v805_v44, %v802_v35 }
  0xfd   : > { %v979_v7 = vsel %vm958_vm7, %v455_v57, 0.0  ;;  %v2202_v11 = vsel %vm8784_vm8, %v455_v57, 0.0  ;;  %v476_v12 = vadd.f32 %v7246_v4, %v8781_v60  ;;  %v8990_v16 = vpack.c.bf16 %v797_v3, %v794_v45 }
  0xfe   : > { %13671 = vst [vmem:[#allocation10_spill] sm:$0xff] %v8974_v58  ;;  %13672 = vst [vmem:[#allocation11_spill] sm:$0xff] %v8976_v61  ;;  %v8986_v13 = vpack.c.bf16 %v979_v7, %v978_v41  ;;  %v8988_v15 = vpack.c.bf16 %v2202_v11, %v2201_v42  ;;  %v467_v20 = vpop.f32.mrf.mxu1  ;;  %v809_v25 = vpop.f32.mrf.mxu0  ;;  %v818_v34 = vadd.f32 %v7314_v5, %v8792_v1 }
  0xff   : > { %13673 = vst [vmem:[#allocation12_spill] sm:$0xff] %v8979_v6  ;;  %13674 = vst [vmem:[#allocation13_spill] sm:$0xff] %v8990_v16  ;;  %v984_v30 = vsel %vm958_vm7, %v476_v12, 0.0  ;;  %v2207_v31 = vsel %vm8784_vm8, %v476_v12, 0.0  ;;  %v468_v32 = vadd.f32 %v8781_v60, %v467_v20  ;;  %7342 = vmatprep.mubr.msk.bf16.mxu0 %vm304_vm0, %v8990_v16  ;;  %v810_v44 = vadd.f32 %v8792_v1, %v809_v25 }
 0x100   : > { %v7247_v35 = vpop.f32.mrf.mxu1  ;;  %v7315_v36 = vpop.f32.mrf.mxu0  ;;  %7343 = vmatmul.mubr.msk.bf16.gmra.mxu0 %vm304_vm0, %v8979_v6 }
 0x101   : > { %v982_v40 = vsel %vm958_vm7, %v468_v32, 0.0  ;;  %v2205_v41 = vsel %vm8784_vm8, %v468_v32, 0.0  ;;  %v479_v42 = vadd.f32 %v7247_v35, %v8781_v60  ;;  %v821_v43 = vadd.f32 %v7315_v36, %v8792_v1 }
 0x102   : > { %v470_v45 = vpop.f32.mrf.mxu1  ;;  %v812_v46 = vpop.f32.mrf.mxu0 }
 0x103   : > { %v985_v49 = vsel %vm958_vm7, %v479_v42, 0.0  ;;  %v2208_v50 = vsel %vm8784_vm8, %v479_v42, 0.0  ;;  %v471_v55 = vadd.f32 %v8781_v60, %v470_v45  ;;  %v813_v4 = vadd.f32 %v8792_v1, %v812_v46 }
 0x104   : > { %v9014_v57 = vpack.c.bf16 %v985_v49, %v984_v30  ;;  %v9016_v3 = vpack.c.bf16 %v2208_v50, %v2207_v31  ;;  %v7250_v5 = vpop.f32.mrf.mxu1  ;;  %v7318_v7 = vpop.f32.mrf.mxu0  ;;  %v9019_v11 = vpack.c.bf16 %v821_v43, %v818_v34 }
 0x105   : > { %v983_v12 = vsel %vm958_vm7, %v471_v55, 0.0  ;;  %v2206_v20 = vsel %vm8784_vm8, %v471_v55, 0.0  ;;  %v492_v25 = vadd.f32 %v7250_v5, %v8781_v60  ;;  %v9030_v31 = vpack.c.bf16 %v813_v4, %v810_v44 }
 0x106   : > { %13675 = vst [vmem:[#allocation14_spill] sm:$0xff] %v9014_v57  ;;  %13676 = vst [vmem:[#allocation15_spill] sm:$0xff] %v9016_v3  ;;  %v9026_v32 = vpack.c.bf16 %v983_v12, %v982_v40  ;;  %v9028_v30 = vpack.c.bf16 %v2206_v20, %v2205_v41  ;;  %v483_v35 = vpop.f32.mrf.mxu1  ;;  %v825_v36 = vpop.f32.mrf.mxu0  ;;  %v834_v45 = vadd.f32 %v7318_v7, %v8792_v1 }
 0x107   : > { %13677 = vst [vmem:[#allocation16_spill] sm:$0xff] %v9019_v11  ;;  %13680 = vst [vmem:[#allocation19_spill] sm:$0xff] %v9030_v31  ;;  %v988_v34 = vsel %vm958_vm7, %v492_v25, 0.0  ;;  %v2211_v42 = vsel %vm8784_vm8, %v492_v25, 0.0  ;;  %v484_v43 = vadd.f32 %v8781_v60, %v483_v35  ;;  %7346 = vmatprep.mubr.msk.bf16.mxu0 %vm304_vm0, %v9030_v31  ;;  %v826_v55 = vadd.f32 %v8792_v1, %v825_v36 }
 0x108   : > { %13678 = vst [vmem:[#allocation17_spill] sm:$0xff] %v9026_v32  ;;  %13679 = vst [vmem:[#allocation18_spill] sm:$0xff] %v9028_v30  ;;  %v7251_v40 = vpop.f32.mrf.mxu1  ;;  %v7319_v41 = vpop.f32.mrf.mxu0  ;;  %7347 = vmatmul.mubr.msk.bf16.gmra.mxu0 %vm304_vm0, %v9019_v11 }
 0x109   : > { %v986_v44 = vsel %vm958_vm7, %v484_v43, 0.0  ;;  %v2209_v46 = vsel %vm8784_vm8, %v484_v43, 0.0  ;;  %v495_v49 = vadd.f32 %v7251_v40, %v8781_v60  ;;  %v837_v50 = vadd.f32 %v7319_v41, %v8792_v1 }
 0x10a   : > { %v486_v4 = vpop.f32.mrf.mxu1  ;;  %v828_v5 = vpop.f32.mrf.mxu0 }
 0x10b   : > { %v989_v7 = vsel %vm958_vm7, %v495_v49, 0.0  ;;  %v2212_v12 = vsel %vm8784_vm8, %v495_v49, 0.0  ;;  %v487_v20 = vadd.f32 %v8781_v60, %v486_v4  ;;  %v829_v43 = vadd.f32 %v8792_v1, %v828_v5 }
 0x10c   : > { %v9054_v25 = vpack.c.bf16 %v989_v7, %v988_v34  ;;  %v9056_v35 = vpack.c.bf16 %v2212_v12, %v2211_v42  ;;  %v7254_v40 = vpop.f32.mrf.mxu1  ;;  %v7322_v41 = vpop.f32.mrf.mxu0  ;;  %v9059_v11 = vpack.c.bf16 %v837_v50, %v834_v45 }
 0x10d   : > { %v987_v36 = vsel %vm958_vm7, %v487_v20, 0.0  ;;  %v2210_v31 = vsel %vm8784_vm8, %v487_v20, 0.0  ;;  %v508_v49 = vadd.f32 %v7254_v40, %v8781_v60  ;;  %v9070_v42 = vpack.c.bf16 %v829_v43, %v826_v55 }
 0x10e   : > { %13681 = vst [vmem:[#allocation20_spill] sm:$0xff] %v9054_v25  ;;  %13682 = vst [vmem:[#allocation21_spill] sm:$0xff] %v9056_v35  ;;  %v9066_v6 = vpack.c.bf16 %v987_v36, %v986_v44  ;;  %v9068_v34 = vpack.c.bf16 %v2210_v31, %v2209_v46  ;;  %v499_v4 = vpop.f32.mrf.mxu1  ;;  %v841_v5 = vpop.f32.mrf.mxu0  ;;  %v850_v12 = vadd.f32 %v7322_v41, %v8792_v1 }
 0x10f   : > { %13683 = vst [vmem:[#allocation22_spill] sm:$0xff] %v9059_v11  ;;  %13686 = vst [vmem:[#allocation25_spill] sm:$0xff] %v9070_v42  ;;  %v992_v45 = vsel %vm958_vm7, %v508_v49, 0.0  ;;  %v2215_v50 = vsel %vm8784_vm8, %v508_v49, 0.0  ;;  %v500_v7 = vadd.f32 %v8781_v60, %v499_v4  ;;  %7350 = vmatprep.mubr.msk.bf16.mxu0 %vm304_vm0, %v9070_v42  ;;  %v842_v40 = vadd.f32 %v8792_v1, %v841_v5 }
 0x110   : > { %13684 = vst [vmem:[#allocation23_spill] sm:$0xff] %v9066_v6  ;;  %13685 = vst [vmem:[#allocation24_spill] sm:$0xff] %v9068_v34  ;;  %v7255_v44 = vpop.f32.mrf.mxu1  ;;  %v7323_v31 = vpop.f32.mrf.mxu0  ;;  %7351 = vmatmul.mubr.msk.bf16.gmra.mxu0 %vm304_vm0, %v9059_v11  ;;  %v2186_v5 = vsel %vm8784_vm8, %v8810_v17, 0.0 }
 0x111   : > { %v990_v46 = vsel %vm958_vm7, %v500_v7, 0.0  ;;  %v2213_v55 = vsel %vm8784_vm8, %v500_v7, 0.0  ;;  %v511_v20 = vadd.f32 %v7255_v44, %v8781_v60  ;;  %v853_v43 = vadd.f32 %v7323_v31, %v8792_v1 }
 0x112   : > { %v502_v41 = vpop.f32.mrf.mxu1  ;;  %v844_v36 = vpop.f32.mrf.mxu0 }
 0x113   : > { %v993_v49 = vsel %vm958_vm7, %v511_v20, 0.0  ;;  %v2216_v4 = vsel %vm8784_vm8, %v511_v20, 0.0  ;;  %v503_v42 = vadd.f32 %v8781_v60, %v502_v41  ;;  %v845_v31 = vadd.f32 %v8792_v1, %v844_v36  ;;  %v9117_v1 = vld [vmem:[%s13359_s4 + $0x1] ss:$0 sm:$0xff] }
 0x114   : > { %v9094_v7 = vpack.c.bf16 %v993_v49, %v992_v45  ;;  %v9096_v44 = vpack.c.bf16 %v2216_v4, %v2215_v50  ;;  %v7260_v16 = vpop.f32.mrf.mxu1  ;;  %v9102_v11 = vpack.c.bf16 %v853_v43, %v850_v12  ;;  %v9124_v12 = vpack.c.bf16 %v2186_v5, %v2185_v59 }
 0x115   : > { %v991_v14 = vsel %vm958_vm7, %v503_v42, 0.0  ;;  %v2214_v20 = vsel %vm8784_vm8, %v503_v42, 0.0  ;;  %v9112_v50 = vpack.c.bf16 %v845_v31, %v842_v40  ;;  %v9129_v42 = vadd.f32 %v7260_v16, %v9117_v1 }
 0x116   : > { %13687 = vst [vmem:[#allocation26_spill] sm:$0xff] %v9094_v7  ;;  %13688 = vst [vmem:[#allocation27_spill] sm:$0xff] %v9096_v44  ;;  %v9108_v60 = vpack.c.bf16 %v991_v14, %v990_v46  ;;  %v9110_v45 = vpack.c.bf16 %v2214_v20, %v2213_v55  ;;  %v9119_v17 = vpop.f32.mrf.mxu1 }
 0x117   : > { %13689 = vst [vmem:[#allocation28_spill] sm:$0xff] %v9102_v11  ;;  %13692 = vst [vmem:[#allocation31_spill] sm:$0xff] %v9112_v50  ;;  %7354 = vmatprep.mubr.msk.bf16.mxu0 %vm304_vm0, %v9112_v50 }
 0x118   : > { %13690 = vst [vmem:[#allocation29_spill] sm:$0xff] %v9108_v60  ;;  %13691 = vst [vmem:[#allocation30_spill] sm:$0xff] %v9110_v45  ;;  %v7261_v14 = vpop.f32.mrf.mxu1  ;;  %7355 = vmatmul.mubr.msk.bf16.gmra.mxu0 %vm304_vm0, %v9102_v11 }
 0x119   : > { %v9132_v46 = vadd.f32 %v7261_v14, %v9117_v1  ;;  %6932 = vmatprep.mubr.msk.bf16.mxu0 %vm304_vm0, %v9124_v12 }
 0x11a   : > { %v9138_v62 = vpop.f32.mrf.mxu1 }
 0x11c   : > { %v7264_v55 = vpop.f32.mrf.mxu1 }
 0x11d   : > { %v9145_v16 = vadd.f32 %v7264_v55, %v9117_v1 }
 0x11e   : > { %v9142_v43 = vpop.f32.mrf.mxu1 }
 0x120   : > { %v7265_v40 = vpop.f32.mrf.mxu1 }
 0x121   : > { %v9148_v41 = vadd.f32 %v7265_v40, %v9117_v1 }
 0x122   : > { %v9150_v36 = vpop.f32.mrf.mxu1 }
 0x124   : > { %v7268_v4 = vpop.f32.mrf.mxu1 }
 0x126   : > { %v9154_v31 = vpop.f32.mrf.mxu1 }
 0x128   : > { %v7269_v5 = vpop.f32.mrf.mxu1 }
 0x12a   : > { %v593_v20 = vpop.f32.mrf.mxu1 }
 0x12c   : > { %v7272_v59 = vpop.f32.mrf.mxu1 }
 0x12e   : > { %v606_v14 = vpop.f32.mrf.mxu1 }
 0x130   : > { %v7273_v9 = vpop.f32.mrf.mxu1 }
 0x131   : > { %v618_v25 = vadd.f32 %v7273_v9, %v9117_v1 }
 0x132   : > { %v609_v11 = vpop.f32.mrf.mxu1 }
 0x133   : > { %v610_v61 = vadd.f32 %v9117_v1, %v609_v11 }
 0x134   : > { %v7276_v50 = vpop.f32.mrf.mxu1 }
 0x135   : > { %v631_v40 = vadd.f32 %v7276_v50, %v9117_v1  ;;  %v615_v50 = vadd.f32 %v7272_v59, %v9117_v1  ;;  %v591_v59 = vadd.f32 %v9117_v1, %v9154_v31 }
 0x136   : > { %v9156_v55 = vpop.f32.mrf.mxu1 }
 0x138   : > { %v7277_v23 = vpop.f32.mrf.mxu1 }
 0x139   : > { %v634_v33 = vadd.f32 %v7277_v23, %v9117_v1  ;;  %v863_v23 = vpack.c.bf16 %v618_v25, %v615_v50  ;;  %v607_v25 = vadd.f32 %v9117_v1, %v606_v14 }
 0x13a   : > { %v9160_v39 = vpop.f32.mrf.mxu1 }
 0x13b   : > { %v9162_v49 = vpack.c.bf16 %v634_v33, %v631_v40  ;;  %v1080_v9 = vsel %vm304_vm0, %v863_v23, 0  ;;  %v578_v23 = vadd.f32 %v9117_v1, %v9150_v36 }
 0x13c   : > { %v7280_v56 = vpop.f32.mrf.mxu1 }
 0x13e   : > { %v638_v2 = vpop.f32.mrf.mxu1 }
 0x13f   : > { %v639_v50 = vadd.f32 %v9117_v1, %v638_v2 }
 0x140   : > { %v7281_v24 = vpop.f32.mrf.mxu1 }
 0x141   : > { %v650_v14 = vadd.f32 %v7281_v24, %v9117_v1  ;;  %v13693_v24 = vpack.c.bf16 %v9148_v41, %v9145_v16  ;;  %v626_v16 = vadd.f32 %v9117_v1, %v9160_v39  ;;  %v562_v41 = vadd.f32 %v9117_v1, %v9138_v62 }
 0x142   : > { %v641_v28 = vpop.f32.mrf.mxu1  ;;  %v3090_v39 = vsel %vm8747_vm4, %v8736_v51, 0  ;;  %v3091_v62 = vsel %vm8743_vm2, %v8741_v52, 0 }
 0x143   : > { %v642_v31 = vadd.f32 %v9117_v1, %v641_v28 }
 0x144   : > { %v7284_v44 = vpop.f32.mrf.mxu1 }
 0x145   : > { %v663_v11 = vadd.f32 %v7284_v44, %v9117_v1  ;;  %v594_v44 = vadd.f32 %v9117_v1, %v593_v20 }
 0x146   : > { %v654_v7 = vpop.f32.mrf.mxu1 }
 0x148   : > { %v7285_v45 = vpop.f32.mrf.mxu1 }
 0x14a   : > { %v657_v60 = vpop.f32.mrf.mxu1 }
 0x14c   : > { %v7288_v35 = vpop.f32.mrf.mxu1 }
 0x14d   : > { %v679_v3 = vadd.f32 %v7288_v35, %v9117_v1  ;;  %v599_v35 = vadd.f32 %v7268_v4, %v9117_v1  ;;  %v860_v4 = vpack.c.bf16 %v594_v44, %v591_v59  ;;  %v13697_v59 = vld [vmem:[#allocation17_spill] sm:$0xff] }
 0x14e   : > { %v670_v34 = vpop.f32.mrf.mxu1 }
 0x14f   : > { %v671_v57 = vadd.f32 %v9117_v1, %v670_v34  ;;  %v1071_v20 = vsel %vm304_vm0, %v860_v4, 0 }
 0x150   : > { %v7289_v6 = vpop.f32.mrf.mxu1 }
 0x151   : > { %v682_v33 = vadd.f32 %v7289_v6, %v9117_v1  ;;  %v862_v6 = vpack.c.bf16 %v610_v61, %v607_v25  ;;  %v655_v61 = vadd.f32 %v9117_v1, %v654_v7 }
 0x152   : > { %v673_v40 = vpop.f32.mrf.mxu1 }
 0x153   : > { %v871_v30 = vpack.c.bf16 %v682_v33, %v679_v3  ;;  %v674_v32 = vadd.f32 %v9117_v1, %v673_v40  ;;  %v666_v3 = vadd.f32 %v7285_v45, %v9117_v1  ;;  %v866_v33 = vpack.c.bf16 %v642_v31, %v639_v50  ;;  %v13699_v31 = vld [vmem:[#allocation14_spill] sm:$0xff]  ;;  %v13700_v50 = vld [vmem:[#allocation15_spill] sm:$0xff] }
 0x154   : > { %v575_v40 = vadd.f32 %v9117_v1, %v9142_v43  ;;  %v623_v43 = vadd.f32 %v9117_v1, %v9156_v55 }
 0x155   : > { %v870_v58 = vpack.c.bf16 %v674_v32, %v671_v57  ;;  %7426 = vmatprep.subr.msk.bf16.mxu1 %vm304_vm0, %v871_v30  ;;  %7434 = vmatprep.subr.msk.bf16.mxu0 %vm304_vm0, %v871_v30  ;;  %v602_v57 = vadd.f32 %v7269_v5, %v9117_v1  ;;  %v869_v32 = vpack.c.bf16 %v666_v3, %v663_v11  ;;  %v1077_v30 = vsel %vm304_vm0, %v862_v6, 0 }
 0x156   : > { %6852 = vmatpush3.bf16.xpose.msra.mxu1 %v1080_v9  ;;  %6917 = vmatpush3.bf16.xpose.msra.mxu0 %v1080_v9  ;;  %v858_v28 = vpack.c.bf16 %v578_v23, %v575_v40  ;;  %v864_v36 = vpack.c.bf16 %v626_v16, %v623_v43  ;;  %v13694_v9 = vpack.c.bf16 %v9132_v46, %v9129_v42  ;;  %v13701_v40 = vld [vmem:[#allocation23_spill] sm:$0xff] }
 0x157   : > { %7427 = vmatprep.subr.msk.bf16.mxu1 %vm304_vm0, %v870_v58  ;;  %7435 = vmatprep.subr.msk.bf16.mxu0 %vm304_vm0, %v870_v58  ;;  %v861_v34 = vpack.c.bf16 %v602_v57, %v599_v35  ;;  %v658_v58 = vadd.f32 %v9117_v1, %v657_v60  ;;  %v647_v60 = vadd.f32 %v7280_v56, %v9117_v1  ;;  %v1068_v56 = vsel %vm304_vm0, %v13693_v24, 0 }
 0x158   : > { %v1065_v2 = vsel %vm304_vm0, %v858_v28, 0  ;;  %v1062_v25 = vsel %vm304_vm0, %v13694_v9, 0  ;;  %v6734_v46 = vcombine.low %v3090_v39, %v3091_v62  ;;  %v13702_v28 = vld [vmem:[#allocation24_spill] sm:$0xff]  ;;  %v13706_v39 = vld [vmem:[#allocation30_spill] sm:$0xff] }
 0x159   : > { %v868_v45 = vpack.c.bf16 %v658_v58, %v655_v61  ;;  %v1074_v5 = vsel %vm304_vm0, %v861_v34, 0  ;;  %v867_v7 = vpack.c.bf16 %v650_v14, %v647_v60  ;;  %v13695_v58 = vld [vmem:[#allocation10_spill] sm:$0xff] }
 0x15a   : > { %v13707_v62 = vld [vmem:[#allocation26_spill] sm:$0xff] }
 0x15e   : > { %6854 = vmatpush3.bf16.xpose.msra.mxu1 %v1077_v30  ;;  %6919 = vmatpush3.bf16.xpose.msra.mxu0 %v1077_v30 }
 0x15f   : > { %7428 = vmatprep.subr.msk.bf16.mxu1 %vm304_vm0, %v869_v32  ;;  %7436 = vmatprep.subr.msk.bf16.mxu0 %vm304_vm0, %v869_v32 }
 0x166   : > { %6856 = vmatpush3.bf16.xpose.msra.mxu1 %v1074_v5  ;;  %6921 = vmatpush3.bf16.xpose.msra.mxu0 %v1074_v5 }
 0x167   : > { %7429 = vmatprep.subr.msk.bf16.mxu1 %vm304_vm0, %v868_v45  ;;  %7437 = vmatprep.subr.msk.bf16.mxu0 %vm304_vm0, %v868_v45 }
 0x16e   : > { %6858 = vmatpush3.bf16.xpose.msra.mxu1 %v1071_v20  ;;  %6923 = vmatpush3.bf16.xpose.msra.mxu0 %v1071_v20 }
 0x16f   : > { %7430 = vmatprep.subr.msk.bf16.mxu1 %vm304_vm0, %v867_v7  ;;  %7438 = vmatprep.subr.msk.bf16.mxu0 %vm304_vm0, %v867_v7 }
 0x176   : > { %6860 = vmatpush3.bf16.xpose.msra.mxu1 %v1068_v56  ;;  %6925 = vmatpush3.bf16.xpose.msra.mxu0 %v1068_v56 }
 0x177   : > { %7431 = vmatprep.subr.msk.bf16.mxu1 %vm304_vm0, %v866_v33  ;;  %7439 = vmatprep.subr.msk.bf16.mxu0 %vm304_vm0, %v866_v33 }
 0x17e   : > { %6862 = vmatpush3.bf16.xpose.msra.mxu1 %v1065_v2  ;;  %6927 = vmatpush3.bf16.xpose.msra.mxu0 %v1065_v2 }
 0x17f   : > { %7432 = vmatprep.subr.msk.bf16.mxu1 %vm304_vm0, %v9162_v49  ;;  %7440 = vmatprep.subr.msk.bf16.mxu0 %vm304_vm0, %v9162_v49  ;;  %v559_v49 = vadd.f32 %v9117_v1, %v9119_v17 }
 0x181   : > { %v856_v42 = vpack.c.bf16 %v562_v41, %v559_v49  ;;  %v13703_v41 = vld [vmem:[#allocation20_spill] sm:$0xff]  ;;  %v13705_v49 = vld [vmem:[#allocation29_spill] sm:$0xff] }
 0x183   : > { %v1059_v55 = vsel %vm304_vm0, %v856_v42, 0  ;;  %v13708_v42 = vld [vmem:[#allocation27_spill] sm:$0xff] }
 0x186   : > { %6864 = vmatpush3.bf16.xpose.msra.mxu1 %v1062_v25  ;;  %6929 = vmatpush3.bf16.xpose.msra.mxu0 %v1062_v25 }
 0x187   : > { %7433 = vmatprep.subr.msk.bf16.mxu1 %vm304_vm0, %v864_v36  ;;  %7441 = vmatprep.subr.msk.bf16.mxu0 %vm304_vm0, %v864_v36  ;;  %v13704_v36 = vld [vmem:[#allocation21_spill] sm:$0xff] }
 0x18e   : > { %6866 = vmatpush3.bf16.xpose.msra.mxu1 %v1059_v55  ;;  %6931 = vmatpush3.bf16.xpose.msra.mxu0 %v1059_v55  ;;  %v13710_v55 = vld [vmem:[#allocation2_spill] sm:$0xff] }
 0x18f   : > { %7358 = vmatprep.subr.bf16.mxu1 %v6734_v46 }
 0x195   : > { %6868 = vmatmul.mubr.msk.bf16.vlgmr.msra.gmra.mxu1 %vm304_vm0, %v8826_v27  ;;  %6933 = vmatmul.mubr.msk.bf16.vlgmr.msra.gmra.mxu0 %vm304_vm0, %v9124_v12 }
 0x196   : > { %6869 = vmatprep.mubr.msk.bf16.mxu1 %vm304_vm0, %v8812_v18  ;;  %6934 = vmatprep.mubr.msk.bf16.mxu0 %vm304_vm0, %v8814_v19 }
 0x197   : > { %7359 = vmatpush3.bf16.msra.mxu1 %v6734_v46  ;;  %v13709_v46 = vld [vmem:[#allocation3_spill] sm:$0xff] }
 0x19d   : > { %6870 = vmatmul.mubr.msk.bf16.gmra.mxu1 %vm304_vm0, %v8812_v18  ;;  %6935 = vmatmul.mubr.msk.bf16.gmra.mxu0 %vm304_vm0, %v8814_v19 }
 0x19e   : > { %6871 = vmatprep.mubr.msk.bf16.mxu1 %vm304_vm0, %v8866_v63  ;;  %6936 = vmatprep.mubr.msk.bf16.mxu0 %vm304_vm0, %v8868_v0 }
 0x1a0   : > { %v9251_v51 = vpop.f32.mrf.mxu0 }
 0x1a2   : > { %v9253_v52 = vpop.f32.mrf.mxu0 }
 0x1a4   : > { %v9259_v53 = vpop.f32.mrf.mxu0 }
 0x1a5   : > { %6872 = vmatmul.mubr.msk.bf16.gmra.mxu1 %vm304_vm0, %v8866_v63  ;;  %6937 = vmatmul.mubr.msk.bf16.gmra.mxu0 %vm304_vm0, %v8868_v0  ;;  %v2165_v54 = vpack.c.bf16 %v9259_v53, %v9251_v51  ;;  %v13711_v51 = vld [vmem:[#allocation5_spill] sm:$0xff]  ;;  %v13713_v53 = vld [vmem:[#allocation7_spill] sm:$0xff] }
 0x1a6   : > { %6873 = vmatprep.mubr.msk.bf16.mxu1 %vm304_vm0, %v8854_v47  ;;  %6938 = vmatprep.mubr.msk.bf16.mxu0 %vm304_vm0, %v8856_v48  ;;  %v9267_v18 = vpop.f32.mrf.mxu0 }
 0x1a7   : > { %v2164_v25 = vpack.c.bf16 %v9267_v18, %v9253_v52  ;;  %v13712_v52 = vld [vmem:[#allocation4_spill] sm:$0xff]  ;;  %v13715_v18 = vld [vmem:[#allocation9_spill] sm:$0xff] }
 0x1a8   : > { %v9269_v19 = vpop.f32.mrf.mxu0 }
 0x1aa   : > { %v9271_v27 = vpop.f32.mrf.mxu0 }
 0x1ac   : > { %v9277_v63 = vpop.f32.mrf.mxu0 }
 0x1ad   : > { %6874 = vmatmul.mubr.msk.bf16.gmra.mxu1 %vm304_vm0, %v8854_v47  ;;  %6939 = vmatmul.mubr.msk.bf16.gmra.mxu0 %vm304_vm0, %v8856_v48  ;;  %v2167_v0 = vpack.c.bf16 %v9277_v63, %v9269_v19  ;;  %v13716_v19 = vld [vmem:[#allocation8_spill] sm:$0xff] }
 0x1ae   : > { %6875 = vmatprep.mubr.msk.bf16.mxu1 %vm304_vm0, %v8906_v37  ;;  %6940 = vmatprep.mubr.msk.bf16.mxu0 %vm304_vm0, %v8908_v38  ;;  %v9285_v1 = vpop.f32.mrf.mxu0  ;;  %v13718_v63 = vld [vmem:[#allocation12_spill] sm:$0xff] }
 0x1af   : > { %v2166_v16 = vpack.c.bf16 %v9285_v1, %v9271_v27  ;;  %v13717_v27 = vld [vmem:[#allocation13_spill] sm:$0xff]  ;;  %v13720_v1 = vld [vmem:[#allocation16_spill] sm:$0xff] }
 0x1b0   : > { %v9287_v17 = vpop.f32.mrf.mxu0 }
 0x1b2   : > { %v9289_v12 = vpop.f32.mrf.mxu0 }
 0x1b4   : > { %v7337_v47 = vpop.f32.mrf.mxu0 }
 0x1b5   : > { %6876 = vmatmul.mubr.msk.bf16.gmra.mxu1 %vm304_vm0, %v8906_v37  ;;  %6941 = vmatmul.mubr.msk.bf16.gmra.mxu0 %vm304_vm0, %v8908_v38  ;;  %v2169_v23 = vpack.c.bf16 %v7337_v47, %v9287_v17  ;;  %v13721_v17 = vld [vmem:[#allocation25_spill] sm:$0xff]  ;;  %v13723_v47 = vld [vmem:[#allocation31_spill] sm:$0xff] }
 0x1b6   : > { %6877 = vmatprep.mubr.msk.bf16.mxu1 %vm304_vm0, %v8894_v26  ;;  %6942 = vmatprep.mubr.msk.bf16.mxu0 %vm304_vm0, %v8896_v29  ;;  %v9299_v48 = vpop.f32.mrf.mxu0 }
 0x1b7   : > { %v2168_v24 = vpack.c.bf16 %v9299_v48, %v9289_v12  ;;  %v13722_v12 = vld [vmem:[#allocation22_spill] sm:$0xff]  ;;  %v13724_v48 = vld [vmem:[#allocation28_spill] sm:$0xff] }
 0x1b8   : > { %v7340_v6 = vpop.f32.mrf.mxu0 }
 0x1ba   : > { %v2053_v3 = vpop.f32.mrf.mxu0 }
 0x1bc   : > { %v7341_v37 = vpop.f32.mrf.mxu0 }
 0x1bd   : > { %6878 = vmatmul.mubr.msk.bf16.gmra.mxu1 %vm304_vm0, %v8894_v26  ;;  %6943 = vmatmul.mubr.msk.bf16.gmra.mxu0 %vm304_vm0, %v8896_v29  ;;  %v2171_v5 = vpack.c.bf16 %v7341_v37, %v7340_v6 }
 0x1be   : > { %6879 = vmatprep.mubr.msk.bf16.mxu1 %vm304_vm0, %v8946_v21  ;;  %6944 = vmatprep.mubr.msk.bf16.mxu0 %vm304_vm0, %v8948_v22  ;;  %v2056_v38 = vpop.f32.mrf.mxu0 }
 0x1bf   : > { %v2170_v7 = vpack.c.bf16 %v2056_v38, %v2053_v3 }
 0x1c0   : > { %v9309_v11 = vpop.f32.mrf.mxu0 }
 0x1c2   : > { %v9311_v57 = vpop.f32.mrf.mxu0 }
 0x1c4   : > { %v9317_v26 = vpop.f32.mrf.mxu0 }
 0x1c5   : > { %6880 = vmatmul.mubr.msk.bf16.gmra.mxu1 %vm304_vm0, %v8946_v21  ;;  %6945 = vmatmul.mubr.msk.bf16.gmra.mxu0 %vm304_vm0, %v8948_v22  ;;  %v2173_v43 = vpack.c.bf16 %v9317_v26, %v9309_v11  ;;  %v889_v26 = vld [vmem:[%s13356_s1 + $0x8] sm:$0xff] }
 0x1c6   : > { %6881 = vmatprep.mubr.msk.bf16.mxu1 %vm304_vm0, %v8934_v8  ;;  %6946 = vmatprep.mubr.msk.bf16.mxu0 %vm304_vm0, %v8936_v10  ;;  %v9323_v29 = vpop.f32.mrf.mxu0 }
 0x1c7   : > { %v2172_v9 = vpack.c.bf16 %v9323_v29, %v9311_v57 }
 0x1c8   : > { %v7348_v32 = vpop.f32.mrf.mxu0 }
 0x1ca   : > { %v2085_v30 = vpop.f32.mrf.mxu0 }
 0x1cc   : > { %v7349_v21 = vpop.f32.mrf.mxu0 }
 0x1cd   : > { %6882 = vmatmul.mubr.msk.bf16.gmra.mxu1 %vm304_vm0, %v8934_v8  ;;  %6947 = vmatmul.mubr.msk.bf16.gmra.mxu0 %vm304_vm0, %v8936_v10  ;;  %v13696_v10 = vld [vmem:[#allocation11_spill] sm:$0xff]  ;;  %v2175_v56 = vpack.c.bf16 %v7349_v21, %v7348_v32 }
 0x1ce   : > { %6883 = vmatprep.mubr.msk.bf16.mxu1 %vm304_vm0, %v8986_v13  ;;  %6948 = vmatprep.mubr.msk.bf16.mxu0 %vm304_vm0, %v8988_v15  ;;  %v2088_v22 = vpop.f32.mrf.mxu0 }
 0x1cf   : > { %v2174_v2 = vpack.c.bf16 %v2088_v22, %v2085_v30  ;;  %v888_v30 = vld [vmem:[%s13356_s1] sm:$0xff] }
 0x1d0   : > { %v7352_v35 = vpop.f32.mrf.mxu0 }
 0x1d2   : > { %v2101_v34 = vpop.f32.mrf.mxu0 }
 0x1d4   : > { %v7353_v8 = vpop.f32.mrf.mxu0 }
 0x1d5   : > { %6884 = vmatmul.mubr.msk.bf16.gmra.mxu1 %vm304_vm0, %v8986_v13  ;;  %6949 = vmatmul.mubr.msk.bf16.gmra.mxu0 %vm304_vm0, %v8988_v15  ;;  %v13698_v15 = vld [vmem:[#allocation18_spill] sm:$0xff]  ;;  %v2177_v20 = vpack.c.bf16 %v7353_v8, %v7352_v35 }
 0x1d6   : > { %6885 = vmatprep.mubr.msk.bf16.mxu1 %vm304_vm0, %v13695_v58  ;;  %6950 = vmatprep.mubr.msk.bf16.mxu0 %vm304_vm0, %v13696_v10  ;;  %v2104_v61 = vpop.f32.mrf.mxu0 }
 0x1d7   : > { %v2176_v33 = vpack.c.bf16 %v2104_v61, %v2101_v34 }
 0x1d8   : > { %v7356_v44 = vpop.f32.mrf.mxu0 }
 0x1da   : > { %v2117_v45 = vpop.f32.mrf.mxu0 }
 0x1dc   : > { %v7357_v13 = vpop.f32.mrf.mxu0 }
 0x1dd   : > { %6886 = vmatmul.mubr.msk.bf16.gmra.mxu1 %vm304_vm0, %v13695_v58  ;;  %6951 = vmatmul.mubr.msk.bf16.gmra.mxu0 %vm304_vm0, %v13696_v10  ;;  %v2179_v4 = vpack.c.bf16 %v7357_v13, %v7356_v44  ;;  %v890_v13 = vld [vmem:[%s13356_s1 + $0x10] sm:$0xff] }
 0x1de   : > { %6887 = vmatprep.mubr.msk.bf16.mxu1 %vm304_vm0, %v13697_v59  ;;  %6952 = vmatprep.mubr.msk.bf16.mxu0 %vm304_vm0, %v13698_v15  ;;  %v2120_v14 = vpop.f32.mrf.mxu0 }
 0x1df   : > { %7093 = vmatprep.subr.bf16.mxu0 %v2179_v4  ;;  %v2178_v60 = vpack.c.bf16 %v2120_v14, %v2117_v45 }
 0x1e0   : > { %7094 = vmatpush3.bf16.msra.mxu0 %v2171_v5  ;;  %v891_v5 = vld [vmem:[%s13356_s1 + $0x18] sm:$0xff] }
 0x1e1   : > { %7095 = vmatprep.subr.bf16.mxu0 %v2178_v60 }
 0x1e4   : > { %7096 = vmatpush3.bf16.msra.mxu0 %v2170_v7 }
 0x1e5   : > { %6888 = vmatmul.mubr.msk.bf16.gmra.mxu1 %vm304_vm0, %v13697_v59  ;;  %6953 = vmatmul.mubr.msk.bf16.gmra.mxu0 %vm304_vm0, %v13698_v15 }
 0x1e6   : > { %6889 = vmatprep.mubr.msk.bf16.mxu1 %vm304_vm0, %v13699_v31  ;;  %6954 = vmatprep.mubr.msk.bf16.mxu0 %vm304_vm0, %v13700_v50 }
 0x1e7   : > { %7097 = vmatprep.subr.bf16.mxu0 %v2177_v20 }
 0x1e8   : > { %7098 = vmatpush3.bf16.msra.mxu0 %v2169_v23 }
 0x1e9   : > { %7099 = vmatprep.subr.bf16.mxu0 %v2176_v33 }
 0x1ec   : > { %7100 = vmatpush3.bf16.msra.mxu0 %v2168_v24  ;;  %v893_v24 = vld [vmem:[%s13356_s1 + $0x28] sm:$0xff] }
 0x1ed   : > { %6890 = vmatmul.mubr.msk.bf16.gmra.mxu1 %vm304_vm0, %v13699_v31  ;;  %6955 = vmatmul.mubr.msk.bf16.gmra.mxu0 %vm304_vm0, %v13700_v50 }
 0x1ee   : > { %6891 = vmatprep.mubr.msk.bf16.mxu1 %vm304_vm0, %v13701_v40  ;;  %6956 = vmatprep.mubr.msk.bf16.mxu0 %vm304_vm0, %v13702_v28 }
 0x1ef   : > { %7101 = vmatprep.subr.bf16.mxu0 %v2175_v56 }
 0x1f0   : > { %7102 = vmatpush3.bf16.msra.mxu0 %v2167_v0  ;;  %v13719_v0 = vld [vmem:[#allocation19_spill] sm:$0xff] }
 0x1f1   : > { %7103 = vmatprep.subr.bf16.mxu0 %v2174_v2 }
 0x1f4   : > { %7104 = vmatpush3.bf16.msra.mxu0 %v2166_v16 }
 0x1f5   : > { %6892 = vmatmul.mubr.msk.bf16.gmra.mxu1 %vm304_vm0, %v13701_v40  ;;  %6957 = vmatmul.mubr.msk.bf16.gmra.mxu0 %vm304_vm0, %v13702_v28  ;;  %v892_v28 = vld [vmem:[%s13356_s1 + $0x20] sm:$0xff] }
 0x1f6   : > { %6893 = vmatprep.mubr.msk.bf16.mxu1 %vm304_vm0, %v13703_v41  ;;  %6958 = vmatprep.mubr.msk.bf16.mxu0 %vm304_vm0, %v13704_v36 }
 0x1f7   : > { %7105 = vmatprep.subr.bf16.mxu0 %v2173_v43 }
 0x1f8   : > { %7106 = vmatpush3.bf16.msra.mxu0 %v2165_v54  ;;  %v13714_v54 = vld [vmem:[#allocation6_spill] sm:$0xff] }
 0x1f9   : > { %7107 = vmatprep.subr.bf16.mxu0 %v2172_v9 }
 0x1fc   : > { %7108 = vmatpush3.bf16.msra.mxu0 %v2164_v25 }
 0x1fd   : > { %6894 = vmatmul.mubr.msk.bf16.gmra.mxu1 %vm304_vm0, %v13703_v41  ;;  %6959 = vmatmul.mubr.msk.bf16.gmra.mxu0 %vm304_vm0, %v13704_v36 }
 0x1fe   : > { %6895 = vmatprep.mubr.msk.bf16.mxu1 %vm304_vm0, %v13705_v49  ;;  %6960 = vmatprep.mubr.msk.bf16.mxu0 %vm304_vm0, %v13706_v39 }
 0x205   : > { %6896 = vmatmul.mubr.msk.bf16.gmra.mxu1 %vm304_vm0, %v13705_v49  ;;  %6961 = vmatmul.mubr.msk.bf16.gmra.mxu0 %vm304_vm0, %v13706_v39 }
 0x206   : > { %6897 = vmatprep.mubr.msk.bf16.mxu1 %vm304_vm0, %v13707_v62  ;;  %6962 = vmatprep.mubr.msk.bf16.mxu0 %vm304_vm0, %v13708_v42 }
 0x20d   : > { %6898 = vmatmul.mubr.msk.bf16.gmra.mxu1 %vm304_vm0, %v13707_v62  ;;  %6963 = vmatmul.mubr.msk.bf16.gmra.mxu0 %vm304_vm0, %v13708_v42 }
 0x20e   : > { %7360 = vmatprep.mubr.msk.bf16.mxu1 %vm304_vm0, %v13709_v46 }
 0x215   : > { %7361 = vmatmul.mubr.msk.bf16.vlgmr.msra.gmra.mxu1 %vm304_vm0, %v13710_v55  ;;  %v895_v55 = vld [vmem:[%s13356_s1 + $0x38] sm:$0xff] }
 0x216   : > { %7364 = vmatprep.mubr.msk.bf16.mxu1 %vm304_vm0, %v13711_v51  ;;  %v894_v51 = vld [vmem:[%s13356_s1 + $0x30] sm:$0xff] }
 0x21d   : > { %7365 = vmatmul.mubr.msk.bf16.gmra.mxu1 %vm304_vm0, %v13712_v52 }
 0x21e   : > { %7368 = vmatprep.mubr.msk.bf16.mxu1 %vm304_vm0, %v13713_v53 }
 0x225   : > { %7369 = vmatmul.mubr.msk.bf16.gmra.mxu1 %vm304_vm0, %v13714_v54 }
 0x226   : > { %7372 = vmatprep.mubr.msk.bf16.mxu1 %vm304_vm0, %v13715_v18 }
 0x22d   : > { %7373 = vmatmul.mubr.msk.bf16.gmra.mxu1 %vm304_vm0, %v13716_v19 }
 0x22e   : > { %7376 = vmatprep.mubr.msk.bf16.mxu1 %vm304_vm0, %v13717_v27 }
 0x235   : > { %7377 = vmatmul.mubr.msk.bf16.gmra.mxu1 %vm304_vm0, %v13718_v63 }
 0x236   : > { %7380 = vmatprep.mubr.msk.bf16.mxu1 %vm304_vm0, %v13719_v0 }
 0x23d   : > { %7381 = vmatmul.mubr.msk.bf16.gmra.mxu1 %vm304_vm0, %v13720_v1 }
 0x23e   : > { %7384 = vmatprep.mubr.msk.bf16.mxu1 %vm304_vm0, %v13721_v17 }
 0x245   : > { %7385 = vmatmul.mubr.msk.bf16.gmra.mxu1 %vm304_vm0, %v13722_v12 }
 0x246   : > { %7388 = vmatprep.mubr.msk.bf16.mxu1 %vm304_vm0, %v13723_v47  ;;  %v897_v47 = vld [vmem:[%s13356_s1 + $0x48] sm:$0xff] }
 0x24d   : > { %7389 = vmatmul.mubr.msk.bf16.gmra.mxu1 %vm304_vm0, %v13724_v48 }
 0x255   : > { %v1140_v6 = vpop.f32.mrf.mxu1  ;;  %v2315_v3 = vpop.f32.mrf.mxu0 }
 0x256   : > { %v1299_v37 = vmul.f32 0.35355338, %v1140_v6  ;;  %v2474_v38 = vmul.f32 0.35355338, %v2315_v3  ;;  %v896_v3 = vld [vmem:[%s13356_s1 + $0x40] sm:$0xff] }
 0x257   : > { %v1142_v11 = vpop.f32.mrf.mxu1  ;;  %v2317_v57 = vpop.f32.mrf.mxu0 }
 0x258   : > { %v1300_v29 = vmul.f32 0.35355338, %v1142_v11  ;;  %v2475_v32 = vmul.f32 0.35355338, %v2317_v57  ;;  %v9452_v44 = vadd.f32 %v2474_v38, %v888_v30  ;;  %v9454_v45 = vadd.f32 %v1299_v37, %v888_v30 }
 0x259   : > { %v1144_v21 = vpop.f32.mrf.mxu1  ;;  %v2319_v22 = vpop.f32.mrf.mxu0 }
 0x25a   : > { %v9448_v35 = vadd.f32 %v2475_v32, %v889_v26  ;;  %v9450_v34 = vadd.f32 %v1300_v29, %v889_v26  ;;  %v1301_v8 = vmul.f32 0.35355338, %v1144_v21  ;;  %v2476_v58 = vmul.f32 0.35355338, %v2319_v22 }
 0x25b   : > { %v1146_v10 = vpop.f32.mrf.mxu1  ;;  %v2321_v61 = vpop.f32.mrf.mxu0 }
 0x25c   : > { %v1302_v59 = vmul.f32 0.35355338, %v1146_v10  ;;  %v2477_v15 = vmul.f32 0.35355338, %v2321_v61  ;;  %v2602_v60 = vmax.f32 %v9452_v44, %v9448_v35  ;;  %v1427_v7 = vmax.f32 %v9454_v45, %v9450_v34 }
 0x25d   : > { %v1150_v4 = vpop.f32.mrf.mxu1  ;;  %v2325_v14 = vpop.f32.mrf.mxu0  ;;  %v9470_v50 = vadd.f32 %v1301_v8, %v890_v13  ;;  %v9472_v23 = vadd.f32 %v2476_v58, %v890_v13  ;;  %v898_v13 = vld [vmem:[%s13356_s1 + $0x50] sm:$0xff] }
 0x25e   : > { %v9466_v20 = vadd.f32 %v2477_v15, %v891_v5  ;;  %v9468_v31 = vadd.f32 %v1302_v59, %v891_v5  ;;  %v1303_v33 = vmul.f32 0.35355338, %v1150_v4  ;;  %2603 = vmax.xlane.f32.xlu1 %v2602_v60  ;;  %1428 = vmax.xlane.f32.xlu0 %v1427_v7  ;;  %v2478_v39 = vmul.f32 0.35355338, %v2325_v14  ;;  %v899_v5 = vld [vmem:[%s13356_s1 + $0x58] sm:$0xff] }
 0x25f   : > { %v1152_v56 = vpop.f32.mrf.mxu1  ;;  %v2327_v40 = vpop.f32.mrf.mxu0 }
 0x260   : > { %v1304_v2 = vmul.f32 0.35355338, %v1152_v56  ;;  %v2479_v16 = vmul.f32 0.35355338, %v2327_v40  ;;  %v2605_v36 = vmax.f32 %v9472_v23, %v9466_v20  ;;  %v1430_v9 = vmax.f32 %v9470_v50, %v9468_v31 }
 0x261   : > { %v1154_v43 = vpop.f32.mrf.mxu1  ;;  %v2329_v41 = vpop.f32.mrf.mxu0  ;;  %v9486_v49 = vadd.f32 %v1303_v33, %v892_v28  ;;  %v9500_v0 = vadd.f32 %v2478_v39, %v892_v28 }
 0x262   : > { %v9484_v25 = vadd.f32 %v1304_v2, %v893_v24  ;;  %v1305_v62 = vmul.f32 0.35355338, %v1154_v43  ;;  %2606 = vmax.xlane.f32.xlu1 %v2605_v36  ;;  %1431 = vmax.xlane.f32.xlu0 %v1430_v9  ;;  %v9494_v53 = vadd.f32 %v2479_v16, %v893_v24  ;;  %v2480_v17 = vmul.f32 0.35355338, %v2329_v41  ;;  %v901_v16 = vld [vmem:[%s13356_s1 + $0x68] sm:$0xff]  ;;  %v900_v36 = vld [vmem:[%s13356_s1 + $0x60] sm:$0xff] }
 0x263   : > { %v1156_v42 = vpop.f32.mrf.mxu1  ;;  %v2331_v46 = vpop.f32.mrf.mxu0 }
 0x264   : > { %v1306_v52 = vmul.f32 0.35355338, %v1156_v42  ;;  %v2481_v54 = vmul.f32 0.35355338, %v2331_v46  ;;  %v1433_v27 = vmax.f32 %v9486_v49, %v9484_v25  ;;  %v9502_v1 = vadd.f32 %v1305_v62, %v894_v51 }
 0x265   : > { %v1160_v18 = vpop.f32.mrf.mxu1  ;;  %v2335_v19 = vpop.f32.mrf.mxu0  ;;  %v2608_v26 = vmax.f32 %v9500_v0, %v9494_v53  ;;  %v9518_v21 = vadd.f32 %v2480_v17, %v894_v51 }
 0x266   : > { %v9498_v63 = vadd.f32 %v1306_v52, %v895_v55  ;;  %v1307_v12 = vmul.f32 0.35355338, %v1160_v18  ;;  %1434 = vmax.xlane.f32.xlu0 %v1433_v27  ;;  %v9514_v32 = vadd.f32 %v2481_v54, %v895_v55  ;;  %v2482_v8 = vmul.f32 0.35355338, %v2335_v19 }
 0x267   : > { %v1162_v48 = vpop.f32.mrf.mxu1  ;;  %v2337_v6 = vpop.f32.mrf.mxu0 }
 0x268   : > { %v1308_v37 = vmul.f32 0.35355338, %v1162_v48  ;;  %v2483_v38 = vmul.f32 0.35355338, %v2337_v6  ;;  %v1436_v29 = vmax.f32 %v9502_v1, %v9498_v63  ;;  %v9520_v22 = vadd.f32 %v1307_v12, %v896_v3  ;;  %v902_v48 = vld [vmem:[%s13356_s1 + $0x70] sm:$0xff] }
 0x269   : > { %v1164_v11 = vpop.f32.mrf.mxu1  ;;  %v2339_v57 = vpop.f32.mrf.mxu0  ;;  %v2611_v7 = vmax.f32 %v9518_v21, %v9514_v32  ;;  %v9536_v56 = vadd.f32 %v2482_v8, %v896_v3 }
 0x26a   : > { %v9516_v30 = vadd.f32 %v1308_v37, %v897_v47  ;;  %v1309_v58 = vmul.f32 0.35355338, %v1164_v11  ;;  %2609 = vmax.xlane.f32.xlu0 %v2608_v26  ;;  %1437 = vmax.xlane.f32.xlu1 %v1436_v29  ;;  %v9528_v15 = vadd.f32 %v2483_v38, %v897_v47  ;;  %v2484_v28 = vmul.f32 0.35355338, %v2339_v57  ;;  %v903_v47 = vld [vmem:[%s13356_s1 + $0x78] sm:$0xff] }
 0x26b   : > { %v1166_v10 = vpop.f32.mrf.mxu1  ;;  %v2341_v61 = vpop.f32.mrf.mxu0 }
 0x26c   : > { %v1310_v59 = vmul.f32 0.35355338, %v1166_v10  ;;  %v2485_v4 = vmul.f32 0.35355338, %v2341_v61  ;;  %v1439_v33 = vmax.f32 %v9520_v22, %v9516_v30  ;;  %v9538_v40 = vadd.f32 %v1309_v58, %v898_v13 }
 0x26d   : > { %v1170_v14 = vpop.f32.mrf.mxu1  ;;  %v2345_v60 = vpop.f32.mrf.mxu0  ;;  %v2614_v46 = vmax.f32 %v9536_v56, %v9528_v15  ;;  %v9554_v54 = vadd.f32 %v2484_v28, %v898_v13 }
 0x26e   : > { %v9534_v24 = vadd.f32 %v1310_v59, %v899_v5  ;;  %v1311_v2 = vmul.f32 0.35355338, %v1170_v14  ;;  %2612 = vmax.xlane.f32.xlu1 %v2611_v7  ;;  %1440 = vmax.xlane.f32.xlu0 %v1439_v33  ;;  %v9550_v51 = vadd.f32 %v2485_v4, %v899_v5  ;;  %v2486_v19 = vmul.f32 0.35355338, %v2345_v60  ;;  %v905_v5 = vld [vmem:[%s13356_s1 + $0x88] sm:$0xff]  ;;  %v904_v4 = vld [vmem:[%s13356_s1 + $0x80] sm:$0xff] }
 0x26f   : > { %v1172_v43 = vpop.f32.mrf.mxu1  ;;  %v2347_v41 = vpop.f32.mrf.mxu0 }
 0x270   : > { %v1312_v9 = vmul.f32 0.35355338, %v1172_v43  ;;  %v2487_v39 = vmul.f32 0.35355338, %v2347_v41  ;;  %v1442_v55 = vmax.f32 %v9538_v40, %v9534_v24  ;;  %v9556_v18 = vadd.f32 %v1311_v2, %v900_v36 }
 0x271   : > { %v1174_v62 = vpop.f32.mrf.mxu1  ;;  %v2349_v42 = vpop.f32.mrf.mxu0  ;;  %v2617_v57 = vmax.f32 %v9554_v54, %v9550_v51  ;;  %v9572_v8 = vadd.f32 %v2486_v19, %v900_v36 }
 0x272   : > { %v9552_v52 = vadd.f32 %v1312_v9, %v901_v16  ;;  %v1313_v27 = vmul.f32 0.35355338, %v1174_v62  ;;  %2615 = vmax.xlane.f32.xlu0 %v2614_v46  ;;  %1443 = vmax.xlane.f32.xlu1 %v1442_v55  ;;  %v9564_v3 = vadd.f32 %v2487_v39, %v901_v16  ;;  %v2488_v10 = vmul.f32 0.35355338, %v2349_v42  ;;  %v907_v46 = vld [vmem:[%s13356_s1 + $0x98] sm:$0xff]  ;;  %v906_v55 = vld [vmem:[%s13356_s1 + $0x90] sm:$0xff] }
 0x273   : > { %v1176_v17 = vpop.f32.mrf.mxu1  ;;  %v2351_v12 = vpop.f32.mrf.mxu0 }
 0x274   : > { %v1314_v6 = vmul.f32 0.35355338, %v1176_v17  ;;  %v2489_v37 = vmul.f32 0.35355338, %v2351_v12  ;;  %v1445_v26 = vmax.f32 %v9556_v18, %v9552_v52  ;;  %v9574_v58 = vadd.f32 %v1313_v27, %v902_v48 }
 0x275   : > { %v1180_v38 = vpop.f32.mrf.mxu1  ;;  %v2355_v11 = vpop.f32.mrf.mxu0  ;;  %v2620_v28 = vmax.f32 %v9572_v8, %v9564_v3  ;;  %v9590_v41 = vadd.f32 %v2488_v10, %v902_v48  ;;  %v909_v10 = vld [vmem:[%s13356_s1 + $0xa8] sm:$0xff] }
 0x276   : > { %v9570_v29 = vadd.f32 %v1314_v6, %v903_v47  ;;  %v1315_v61 = vmul.f32 0.35355338, %v1180_v38  ;;  %2618 = vmax.xlane.f32.xlu1 %v2617_v57  ;;  %1446 = vmax.xlane.f32.xlu0 %v1445_v26  ;;  %v9586_v16 = vadd.f32 %v2489_v37, %v903_v47  ;;  %v2490_v9 = vmul.f32 0.35355338, %v2355_v11 }
 0x277   : > { %v1182_v13 = vpop.f32.mrf.mxu1  ;;  %v2357_v59 = vpop.f32.mrf.mxu0 }
 0x278   : > { %v1316_v14 = vmul.f32 0.35355338, %v1182_v13  ;;  %v2491_v60 = vmul.f32 0.35355338, %v2357_v59  ;;  %v1448_v2 = vmax.f32 %v9574_v58, %v9570_v29  ;;  %v9592_v36 = vadd.f32 %v1315_v61, %v904_v4  ;;  %v908_v13 = vld [vmem:[%s13356_s1 + $0xa0] sm:$0xff] }
 0x279   : > { %v1184_v7 = vpop.f32.mrf.mxu1  ;;  %v2359_v33 = vpop.f32.mrf.mxu0  ;;  %v2623_v48 = vmax.f32 %v9590_v41, %v9586_v16  ;;  %v9608_v38 = vadd.f32 %v2490_v9, %v904_v4 }
 0x27a   : > { %v9588_v43 = vadd.f32 %v1316_v14, %v905_v5  ;;  %v1317_v39 = vmul.f32 0.35355338, %v1184_v7  ;;  %2621 = vmax.xlane.f32.xlu0 %v2620_v28  ;;  %1449 = vmax.xlane.f32.xlu1 %v1448_v2  ;;  %v9600_v27 = vadd.f32 %v2491_v60, %v905_v5  ;;  %v2492_v57 = vmul.f32 0.35355338, %v2359_v33 }
 0x27b   : > { %v1186_v62 = vpop.f32.mrf.mxu1  ;;  %v2361_v42 = vpop.f32.mrf.mxu0 }
 0x27c   : > { %v1318_v19 = vmul.f32 0.35355338, %v1186_v62  ;;  %v2493_v17 = vmul.f32 0.35355338, %v2361_v42  ;;  %v1451_v6 = vmax.f32 %v9592_v36, %v9588_v43  ;;  %v9610_v11 = vadd.f32 %v1317_v39, %v906_v55 }
 0x27d   : > { %v1190_v12 = vpop.f32.mrf.mxu1  ;;  %v2365_v47 = vpop.f32.mrf.mxu0  ;;  %v2626_v7 = vmax.f32 %v9608_v38, %v9600_v27  ;;  %v9626_v9 = vadd.f32 %v2492_v57, %v906_v55 }
 0x27e   : > { %v9606_v37 = vadd.f32 %v1318_v19, %v907_v46  ;;  %v1319_v26 = vmul.f32 0.35355338, %v1190_v12  ;;  %2624 = vmax.xlane.f32.xlu1 %v2623_v48  ;;  %1452 = vmax.xlane.f32.xlu0 %v1451_v6  ;;  %v9622_v28 = vadd.f32 %v2493_v17, %v907_v46  ;;  %v2494_v62 = vmul.f32 0.35355338, %v2365_v47  ;;  %v911_v48 = vld [vmem:[%s13356_s1 + $0xb8] sm:$0xff]  ;;  %v910_v46 = vld [vmem:[%s13356_s1 + $0xb0] sm:$0xff] }
 0x27f   : > { %v1192_v61 = vpop.f32.mrf.mxu1  ;;  %v2367_v5 = vpop.f32.mrf.mxu0  ;;  %13727 = vst [vmem:[#allocation17_spill] sm:$0xff] %v9626_v9 }
 0x280   : > { %v1320_v59 = vmul.f32 0.35355338, %v1192_v61  ;;  %v2495_v14 = vmul.f32 0.35355338, %v2367_v5  ;;  %v1454_v33 = vmax.f32 %v9610_v11, %v9606_v37  ;;  %13725 = vst [vmem:[#allocation10_spill] sm:$0xff] %v9622_v28  ;;  %v9628_v39 = vadd.f32 %v1319_v26, %v908_v13 }
 0x281   : > { %v1194_v4 = vpop.f32.mrf.mxu1  ;;  %v2369_v60 = vpop.f32.mrf.mxu0  ;;  %v2629_v47 = vmax.f32 %v9626_v9, %v9622_v28 }
 0x282   : > { %v9624_v2 = vadd.f32 %v1320_v59, %v909_v10  ;;  %13728 = vst [vmem:[#allocation18_spill] sm:$0xff] %v9628_v39  ;;  %v1321_v42 = vmul.f32 0.35355338, %v1194_v4  ;;  %2627 = vmax.xlane.f32.xlu0 %v2626_v7  ;;  %1455 = vmax.xlane.f32.xlu1 %v1454_v33  ;;  %v9636_v6 = vadd.f32 %v2495_v14, %v909_v10  ;;  %v2496_v7 = vmul.f32 0.35355338, %v2369_v60  ;;  %v913_v10 = vld [vmem:[%s13356_s1 + $0xc8] sm:$0xff] }
 0x283   : > { %v1196_v19 = vpop.f32.mrf.mxu1  ;;  %v2371_v12 = vpop.f32.mrf.mxu0  ;;  %v9644_v59 = vadd.f32 %v2494_v62, %v908_v13 }
 0x284   : > { %13726 = vst [vmem:[#allocation11_spill] sm:$0xff] %v9624_v2  ;;  %v1322_v17 = vmul.f32 0.35355338, %v1196_v19  ;;  %13729 = vst [vmem:[#allocation14_spill] sm:$0xff] %v9636_v6  ;;  %v2497_v55 = vmul.f32 0.35355338, %v2371_v12  ;;  %v1457_v61 = vmax.f32 %v9628_v39, %v9624_v2  ;;  %v9646_v4 = vadd.f32 %v1321_v42, %v910_v46 }
 0x285   : > { %v1200_v57 = vpop.f32.mrf.mxu1  ;;  %v2375_v26 = vpop.f32.mrf.mxu0  ;;  %13731 = vst [vmem:[#allocation23_spill] sm:$0xff] %v9644_v59  ;;  %v912_v12 = vld [vmem:[%s13356_s1 + $0xc0] sm:$0xff]  ;;  %v2632_v60 = vmax.f32 %v9644_v59, %v9636_v6  ;;  %v915_v6 = vld [vmem:[%s13356_s1 + $0xd8] sm:$0xff] }
 0x286   : > { %v9642_v5 = vadd.f32 %v1322_v17, %v911_v48  ;;  %13732 = vst [vmem:[#allocation24_spill] sm:$0xff] %v9646_v4  ;;  %v1323_v33 = vmul.f32 0.35355338, %v1200_v57  ;;  %2630 = vmax.xlane.f32.xlu1 %v2629_v47  ;;  %1458 = vmax.xlane.f32.xlu0 %v1457_v61  ;;  %v9658_v57 = vadd.f32 %v2497_v55, %v911_v48  ;;  %v2498_v28 = vmul.f32 0.35355338, %v2375_v26  ;;  %v914_v48 = vld [vmem:[%s13356_s1 + $0xd0] sm:$0xff] }
 0x287   : > { %v1202_v14 = vpop.f32.mrf.mxu1  ;;  %v2377_v19 = vpop.f32.mrf.mxu0  ;;  %v9662_v61 = vadd.f32 %v2496_v7, %v910_v46 }
 0x288   : > { %13730 = vst [vmem:[#allocation15_spill] sm:$0xff] %v9642_v5  ;;  %v1324_v17 = vmul.f32 0.35355338, %v1202_v14  ;;  %v2499_v2 = vmul.f32 0.35355338, %v2377_v19  ;;  %v1460_v42 = vmax.f32 %v9646_v4, %v9642_v5  ;;  %13733 = vst [vmem:[#allocation20_spill] sm:$0xff] %v9658_v57  ;;  %v9664_v39 = vadd.f32 %v1323_v33, %v912_v12 }
 0x289   : > { %v1204_v13 = vpop.f32.mrf.mxu1  ;;  %v2379_v62 = vpop.f32.mrf.mxu0  ;;  %13735 = vst [vmem:[#allocation29_spill] sm:$0xff] %v9662_v61  ;;  %v2635_v26 = vmax.f32 %v9662_v61, %v9658_v57 }
 0x28a   : > { %v9660_v47 = vadd.f32 %v1324_v17, %v913_v10  ;;  %13736 = vst [vmem:[#allocation30_spill] sm:$0xff] %v9664_v39  ;;  %v1325_v9 = vmul.f32 0.35355338, %v1204_v13  ;;  %2633 = vmax.xlane.f32.xlu0 %v2632_v60  ;;  %1461 = vmax.xlane.f32.xlu1 %v1460_v42  ;;  %v9672_v17 = vadd.f32 %v2499_v2, %v913_v10  ;;  %v2500_v4 = vmul.f32 0.35355338, %v2379_v62  ;;  %v917_v2 = vld [vmem:[%s13356_s1 + $0xe8] sm:$0xff] }
 0x28b   : > { %v1206_v14 = vpop.f32.mrf.mxu1  ;;  %v2381_v19 = vpop.f32.mrf.mxu0  ;;  %v9680_v42 = vadd.f32 %v2498_v28, %v912_v12 }
 0x28c   : > { %13734 = vst [vmem:[#allocation21_spill] sm:$0xff] %v9660_v47  ;;  %v1326_v55 = vmul.f32 0.35355338, %v1206_v14  ;;  %13737 = vst [vmem:[#allocation26_spill] sm:$0xff] %v9672_v17  ;;  %v2501_v46 = vmul.f32 0.35355338, %v2381_v19  ;;  %v1463_v13 = vmax.f32 %v9664_v39, %v9660_v47  ;;  %v9682_v5 = vadd.f32 %v1325_v9, %v914_v48 }
 0x28d   : > { %v1210_v7 = vpop.f32.mrf.mxu1  ;;  %v2385_v33 = vpop.f32.mrf.mxu0  ;;  %13739 = vst [vmem:[#allocation3_spill] sm:$0xff] %v9680_v42  ;;  %v916_v19 = vld [vmem:[%s13356_s1 + $0xe0] sm:$0xff]  ;;  %v2638_v9 = vmax.f32 %v9680_v42, %v9672_v17  ;;  %v919_v17 = vld [vmem:[%s13356_s1 + $0xf8] sm:$0xff] }
 0x28e   : > { %v9678_v60 = vadd.f32 %v1326_v55, %v915_v6  ;;  %13740 = vst [vmem:[#allocation2_spill] sm:$0xff] %v9682_v5  ;;  %v1327_v59 = vmul.f32 0.35355338, %v1210_v7  ;;  %2636 = vmax.xlane.f32.xlu1 %v2635_v26  ;;  %1464 = vmax.xlane.f32.xlu0 %v1463_v13  ;;  %v9694_v7 = vadd.f32 %v2501_v46, %v915_v6  ;;  %v2502_v57 = vmul.f32 0.35355338, %v2385_v33  ;;  %v918_v6 = vld [vmem:[%s13356_s1 + $0xf0] sm:$0xff] }
 0x28f   : > { %v1212_v10 = vpop.f32.mrf.mxu1  ;;  %v2387_v14 = vpop.f32.mrf.mxu0  ;;  %v9698_v13 = vadd.f32 %v2500_v4, %v914_v48 }
 0x290   : > { %13738 = vst [vmem:[#allocation27_spill] sm:$0xff] %v9678_v60  ;;  %v1328_v55 = vmul.f32 0.35355338, %v1212_v10  ;;  %v2503_v47 = vmul.f32 0.35355338, %v2387_v14  ;;  %v1466_v62 = vmax.f32 %v9682_v5, %v9678_v60  ;;  %13741 = vst [vmem:[#allocation5_spill] sm:$0xff] %v9694_v7  ;;  %v9700_v39 = vadd.f32 %v1327_v59, %v916_v19 }
 0x291   : > { %v1214_v28 = vpop.f32.mrf.mxu1  ;;  %v2389_v12 = vpop.f32.mrf.mxu0  ;;  %13743 = vst [vmem:[#allocation7_spill] sm:$0xff] %v9698_v13  ;;  %v2641_v33 = vmax.f32 %v9698_v13, %v9694_v7 }
 0x292   : > { %v9696_v26 = vadd.f32 %v1328_v55, %v917_v2  ;;  %13744 = vst [vmem:[#allocation6_spill] sm:$0xff] %v9700_v39  ;;  %v1329_v61 = vmul.f32 0.35355338, %v1214_v28  ;;  %2639 = vmax.xlane.f32.xlu0 %v2638_v9  ;;  %1467 = vmax.xlane.f32.xlu1 %v1466_v62  ;;  %v9708_v55 = vadd.f32 %v2503_v47, %v917_v2  ;;  %v2504_v5 = vmul.f32 0.35355338, %v2389_v12  ;;  %v921_v47 = vld [vmem:[%s13356_s1 + $0x108] sm:$0xff] }
 0x293   : > { %v1216_v10 = vpop.f32.mrf.mxu1  ;;  %v2391_v14 = vpop.f32.mrf.mxu0  ;;  %v9716_v62 = vadd.f32 %v2502_v57, %v916_v19 }
 0x294   : > { %13742 = vst [vmem:[#allocation4_spill] sm:$0xff] %v9696_v26  ;;  %v1330_v46 = vmul.f32 0.35355338, %v1216_v10  ;;  %13745 = vst [vmem:[#allocation9_spill] sm:$0xff] %v9708_v55  ;;  %v2505_v4 = vmul.f32 0.35355338, %v2391_v14  ;;  %v1469_v28 = vmax.f32 %v9700_v39, %v9696_v26  ;;  %v9718_v60 = vadd.f32 %v1329_v61, %v918_v6 }
 0x295   : > { %v1220_v59 = vpop.f32.mrf.mxu1  ;;  %v2395_v48 = vpop.f32.mrf.mxu0  ;;  %13747 = vst [vmem:[#allocation13_spill] sm:$0xff] %v9716_v62  ;;  %v920_v14 = vld [vmem:[%s13356_s1 + $0x100] sm:$0xff]  ;;  %v2644_v61 = vmax.f32 %v9716_v62, %v9708_v55  ;;  %v923_v55 = vld [vmem:[%s13356_s1 + $0x118] sm:$0xff] }
 0x296   : > { %v9714_v9 = vadd.f32 %v1330_v46, %v919_v17  ;;  %13748 = vst [vmem:[#allocation12_spill] sm:$0xff] %v9718_v60  ;;  %v1331_v42 = vmul.f32 0.35355338, %v1220_v59  ;;  %2642 = vmax.xlane.f32.xlu1 %v2641_v33  ;;  %1470 = vmax.xlane.f32.xlu0 %v1469_v28  ;;  %v9730_v59 = vadd.f32 %v2505_v4, %v919_v17  ;;  %v2506_v7 = vmul.f32 0.35355338, %v2395_v48  ;;  %v922_v17 = vld [vmem:[%s13356_s1 + $0x110] sm:$0xff] }
 0x297   : > { %v1222_v2 = vpop.f32.mrf.mxu1  ;;  %v2397_v10 = vpop.f32.mrf.mxu0  ;;  %v9734_v28 = vadd.f32 %v2504_v5, %v918_v6 }
 0x298   : > { %13746 = vst [vmem:[#allocation8_spill] sm:$0xff] %v9714_v9  ;;  %v1332_v46 = vmul.f32 0.35355338, %v1222_v2  ;;  %v2507_v26 = vmul.f32 0.35355338, %v2397_v10  ;;  %v1472_v12 = vmax.f32 %v9718_v60, %v9714_v9  ;;  %13749 = vst [vmem:[#allocation19_spill] sm:$0xff] %v9730_v59  ;;  %v9736_v39 = vadd.f32 %v1331_v42, %v920_v14 }
 0x299   : > { %v1224_v57 = vpop.f32.mrf.mxu1  ;;  %v2399_v19 = vpop.f32.mrf.mxu0  ;;  %13751 = vst [vmem:[#allocation25_spill] sm:$0xff] %v9734_v28  ;;  %v2647_v48 = vmax.f32 %v9734_v28, %v9730_v59 }
 0x29a   : > { %v9732_v33 = vadd.f32 %v1332_v46, %v921_v47  ;;  %13752 = vst [vmem:[#allocation22_spill] sm:$0xff] %v9736_v39  ;;  %v1333_v13 = vmul.f32 0.35355338, %v1224_v57  ;;  %2645 = vmax.xlane.f32.xlu0 %v2644_v61  ;;  %1473 = vmax.xlane.f32.xlu1 %v1472_v12  ;;  %v9744_v46 = vadd.f32 %v2507_v26, %v921_v47  ;;  %v2508_v60 = vmul.f32 0.35355338, %v2399_v19  ;;  %v925_v26 = vld [vmem:[%s13356_s1 + $0x128] sm:$0xff] }
 0x29b   : > { %v1226_v2 = vpop.f32.mrf.mxu1  ;;  %v2401_v10 = vpop.f32.mrf.mxu0  ;;  %v9752_v12 = vadd.f32 %v2506_v7, %v920_v14 }
 0x29c   : > { %13750 = vst [vmem:[#allocation16_spill] sm:$0xff] %v9732_v33  ;;  %v1334_v4 = vmul.f32 0.35355338, %v1226_v2  ;;  %13753 = vst [vmem:[#allocation31_spill] sm:$0xff] %v9744_v46  ;;  %v2509_v5 = vmul.f32 0.35355338, %v2401_v10  ;;  %v1475_v57 = vmax.f32 %v9736_v39, %v9732_v33  ;;  %v9754_v9 = vadd.f32 %v1333_v13, %v922_v17 }
 0x29d   : > { %v1230_v42 = vpop.f32.mrf.mxu1  ;;  %v2405_v6 = vpop.f32.mrf.mxu0  ;;  %13755 = vst [vmem:[#allocation32_spill] sm:$0xff] %v9752_v12  ;;  %v924_v10 = vld [vmem:[%s13356_s1 + $0x120] sm:$0xff]  ;;  %v2650_v13 = vmax.f32 %v9752_v12, %v9744_v46  ;;  %v927_v46 = vld [vmem:[%s13356_s1 + $0x138] sm:$0xff] }
 0x29e   : > { %v9750_v61 = vadd.f32 %v1334_v4, %v923_v55  ;;  %13756 = vst [vmem:[#allocation33_spill] sm:$0xff] %v9754_v9  ;;  %v1335_v62 = vmul.f32 0.35355338, %v1230_v42  ;;  %2648 = vmax.xlane.f32.xlu1 %v2647_v48  ;;  %1476 = vmax.xlane.f32.xlu0 %v1475_v57  ;;  %v9766_v42 = vadd.f32 %v2509_v5, %v923_v55  ;;  %v2510_v59 = vmul.f32 0.35355338, %v2405_v6  ;;  %v926_v55 = vld [vmem:[%s13356_s1 + $0x130] sm:$0xff] }
 0x29f   : > { %v1232_v47 = vpop.f32.mrf.mxu1  ;;  %v2407_v2 = vpop.f32.mrf.mxu0  ;;  %v9770_v57 = vadd.f32 %v2508_v60, %v922_v17 }
 0x2a0   : > { %13754 = vst [vmem:[#allocation28_spill] sm:$0xff] %v9750_v61  ;;  %v1336_v4 = vmul.f32 0.35355338, %v1232_v47  ;;  %v2511_v33 = vmul.f32 0.35355338, %v2407_v2  ;;  %v1478_v19 = vmax.f32 %v9754_v9, %v9750_v61  ;;  %13757 = vst [vmem:[#allocation34_spill] sm:$0xff] %v9766_v42  ;;  %v9772_v39 = vadd.f32 %v1335_v62, %v924_v10 }
 0x2a1   : > { %v1234_v7 = vpop.f32.mrf.mxu1  ;;  %v2409_v14 = vpop.f32.mrf.mxu0  ;;  %13759 = vst [vmem:[#allocation36_spill] sm:$0xff] %v9770_v57  ;;  %v2653_v6 = vmax.f32 %v9770_v57, %v9766_v42 }
 0x2a2   : > { %v9768_v48 = vadd.f32 %v1336_v4, %v925_v26  ;;  %13760 = vst [vmem:[#allocation37_spill] sm:$0xff] %v9772_v39  ;;  %v1337_v28 = vmul.f32 0.35355338, %v1234_v7  ;;  %2651 = vmax.xlane.f32.xlu0 %v2650_v13  ;;  %1479 = vmax.xlane.f32.xlu1 %v1478_v19  ;;  %v9780_v4 = vadd.f32 %v2511_v33, %v925_v26  ;;  %v2512_v9 = vmul.f32 0.35355338, %v2409_v14  ;;  %v929_v33 = vld [vmem:[%s13356_s1 + $0x148] sm:$0xff] }
 0x2a3   : > { %v1236_v47 = vpop.f32.mrf.mxu1  ;;  %v2411_v2 = vpop.f32.mrf.mxu0  ;;  %v9788_v19 = vadd.f32 %v2510_v59, %v924_v10 }
 0x2a4   : > { %13758 = vst [vmem:[#allocation35_spill] sm:$0xff] %v9768_v48  ;;  %v1338_v5 = vmul.f32 0.35355338, %v1236_v47  ;;  %13761 = vst [vmem:[#allocation38_spill] sm:$0xff] %v9780_v4  ;;  %v2513_v60 = vmul.f32 0.35355338, %v2411_v2  ;;  %v1481_v7 = vmax.f32 %v9772_v39, %v9768_v48  ;;  %v9790_v61 = vadd.f32 %v1337_v28, %v926_v55 }
 0x2a5   : > { %v1240_v62 = vpop.f32.mrf.mxu1  ;;  %v2415_v17 = vpop.f32.mrf.mxu0  ;;  %13763 = vst [vmem:[#allocation40_spill] sm:$0xff] %v9788_v19  ;;  %v928_v2 = vld [vmem:[%s13356_s1 + $0x140] sm:$0xff]  ;;  %v2656_v28 = vmax.f32 %v9788_v19, %v9780_v4  ;;  %v931_v4 = vld [vmem:[%s13356_s1 + $0x158] sm:$0xff] }
 0x2a6   : > { %v9786_v13 = vadd.f32 %v1338_v5, %v927_v46  ;;  %13764 = vst [vmem:[#allocation41_spill] sm:$0xff] %v9790_v61  ;;  %v1339_v12 = vmul.f32 0.35355338, %v1240_v62  ;;  %2654 = vmax.xlane.f32.xlu1 %v2653_v6  ;;  %1482 = vmax.xlane.f32.xlu0 %v1481_v7  ;;  %v9802_v62 = vadd.f32 %v2513_v60, %v927_v46  ;;  %v2514_v42 = vmul.f32 0.35355338, %v2415_v17  ;;  %v930_v46 = vld [vmem:[%s13356_s1 + $0x150] sm:$0xff] }
 0x2a7   : > { %v1242_v26 = vpop.f32.mrf.mxu1  ;;  %v2417_v47 = vpop.f32.mrf.mxu0  ;;  %v9806_v7 = vadd.f32 %v2512_v9, %v926_v55 }
 0x2a8   : > { %13762 = vst [vmem:[#allocation39_spill] sm:$0xff] %v9786_v13  ;;  %v1340_v5 = vmul.f32 0.35355338, %v1242_v26  ;;  %v2515_v48 = vmul.f32 0.35355338, %v2417_v47  ;;  %v1484_v14 = vmax.f32 %v9790_v61, %v9786_v13  ;;  %13765 = vst [vmem:[#allocation42_spill] sm:$0xff] %v9802_v62  ;;  %v9808_v39 = vadd.f32 %v1339_v12, %v928_v2 }
 0x2a9   : > { %v1244_v59 = vpop.f32.mrf.mxu1  ;;  %v2419_v10 = vpop.f32.mrf.mxu0  ;;  %13767 = vst [vmem:[#allocation44_spill] sm:$0xff] %v9806_v7  ;;  %v2659_v17 = vmax.f32 %v9806_v7, %v9802_v62 }
 0x2aa   : > { %v9804_v6 = vadd.f32 %v1340_v5, %v929_v33  ;;  %13768 = vst [vmem:[#allocation45_spill] sm:$0xff] %v9808_v39  ;;  %v1341_v57 = vmul.f32 0.35355338, %v1244_v59  ;;  %2657 = vmax.xlane.f32.xlu0 %v2656_v28  ;;  %1485 = vmax.xlane.f32.xlu1 %v1484_v14  ;;  %v9816_v5 = vadd.f32 %v2515_v48, %v929_v33  ;;  %v2516_v61 = vmul.f32 0.35355338, %v2419_v10  ;;  %v933_v48 = vld [vmem:[%s13356_s1 + $0x168] sm:$0xff] }
 0x2ab   : > { %v1246_v26 = vpop.f32.mrf.mxu1  ;;  %v2421_v47 = vpop.f32.mrf.mxu0  ;;  %v9824_v14 = vadd.f32 %v2514_v42, %v928_v2 }
 0x2ac   : > { %13766 = vst [vmem:[#allocation43_spill] sm:$0xff] %v9804_v6  ;;  %v1342_v60 = vmul.f32 0.35355338, %v1246_v26  ;;  %13769 = vst [vmem:[#allocation46_spill] sm:$0xff] %v9816_v5  ;;  %v2517_v9 = vmul.f32 0.35355338, %v2421_v47  ;;  %v1487_v59 = vmax.f32 %v9808_v39, %v9804_v6  ;;  %v9826_v13 = vadd.f32 %v1341_v57, %v930_v46 }
 0x2ad   : > { %v1250_v12 = vpop.f32.mrf.mxu1  ;;  %v2425_v55 = vpop.f32.mrf.mxu0  ;;  %13771 = vst [vmem:[#allocation48_spill] sm:$0xff] %v9824_v14  ;;  %v932_v47 = vld [vmem:[%s13356_s1 + $0x160] sm:$0xff]  ;;  %v2662_v57 = vmax.f32 %v9824_v14, %v9816_v5  ;;  %v935_v5 = vld [vmem:[%s13356_s1 + $0x178] sm:$0xff] }
 0x2ae   : > { %v9822_v28 = vadd.f32 %v1342_v60, %v931_v4  ;;  %13772 = vst [vmem:[#allocation49_spill] sm:$0xff] %v9826_v13  ;;  %v1343_v19 = vmul.f32 0.35355338, %v1250_v12  ;;  %2660 = vmax.xlane.f32.xlu1 %v2659_v17  ;;  %1488 = vmax.xlane.f32.xlu0 %v1487_v59  ;;  %v9838_v12 = vadd.f32 %v2517_v9, %v931_v4  ;;  %v2518_v62 = vmul.f32 0.35355338, %v2425_v55  ;;  %v934_v4 = vld [vmem:[%s13356_s1 + $0x170] sm:$0xff] }
 0x2af   : > { %v1252_v33 = vpop.f32.mrf.mxu1  ;;  %v2427_v26 = vpop.f32.mrf.mxu0  ;;  %v9842_v59 = vadd.f32 %v2516_v61, %v930_v46 }
 0x2b0   : > { %13770 = vst [vmem:[#allocation47_spill] sm:$0xff] %v9822_v28  ;;  %v1344_v60 = vmul.f32 0.35355338, %v1252_v33  ;;  %v2519_v6 = vmul.f32 0.35355338, %v2427_v26  ;;  %v1490_v10 = vmax.f32 %v9826_v13, %v9822_v28  ;;  %13773 = vst [vmem:[#allocation50_spill] sm:$0xff] %v9838_v12  ;;  %v9844_v39 = vadd.f32 %v1343_v19, %v932_v47 }
 0x2b1   : > { %v1254_v42 = vpop.f32.mrf.mxu1  ;;  %v2429_v2 = vpop.f32.mrf.mxu0  ;;  %13775 = vst [vmem:[#allocation52_spill] sm:$0xff] %v9842_v59  ;;  %v2665_v55 = vmax.f32 %v9842_v59, %v9838_v12 }
 0x2b2   : > { %v9840_v17 = vadd.f32 %v1344_v60, %v933_v48  ;;  %13776 = vst [vmem:[#allocation53_spill] sm:$0xff] %v9844_v39  ;;  %v1345_v7 = vmul.f32 0.35355338, %v1254_v42  ;;  %2663 = vmax.xlane.f32.xlu0 %v2662_v57  ;;  %1491 = vmax.xlane.f32.xlu1 %v1490_v10  ;;  %v9852_v60 = vadd.f32 %v2519_v6, %v933_v48  ;;  %v2520_v13 = vmul.f32 0.35355338, %v2429_v2  ;;  %v937_v6 = vld [vmem:[%s13356_s1 + $0x188] sm:$0xff] }
 0x2b3   : > { %v1256_v33 = vpop.f32.mrf.mxu1  ;;  %v2431_v26 = vpop.f32.mrf.mxu0  ;;  %v9860_v10 = vadd.f32 %v2518_v62, %v932_v47 }
 0x2b4   : > { %13774 = vst [vmem:[#allocation51_spill] sm:$0xff] %v9840_v17  ;;  %v1346_v9 = vmul.f32 0.35355338, %v1256_v33  ;;  %13777 = vst [vmem:[#allocation54_spill] sm:$0xff] %v9852_v60  ;;  %v2521_v61 = vmul.f32 0.35355338, %v2431_v26  ;;  %v1493_v42 = vmax.f32 %v9844_v39, %v9840_v17  ;;  %v9862_v28 = vadd.f32 %v1345_v7, %v934_v4 }
 0x2b5   : > { %v1260_v19 = vpop.f32.mrf.mxu1  ;;  %v2435_v46 = vpop.f32.mrf.mxu0  ;;  %13779 = vst [vmem:[#allocation56_spill] sm:$0xff] %v9860_v10  ;;  %v936_v26 = vld [vmem:[%s13356_s1 + $0x180] sm:$0xff]  ;;  %v2668_v7 = vmax.f32 %v9860_v10, %v9852_v60  ;;  %v939_v60 = vld [vmem:[%s13356_s1 + $0x198] sm:$0xff] }
 0x2b6   : > { %v9858_v57 = vadd.f32 %v1346_v9, %v935_v5  ;;  %13780 = vst [vmem:[#allocation57_spill] sm:$0xff] %v9862_v28  ;;  %v1347_v14 = vmul.f32 0.35355338, %v1260_v19  ;;  %2666 = vmax.xlane.f32.xlu1 %v2665_v55  ;;  %1494 = vmax.xlane.f32.xlu0 %v1493_v42  ;;  %v9874_v19 = vadd.f32 %v2521_v61, %v935_v5  ;;  %v2522_v12 = vmul.f32 0.35355338, %v2435_v46  ;;  %v938_v5 = vld [vmem:[%s13356_s1 + $0x190] sm:$0xff] }
 0x2b7   : > { %v1262_v48 = vpop.f32.mrf.mxu1  ;;  %v2437_v33 = vpop.f32.mrf.mxu0  ;;  %v9878_v42 = vadd.f32 %v2520_v13, %v934_v4 }
 0x2b8   : > { %13778 = vst [vmem:[#allocation55_spill] sm:$0xff] %v9858_v57  ;;  %v1348_v9 = vmul.f32 0.35355338, %v1262_v48  ;;  %v2523_v17 = vmul.f32 0.35355338, %v2437_v33  ;;  %v1496_v2 = vmax.f32 %v9862_v28, %v9858_v57  ;;  %13781 = vst [vmem:[#allocation58_spill] sm:$0xff] %v9874_v19  ;;  %v9880_v39 = vadd.f32 %v1347_v14, %v936_v26 }
 0x2b9   : > { %v1264_v62 = vpop.f32.mrf.mxu1  ;;  %v2439_v47 = vpop.f32.mrf.mxu0  ;;  %13783 = vst [vmem:[#allocation60_spill] sm:$0xff] %v9878_v42  ;;  %v2671_v46 = vmax.f32 %v9878_v42, %v9874_v19 }
 0x2ba   : > { %v9876_v55 = vadd.f32 %v1348_v9, %v937_v6  ;;  %13784 = vst [vmem:[#allocation61_spill] sm:$0xff] %v9880_v39  ;;  %v1349_v59 = vmul.f32 0.35355338, %v1264_v62  ;;  %2669 = vmax.xlane.f32.xlu0 %v2668_v7  ;;  %1497 = vmax.xlane.f32.xlu1 %v1496_v2  ;;  %v9888_v9 = vadd.f32 %v2523_v17, %v937_v6  ;;  %v2524_v28 = vmul.f32 0.35355338, %v2439_v47  ;;  %v941_v17 = vld [vmem:[%s13356_s1 + $0x1a8] sm:$0xff] }
 0x2bb   : > { %v1266_v48 = vpop.f32.mrf.mxu1  ;;  %v2441_v33 = vpop.f32.mrf.mxu0  ;;  %v9896_v2 = vadd.f32 %v2522_v12, %v936_v26 }
 0x2bc   : > { %13782 = vst [vmem:[#allocation59_spill] sm:$0xff] %v9876_v55  ;;  %v1350_v61 = vmul.f32 0.35355338, %v1266_v48  ;;  %13785 = vst [vmem:[#allocation62_spill] sm:$0xff] %v9888_v9  ;;  %v2525_v13 = vmul.f32 0.35355338, %v2441_v33  ;;  %v1499_v62 = vmax.f32 %v9880_v39, %v9876_v55  ;;  %v9898_v57 = vadd.f32 %v1349_v59, %v938_v5 }
 0x2bd   : > { %v1270_v14 = vpop.f32.mrf.mxu1  ;;  %v2445_v4 = vpop.f32.mrf.mxu0  ;;  %13787 = vst [vmem:[#allocation64_spill] sm:$0xff] %v9896_v2  ;;  %v940_v33 = vld [vmem:[%s13356_s1 + $0x1a0] sm:$0xff]  ;;  %v2674_v59 = vmax.f32 %v9896_v2, %v9888_v9  ;;  %v943_v9 = vld [vmem:[%s13356_s1 + $0x1b8] sm:$0xff] }
 0x2be   : > { %v9894_v7 = vadd.f32 %v1350_v61, %v939_v60  ;;  %13788 = vst [vmem:[#allocation65_spill] sm:$0xff] %v9898_v57  ;;  %v1351_v10 = vmul.f32 0.35355338, %v1270_v14  ;;  %2672 = vmax.xlane.f32.xlu1 %v2671_v46  ;;  %1500 = vmax.xlane.f32.xlu0 %v1499_v62  ;;  %v9910_v14 = vadd.f32 %v2525_v13, %v939_v60  ;;  %v2526_v19 = vmul.f32 0.35355338, %v2445_v4  ;;  %v942_v60 = vld [vmem:[%s13356_s1 + $0x1b0] sm:$0xff] }
 0x2bf   : > { %v1272_v6 = vpop.f32.mrf.mxu1  ;;  %v2447_v48 = vpop.f32.mrf.mxu0  ;;  %v9914_v62 = vadd.f32 %v2524_v28, %v938_v5 }
 0x2c0   : > { %13786 = vst [vmem:[#allocation63_spill] sm:$0xff] %v9894_v7  ;;  %v1352_v61 = vmul.f32 0.35355338, %v1272_v6  ;;  %v2527_v55 = vmul.f32 0.35355338, %v2447_v48  ;;  %v1502_v47 = vmax.f32 %v9898_v57, %v9894_v7  ;;  %13789 = vst [vmem:[#allocation66_spill] sm:$0xff] %v9910_v14  ;;  %v9916_v39 = vadd.f32 %v1351_v10, %v940_v33 }
 0x2c1   : > { %v1274_v12 = vpop.f32.mrf.mxu1  ;;  %v2449_v26 = vpop.f32.mrf.mxu0  ;;  %13791 = vst [vmem:[#allocation68_spill] sm:$0xff] %v9914_v62  ;;  %v2677_v4 = vmax.f32 %v9914_v62, %v9910_v14 }
 0x2c2   : > { %v9912_v46 = vadd.f32 %v1352_v61, %v941_v17  ;;  %13792 = vst [vmem:[#allocation69_spill] sm:$0xff] %v9916_v39  ;;  %v1353_v42 = vmul.f32 0.35355338, %v1274_v12  ;;  %2675 = vmax.xlane.f32.xlu0 %v2674_v59  ;;  %1503 = vmax.xlane.f32.xlu1 %v1502_v47  ;;  %v9924_v61 = vadd.f32 %v2527_v55, %v941_v17  ;;  %v2528_v57 = vmul.f32 0.35355338, %v2449_v26  ;;  %v945_v55 = vld [vmem:[%s13356_s1 + $0x1c8] sm:$0xff] }
 0x2c3   : > { %v1276_v6 = vpop.f32.mrf.mxu1  ;;  %v2451_v48 = vpop.f32.mrf.mxu0  ;;  %v9932_v47 = vadd.f32 %v2526_v19, %v940_v33 }
 0x2c4   : > { %13790 = vst [vmem:[#allocation67_spill] sm:$0xff] %v9912_v46  ;;  %v1354_v13 = vmul.f32 0.35355338, %v1276_v6  ;;  %13793 = vst [vmem:[#allocation70_spill] sm:$0xff] %v9924_v61  ;;  %v2529_v28 = vmul.f32 0.35355338, %v2451_v48  ;;  %v1505_v12 = vmax.f32 %v9916_v39, %v9912_v46  ;;  %v9934_v7 = vadd.f32 %v1353_v42, %v942_v60 }
 0x2c5   : > { %v1280_v10 = vpop.f32.mrf.mxu1  ;;  %v2455_v5 = vpop.f32.mrf.mxu0  ;;  %13795 = vst [vmem:[#allocation72_spill] sm:$0xff] %v9932_v47  ;;  %v944_v48 = vld [vmem:[%s13356_s1 + $0x1c0] sm:$0xff]  ;;  %v2680_v42 = vmax.f32 %v9932_v47, %v9924_v61  ;;  %v947_v61 = vld [vmem:[%s13356_s1 + $0x1d8] sm:$0xff] }
 0x2c6   : > { %v9930_v59 = vadd.f32 %v1354_v13, %v943_v9  ;;  %13796 = vst [vmem:[#allocation73_spill] sm:$0xff] %v9934_v7  ;;  %v1355_v2 = vmul.f32 0.35355338, %v1280_v10  ;;  %2678 = vmax.xlane.f32.xlu1 %v2677_v4  ;;  %1506 = vmax.xlane.f32.xlu0 %v1505_v12  ;;  %v9946_v10 = vadd.f32 %v2529_v28, %v943_v9  ;;  %v2530_v14 = vmul.f32 0.35355338, %v2455_v5  ;;  %v946_v9 = vld [vmem:[%s13356_s1 + $0x1d0] sm:$0xff] }
 0x2c7   : > { %v1282_v17 = vpop.f32.mrf.mxu1  ;;  %v2457_v6 = vpop.f32.mrf.mxu0  ;;  %v9950_v12 = vadd.f32 %v2528_v57, %v942_v60 }
 0x2c8   : > { %13794 = vst [vmem:[#allocation71_spill] sm:$0xff] %v9930_v59  ;;  %v1356_v13 = vmul.f32 0.35355338, %v1282_v17  ;;  %v2531_v46 = vmul.f32 0.35355338, %v2457_v6  ;;  %v1508_v26 = vmax.f32 %v9934_v7, %v9930_v59  ;;  %13797 = vst [vmem:[#allocation74_spill] sm:$0xff] %v9946_v10  ;;  %v9952_v39 = vadd.f32 %v1355_v2, %v944_v48 }
 0x2c9   : > { %v1284_v19 = vpop.f32.mrf.mxu1  ;;  %v2459_v33 = vpop.f32.mrf.mxu0  ;;  %13799 = vst [vmem:[#allocation76_spill] sm:$0xff] %v9950_v12  ;;  %v2683_v5 = vmax.f32 %v9950_v12, %v9946_v10 }
 0x2ca   : > { %v9948_v4 = vadd.f32 %v1356_v13, %v945_v55  ;;  %13800 = vst [vmem:[#allocation77_spill] sm:$0xff] %v9952_v39  ;;  %v1357_v62 = vmul.f32 0.35355338, %v1284_v19  ;;  %2681 = vmax.xlane.f32.xlu0 %v2680_v42  ;;  %1509 = vmax.xlane.f32.xlu1 %v1508_v26  ;;  %v9960_v13 = vadd.f32 %v2531_v46, %v945_v55  ;;  %v2532_v7 = vmul.f32 0.35355338, %v2459_v33  ;;  %v949_v46 = vld [vmem:[%s13356_s1 + $0x1e8] sm:$0xff] }
 0x2cb   : > { %v1286_v17 = vpop.f32.mrf.mxu1  ;;  %v2461_v6 = vpop.f32.mrf.mxu0  ;;  %v9968_v26 = vadd.f32 %v2530_v14, %v944_v48 }
 0x2cc   : > { %13798 = vst [vmem:[#allocation75_spill] sm:$0xff] %v9948_v4  ;;  %v1358_v28 = vmul.f32 0.35355338, %v1286_v17  ;;  %13801 = vst [vmem:[#allocation78_spill] sm:$0xff] %v9960_v13  ;;  %v2533_v57 = vmul.f32 0.35355338, %v2461_v6  ;;  %v1511_v19 = vmax.f32 %v9952_v39, %v9948_v4  ;;  %v9970_v59 = vadd.f32 %v1357_v62, %v946_v9 }
 0x2cd   : > { %v1290_v2 = vpop.f32.mrf.mxu1  ;;  %v2465_v60 = vpop.f32.mrf.mxu0  ;;  %v948_v6 = vld [vmem:[%s13356_s1 + $0x1e0] sm:$0xff]  ;;  %v2686_v62 = vmax.f32 %v9968_v26, %v9960_v13  ;;  %v9986_v39 = vadd.f32 %v2532_v7, %v946_v9 }
 0x2ce   : > { %v9966_v42 = vadd.f32 %v1358_v28, %v947_v61  ;;  %13803 = vst [vmem:[#allocation80_spill] sm:$0xff] %v9970_v59  ;;  %v1359_v47 = vmul.f32 0.35355338, %v1290_v2  ;;  %2684 = vmax.xlane.f32.xlu1 %v2683_v5  ;;  %1512 = vmax.xlane.f32.xlu0 %v1511_v19  ;;  %v9982_v2 = vadd.f32 %v2533_v57, %v947_v61  ;;  %v2534_v12 = vmul.f32 0.35355338, %v2465_v60  ;;  %v951_v61 = vld [vmem:[%s13356_s1 + $0x1f8] sm:$0xff] }
 0x2cf   : > { %v1292_v55 = vpop.f32.mrf.mxu1  ;;  %v2467_v17 = vpop.f32.mrf.mxu0  ;;  %13806 = vst [vmem:[#allocation83_spill] sm:$0xff] %v9986_v39 }
 0x2d0   : > { %13802 = vst [vmem:[#allocation79_spill] sm:$0xff] %v9966_v42  ;;  %v1360_v28 = vmul.f32 0.35355338, %v1292_v55  ;;  %v2535_v4 = vmul.f32 0.35355338, %v2467_v17  ;;  %v1514_v33 = vmax.f32 %v9970_v59, %v9966_v42  ;;  %13804 = vst [vmem:[#allocation81_spill] sm:$0xff] %v9982_v2  ;;  %v9988_v10 = vadd.f32 %v1359_v47, %v948_v6 }
 0x2d1   : > { %v1294_v14 = vpop.f32.mrf.mxu1  ;;  %v2469_v48 = vpop.f32.mrf.mxu0  ;;  %v950_v55 = vld [vmem:[%s13356_s1 + $0x1f0] sm:$0xff]  ;;  %v2689_v47 = vmax.f32 %v9986_v39, %v9982_v2 }
 0x2d2   : > { %v9984_v5 = vadd.f32 %v1360_v28, %v949_v46  ;;  %v1361_v19 = vmul.f32 0.35355338, %v1294_v14  ;;  %13807 = vst [vmem:[#allocation84_spill] sm:$0xff] %v9988_v10  ;;  %2687 = vmax.xlane.f32.xlu0 %v2686_v62  ;;  %1515 = vmax.xlane.f32.xlu1 %v1514_v33  ;;  %v9996_v28 = vadd.f32 %v2535_v4, %v949_v46  ;;  %v2536_v42 = vmul.f32 0.35355338, %v2469_v48 }
 0x2d3   : > { %v1296_v17 = vpop.f32.mrf.mxu1  ;;  %v2471_v13 = vpop.f32.mrf.mxu0  ;;  %v10008_v33 = vadd.f32 %v2534_v12, %v948_v6 }
 0x2d4   : > { %13805 = vst [vmem:[#allocation82_spill] sm:$0xff] %v9984_v5  ;;  %v1362_v57 = vmul.f32 0.35355338, %v1296_v17  ;;  %13808 = vst [vmem:[#allocation85_spill] sm:$0xff] %v9996_v28  ;;  %v2537_v7 = vmul.f32 0.35355338, %v2471_v13  ;;  %v1517_v60 = vmax.f32 %v9988_v10, %v9984_v5  ;;  %v10004_v14 = vadd.f32 %v1361_v19, %v950_v55 }
 0x2d5   : > { %v9998_v9 = vpop.f32.mrf.mxu1  ;;  %13811 = vst [vmem:[#allocation88_spill] sm:$0xff] %v10008_v33  ;;  %v2692_v17 = vmax.f32 %v10008_v33, %v9996_v28  ;;  %v10022_v12 = vadd.f32 %v2536_v42, %v950_v55 }
 0x2d6   : > { %13809 = vst [vmem:[#allocation86_spill] sm:$0xff] %v10004_v14  ;;  %v10006_v62 = vadd.f32 %v1362_v57, %v951_v61  ;;  %2690 = vmax.xlane.f32.xlu1 %v2689_v47  ;;  %1518 = vmax.xlane.f32.xlu0 %v1517_v60  ;;  %v10018_v5 = vadd.f32 %v2537_v7, %v951_v61 }
 0x2d7   : > { %v10010_v4 = vpop.f32.mrf.mxu1  ;;  %13813 = vst [vmem:[#allocation90_spill] sm:$0xff] %v10022_v12 }
 0x2d8   : > { %13810 = vst [vmem:[#allocation87_spill] sm:$0xff] %v10006_v62  ;;  %v1520_v13 = vmax.f32 %v10004_v14, %v10006_v62  ;;  %13812 = vst [vmem:[#allocation89_spill] sm:$0xff] %v10018_v5  ;;  %v2695_v57 = vmax.f32 %v10022_v12, %v10018_v5 }
 0x2d9   : > { %v10014_v46 = vpop.f32.mrf.mxu1 }
 0x2da   : > { %2693 = vmax.xlane.f32.xlu0 %v2692_v17  ;;  %1521 = vmax.xlane.f32.xlu1 %v1520_v13 }
 0x2db   : > { %v10024_v6 = vpop.f32.mrf.mxu1 }
 0x2dd   : > { %v10026_v48 = vpop.f32.mrf.mxu1 }
 0x2de   : > { %2696 = vmax.xlane.f32.xlu1 %v2695_v57 }
 0x2df   : > { %v10030_v47 = vpop.f32.mrf.mxu1 }
 0x2e1   : > { %v10032_v60 = vpop.f32.mrf.mxu1 }
 0x2e3   : > { %v10036_v7 = vpop.f32.mrf.mxu1 }
 0x2e5   : > { %v10038_v42 = vpop.f32.mrf.mxu1 }
 0x2e7   : > { %v10040_v55 = vpop.f32.mrf.mxu1  ;;  %v2604_v13 = vpop.xlane.xlu1 %2603 }
 0x2e8   : > { %v1429_v17 = vpop.xlane.xlu0 %1428  ;;  %v2698_v19 = vsub.f32 %v9452_v44, %v2604_v13  ;;  %v2699_v5 = vsub.f32 %v9448_v35, %v2604_v13 }
 0x2e9   : > { %v1523_v57 = vsub.f32 %v9454_v45, %v1429_v17  ;;  %v1524_v12 = vsub.f32 %v9450_v34, %v1429_v17  ;;  %v10046_v62 = vpop.f32.mrf.mxu1 }
 0x2ea   : > { %v2762_v14 = vmul.f32 1.442695, %v2698_v19  ;;  %v2764_v61 = vmul.f32 1.442695, %v2699_v5 }
 0x2eb   : > { %v1587_v28 = vmul.f32 1.442695, %v1523_v57  ;;  %v10048_v33 = vpop.f32.mrf.mxu1  ;;  %v1589_v10 = vmul.f32 1.442695, %v1524_v12  ;;  %v2607_v2 = vpop.xlane.xlu1 %2606 }
 0x2ec   : > { %v1432_v39 = vpop.xlane.xlu0 %1431  ;;  %8014 = vpow2.f32 %v2762_v14  ;;  %v2700_v59 = vsub.f32 %v9472_v23, %v2607_v2  ;;  %v2701_v44 = vsub.f32 %v9466_v20, %v2607_v2 }
 0x2ed   : > { %v1525_v35 = vsub.f32 %v9470_v50, %v1432_v39  ;;  %v10053_v45 = vpop.f32.mrf.mxu1  ;;  %8016 = vpow2.f32 %v2764_v61  ;;  %v1526_v34 = vsub.f32 %v9468_v31, %v1432_v39 }
 0x2ee   : > { %8018 = vpow2.f32 %v1587_v28  ;;  %v2766_v5 = vmul.f32 1.442695, %v2700_v59  ;;  %v2768_v19 = vmul.f32 1.442695, %v2701_v44 }
 0x2ef   : > { %v1591_v13 = vmul.f32 1.442695, %v1525_v35  ;;  %v10056_v17 = vpop.f32.mrf.mxu1  ;;  %8020 = vpow2.f32 %v1589_v10  ;;  %v1593_v12 = vmul.f32 1.442695, %v1526_v34 }
 0x2f0   : > { %v1435_v14 = vpop.xlane.xlu0 %1434  ;;  %8022 = vpow2.f32 %v2766_v5 }
 0x2f1   : > { %v1527_v23 = vsub.f32 %v9486_v49, %v1435_v14  ;;  %v1528_v20 = vsub.f32 %v9484_v25, %v1435_v14  ;;  %v10060_v50 = vpop.f32.mrf.mxu1  ;;  %8024 = vpow2.f32 %v2768_v19 }
 0x2f2   : > { %8026 = vpow2.f32 %v1591_v13 }
 0x2f3   : > { %v1595_v2 = vmul.f32 1.442695, %v1527_v23  ;;  %v1597_v31 = vmul.f32 1.442695, %v1528_v20  ;;  %v10062_v39 = vpop.f32.mrf.mxu1  ;;  %8028 = vpow2.f32 %v1593_v12  ;;  %v1438_v28 = vpop.xlane.xlu1 %1437 }
 0x2f4   : > { %v2610_v59 = vpop.xlane.xlu0 %2609  ;;  %v1529_v49 = vsub.f32 %v9502_v1, %v1438_v28  ;;  %v1530_v25 = vsub.f32 %v9498_v63, %v1438_v28 }
 0x2f5   : > { %8030 = vpow2.f32 %v1595_v2  ;;  %v2702_v10 = vsub.f32 %v9500_v0, %v2610_v59  ;;  %v2703_v61 = vsub.f32 %v9494_v53, %v2610_v59  ;;  %v10067_v57 = vpop.f32.mrf.mxu1 }
 0x2f6   : > { %8032 = vpow2.f32 %v1597_v31  ;;  %v1599_v34 = vmul.f32 1.442695, %v1529_v49  ;;  %v1601_v19 = vmul.f32 1.442695, %v1530_v25 }
 0x2f7   : > { %v2770_v44 = vmul.f32 1.442695, %v2702_v10  ;;  %v2772_v35 = vmul.f32 1.442695, %v2703_v61  ;;  %v10070_v5 = vpop.f32.mrf.mxu1  ;;  %v2613_v13 = vpop.xlane.xlu1 %2612 }
 0x2f8   : > { %v1441_v12 = vpop.xlane.xlu0 %1440  ;;  %v2704_v0 = vsub.f32 %v9518_v21, %v2613_v13  ;;  %v2705_v53 = vsub.f32 %v9514_v32, %v2613_v13 }
 0x2f9   : > { %8034 = vpow2.f32 %v2770_v44  ;;  %v1531_v1 = vsub.f32 %v9520_v22, %v1441_v12  ;;  %v10075_v14 = vpop.f32.mrf.mxu1  ;;  %v10077_v23 = vpop.eup %8014  ;;  %v1532_v63 = vsub.f32 %v9516_v30, %v1441_v12 }
 0x2fa   : > { %8036 = vpow2.f32 %v2772_v35  ;;  %v10080_v20 = vpop.eup %8016  ;;  %v2774_v2 = vmul.f32 1.442695, %v2704_v0  ;;  %v2776_v31 = vmul.f32 1.442695, %v2705_v53 }
 0x2fb   : > { %8038 = vpow2.f32 %v1599_v34  ;;  %v1603_v59 = vmul.f32 1.442695, %v1531_v1  ;;  %v10082_v28 = vpop.f32.mrf.mxu1  ;;  %v10084_v21 = vpop.eup %8018  ;;  %v1605_v32 = vmul.f32 1.442695, %v1532_v63 }
 0x2fc   : > { %8040 = vpow2.f32 %v1601_v19  ;;  %v2616_v22 = vpop.xlane.xlu0 %2615  ;;  %v1444_v10 = vpop.xlane.xlu1 %1443 }
 0x2fd   : > { %v10086_v61 = vpop.eup %8020  ;;  %8042 = vpow2.f32 %v2774_v2  ;;  %v2706_v49 = vsub.f32 %v9536_v56, %v2616_v22  ;;  %v2707_v30 = vsub.f32 %v9528_v15, %v2616_v22  ;;  %v1533_v25 = vsub.f32 %v9538_v40, %v1444_v10  ;;  %v10091_v44 = vpop.f32.mrf.mxu1 }
 0x2fe   : > { %v10093_v35 = vpop.eup %8022  ;;  %8044 = vpow2.f32 %v2776_v31  ;;  %v1534_v34 = vsub.f32 %v9534_v24, %v1444_v10  ;;  %v1715_v19 = vadd.f32 %v10086_v61, %v10084_v21 }
 0x2ff   : > { %v10098_v13 = vpop.eup %8024  ;;  %8046 = vpow2.f32 %v1603_v59  ;;  %v2778_v12 = vmul.f32 1.442695, %v2706_v49  ;;  %v2780_v0 = vmul.f32 1.442695, %v2707_v30  ;;  %v1607_v56 = vmul.f32 1.442695, %v1533_v25  ;;  %v10100_v53 = vpop.f32.mrf.mxu1 }
 0x300   : > { %v10102_v15 = vpop.eup %8026  ;;  %8048 = vpow2.f32 %v1605_v32  ;;  %v1609_v40 = vmul.f32 1.442695, %v1534_v34  ;;  %1716 = vadd.xlane.f32.xlu0 %v1715_v19  ;;  %v2619_v1 = vpop.xlane.xlu1 %2618  ;;  %v2890_v49 = vadd.f32 %v10080_v20, %v10077_v23 }
 0x301   : > { %v1447_v63 = vpop.xlane.xlu0 %1446  ;;  %v10104_v2 = vpop.eup %8028  ;;  %8050 = vpow2.f32 %v2778_v12  ;;  %v2708_v24 = vsub.f32 %v9554_v54, %v2619_v1  ;;  %v2709_v31 = vsub.f32 %v9550_v51, %v2619_v1 }
 0x302   : > { %v1535_v59 = vsub.f32 %v9556_v18, %v1447_v63  ;;  %v10109_v22 = vpop.f32.mrf.mxu1  ;;  %v10111_v10 = vpop.eup %8030  ;;  %8052 = vpow2.f32 %v2780_v0  ;;  %v1536_v32 = vsub.f32 %v9552_v52, %v1447_v63  ;;  %v1718_v30 = vadd.f32 %v10104_v2, %v10102_v15 }
 0x303   : > { %13814 = vst [vmem:[#allocation91_spill] sm:$0xff] %v10111_v10  ;;  %v10118_v25 = vpop.eup %8032  ;;  %8054 = vpow2.f32 %v1607_v56  ;;  %v2782_v54 = vmul.f32 1.442695, %v2708_v24  ;;  %v2784_v51 = vmul.f32 1.442695, %v2709_v31 }
 0x304   : > { %v1611_v34 = vmul.f32 1.442695, %v1535_v59  ;;  %v10120_v18 = vpop.f32.mrf.mxu1  ;;  %8056 = vpow2.f32 %v1609_v40  ;;  %v1613_v19 = vmul.f32 1.442695, %v1536_v32  ;;  %2891 = vadd.xlane.f32.xlu0 %v2890_v49  ;;  %1719 = vadd.xlane.f32.xlu1 %v1718_v30  ;;  %v1450_v52 = vpop.xlane.xlu1 %1449  ;;  %v1721_v0 = vadd.f32 %v10118_v25, %v10111_v10 }
 0x305   : > { %v2622_v12 = vpop.xlane.xlu0 %2621  ;;  %8058 = vpow2.f32 %v2782_v54  ;;  %v1537_v56 = vsub.f32 %v9574_v58, %v1450_v52  ;;  %v1538_v40 = vsub.f32 %v9570_v29, %v1450_v52  ;;  %v2893_v59 = vadd.f32 %v10098_v13, %v10093_v35 }
 0x306   : > { %v2710_v1 = vsub.f32 %v9572_v8, %v2622_v12  ;;  %v2711_v63 = vsub.f32 %v9564_v3, %v2622_v12  ;;  %v10127_v24 = vpop.f32.mrf.mxu1  ;;  %v10129_v31 = vpop.eup %8034  ;;  %8060 = vpow2.f32 %v2784_v51 }
 0x307   : > { %13815 = vst [vmem:[#allocation92_spill] sm:$0xff] %v10129_v31  ;;  %v10134_v32 = vpop.eup %8036  ;;  %8062 = vpow2.f32 %v1611_v34  ;;  %v1615_v8 = vmul.f32 1.442695, %v1537_v56  ;;  %v1617_v58 = vmul.f32 1.442695, %v1538_v40 }
 0x308   : > { %13816 = vst [vmem:[#allocation93_spill] sm:$0xff] %v10134_v32  ;;  %v2786_v49 = vmul.f32 1.442695, %v2710_v1  ;;  %v2788_v30 = vmul.f32 1.442695, %v2711_v63  ;;  %v10136_v54 = vpop.f32.mrf.mxu1  ;;  %v10138_v3 = vpop.eup %8038  ;;  %8064 = vpow2.f32 %v1613_v19  ;;  %1722 = vadd.xlane.f32.xlu0 %v1721_v0  ;;  %2894 = vadd.xlane.f32.xlu1 %v2893_v59  ;;  %v2896_v29 = vadd.f32 %v10134_v32, %v10129_v31 }
 0x309   : > { %13817 = vst [vmem:[#allocation94_spill] sm:$0xff] %v10138_v3  ;;  %v2625_v51 = vpop.xlane.xlu1 %2624  ;;  %v1453_v12 = vpop.xlane.xlu0 %1452 }
 0x30a   : > { %v10142_v52 = vpop.eup %8040  ;;  %8066 = vpow2.f32 %v2786_v49  ;;  %v2712_v34 = vsub.f32 %v9590_v41, %v2625_v51  ;;  %v2713_v1 = vsub.f32 %v9586_v16, %v2625_v51  ;;  %v1539_v63 = vsub.f32 %v9592_v36, %v1453_v12  ;;  %v10147_v56 = vpop.f32.mrf.mxu1 }
 0x30b   : > { %v10149_v19 = vpop.eup %8042  ;;  %8068 = vpow2.f32 %v2788_v30  ;;  %v1540_v0 = vsub.f32 %v9588_v43, %v1453_v12  ;;  %v1724_v40 = vadd.f32 %v10142_v52, %v10138_v3 }
 0x30c   : > { %13818 = vst [vmem:[#allocation95_spill] sm:$0xff] %v10149_v19  ;;  %v10154_v59 = vpop.eup %8044  ;;  %8070 = vpow2.f32 %v1615_v8  ;;  %v2790_v49 = vmul.f32 1.442695, %v2712_v34  ;;  %v2792_v31 = vmul.f32 1.442695, %v2713_v1  ;;  %v10156_v32 = vpop.f32.mrf.mxu1  ;;  %2897 = vadd.xlane.f32.xlu0 %v2896_v29 }
 0x30d   : > { %13819 = vst [vmem:[#allocation96_spill] sm:$0xff] %v10154_v59  ;;  %v1619_v41 = vmul.f32 1.442695, %v1539_v63  ;;  %v10158_v16 = vpop.eup %8046  ;;  %8072 = vpow2.f32 %v1617_v58  ;;  %v1621_v36 = vmul.f32 1.442695, %v1540_v0  ;;  %1725 = vadd.xlane.f32.xlu1 %v1724_v40  ;;  %v2628_v30 = vpop.xlane.xlu0 %2627  ;;  %v2899_v43 = vadd.f32 %v10154_v59, %v10149_v19 }
 0x30e   : > { %13820 = vst [vmem:[#allocation97_spill] sm:$0xff] %v10158_v16  ;;  %v1456_v51 = vpop.xlane.xlu1 %1455  ;;  %v10162_v12 = vpop.eup %8048  ;;  %8074 = vpow2.f32 %v2790_v49  ;;  %v2714_v8 = vsub.f32 %v9608_v38, %v2628_v30  ;;  %v2715_v34 = vsub.f32 %v9600_v27, %v2628_v30  ;;  %v3298_v27 = vpack.c.bf16 %v10060_v50, %v10053_v45  ;;  %v13828_v50 = vld [vmem:[#allocation11_spill] sm:$0xff] }
 0x30f   : > { %13821 = vst [vmem:[#allocation98_spill] sm:$0xff] %v10162_v12  ;;  %v1541_v1 = vsub.f32 %v9610_v11, %v1456_v51  ;;  %v7390_v63 = vpop.f32.mrf.mxu1  ;;  %v10167_v3 = vpop.eup %8050  ;;  %8076 = vpow2.f32 %v2792_v31  ;;  %v1542_v58 = vsub.f32 %v9606_v37, %v1456_v51  ;;  %v1727_v29 = vadd.f32 %v10162_v12, %v10158_v16  ;;  %v13827_v16 = vld [vmem:[#allocation18_spill] sm:$0xff] }
 0x310   : > { %13822 = vst [vmem:[#allocation99_spill] sm:$0xff] %v10167_v3  ;;  %v10172_v0 = vpop.eup %8052  ;;  %8078 = vpow2.f32 %v1619_v41  ;;  %v2794_v40 = vmul.f32 1.442695, %v2714_v8  ;;  %v2796_v49 = vmul.f32 1.442695, %v2715_v34  ;;  %v13825_v41 = vld [vmem:[#allocation17_spill] sm:$0xff] }
 0x311   : > { %13823 = vst [vmem:[#allocation100_spill] sm:$0xff] %v10172_v0  ;;  %v1623_v19 = vmul.f32 1.442695, %v1541_v1  ;;  %v3244_v38 = vpop.f32.mrf.mxu1  ;;  %v10174_v59 = vpop.eup %8054  ;;  %8080 = vpow2.f32 %v1621_v36  ;;  %v1625_v11 = vmul.f32 1.442695, %v1542_v58  ;;  %1728 = vadd.xlane.f32.xlu0 %v1727_v29  ;;  %2900 = vadd.xlane.f32.xlu1 %v2899_v43  ;;  %v2902_v30 = vadd.f32 %v10172_v0, %v10167_v3  ;;  %v13826_v34 = vld [vmem:[#allocation10_spill] sm:$0xff] }
 0x312   : > { %13824 = vst [vmem:[#allocation101_spill] sm:$0xff] %v10174_v59  ;;  %v2631_v37 = vpop.xlane.xlu1 %2630  ;;  %v1459_v31 = vpop.xlane.xlu0 %1458  ;;  %8082 = vpow2.f32 %v2794_v40 }
 0x313   : > { %v10180_v51 = vpop.eup %8056  ;;  %v2716_v8 = vsub.f32 %v13825_v41, %v2631_v37  ;;  %v2717_v1 = vsub.f32 %v13826_v34, %v2631_v37  ;;  %v1543_v12 = vsub.f32 %v13827_v16, %v1459_v31  ;;  %v7391_v10 = vpop.f32.mrf.mxu1  ;;  %8084 = vpow2.f32 %v2796_v49 }
 0x314   : > { %v10185_v45 = vpop.eup %8058  ;;  %v1544_v36 = vsub.f32 %v13828_v50, %v1459_v31  ;;  %v1730_v43 = vadd.f32 %v10180_v51, %v10174_v59  ;;  %v3306_v58 = vpack.c.bf16 %v7391_v10, %v7390_v63  ;;  %8086 = vpow2.f32 %v1623_v19  ;;  %v13829_v19 = vld [vmem:[#allocation23_spill] sm:$0xff] }
 0x315   : > { %v10190_v29 = vpop.eup %8060  ;;  %v2798_v40 = vmul.f32 1.442695, %v2716_v8  ;;  %v2800_v3 = vmul.f32 1.442695, %v2717_v1  ;;  %v1627_v41 = vmul.f32 1.442695, %v1543_v12  ;;  %v3247_v0 = vpop.f32.mrf.mxu1  ;;  %8088 = vpow2.f32 %v1625_v11  ;;  %2903 = vadd.xlane.f32.xlu0 %v2902_v30 }
 0x316   : > { %v10192_v37 = vpop.eup %8062  ;;  %v1629_v16 = vmul.f32 1.442695, %v1544_v36  ;;  %1731 = vadd.xlane.f32.xlu1 %v1730_v43  ;;  %v2634_v49 = vpop.xlane.xlu0 %2633  ;;  %v3305_v31 = vpack.c.bf16 %v3247_v0, %v3244_v38  ;;  %v2905_v50 = vadd.f32 %v10190_v29, %v10185_v45  ;;  %v13830_v8 = vld [vmem:[#allocation14_spill] sm:$0xff]  ;;  %v13831_v1 = vld [vmem:[#allocation24_spill] sm:$0xff]  ;;  %6981 = vmatprep.subr.bf16.mxu1 %v3306_v58  ;;  %v3297_v30 = vpack.c.bf16 %v10062_v39, %v10056_v17  ;;  %v13832_v0 = vld [vmem:[#allocation15_spill] sm:$0xff] }
 0x317   : > { %v1462_v34 = vpop.xlane.xlu1 %1461  ;;  %v10196_v10 = vpop.eup %8064  ;;  %8090 = vpow2.f32 %v2798_v40  ;;  %v2718_v63 = vsub.f32 %v13829_v19, %v2634_v49  ;;  %v2719_v12 = vsub.f32 %v13830_v8, %v2634_v49  ;;  %6982 = vmatpush3.bf16.msra.mxu1 %v3298_v27  ;;  %v3304_v8 = vpack.c.bf16 %v10147_v56, %v10127_v24  ;;  %v13836_v56 = vld [vmem:[#allocation21_spill] sm:$0xff] }
 0x318   : > { %v1545_v59 = vsub.f32 %v13831_v1, %v1462_v34  ;;  %v10201_v11 = vpop.eup %8066  ;;  %8092 = vpow2.f32 %v2800_v3  ;;  %v1546_v38 = vsub.f32 %v13832_v0, %v1462_v34  ;;  %v1733_v36 = vadd.f32 %v10196_v10, %v10192_v37  ;;  %6983 = vmatprep.subr.bf16.mxu1 %v3305_v31  ;;  %v13834_v31 = vld [vmem:[#allocation20_spill] sm:$0xff] }
 0x319   : > { %v10208_v43 = vpop.eup %8068  ;;  %8094 = vpow2.f32 %v1627_v41  ;;  %v2802_v40 = vmul.f32 1.442695, %v2718_v63  ;;  %v2804_v49 = vmul.f32 1.442695, %v2719_v12  ;;  %v13833_v41 = vld [vmem:[#allocation29_spill] sm:$0xff]  ;;  %v13835_v12 = vld [vmem:[#allocation30_spill] sm:$0xff]  ;;  %v3296_v24 = vpack.c.bf16 %v10046_v62, %v10038_v42 }
 0x31a   : > { %v1631_v19 = vmul.f32 1.442695, %v1545_v59  ;;  %v10210_v58 = vpop.eup %8070  ;;  %8096 = vpow2.f32 %v1629_v16  ;;  %v1633_v17 = vmul.f32 1.442695, %v1546_v38  ;;  %1734 = vadd.xlane.f32.xlu0 %v1733_v36  ;;  %2906 = vadd.xlane.f32.xlu1 %v2905_v50  ;;  %v1465_v3 = vpop.xlane.xlu0 %1464  ;;  %v2908_v27 = vadd.f32 %v10208_v43, %v10201_v11 }
 0x31b   : > { %v2637_v39 = vpop.xlane.xlu1 %2636  ;;  %v10216_v34 = vpop.eup %8072  ;;  %8098 = vpow2.f32 %v2802_v40  ;;  %v1547_v1 = vsub.f32 %v13835_v12, %v1465_v3  ;;  %v1548_v16 = vsub.f32 %v13836_v56, %v1465_v3  ;;  %6984 = vmatpush3.bf16.msra.mxu1 %v3297_v30  ;;  %v13839_v12 = vld [vmem:[#allocation2_spill] sm:$0xff] }
 0x31c   : > { %v2720_v59 = vsub.f32 %v13833_v41, %v2637_v39  ;;  %v2721_v63 = vsub.f32 %v13834_v31, %v2637_v39  ;;  %v10221_v0 = vpop.eup %8074  ;;  %8100 = vpow2.f32 %v2804_v49  ;;  %v1736_v50 = vadd.f32 %v10216_v34, %v10210_v58  ;;  %6985 = vmatprep.subr.bf16.mxu1 %v3304_v8  ;;  %v13838_v8 = vld [vmem:[#allocation26_spill] sm:$0xff] }
 0x31d   : > { %v10228_v38 = vpop.eup %8076  ;;  %8102 = vpow2.f32 %v1631_v19  ;;  %v1635_v39 = vmul.f32 1.442695, %v1547_v1  ;;  %v3303_v31 = vpack.c.bf16 %v10156_v32, %v10136_v54  ;;  %v1637_v62 = vmul.f32 1.442695, %v1548_v16  ;;  %v13837_v19 = vld [vmem:[#allocation3_spill] sm:$0xff] }
 0x31e   : > { %v2806_v36 = vmul.f32 1.442695, %v2720_v59  ;;  %v2808_v40 = vmul.f32 1.442695, %v2721_v63  ;;  %v10230_v41 = vpop.eup %8078  ;;  %8104 = vpow2.f32 %v1633_v17  ;;  %2909 = vadd.xlane.f32.xlu0 %v2908_v27  ;;  %1737 = vadd.xlane.f32.xlu1 %v1736_v50  ;;  %v2640_v42 = vpop.xlane.xlu0 %2639  ;;  %v2911_v30 = vadd.f32 %v10228_v38, %v10221_v0  ;;  %v13841_v54 = vld [vmem:[#allocation27_spill] sm:$0xff] }
 0x31f   : > { %v1468_v49 = vpop.xlane.xlu1 %1467  ;;  %v10236_v3 = vpop.eup %8080  ;;  %v2722_v59 = vsub.f32 %v13837_v19, %v2640_v42  ;;  %v2723_v63 = vsub.f32 %v13838_v8, %v2640_v42  ;;  %v3295_v32 = vpack.c.bf16 %v10048_v33, %v10040_v55  ;;  %6986 = vmatpush3.bf16.msra.mxu1 %v3296_v24  ;;  %v3302_v8 = vpack.c.bf16 %v10109_v22, %v10091_v44  ;;  %v13845_v44 = vld [vmem:[#allocation4_spill] sm:$0xff] }
 0x320   : > { %8106 = vpow2.f32 %v2806_v36  ;;  %v1549_v1 = vsub.f32 %v13839_v12, %v1468_v49  ;;  %v10241_v56 = vpop.eup %8082  ;;  %v1550_v17 = vsub.f32 %v13841_v54, %v1468_v49  ;;  %v1739_v27 = vadd.f32 %v10236_v3, %v10230_v41  ;;  %6987 = vmatprep.subr.bf16.mxu1 %v3303_v31  ;;  %v13843_v31 = vld [vmem:[#allocation5_spill] sm:$0xff]  ;;  %v13844_v12 = vld [vmem:[#allocation6_spill] sm:$0xff] }
 0x321   : > { %13840 = vst [vmem:[#allocation17_spill] sm:$0xff] %v10241_v56  ;;  %8108 = vpow2.f32 %v2808_v40  ;;  %v10248_v16 = vpop.eup %8084  ;;  %v2810_v50 = vmul.f32 1.442695, %v2722_v59  ;;  %v2812_v36 = vmul.f32 1.442695, %v2723_v63 }
 0x322   : > { %8110 = vpow2.f32 %v1635_v39  ;;  %v1639_v42 = vmul.f32 1.442695, %v1549_v1  ;;  %v10250_v19 = vpop.eup %8086  ;;  %v1641_v33 = vmul.f32 1.442695, %v1550_v17  ;;  %1740 = vadd.xlane.f32.xlu0 %v1739_v27  ;;  %2912 = vadd.xlane.f32.xlu1 %v2911_v30  ;;  %v1471_v40 = vpop.xlane.xlu0 %1470  ;;  %v2914_v24 = vadd.f32 %v10248_v16, %v10241_v56  ;;  %v13842_v39 = vld [vmem:[#allocation7_spill] sm:$0xff] }
 0x323   : > { %8112 = vpow2.f32 %v1637_v62  ;;  %v2643_v55 = vpop.xlane.xlu1 %2642  ;;  %v10256_v49 = vpop.eup %8088  ;;  %v1551_v1 = vsub.f32 %v13844_v12, %v1471_v40  ;;  %v1552_v22 = vsub.f32 %v13845_v44, %v1471_v40  ;;  %6988 = vmatpush3.bf16.msra.mxu1 %v3295_v32 }
 0x324   : > { %8114 = vpow2.f32 %v2810_v50  ;;  %v2724_v59 = vsub.f32 %v13842_v39, %v2643_v55  ;;  %v2725_v63 = vsub.f32 %v13843_v31, %v2643_v55  ;;  %v10261_v54 = vpop.eup %8090  ;;  %v1742_v62 = vadd.f32 %v10256_v49, %v10250_v19  ;;  %6989 = vmatprep.subr.bf16.mxu1 %v3302_v8  ;;  %v13847_v8 = vld [vmem:[#allocation9_spill] sm:$0xff] }
 0x325   : > { %8116 = vpow2.f32 %v2812_v36  ;;  %v10266_v30 = vpop.eup %8092  ;;  %v1643_v50 = vmul.f32 1.442695, %v1551_v1  ;;  %v3301_v55 = vpack.c.bf16 %v10120_v18, %v10100_v53  ;;  %v1645_v36 = vmul.f32 1.442695, %v1552_v22  ;;  %v13848_v1 = vld [vmem:[#allocation12_spill] sm:$0xff] }
 0x326   : > { %8118 = vpow2.f32 %v1639_v42  ;;  %v2814_v17 = vmul.f32 1.442695, %v2724_v59  ;;  %v2816_v27 = vmul.f32 1.442695, %v2725_v63  ;;  %v10268_v39 = vpop.eup %8094  ;;  %2915 = vadd.xlane.f32.xlu0 %v2914_v24  ;;  %1743 = vadd.xlane.f32.xlu1 %v1742_v62  ;;  %v2646_v40 = vpop.xlane.xlu0 %2645  ;;  %v2917_v32 = vadd.f32 %v10266_v30, %v10261_v54  ;;  %v13846_v42 = vld [vmem:[#allocation13_spill] sm:$0xff]  ;;  %v13849_v18 = vld [vmem:[#allocation8_spill] sm:$0xff] }
 0x327   : > { %8120 = vpow2.f32 %v1641_v33  ;;  %v1474_v31 = vpop.xlane.xlu1 %1473  ;;  %v10274_v12 = vpop.eup %8096  ;;  %v2726_v59 = vsub.f32 %v13846_v42, %v2646_v40  ;;  %v2727_v63 = vsub.f32 %v13847_v8, %v2646_v40  ;;  %v3293_v53 = vpack.c.bf16 %v10036_v7, %v10030_v47 }
 0x328   : > { %8122 = vpow2.f32 %v2814_v17  ;;  %v1553_v44 = vsub.f32 %v13848_v1, %v1474_v31  ;;  %v10279_v56 = vpop.eup %8098  ;;  %v1554_v33 = vsub.f32 %v13849_v18, %v1474_v31  ;;  %v1745_v24 = vadd.f32 %v10274_v12, %v10268_v39  ;;  %v13853_v1 = vld [vmem:[#allocation22_spill] sm:$0xff] }
 0x329   : > { %8124 = vpow2.f32 %v2816_v27  ;;  %v13850_v22 = vpack.c.bf16 %v10032_v60, %v10026_v48  ;;  %v10289_v62 = vpop.eup %8100  ;;  %v2818_v17 = vmul.f32 1.442695, %v2726_v59  ;;  %v2820_v40 = vmul.f32 1.442695, %v2727_v63 }
 0x32a   : > { %8126 = vpow2.f32 %v1643_v50  ;;  %v1647_v42 = vmul.f32 1.442695, %v1553_v44  ;;  %v10291_v8 = vpop.eup %8102  ;;  %v3300_v47 = vpack.c.bf16 %v10075_v14, %v10067_v57  ;;  %v1649_v7 = vmul.f32 1.442695, %v1554_v33  ;;  %1746 = vadd.xlane.f32.xlu0 %v1745_v24  ;;  %2918 = vadd.xlane.f32.xlu1 %v2917_v32  ;;  %v1477_v31 = vpop.xlane.xlu0 %1476  ;;  %v13851_v50 = vld [vmem:[#allocation25_spill] sm:$0xff]  ;;  %v13854_v57 = vld [vmem:[#allocation16_spill] sm:$0xff] }
 0x32b   : > { %6990 = vmatpush3.bf16.msra.mxu1 %v13850_v22  ;;  %8128 = vpow2.f32 %v1645_v36  ;;  %v2649_v27 = vpop.xlane.xlu1 %2648  ;;  %v2920_v48 = vadd.f32 %v10289_v62, %v10279_v56  ;;  %v10297_v60 = vpop.eup %8104  ;;  %v1555_v44 = vsub.f32 %v13853_v1, %v1477_v31  ;;  %v1556_v14 = vsub.f32 %v13854_v57, %v1477_v31  ;;  %v13857_v1 = vld [vmem:[#allocation33_spill] sm:$0xff] }
 0x32c   : > { %6991 = vmatprep.subr.bf16.mxu1 %v3301_v55  ;;  %8130 = vpow2.f32 %v2818_v17  ;;  %v2728_v59 = vsub.f32 %v13851_v50, %v2649_v27  ;;  %v13852_v55 = vld [vmem:[#allocation19_spill] sm:$0xff]  ;;  %v1748_v36 = vadd.f32 %v10297_v60, %v10291_v8 }
 0x32d   : > { %v2729_v63 = vsub.f32 %v13852_v55, %v2649_v27  ;;  %v10302_v18 = vpop.eup %8106  ;;  %8132 = vpow2.f32 %v2820_v40  ;;  %v1651_v22 = vmul.f32 1.442695, %v1555_v44  ;;  %v3299_v27 = vpack.c.bf16 %v10082_v28, %v10070_v5  ;;  %v13859_v5 = vld [vmem:[#allocation28_spill] sm:$0xff] }
 0x32e   : > { %v10307_v32 = vpop.eup %8108  ;;  %8134 = vpow2.f32 %v1647_v42  ;;  %v2822_v33 = vmul.f32 1.442695, %v2728_v59  ;;  %v1653_v40 = vmul.f32 1.442695, %v1556_v14  ;;  %2921 = vadd.xlane.f32.xlu0 %v2920_v48  ;;  %1749 = vadd.xlane.f32.xlu1 %v1748_v36  ;;  %v2652_v31 = vpop.xlane.xlu0 %2651  ;;  %v13855_v42 = vld [vmem:[#allocation32_spill] sm:$0xff]  ;;  %v13860_v48 = vpack.c.bf16 %v10014_v46, %v9998_v9 }
 0x32f   : > { %6992 = vmatpush3.bf16.msra.mxu1 %v3293_v53  ;;  %v2824_v24 = vmul.f32 1.442695, %v2729_v63  ;;  %v10309_v17 = vpop.eup %8110  ;;  %8136 = vpow2.f32 %v1649_v7  ;;  %v1480_v50 = vpop.xlane.xlu1 %1479  ;;  %v2923_v53 = vadd.f32 %v10307_v32, %v10302_v18  ;;  %v2730_v59 = vsub.f32 %v13855_v42, %v2652_v31 }
 0x330   : > { %6993 = vmatprep.subr.bf16.mxu1 %v3300_v47  ;;  %v10315_v55 = vpop.eup %8112  ;;  %8138 = vpow2.f32 %v2822_v33  ;;  %v13856_v47 = vld [vmem:[#allocation31_spill] sm:$0xff]  ;;  %v1557_v44 = vsub.f32 %v13857_v1, %v1480_v50  ;;  %v1558_v28 = vsub.f32 %v13859_v5, %v1480_v50 }
 0x331   : > { %v2731_v63 = vsub.f32 %v13856_v47, %v2652_v31  ;;  %v10320_v57 = vpop.eup %8114  ;;  %8140 = vpow2.f32 %v2824_v24  ;;  %v1751_v7 = vadd.f32 %v10315_v55, %v10309_v17  ;;  %v2826_v36 = vmul.f32 1.442695, %v2730_v59 }
 0x332   : > { %13858 = vst [vmem:[#allocation10_spill] sm:$0xff] %v10320_v57  ;;  %v10328_v14 = vpop.eup %8116  ;;  %8142 = vpow2.f32 %v1651_v22  ;;  %v1655_v31 = vmul.f32 1.442695, %v1557_v44  ;;  %v3291_v24 = vpack.c.bf16 %v10024_v6, %v10010_v4  ;;  %v1657_v50 = vmul.f32 1.442695, %v1558_v28  ;;  %2924 = vadd.xlane.f32.xlu1 %v2923_v53  ;;  %v1483_v1 = vpop.xlane.xlu0 %1482  ;;  %v13862_v22 = vld [vmem:[#allocation36_spill] sm:$0xff] }
 0x333   : > { %6994 = vmatpush3.bf16.msra.mxu1 %v13860_v48  ;;  %13861 = vst [vmem:[#allocation18_spill] sm:$0xff] %v10328_v14  ;;  %v2828_v33 = vmul.f32 1.442695, %v2731_v63  ;;  %v10330_v42 = vpop.eup %8118  ;;  %8144 = vpow2.f32 %v1653_v40  ;;  %1752 = vadd.xlane.f32.xlu0 %v1751_v7  ;;  %v2655_v47 = vpop.xlane.xlu1 %2654  ;;  %v2926_v9 = vadd.f32 %v10328_v14, %v10320_v57  ;;  %v13864_v44 = vld [vmem:[#allocation37_spill] sm:$0xff]  ;;  %v13866_v4 = vld [vmem:[#allocation35_spill] sm:$0xff] }
 0x334   : > { %6995 = vmatprep.subr.bf16.mxu1 %v3299_v27  ;;  %v10336_v46 = vpop.eup %8120  ;;  %8146 = vpow2.f32 %v2826_v36  ;;  %v2732_v59 = vsub.f32 %v13862_v22, %v2655_v47  ;;  %v13863_v27 = vld [vmem:[#allocation34_spill] sm:$0xff]  ;;  %v1559_v5 = vsub.f32 %v13864_v44, %v1483_v1  ;;  %v1560_v6 = vsub.f32 %v13866_v4, %v1483_v1 }
 0x335   : > { %v2733_v63 = vsub.f32 %v13863_v27, %v2655_v47  ;;  %v10341_v48 = vpop.eup %8122  ;;  %8148 = vpow2.f32 %v2828_v33  ;;  %v1754_v40 = vadd.f32 %v10336_v46, %v10330_v42 }
 0x336   : > { %13865 = vst [vmem:[#allocation11_spill] sm:$0xff] %v10341_v48  ;;  %v10346_v53 = vpop.eup %8124  ;;  %8150 = vpow2.f32 %v1655_v31  ;;  %v2830_v28 = vmul.f32 1.442695, %v2732_v59  ;;  %v1659_v36 = vmul.f32 1.442695, %v1559_v5  ;;  %v2658_v27 = vpop.xlane.xlu0 %2657  ;;  %v13871_v31 = vld [vmem:[#allocation38_spill] sm:$0xff] }
 0x337   : > { %6996 = vmatpush3.bf16.msra.mxu1 %v3291_v24  ;;  %13867 = vst [vmem:[#allocation23_spill] sm:$0xff] %v10346_v53  ;;  %v2832_v7 = vmul.f32 1.442695, %v2733_v63  ;;  %v10348_v22 = vpop.eup %8126  ;;  %8152 = vpow2.f32 %v1657_v50  ;;  %v1661_v47 = vmul.f32 1.442695, %v1560_v6  ;;  %2927 = vadd.xlane.f32.xlu0 %v2926_v9  ;;  %v1486_v33 = vpop.xlane.xlu1 %1485  ;;  %v2929_v1 = vadd.f32 %v10346_v53, %v10341_v48  ;;  %v13870_v24 = vld [vmem:[#allocation40_spill] sm:$0xff] }
 0x338   : > { %13868 = vst [vmem:[#allocation14_spill] sm:$0xff] %v10348_v22  ;;  %1755 = vadd.xlane.f32.xlu1 %v1754_v40  ;;  %v10352_v44 = vpop.eup %8128  ;;  %8154 = vpow2.f32 %v2830_v28  ;;  %v2734_v4 = vsub.f32 %v13870_v24, %v2658_v27  ;;  %v2735_v59 = vsub.f32 %v13871_v31, %v2658_v27  ;;  %v13872_v63 = vld [vmem:[#allocation41_spill] sm:$0xff]  ;;  %v13874_v50 = vld [vmem:[#allocation39_spill] sm:$0xff] }
 0x339   : > { %13869 = vst [vmem:[#allocation24_spill] sm:$0xff] %v10352_v44  ;;  %v1561_v5 = vsub.f32 %v13872_v63, %v1486_v33  ;;  %v10357_v57 = vpop.eup %8130  ;;  %8156 = vpow2.f32 %v2832_v7  ;;  %v1562_v9 = vsub.f32 %v13874_v50, %v1486_v33  ;;  %v1757_v6 = vadd.f32 %v10352_v44, %v10348_v22  ;;  %v13878_v63 = vld [vmem:[#allocation44_spill] sm:$0xff] }
 0x33a   : > { %13873 = vst [vmem:[#allocation15_spill] sm:$0xff] %v10357_v57  ;;  %v10362_v40 = vpop.eup %8132  ;;  %8158 = vpow2.f32 %v1659_v36  ;;  %v2834_v48 = vmul.f32 1.442695, %v2734_v4  ;;  %v2836_v53 = vmul.f32 1.442695, %v2735_v59  ;;  %v1489_v31 = vpop.xlane.xlu0 %1488  ;;  %v13879_v36 = vld [vmem:[#allocation42_spill] sm:$0xff] }
 0x33b   : > { %13875 = vst [vmem:[#allocation29_spill] sm:$0xff] %v10362_v40  ;;  %v1663_v28 = vmul.f32 1.442695, %v1561_v5  ;;  %v10364_v14 = vpop.eup %8134  ;;  %8160 = vpow2.f32 %v1661_v47  ;;  %v1665_v27 = vmul.f32 1.442695, %v1562_v9  ;;  %1758 = vadd.xlane.f32.xlu0 %v1757_v6  ;;  %v2661_v24 = vpop.xlane.xlu1 %2660  ;;  %v2932_v7 = vadd.f32 %v10362_v40, %v10357_v57  ;;  %v13880_v59 = vld [vmem:[#allocation45_spill] sm:$0xff] }
 0x33c   : > { %13876 = vst [vmem:[#allocation20_spill] sm:$0xff] %v10364_v14  ;;  %2930 = vadd.xlane.f32.xlu1 %v2929_v1  ;;  %v10368_v33 = vpop.eup %8136  ;;  %8162 = vpow2.f32 %v2834_v48  ;;  %v2736_v50 = vsub.f32 %v13878_v63, %v2661_v24  ;;  %v2737_v4 = vsub.f32 %v13879_v36, %v2661_v24  ;;  %v1563_v5 = vsub.f32 %v13880_v59, %v1489_v31  ;;  %v13882_v47 = vld [vmem:[#allocation43_spill] sm:$0xff]  ;;  %v13886_v59 = vld [vmem:[#allocation48_spill] sm:$0xff] }
 0x33d   : > { %13877 = vst [vmem:[#allocation30_spill] sm:$0xff] %v10368_v33  ;;  %v10373_v22 = vpop.eup %8138  ;;  %8164 = vpow2.f32 %v2836_v53  ;;  %v1564_v9 = vsub.f32 %v13882_v47, %v1489_v31  ;;  %v1760_v1 = vadd.f32 %v10368_v33, %v10364_v14 }
 0x33e   : > { %13881 = vst [vmem:[#allocation21_spill] sm:$0xff] %v10373_v22  ;;  %v10378_v6 = vpop.eup %8140  ;;  %8166 = vpow2.f32 %v1663_v28  ;;  %v2838_v57 = vmul.f32 1.442695, %v2736_v50  ;;  %v2840_v40 = vmul.f32 1.442695, %v2737_v4  ;;  %v2664_v63 = vpop.xlane.xlu0 %2663  ;;  %v13887_v28 = vld [vmem:[#allocation46_spill] sm:$0xff] }
 0x33f   : > { %13883 = vst [vmem:[#allocation3_spill] sm:$0xff] %v10378_v6  ;;  %v1667_v48 = vmul.f32 1.442695, %v1563_v5  ;;  %v10380_v44 = vpop.eup %8142  ;;  %8168 = vpow2.f32 %v1665_v27  ;;  %v1669_v24 = vmul.f32 1.442695, %v1564_v9  ;;  %2933 = vadd.xlane.f32.xlu0 %v2932_v7  ;;  %v1492_v36 = vpop.xlane.xlu1 %1491  ;;  %v2935_v53 = vadd.f32 %v10378_v6, %v10373_v22  ;;  %v13888_v4 = vld [vmem:[#allocation49_spill] sm:$0xff] }
 0x340   : > { %13884 = vst [vmem:[#allocation26_spill] sm:$0xff] %v10380_v44  ;;  %1761 = vadd.xlane.f32.xlu1 %v1760_v1  ;;  %v10384_v31 = vpop.eup %8144  ;;  %8170 = vpow2.f32 %v2838_v57  ;;  %v2738_v47 = vsub.f32 %v13886_v59, %v2664_v63  ;;  %v2739_v50 = vsub.f32 %v13887_v28, %v2664_v63  ;;  %v1565_v5 = vsub.f32 %v13888_v4, %v1492_v36  ;;  %v13890_v27 = vld [vmem:[#allocation47_spill] sm:$0xff]  ;;  %v13894_v4 = vld [vmem:[#allocation52_spill] sm:$0xff] }
 0x341   : > { %13885 = vst [vmem:[#allocation2_spill] sm:$0xff] %v10384_v31  ;;  %v10389_v14 = vpop.eup %8146  ;;  %8172 = vpow2.f32 %v2840_v40  ;;  %v1566_v7 = vsub.f32 %v13890_v27, %v1492_v36  ;;  %v1763_v9 = vadd.f32 %v10384_v31, %v10380_v44 }
 0x342   : > { %13889 = vst [vmem:[#allocation27_spill] sm:$0xff] %v10389_v14  ;;  %v10394_v1 = vpop.eup %8148  ;;  %8174 = vpow2.f32 %v1667_v48  ;;  %v2842_v22 = vmul.f32 1.442695, %v2738_v47  ;;  %v2844_v6 = vmul.f32 1.442695, %v2739_v50  ;;  %v1495_v28 = vpop.xlane.xlu0 %1494  ;;  %v13895_v48 = vld [vmem:[#allocation50_spill] sm:$0xff] }
 0x343   : > { %13891 = vst [vmem:[#allocation7_spill] sm:$0xff] %v10394_v1  ;;  %v1671_v57 = vmul.f32 1.442695, %v1565_v5  ;;  %v10396_v33 = vpop.eup %8150  ;;  %8176 = vpow2.f32 %v1669_v24  ;;  %v1673_v63 = vmul.f32 1.442695, %v1566_v7  ;;  %1764 = vadd.xlane.f32.xlu0 %v1763_v9  ;;  %v2667_v59 = vpop.xlane.xlu1 %2666  ;;  %v2938_v40 = vadd.f32 %v10394_v1, %v10389_v14  ;;  %v13896_v50 = vld [vmem:[#allocation53_spill] sm:$0xff] }
 0x344   : > { %13892 = vst [vmem:[#allocation5_spill] sm:$0xff] %v10396_v33  ;;  %2936 = vadd.xlane.f32.xlu1 %v2935_v53  ;;  %v10400_v36 = vpop.eup %8152  ;;  %8178 = vpow2.f32 %v2842_v22  ;;  %v2740_v27 = vsub.f32 %v13894_v4, %v2667_v59  ;;  %v2741_v47 = vsub.f32 %v13895_v48, %v2667_v59  ;;  %v1567_v5 = vsub.f32 %v13896_v50, %v1495_v28  ;;  %v13898_v24 = vld [vmem:[#allocation51_spill] sm:$0xff]  ;;  %v13902_v50 = vld [vmem:[#allocation56_spill] sm:$0xff] }
 0x345   : > { %13893 = vst [vmem:[#allocation6_spill] sm:$0xff] %v10400_v36  ;;  %v10405_v44 = vpop.eup %8154  ;;  %8180 = vpow2.f32 %v2844_v6  ;;  %v1568_v7 = vsub.f32 %v13898_v24, %v1495_v28  ;;  %v1766_v53 = vadd.f32 %v10400_v36, %v10396_v33 }
 0x346   : > { %13897 = vst [vmem:[#allocation4_spill] sm:$0xff] %v10405_v44  ;;  %v10410_v9 = vpop.eup %8156  ;;  %8182 = vpow2.f32 %v1671_v57  ;;  %v2846_v14 = vmul.f32 1.442695, %v2740_v27  ;;  %v2848_v1 = vmul.f32 1.442695, %v2741_v47  ;;  %v2670_v4 = vpop.xlane.xlu0 %2669  ;;  %v13903_v57 = vld [vmem:[#allocation54_spill] sm:$0xff] }
 0x347   : > { %13899 = vst [vmem:[#allocation13_spill] sm:$0xff] %v10410_v9  ;;  %v1675_v22 = vmul.f32 1.442695, %v1567_v5  ;;  %v10412_v31 = vpop.eup %8158  ;;  %8184 = vpow2.f32 %v1673_v63  ;;  %v1677_v59 = vmul.f32 1.442695, %v1568_v7  ;;  %2939 = vadd.xlane.f32.xlu0 %v2938_v40  ;;  %v1498_v48 = vpop.xlane.xlu1 %1497  ;;  %v2941_v6 = vadd.f32 %v10410_v9, %v10405_v44  ;;  %v13904_v47 = vld [vmem:[#allocation57_spill] sm:$0xff] }
 0x348   : > { %13900 = vst [vmem:[#allocation9_spill] sm:$0xff] %v10412_v31  ;;  %1767 = vadd.xlane.f32.xlu1 %v1766_v53  ;;  %v10416_v28 = vpop.eup %8160  ;;  %8186 = vpow2.f32 %v2846_v14  ;;  %v2742_v24 = vsub.f32 %v13902_v50, %v2670_v4  ;;  %v2743_v27 = vsub.f32 %v13903_v57, %v2670_v4  ;;  %v1569_v5 = vsub.f32 %v13904_v47, %v1498_v48  ;;  %v13906_v63 = vld [vmem:[#allocation55_spill] sm:$0xff]  ;;  %v13910_v47 = vld [vmem:[#allocation60_spill] sm:$0xff] }
 0x349   : > { %13901 = vst [vmem:[#allocation12_spill] sm:$0xff] %v10416_v28  ;;  %v10421_v33 = vpop.eup %8162  ;;  %8188 = vpow2.f32 %v2848_v1  ;;  %v1570_v40 = vsub.f32 %v13906_v63, %v1498_v48  ;;  %v1769_v7 = vadd.f32 %v10416_v28, %v10412_v31 }
 0x34a   : > { %13905 = vst [vmem:[#allocation8_spill] sm:$0xff] %v10421_v33  ;;  %v10426_v53 = vpop.eup %8164  ;;  %8190 = vpow2.f32 %v1675_v22  ;;  %v2850_v44 = vmul.f32 1.442695, %v2742_v24  ;;  %v2852_v9 = vmul.f32 1.442695, %v2743_v27  ;;  %v1501_v57 = vpop.xlane.xlu0 %1500  ;;  %v13911_v22 = vld [vmem:[#allocation58_spill] sm:$0xff] }
 0x34b   : > { %13907 = vst [vmem:[#allocation25_spill] sm:$0xff] %v10426_v53  ;;  %v1679_v14 = vmul.f32 1.442695, %v1569_v5  ;;  %v10428_v36 = vpop.eup %8166  ;;  %8192 = vpow2.f32 %v1677_v59  ;;  %v1681_v4 = vmul.f32 1.442695, %v1570_v40  ;;  %1770 = vadd.xlane.f32.xlu0 %v1769_v7  ;;  %v2673_v50 = vpop.xlane.xlu1 %2672  ;;  %v2944_v1 = vadd.f32 %v10426_v53, %v10421_v33  ;;  %v13912_v27 = vld [vmem:[#allocation61_spill] sm:$0xff] }
 0x34c   : > { %13908 = vst [vmem:[#allocation19_spill] sm:$0xff] %v10428_v36  ;;  %2942 = vadd.xlane.f32.xlu1 %v2941_v6  ;;  %v10432_v48 = vpop.eup %8168  ;;  %8194 = vpow2.f32 %v2850_v44  ;;  %v2744_v63 = vsub.f32 %v13910_v47, %v2673_v50  ;;  %v2745_v24 = vsub.f32 %v13911_v22, %v2673_v50  ;;  %v1571_v5 = vsub.f32 %v13912_v27, %v1501_v57  ;;  %v13914_v59 = vld [vmem:[#allocation59_spill] sm:$0xff]  ;;  %v13918_v27 = vld [vmem:[#allocation64_spill] sm:$0xff] }
 0x34d   : > { %13909 = vst [vmem:[#allocation22_spill] sm:$0xff] %v10432_v48  ;;  %v10437_v31 = vpop.eup %8170  ;;  %8196 = vpow2.f32 %v2852_v9  ;;  %v1572_v40 = vsub.f32 %v13914_v59, %v1501_v57  ;;  %v1772_v6 = vadd.f32 %v10432_v48, %v10428_v36 }
 0x34e   : > { %13913 = vst [vmem:[#allocation16_spill] sm:$0xff] %v10437_v31  ;;  %v10442_v7 = vpop.eup %8172  ;;  %8198 = vpow2.f32 %v1679_v14  ;;  %v2854_v33 = vmul.f32 1.442695, %v2744_v63  ;;  %v2856_v53 = vmul.f32 1.442695, %v2745_v24  ;;  %v2676_v47 = vpop.xlane.xlu0 %2675  ;;  %v13919_v14 = vld [vmem:[#allocation62_spill] sm:$0xff] }
 0x34f   : > { %13915 = vst [vmem:[#allocation32_spill] sm:$0xff] %v10442_v7  ;;  %v1683_v44 = vmul.f32 1.442695, %v1571_v5  ;;  %v10444_v28 = vpop.eup %8174  ;;  %8200 = vpow2.f32 %v1681_v4  ;;  %v1685_v50 = vmul.f32 1.442695, %v1572_v40  ;;  %2945 = vadd.xlane.f32.xlu0 %v2944_v1  ;;  %v1504_v22 = vpop.xlane.xlu1 %1503  ;;  %v2947_v9 = vadd.f32 %v10442_v7, %v10437_v31  ;;  %v13920_v24 = vld [vmem:[#allocation65_spill] sm:$0xff] }
 0x350   : > { %13916 = vst [vmem:[#allocation31_spill] sm:$0xff] %v10444_v28  ;;  %1773 = vadd.xlane.f32.xlu1 %v1772_v6  ;;  %v10448_v57 = vpop.eup %8176  ;;  %8202 = vpow2.f32 %v2854_v33  ;;  %v2746_v59 = vsub.f32 %v13918_v27, %v2676_v47  ;;  %v2747_v63 = vsub.f32 %v13919_v14, %v2676_v47  ;;  %v1573_v5 = vsub.f32 %v13920_v24, %v1504_v22  ;;  %v13922_v4 = vld [vmem:[#allocation63_spill] sm:$0xff]  ;;  %v13926_v24 = vld [vmem:[#allocation68_spill] sm:$0xff] }
 0x351   : > { %13917 = vst [vmem:[#allocation33_spill] sm:$0xff] %v10448_v57  ;;  %v10453_v36 = vpop.eup %8178  ;;  %8204 = vpow2.f32 %v2856_v53  ;;  %v1574_v1 = vsub.f32 %v13922_v4, %v1504_v22  ;;  %v1775_v40 = vadd.f32 %v10448_v57, %v10444_v28 }
 0x352   : > { %13921 = vst [vmem:[#allocation28_spill] sm:$0xff] %v10453_v36  ;;  %v10458_v6 = vpop.eup %8180  ;;  %8206 = vpow2.f32 %v1683_v44  ;;  %v2858_v31 = vmul.f32 1.442695, %v2746_v59  ;;  %v2860_v7 = vmul.f32 1.442695, %v2747_v63  ;;  %v1507_v14 = vpop.xlane.xlu0 %1506  ;;  %v13927_v44 = vld [vmem:[#allocation66_spill] sm:$0xff] }
 0x353   : > { %13923 = vst [vmem:[#allocation36_spill] sm:$0xff] %v10458_v6  ;;  %v1687_v33 = vmul.f32 1.442695, %v1573_v5  ;;  %v10460_v48 = vpop.eup %8182  ;;  %8208 = vpow2.f32 %v1685_v50  ;;  %v1689_v47 = vmul.f32 1.442695, %v1574_v1  ;;  %1776 = vadd.xlane.f32.xlu0 %v1775_v40  ;;  %v2679_v27 = vpop.xlane.xlu1 %2678  ;;  %v2950_v53 = vadd.f32 %v10458_v6, %v10453_v36  ;;  %v13928_v63 = vld [vmem:[#allocation69_spill] sm:$0xff] }
 0x354   : > { %13924 = vst [vmem:[#allocation34_spill] sm:$0xff] %v10460_v48  ;;  %2948 = vadd.xlane.f32.xlu1 %v2947_v9  ;;  %v10464_v22 = vpop.eup %8184  ;;  %8210 = vpow2.f32 %v2858_v31  ;;  %v2748_v4 = vsub.f32 %v13926_v24, %v2679_v27  ;;  %v2749_v59 = vsub.f32 %v13927_v44, %v2679_v27  ;;  %v1575_v5 = vsub.f32 %v13928_v63, %v1507_v14  ;;  %v13930_v50 = vld [vmem:[#allocation67_spill] sm:$0xff]  ;;  %v13934_v63 = vld [vmem:[#allocation72_spill] sm:$0xff] }
 0x355   : > { %13925 = vst [vmem:[#allocation37_spill] sm:$0xff] %v10464_v22  ;;  %v10469_v28 = vpop.eup %8186  ;;  %8212 = vpow2.f32 %v2860_v7  ;;  %v1576_v1 = vsub.f32 %v13930_v50, %v1507_v14  ;;  %v1778_v9 = vadd.f32 %v10464_v22, %v10460_v48 }
 0x356   : > { %13929 = vst [vmem:[#allocation35_spill] sm:$0xff] %v10469_v28  ;;  %v10474_v40 = vpop.eup %8188  ;;  %8214 = vpow2.f32 %v1687_v33  ;;  %v2862_v36 = vmul.f32 1.442695, %v2748_v4  ;;  %v2864_v6 = vmul.f32 1.442695, %v2749_v59  ;;  %v2682_v24 = vpop.xlane.xlu0 %2681  ;;  %v13935_v33 = vld [vmem:[#allocation70_spill] sm:$0xff] }
 0x357   : > { %13931 = vst [vmem:[#allocation40_spill] sm:$0xff] %v10474_v40  ;;  %v1691_v31 = vmul.f32 1.442695, %v1575_v5  ;;  %v10476_v57 = vpop.eup %8190  ;;  %8216 = vpow2.f32 %v1689_v47  ;;  %v1693_v27 = vmul.f32 1.442695, %v1576_v1  ;;  %2951 = vadd.xlane.f32.xlu0 %v2950_v53  ;;  %v1510_v44 = vpop.xlane.xlu1 %1509  ;;  %v2953_v7 = vadd.f32 %v10474_v40, %v10469_v28  ;;  %v13936_v59 = vld [vmem:[#allocation73_spill] sm:$0xff] }
 0x358   : > { %13932 = vst [vmem:[#allocation38_spill] sm:$0xff] %v10476_v57  ;;  %1779 = vadd.xlane.f32.xlu1 %v1778_v9  ;;  %v10480_v14 = vpop.eup %8192  ;;  %8218 = vpow2.f32 %v2862_v36  ;;  %v2750_v50 = vsub.f32 %v13934_v63, %v2682_v24  ;;  %v2751_v4 = vsub.f32 %v13935_v33, %v2682_v24  ;;  %v1577_v5 = vsub.f32 %v13936_v59, %v1510_v44  ;;  %v13938_v47 = vld [vmem:[#allocation71_spill] sm:$0xff]  ;;  %v13941_v59 = vld [vmem:[#allocation76_spill] sm:$0xff] }
 0x359   : > { %13933 = vst [vmem:[#allocation41_spill] sm:$0xff] %v10480_v14  ;;  %v10485_v48 = vpop.eup %8194  ;;  %8220 = vpow2.f32 %v2864_v6  ;;  %v1578_v53 = vsub.f32 %v13938_v47, %v1510_v44  ;;  %v1781_v1 = vadd.f32 %v10480_v14, %v10476_v57 }
 0x35a   : > { %13937 = vst [vmem:[#allocation39_spill] sm:$0xff] %v10485_v48  ;;  %v10490_v9 = vpop.eup %8196  ;;  %8222 = vpow2.f32 %v1691_v31  ;;  %v2866_v28 = vmul.f32 1.442695, %v2750_v50  ;;  %v2868_v40 = vmul.f32 1.442695, %v2751_v4  ;;  %v1513_v33 = vpop.xlane.xlu0 %1512  ;;  %v13942_v31 = vld [vmem:[#allocation74_spill] sm:$0xff] }
 0x35b   : > { %13939 = vst [vmem:[#allocation44_spill] sm:$0xff] %v10490_v9  ;;  %v1695_v36 = vmul.f32 1.442695, %v1577_v5  ;;  %v10492_v22 = vpop.eup %8198  ;;  %8224 = vpow2.f32 %v1693_v27  ;;  %v1697_v24 = vmul.f32 1.442695, %v1578_v53  ;;  %1782 = vadd.xlane.f32.xlu0 %v1781_v1  ;;  %v2685_v63 = vpop.xlane.xlu1 %2684  ;;  %v2956_v6 = vadd.f32 %v10490_v9, %v10485_v48  ;;  %v13943_v4 = vld [vmem:[#allocation77_spill] sm:$0xff] }
 0x35c   : > { %13940 = vst [vmem:[#allocation42_spill] sm:$0xff] %v10492_v22  ;;  %2954 = vadd.xlane.f32.xlu1 %v2953_v7  ;;  %v10496_v44 = vpop.eup %8200  ;;  %8226 = vpow2.f32 %v2866_v28  ;;  %v2752_v47 = vsub.f32 %v13941_v59, %v2685_v63  ;;  %v2753_v50 = vsub.f32 %v13942_v31, %v2685_v63  ;;  %v1579_v5 = vsub.f32 %v13943_v4, %v1513_v33  ;;  %v13945_v27 = vld [vmem:[#allocation75_spill] sm:$0xff] }
 0x35d   : > { %v10501_v57 = vpop.eup %8202  ;;  %8228 = vpow2.f32 %v2868_v40  ;;  %v1580_v53 = vsub.f32 %v13945_v27, %v1513_v33  ;;  %v1784_v7 = vadd.f32 %v10496_v44, %v10492_v22 }
 0x35e   : > { %13944 = vst [vmem:[#allocation45_spill] sm:$0xff] %v10501_v57  ;;  %v10506_v1 = vpop.eup %8204  ;;  %8230 = vpow2.f32 %v1695_v36  ;;  %v2870_v48 = vmul.f32 1.442695, %v2752_v47  ;;  %v2872_v9 = vmul.f32 1.442695, %v2753_v50  ;;  %v2688_v59 = vpop.xlane.xlu0 %2687  ;;  %v13949_v36 = vld [vmem:[#allocation78_spill] sm:$0xff] }
 0x35f   : > { %13946 = vst [vmem:[#allocation43_spill] sm:$0xff] %v10506_v1  ;;  %v1699_v28 = vmul.f32 1.442695, %v1579_v5  ;;  %v10508_v14 = vpop.eup %8206  ;;  %8232 = vpow2.f32 %v1697_v24  ;;  %v1701_v63 = vmul.f32 1.442695, %v1580_v53  ;;  %2957 = vadd.xlane.f32.xlu0 %v2956_v6  ;;  %v1516_v31 = vpop.xlane.xlu1 %1515  ;;  %v2959_v40 = vadd.f32 %v10506_v1, %v10501_v57  ;;  %v13950_v50 = vld [vmem:[#allocation80_spill] sm:$0xff] }
 0x360   : > { %13947 = vst [vmem:[#allocation48_spill] sm:$0xff] %v10508_v14  ;;  %1785 = vadd.xlane.f32.xlu1 %v1784_v7  ;;  %v10512_v33 = vpop.eup %8208  ;;  %8234 = vpow2.f32 %v2870_v48  ;;  %v2754_v4 = vsub.f32 %v9968_v26, %v2688_v59  ;;  %v2755_v47 = vsub.f32 %v13949_v36, %v2688_v59  ;;  %v1581_v5 = vsub.f32 %v13950_v50, %v1516_v31  ;;  %v13952_v24 = vld [vmem:[#allocation79_spill] sm:$0xff] }
 0x361   : > { %13948 = vst [vmem:[#allocation46_spill] sm:$0xff] %v10512_v33  ;;  %v10517_v27 = vpop.eup %8210  ;;  %8236 = vpow2.f32 %v2872_v9  ;;  %v1582_v6 = vsub.f32 %v13952_v24, %v1516_v31  ;;  %v1787_v53 = vadd.f32 %v10512_v33, %v10508_v14  ;;  %v13956_v50 = vld [vmem:[#allocation83_spill] sm:$0xff] }
 0x362   : > { %13951 = vst [vmem:[#allocation49_spill] sm:$0xff] %v10517_v27  ;;  %v10522_v7 = vpop.eup %8212  ;;  %8238 = vpow2.f32 %v1699_v28  ;;  %v2874_v57 = vmul.f32 1.442695, %v2754_v4  ;;  %v2876_v1 = vmul.f32 1.442695, %v2755_v47  ;;  %v1519_v36 = vpop.xlane.xlu0 %1518  ;;  %v13957_v28 = vld [vmem:[#allocation81_spill] sm:$0xff] }
 0x363   : > { %13953 = vst [vmem:[#allocation47_spill] sm:$0xff] %v10522_v7  ;;  %v1703_v48 = vmul.f32 1.442695, %v1581_v5  ;;  %v10524_v22 = vpop.eup %8214  ;;  %8240 = vpow2.f32 %v1701_v63  ;;  %v1705_v26 = vmul.f32 1.442695, %v1582_v6  ;;  %1788 = vadd.xlane.f32.xlu0 %v1787_v53  ;;  %v2691_v59 = vpop.xlane.xlu1 %2690  ;;  %v2962_v9 = vadd.f32 %v10522_v7, %v10517_v27  ;;  %v13958_v47 = vld [vmem:[#allocation84_spill] sm:$0xff] }
 0x364   : > { %13954 = vst [vmem:[#allocation52_spill] sm:$0xff] %v10524_v22  ;;  %2960 = vadd.xlane.f32.xlu1 %v2959_v40  ;;  %v10528_v31 = vpop.eup %8216  ;;  %8242 = vpow2.f32 %v2874_v57  ;;  %v2756_v24 = vsub.f32 %v13956_v50, %v2691_v59  ;;  %v2757_v4 = vsub.f32 %v13957_v28, %v2691_v59  ;;  %v1583_v5 = vsub.f32 %v13958_v47, %v1519_v36  ;;  %v13960_v63 = vld [vmem:[#allocation82_spill] sm:$0xff]  ;;  %v13962_v47 = vld [vmem:[#allocation88_spill] sm:$0xff] }
 0x365   : > { %13955 = vst [vmem:[#allocation50_spill] sm:$0xff] %v10528_v31  ;;  %v10533_v14 = vpop.eup %8218  ;;  %8244 = vpow2.f32 %v2876_v1  ;;  %v1584_v6 = vsub.f32 %v13960_v63, %v1519_v36  ;;  %v1790_v40 = vadd.f32 %v10528_v31, %v10524_v22 }
 0x366   : > { %13959 = vst [vmem:[#allocation53_spill] sm:$0xff] %v10533_v14  ;;  %v10538_v53 = vpop.eup %8220  ;;  %8246 = vpow2.f32 %v1703_v48  ;;  %v2878_v27 = vmul.f32 1.442695, %v2756_v24  ;;  %v2880_v7 = vmul.f32 1.442695, %v2757_v4  ;;  %v2694_v50 = vpop.xlane.xlu0 %2693  ;;  %v13963_v48 = vld [vmem:[#allocation85_spill] sm:$0xff] }
 0x367   : > { %13961 = vst [vmem:[#allocation51_spill] sm:$0xff] %v10538_v53  ;;  %v1707_v57 = vmul.f32 1.442695, %v1583_v5  ;;  %v10540_v33 = vpop.eup %8222  ;;  %8248 = vpow2.f32 %v1705_v26  ;;  %v1709_v59 = vmul.f32 1.442695, %v1584_v6  ;;  %2963 = vadd.xlane.f32.xlu0 %v2962_v9  ;;  %v1522_v28 = vpop.xlane.xlu1 %1521  ;;  %v2965_v1 = vadd.f32 %v10538_v53, %v10533_v14  ;;  %v13964_v4 = vld [vmem:[#allocation86_spill] sm:$0xff] }
 0x368   : > { %1791 = vadd.xlane.f32.xlu1 %v1790_v40  ;;  %v10544_v36 = vpop.eup %8224  ;;  %8250 = vpow2.f32 %v2878_v27  ;;  %v2758_v63 = vsub.f32 %v13962_v47, %v2694_v50  ;;  %v2759_v24 = vsub.f32 %v13963_v48, %v2694_v50  ;;  %v1585_v5 = vsub.f32 %v13964_v4, %v1522_v28  ;;  %v13966_v26 = vld [vmem:[#allocation87_spill] sm:$0xff]  ;;  %v13967_v48 = vld [vmem:[#allocation90_spill] sm:$0xff] }
 0x369   : > { %v10549_v22 = vpop.eup %8226  ;;  %8252 = vpow2.f32 %v2880_v7  ;;  %v1586_v9 = vsub.f32 %v13966_v26, %v1522_v28  ;;  %v1793_v6 = vadd.f32 %v10544_v36, %v10540_v33  ;;  %v13968_v26 = vld [vmem:[#allocation89_spill] sm:$0xff] }
 0x36a   : > { %13965 = vst [vmem:[#allocation56_spill] sm:$0xff] %v10549_v22  ;;  %v10554_v40 = vpop.eup %8228  ;;  %8254 = vpow2.f32 %v1707_v57  ;;  %v2882_v14 = vmul.f32 1.442695, %v2758_v63  ;;  %v2884_v53 = vmul.f32 1.442695, %v2759_v24 }
 0x36b   : > { %v1711_v27 = vmul.f32 1.442695, %v1585_v5  ;;  %v10556_v31 = vpop.eup %8230  ;;  %8256 = vpow2.f32 %v1709_v59  ;;  %v1713_v50 = vmul.f32 1.442695, %v1586_v9  ;;  %1794 = vadd.xlane.f32.xlu0 %v1793_v6  ;;  %v2697_v47 = vpop.xlane.xlu1 %2696  ;;  %v2968_v7 = vadd.f32 %v10554_v40, %v10549_v22 }
 0x36c   : > { %2966 = vadd.xlane.f32.xlu1 %v2965_v1  ;;  %v10560_v28 = vpop.eup %8232  ;;  %8258 = vpow2.f32 %v2882_v14  ;;  %v2760_v4 = vsub.f32 %v13967_v48, %v2697_v47  ;;  %v2761_v57 = vsub.f32 %v13968_v26, %v2697_v47 }
 0x36d   : > { %v10564_v63 = vpop.eup %8234  ;;  %8260 = vpow2.f32 %v2884_v53  ;;  %v1796_v59 = vadd.f32 %v10560_v28, %v10556_v31 }
 0x36e   : > { %13969 = vst [vmem:[#allocation54_spill] sm:$0xff] %v10564_v63  ;;  %v10568_v24 = vpop.eup %8236  ;;  %8262 = vpow2.f32 %v1711_v27  ;;  %v2886_v1 = vmul.f32 1.442695, %v2760_v4  ;;  %v2888_v5 = vmul.f32 1.442695, %v2761_v57 }
 0x36f   : > { %13970 = vst [vmem:[#allocation57_spill] sm:$0xff] %v10568_v24  ;;  %v10570_v9 = vpop.eup %8238  ;;  %8264 = vpow2.f32 %v1713_v50  ;;  %2969 = vadd.xlane.f32.xlu0 %v2968_v7  ;;  %v2971_v14 = vadd.f32 %v10568_v24, %v10564_v63 }
 0x370   : > { %13971 = vst [vmem:[#allocation55_spill] sm:$0xff] %v10570_v9  ;;  %1797 = vadd.xlane.f32.xlu1 %v1796_v59  ;;  %v10574_v6 = vpop.eup %8240  ;;  %8266 = vpow2.f32 %v2886_v1 }
 0x371   : > { %13972 = vst [vmem:[#allocation60_spill] sm:$0xff] %v10574_v6  ;;  %v10576_v53 = vpop.eup %8242  ;;  %8268 = vpow2.f32 %v2888_v5  ;;  %v1799_v47 = vadd.f32 %v10574_v6, %v10570_v9 }
 0x372   : > { %13973 = vst [vmem:[#allocation58_spill] sm:$0xff] %v10576_v53  ;;  %v10580_v27 = vpop.eup %8244 }
 0x373   : > { %13974 = vst [vmem:[#allocation61_spill] sm:$0xff] %v10580_v27  ;;  %v10582_v48 = vpop.eup %8246  ;;  %1800 = vadd.xlane.f32.xlu0 %v1799_v47  ;;  %v2974_v50 = vadd.f32 %v10580_v27, %v10576_v53 }
 0x374   : > { %13975 = vst [vmem:[#allocation59_spill] sm:$0xff] %v10582_v48  ;;  %2972 = vadd.xlane.f32.xlu1 %v2971_v14  ;;  %v10586_v7 = vpop.eup %8248 }
 0x375   : > { %13976 = vst [vmem:[#allocation64_spill] sm:$0xff] %v10586_v7  ;;  %v10588_v4 = vpop.eup %8250  ;;  %v1802_v26 = vadd.f32 %v10586_v7, %v10582_v48 }
 0x376   : > { %13977 = vst [vmem:[#allocation62_spill] sm:$0xff] %v10588_v4  ;;  %v10592_v57 = vpop.eup %8252 }
 0x377   : > { %13978 = vst [vmem:[#allocation65_spill] sm:$0xff] %v10592_v57  ;;  %v10594_v59 = vpop.eup %8254  ;;  %2975 = vadd.xlane.f32.xlu0 %v2974_v50  ;;  %v2977_v1 = vadd.f32 %v10592_v57, %v10588_v4 }
 0x378   : > { %13979 = vst [vmem:[#allocation63_spill] sm:$0xff] %v10594_v59  ;;  %1803 = vadd.xlane.f32.xlu1 %v1802_v26  ;;  %v10598_v5 = vpop.eup %8256 }
 0x379   : > { %13980 = vst [vmem:[#allocation68_spill] sm:$0xff] %v10598_v5  ;;  %v10600_v14 = vpop.eup %8258  ;;  %v1805_v47 = vadd.f32 %v10598_v5, %v10594_v59 }
 0x37a   : > { %13981 = vst [vmem:[#allocation66_spill] sm:$0xff] %v10600_v14  ;;  %v10604_v53 = vpop.eup %8260 }
 0x37b   : > { %13982 = vst [vmem:[#allocation69_spill] sm:$0xff] %v10604_v53  ;;  %v10606_v27 = vpop.eup %8262  ;;  %1806 = vadd.xlane.f32.xlu0 %v1805_v47  ;;  %v2980_v50 = vadd.f32 %v10604_v53, %v10600_v14 }
 0x37c   : > { %13983 = vst [vmem:[#allocation67_spill] sm:$0xff] %v10606_v27  ;;  %2978 = vadd.xlane.f32.xlu1 %v2977_v1  ;;  %v10610_v26 = vpop.eup %8264  ;;  %v8004_v1 = vld [vmem:[%s13357_s2 + $0x20] sm:$0xff]  }
 0x37d   : > { %13984 = vst [vmem:[#allocation72_spill] sm:$0xff] %v10610_v26  ;;  %v10612_v48 = vpop.eup %8266  ;;  %v1808_v4 = vadd.f32 %v10610_v26, %v10606_v27  ;;  %7392 = vmatprep.subr.bf16.mxu1 %v8004_v1 }
 0x37e   : > { %13985 = vst [vmem:[#allocation70_spill] sm:$0xff] %v10612_v48  ;;  %v10616_v57 = vpop.eup %8268 }
 0x37f   : > { %13986 = vst [vmem:[#allocation73_spill] sm:$0xff] %v10616_v57  ;;  %2981 = vadd.xlane.f32.xlu0 %v2980_v50  ;;  %v2983_v59 = vadd.f32 %v10616_v57, %v10612_v48 }
 0x380   : > { %1809 = vadd.xlane.f32.xlu1 %v1808_v4 }
 0x384   : > { %2984 = vadd.xlane.f32.xlu1 %v2983_v59 }
 0x389   : > { %v1717_v47 = vpop.xlane.xlu0 %1716 }
 0x38a   : > { %8270 = vrcp.f32 %v1717_v47 }
 0x38d   : > { %v2892_v14 = vpop.xlane.xlu0 %2891  ;;  %v1720_v53 = vpop.xlane.xlu1 %1719 }
 0x38e   : > { %8272 = vrcp.f32 %v1720_v53 }
 0x38f   : > { %8274 = vrcp.f32 %v2892_v14 }
 0x391   : > { %v1723_v27 = vpop.xlane.xlu0 %1722  ;;  %v2895_v26 = vpop.xlane.xlu1 %2894 }
 0x392   : > { %8276 = vrcp.f32 %v2895_v26 }
 0x393   : > { %8278 = vrcp.f32 %v1723_v27 }
 0x395   : > { %v2898_v4 = vpop.xlane.xlu0 %2897 }
 0x396   : > { %v1726_v50 = vpop.xlane.xlu1 %1725 }
 0x397   : > { %8280 = vrcp.f32 %v1726_v50  ;;  %v8271_v48 = vpop.eup %8270 }
 0x398   : > { %8282 = vrcp.f32 %v2898_v4  ;;  %v1843_v9 = vmul.f32 %v8271_v48, %v10084_v21  ;;  %v1844_v26 = vmul.f32 %v8271_v48, %v10086_v61 }
 0x39a   : > { %v1729_v57 = vpop.xlane.xlu0 %1728  ;;  %v2901_v5 = vpop.xlane.xlu1 %2900 }
 0x39b   : > { %8284 = vrcp.f32 %v2901_v5  ;;  %v8273_v59 = vpop.eup %8272 }
 0x39c   : > { %v8275_v47 = vpop.eup %8274  ;;  %v1845_v7 = vmul.f32 %v8273_v59, %v10102_v15  ;;  %8286 = vrcp.f32 %v1729_v57  ;;  %v1846_v27 = vmul.f32 %v8273_v59, %v10104_v2  ;;  %v13987_v59 = vld [vmem:[#allocation91_spill] sm:$0xff] }
 0x39d   : > { %v3018_v63 = vmul.f32 %v8275_v47, %v10077_v23  ;;  %v3019_v57 = vmul.f32 %v8275_v47, %v10080_v20 }
 0x39e   : > { %v2904_v53 = vpop.xlane.xlu0 %2903  ;;  %v2133_v50 = vpack.c.bf16 %v1846_v27, %v1844_v26  ;;  %v2132_v6 = vpack.c.bf16 %v1845_v7, %v1843_v9  ;;  %v13990_v27 = vld [vmem:[#allocation96_spill] sm:$0xff] }
 0x39f   : > { %v1732_v14 = vpop.xlane.xlu1 %1731  ;;  %v8277_v4 = vpop.eup %8276 }
 0x3a0   : > { %8288 = vrcp.f32 %v1732_v14  ;;  %v8279_v5 = vpop.eup %8278  ;;  %v3020_v22 = vmul.f32 %v8277_v4, %v10093_v35  ;;  %3500 = vmatprep.mubr.bf16.mxu0 %v2133_v50  ;;  %v3021_v24 = vmul.f32 %v8277_v4, %v10098_v13  ;;  %v13988_v14 = vld [vmem:[#allocation94_spill] sm:$0xff] }
 0x3a1   : > { %8290 = vrcp.f32 %v2904_v53  ;;  %3501 = vmatmul.mubr.bf16.vlgmr.msra.gmra.mxu0 %v2132_v6  ;;  %v1848_v9 = vmul.f32 %v8279_v5, %v10118_v25  ;;  %v1847_v53 = vmul.f32 %v8279_v5, %v13987_v59  ;;  %v13992_v5 = vld [vmem:[#allocation95_spill] sm:$0xff] }
 0x3a2   : > { %v3260_v61 = vpack.c.bf16 %v3021_v24, %v3019_v57  ;;  %v3259_v2 = vpack.c.bf16 %v3020_v22, %v3018_v63  ;;  %v13989_v24 = vld [vmem:[#allocation93_spill] sm:$0xff] }
 0x3a3   : > { %v1735_v21 = vpop.xlane.xlu0 %1734  ;;  %v2907_v15 = vpop.xlane.xlu1 %2906 }
 0x3a4   : > { %8292 = vrcp.f32 %v2907_v15  ;;  %v8281_v48 = vpop.eup %8280  ;;  %3339 = vmatprep.mubr.bf16.mxu1 %v3260_v61 }
 0x3a5   : > { %8294 = vrcp.f32 %v1735_v21  ;;  %v1850_v35 = vmul.f32 %v8281_v48, %v10142_v52  ;;  %v1849_v26 = vmul.f32 %v8281_v48, %v13988_v14  ;;  %v8283_v20 = vpop.eup %8282  ;;  %3340 = vmatmul.mubr.bf16.vlgmr.msra.gmra.mxu1 %v3259_v2  ;;  %v13991_v52 = vld [vmem:[#allocation92_spill] sm:$0xff] }
 0x3a6   : > { %7393 = vmatpush3.bf16.msra.mxu1 %v8004_v1  ;;  %v3023_v47 = vmul.f32 %v8283_v20, %v13989_v24  ;;  %v3022_v4 = vmul.f32 %v8283_v20, %v13991_v52 }
 0x3a7   : > { %v2910_v23 = vpop.xlane.xlu0 %2909  ;;  %v1738_v7 = vpop.xlane.xlu1 %1737  ;;  %v2135_v13 = vpack.c.bf16 %v1850_v35, %v1848_v9  ;;  %v2134_v6 = vpack.c.bf16 %v1849_v26, %v1847_v53  ;;  %v13993_v9 = vld [vmem:[#allocation98_spill] sm:$0xff]  ;;  %v13994_v35 = vld [vmem:[#allocation97_spill] sm:$0xff] }
 0x3a8   : > { %8296 = vrcp.f32 %v1738_v7  ;;  %v8285_v22 = vpop.eup %8284  ;;  %v13995_v53 = vld [vmem:[#allocation101_spill] sm:$0xff] }
 0x3a9   : > { %8298 = vrcp.f32 %v2910_v23  ;;  %3508 = vmatprep.mubr.bf16.mxu0 %v2135_v13  ;;  %v3025_v50 = vmul.f32 %v8285_v22, %v13990_v27  ;;  %v3024_v21 = vmul.f32 %v8285_v22, %v13992_v5  ;;  %v8287_v15 = vpop.eup %8286  ;;  %v13997_v27 = vld [vmem:[#allocation99_spill] sm:$0xff] }
 0x3aa   : > { %3509 = vmatmul.mubr.bf16.gmra.mxu0 %v2134_v6  ;;  %v1852_v23 = vmul.f32 %v8287_v15, %v13993_v9  ;;  %v1851_v59 = vmul.f32 %v8287_v15, %v13994_v35 }
 0x3ab   : > { %v1741_v25 = vpop.xlane.xlu0 %1740  ;;  %v2913_v63 = vpop.xlane.xlu1 %2912  ;;  %v3262_v57 = vpack.c.bf16 %v3025_v50, %v3023_v47  ;;  %v3261_v61 = vpack.c.bf16 %v3024_v21, %v3022_v4 }
 0x3ac   : > { %8300 = vrcp.f32 %v2913_v63  ;;  %v13996_v63 = vld [vmem:[#allocation100_spill] sm:$0xff] }
 0x3ad   : > { %v8289_v2 = vpop.eup %8288  ;;  %8302 = vrcp.f32 %v1741_v25  ;;  %3347 = vmatprep.mubr.bf16.mxu1 %v3262_v57 }
 0x3ae   : > { %v1854_v7 = vmul.f32 %v8289_v2, %v10180_v51  ;;  %v1853_v14 = vmul.f32 %v8289_v2, %v13995_v53  ;;  %v8291_v26 = vpop.eup %8290  ;;  %3348 = vmatmul.mubr.bf16.gmra.mxu1 %v3261_v61 }
 0x3af   : > { %v2916_v1 = vpop.xlane.xlu0 %2915  ;;  %v1744_v48 = vpop.xlane.xlu1 %1743  ;;  %v3027_v24 = vmul.f32 %v8291_v26, %v13996_v63  ;;  %v3026_v51 = vmul.f32 %v8291_v26, %v13997_v27 }
 0x3b0   : > { %8304 = vrcp.f32 %v1744_v48  ;;  %v2137_v20 = vpack.c.bf16 %v1854_v7, %v1852_v23  ;;  %v2136_v13 = vpack.c.bf16 %v1853_v14, %v1851_v59 }
 0x3b1   : > { %v8293_v6 = vpop.eup %8292  ;;  %8306 = vrcp.f32 %v2916_v1 }
 0x3b2   : > { %3516 = vmatprep.mubr.bf16.mxu0 %v2137_v20  ;;  %v3029_v47 = vmul.f32 %v8293_v6, %v10190_v29  ;;  %v3028_v50 = vmul.f32 %v8293_v6, %v10185_v45  ;;  %v8295_v52 = vpop.eup %8294 }
 0x3b3   : > { %v1747_v22 = vpop.xlane.xlu0 %1746  ;;  %v2919_v25 = vpop.xlane.xlu1 %2918  ;;  %3517 = vmatmul.mubr.bf16.gmra.mxu0 %v2136_v13  ;;  %v1856_v2 = vmul.f32 %v8295_v52, %v10196_v10  ;;  %v1855_v29 = vmul.f32 %v8295_v52, %v10192_v37 }
 0x3b4   : > { %8308 = vrcp.f32 %v2919_v25  ;;  %v3264_v4 = vpack.c.bf16 %v3029_v47, %v3027_v24  ;;  %v3263_v5 = vpack.c.bf16 %v3028_v50, %v3026_v51  ;;  %v13998_v50 = vld [vmem:[#allocation17_spill] sm:$0xff] }
 0x3b5   : > { %v8297_v21 = vpop.eup %8296  ;;  %8310 = vrcp.f32 %v1747_v22 }
 0x3b6   : > { %v8299_v15 = vpop.eup %8298  ;;  %3355 = vmatprep.mubr.bf16.mxu1 %v3264_v4  ;;  %v1858_v1 = vmul.f32 %v8297_v21, %v10216_v34  ;;  %v1857_v48 = vmul.f32 %v8297_v21, %v10210_v58 }
 0x3b7   : > { %v2922_v57 = vpop.xlane.xlu0 %2921  ;;  %v1750_v61 = vpop.xlane.xlu1 %1749  ;;  %3356 = vmatmul.mubr.bf16.gmra.mxu1 %v3263_v5  ;;  %v3031_v7 = vmul.f32 %v8299_v15, %v10208_v43  ;;  %v3030_v34 = vmul.f32 %v8299_v15, %v10201_v11 }
 0x3b8   : > { %8312 = vrcp.f32 %v1750_v61  ;;  %v2139_v45 = vpack.c.bf16 %v1858_v1, %v1856_v2  ;;  %v2138_v9 = vpack.c.bf16 %v1857_v48, %v1855_v29 }
 0x3b9   : > { %v8301_v23 = vpop.eup %8300  ;;  %8314 = vrcp.f32 %v2922_v57 }
 0x3ba   : > { %v8303_v35 = vpop.eup %8302  ;;  %3524 = vmatprep.mubr.bf16.mxu0 %v2139_v45  ;;  %v3033_v10 = vmul.f32 %v8301_v23, %v10228_v38  ;;  %v3032_v37 = vmul.f32 %v8301_v23, %v10221_v0 }
 0x3bb   : > { %v2925_v53 = vpop.xlane.xlu1 %2924  ;;  %3525 = vmatmul.mubr.bf16.gmra.mxu0 %v2138_v9  ;;  %v1860_v20 = vmul.f32 %v8303_v35, %v10236_v3  ;;  %v1859_v38 = vmul.f32 %v8303_v35, %v10230_v41 }
 0x3bc   : > { %v1753_v59 = vpop.xlane.xlu0 %1752  ;;  %8316 = vrcp.f32 %v2925_v53  ;;  %v3266_v58 = vpack.c.bf16 %v3033_v10, %v3031_v7  ;;  %v3265_v14 = vpack.c.bf16 %v3032_v37, %v3030_v34 }
 0x3bd   : > { %v8305_v26 = vpop.eup %8304  ;;  %8318 = vrcp.f32 %v1753_v59 }
 0x3be   : > { %v8307_v13 = vpop.eup %8306  ;;  %3363 = vmatprep.mubr.bf16.mxu1 %v3266_v58  ;;  %v1862_v22 = vmul.f32 %v8305_v26, %v10256_v49  ;;  %v1861_v11 = vmul.f32 %v8305_v26, %v10250_v19  ;;  %v13999_v26 = vld [vmem:[#allocation18_spill] sm:$0xff] }
 0x3bf   : > { %3364 = vmatmul.mubr.bf16.gmra.mxu1 %v3265_v14  ;;  %v3035_v24 = vmul.f32 %v8307_v13, %v10248_v16  ;;  %v3034_v49 = vmul.f32 %v8307_v13, %v13998_v50  ;;  %v14000_v13 = vld [vmem:[#allocation23_spill] sm:$0xff] }
 0x3c0   : > { %v2928_v43 = vpop.xlane.xlu0 %2927  ;;  %v2141_v0 = vpack.c.bf16 %v1862_v22, %v1860_v20  ;;  %v2140_v25 = vpack.c.bf16 %v1861_v11, %v1859_v38 }
 0x3c1   : > { %v1756_v6 = vpop.xlane.xlu1 %1755  ;;  %v8309_v63 = vpop.eup %8308 }
 0x3c2   : > { %8320 = vrcp.f32 %v1756_v6  ;;  %v8311_v47 = vpop.eup %8310  ;;  %3532 = vmatprep.mubr.bf16.mxu0 %v2141_v0  ;;  %v3037_v51 = vmul.f32 %v8309_v63, %v10266_v30  ;;  %v3036_v41 = vmul.f32 %v8309_v63, %v10261_v54  ;;  %v14002_v6 = vld [vmem:[#allocation11_spill] sm:$0xff] }
 0x3c3   : > { %8322 = vrcp.f32 %v2928_v43  ;;  %3533 = vmatmul.mubr.bf16.gmra.mxu0 %v2140_v25  ;;  %v1864_v5 = vmul.f32 %v8311_v47, %v10274_v12  ;;  %v1863_v57 = vmul.f32 %v8311_v47, %v10268_v39  ;;  %v14001_v43 = vld [vmem:[#allocation10_spill] sm:$0xff] }
 0x3c4   : > { %v1759_v3 = vpop.xlane.xlu0 %1758  ;;  %v3268_v19 = vpack.c.bf16 %v3037_v51, %v3035_v24  ;;  %v3267_v52 = vpack.c.bf16 %v3036_v41, %v3034_v49  ;;  %v14003_v24 = vld [vmem:[#allocation24_spill] sm:$0xff]  ;;  %v14005_v51 = vld [vmem:[#allocation14_spill] sm:$0xff] }
 0x3c5   : > { %v2931_v27 = vpop.xlane.xlu1 %2930  ;;  %v8313_v4 = vpop.eup %8312  ;;  %v14006_v49 = vld [vmem:[#allocation20_spill] sm:$0xff] }
 0x3c6   : > { %8324 = vrcp.f32 %v2931_v27  ;;  %3371 = vmatprep.mubr.bf16.mxu1 %v3268_v19  ;;  %v1866_v15 = vmul.f32 %v8313_v4, %v10297_v60  ;;  %v1865_v30 = vmul.f32 %v8313_v4, %v10291_v8  ;;  %v8315_v61 = vpop.eup %8314 }
 0x3c7   : > { %8326 = vrcp.f32 %v1759_v3  ;;  %3372 = vmatmul.mubr.bf16.gmra.mxu1 %v3267_v52  ;;  %v3039_v48 = vmul.f32 %v8315_v61, %v10289_v62  ;;  %v3038_v60 = vmul.f32 %v8315_v61, %v10279_v56  ;;  %v14004_v3 = vld [vmem:[#allocation30_spill] sm:$0xff] }
 0x3c8   : > { %v2934_v16 = vpop.xlane.xlu0 %2933  ;;  %v2143_v54 = vpack.c.bf16 %v1866_v15, %v1864_v5  ;;  %v2142_v2 = vpack.c.bf16 %v1865_v30, %v1863_v57  ;;  %v14007_v5 = vld [vmem:[#allocation29_spill] sm:$0xff]  ;;  %v14008_v30 = vld [vmem:[#allocation3_spill] sm:$0xff] }
 0x3c9   : > { %v1762_v21 = vpop.xlane.xlu1 %1761  ;;  %v8317_v1 = vpop.eup %8316 }
 0x3ca   : > { %8328 = vrcp.f32 %v1762_v21  ;;  %3540 = vmatprep.mubr.bf16.mxu0 %v2143_v54  ;;  %v3041_v45 = vmul.f32 %v8317_v1, %v10307_v32  ;;  %v3040_v39 = vmul.f32 %v8317_v1, %v10302_v18  ;;  %v8319_v9 = vpop.eup %8318  ;;  %v14009_v54 = vld [vmem:[#allocation15_spill] sm:$0xff]  ;;  %v14010_v1 = vld [vmem:[#allocation21_spill] sm:$0xff] }
 0x3cb   : > { %8330 = vrcp.f32 %v2934_v16  ;;  %3541 = vmatmul.mubr.bf16.gmra.mxu0 %v2142_v2  ;;  %v1868_v53 = vmul.f32 %v8319_v9, %v10315_v55  ;;  %v1867_v32 = vmul.f32 %v8319_v9, %v10309_v17 }
 0x3cc   : > { %v1765_v29 = vpop.xlane.xlu0 %1764  ;;  %v3270_v8 = vpack.c.bf16 %v3041_v45, %v3039_v48  ;;  %v3269_v23 = vpack.c.bf16 %v3040_v39, %v3038_v60  ;;  %v14011_v60 = vld [vmem:[#allocation2_spill] sm:$0xff] }
 0x3cd   : > { %v2937_v12 = vpop.xlane.xlu1 %2936 }
 0x3ce   : > { %8332 = vrcp.f32 %v2937_v12  ;;  %3379 = vmatprep.mubr.bf16.mxu1 %v3270_v8 }
 0x3cf   : > { %v8321_v7 = vpop.eup %8320  ;;  %8334 = vrcp.f32 %v1765_v29  ;;  %3380 = vmatmul.mubr.bf16.gmra.mxu1 %v3269_v23 }
 0x3d0   : > { %v2940_v35 = vpop.xlane.xlu0 %2939  ;;  %v1870_v62 = vmul.f32 %v8321_v7, %v10336_v46  ;;  %v1869_v56 = vmul.f32 %v8321_v7, %v10330_v42  ;;  %v8323_v10 = vpop.eup %8322  ;;  %v14012_v7 = vld [vmem:[#allocation6_spill] sm:$0xff] }
 0x3d1   : > { %v1768_v59 = vpop.xlane.xlu1 %1767  ;;  %v3043_v20 = vmul.f32 %v8323_v10, %v13999_v26  ;;  %v3042_v46 = vmul.f32 %v8323_v10, %v14001_v43 }
 0x3d2   : > { %8336 = vrcp.f32 %v1768_v59  ;;  %v2145_v18 = vpack.c.bf16 %v1870_v62, %v1868_v53  ;;  %v2144_v34 = vpack.c.bf16 %v1869_v56, %v1867_v32  ;;  %v14013_v59 = vld [vmem:[#allocation26_spill] sm:$0xff]  ;;  %v14014_v62 = vld [vmem:[#allocation5_spill] sm:$0xff] }
 0x3d3   : > { %v8325_v37 = vpop.eup %8324  ;;  %8338 = vrcp.f32 %v2940_v35 }
 0x3d4   : > { %3548 = vmatprep.mubr.bf16.mxu0 %v2145_v18  ;;  %v1771_v58 = vpop.xlane.xlu0 %1770  ;;  %v3045_v55 = vmul.f32 %v8325_v37, %v14000_v13  ;;  %v3044_v17 = vmul.f32 %v8325_v37, %v14002_v6  ;;  %v8327_v22 = vpop.eup %8326 }
 0x3d5   : > { %v2943_v14 = vpop.xlane.xlu1 %2942  ;;  %3549 = vmatmul.mubr.bf16.gmra.mxu0 %v2144_v34  ;;  %v1872_v47 = vmul.f32 %v8327_v22, %v14003_v24  ;;  %v1871_v50 = vmul.f32 %v8327_v22, %v14005_v51  ;;  %v14015_v34 = vld [vmem:[#allocation7_spill] sm:$0xff] }
 0x3d6   : > { %8340 = vrcp.f32 %v2943_v14  ;;  %v3272_v42 = vpack.c.bf16 %v3045_v55, %v3043_v20  ;;  %v3271_v38 = vpack.c.bf16 %v3044_v17, %v3042_v46  ;;  %v14016_v20 = vld [vmem:[#allocation13_spill] sm:$0xff]  ;;  %v14017_v55 = vld [vmem:[#allocation27_spill] sm:$0xff]  ;;  %v14018_v46 = vld [vmem:[#allocation4_spill] sm:$0xff] }
 0x3d7   : > { %v8329_v11 = vpop.eup %8328  ;;  %8342 = vrcp.f32 %v1771_v58 }
 0x3d8   : > { %v8331_v0 = vpop.eup %8330  ;;  %3387 = vmatprep.mubr.bf16.mxu1 %v3272_v42  ;;  %v2946_v25 = vpop.xlane.xlu0 %2945  ;;  %v1874_v27 = vmul.f32 %v8329_v11, %v14004_v3  ;;  %v1873_v41 = vmul.f32 %v8329_v11, %v14006_v49 }
 0x3d9   : > { %v1774_v63 = vpop.xlane.xlu1 %1773  ;;  %3388 = vmatmul.mubr.bf16.gmra.mxu1 %v3271_v38  ;;  %v3047_v16 = vmul.f32 %v8331_v0, %v14007_v5  ;;  %v3046_v2 = vmul.f32 %v8331_v0, %v14009_v54  ;;  %v14019_v38 = vld [vmem:[#allocation12_spill] sm:$0xff]  ;;  %v14023_v5 = vld [vmem:[#allocation25_spill] sm:$0xff] }
 0x3da   : > { %8344 = vrcp.f32 %v1774_v63  ;;  %v2147_v19 = vpack.c.bf16 %v1874_v27, %v1872_v47  ;;  %v2146_v52 = vpack.c.bf16 %v1873_v41, %v1871_v50  ;;  %v14020_v63 = vld [vmem:[#allocation22_spill] sm:$0xff]  ;;  %v14021_v47 = vld [vmem:[#allocation9_spill] sm:$0xff]  ;;  %v14022_v27 = vld [vmem:[#allocation19_spill] sm:$0xff] }
 0x3db   : > { %v8333_v4 = vpop.eup %8332  ;;  %8346 = vrcp.f32 %v2946_v25 }
 0x3dc   : > { %v8335_v21 = vpop.eup %8334  ;;  %3556 = vmatprep.mubr.bf16.mxu0 %v2147_v19  ;;  %v1777_v15 = vpop.xlane.xlu0 %1776  ;;  %v3049_v61 = vmul.f32 %v8333_v4, %v14008_v30  ;;  %v3048_v29 = vmul.f32 %v8333_v4, %v14010_v1 }
 0x3dd   : > { %v2949_v57 = vpop.xlane.xlu1 %2948  ;;  %3557 = vmatmul.mubr.bf16.gmra.mxu0 %v2146_v52  ;;  %v1876_v39 = vmul.f32 %v8335_v21, %v14011_v60  ;;  %v1875_v53 = vmul.f32 %v8335_v21, %v14013_v59  ;;  %v14024_v21 = vld [vmem:[#allocation32_spill] sm:$0xff]  ;;  %v14027_v60 = vld [vmem:[#allocation33_spill] sm:$0xff] }
 0x3de   : > { %8348 = vrcp.f32 %v2949_v57  ;;  %v3274_v12 = vpack.c.bf16 %v3049_v61, %v3047_v16  ;;  %v3273_v48 = vpack.c.bf16 %v3048_v29, %v3046_v2  ;;  %v14025_v57 = vld [vmem:[#allocation8_spill] sm:$0xff] }
 0x3df   : > { %v8337_v45 = vpop.eup %8336  ;;  %8350 = vrcp.f32 %v1777_v15  ;;  %v14026_v61 = vld [vmem:[#allocation16_spill] sm:$0xff] }
 0x3e0   : > { %v8339_v9 = vpop.eup %8338  ;;  %3395 = vmatprep.mubr.bf16.mxu1 %v3274_v12  ;;  %v2952_v8 = vpop.xlane.xlu0 %2951  ;;  %v1878_v35 = vmul.f32 %v8337_v45, %v14012_v7  ;;  %v1877_v32 = vmul.f32 %v8337_v45, %v14014_v62 }
 0x3e1   : > { %v1780_v23 = vpop.xlane.xlu1 %1779  ;;  %3396 = vmatmul.mubr.bf16.gmra.mxu1 %v3273_v48  ;;  %v3051_v37 = vmul.f32 %v8339_v9, %v14015_v34  ;;  %v3050_v43 = vmul.f32 %v8339_v9, %v14017_v55  ;;  %v14028_v9 = vld [vmem:[#allocation37_spill] sm:$0xff]  ;;  %v14031_v34 = vld [vmem:[#allocation36_spill] sm:$0xff] }
 0x3e2   : > { %8352 = vrcp.f32 %v1780_v23  ;;  %v2149_v56 = vpack.c.bf16 %v1878_v35, %v1876_v39  ;;  %v2148_v10 = vpack.c.bf16 %v1877_v32, %v1875_v53  ;;  %v14029_v23 = vld [vmem:[#allocation31_spill] sm:$0xff]  ;;  %v14030_v35 = vld [vmem:[#allocation34_spill] sm:$0xff] }
 0x3e3   : > { %v8341_v18 = vpop.eup %8340  ;;  %8354 = vrcp.f32 %v2952_v8 }
 0x3e4   : > { %v8343_v58 = vpop.eup %8342  ;;  %3564 = vmatprep.mubr.bf16.mxu0 %v2149_v56  ;;  %v1783_v14 = vpop.xlane.xlu0 %1782  ;;  %v3053_v13 = vmul.f32 %v8341_v18, %v14016_v20  ;;  %v3052_v6 = vmul.f32 %v8341_v18, %v14018_v46 }
 0x3e5   : > { %v2955_v26 = vpop.xlane.xlu1 %2954  ;;  %3565 = vmatmul.mubr.bf16.gmra.mxu0 %v2148_v10  ;;  %v1880_v11 = vmul.f32 %v8343_v58, %v14019_v38  ;;  %v1879_v3 = vmul.f32 %v8343_v58, %v14021_v47  ;;  %v14032_v58 = vld [vmem:[#allocation40_spill] sm:$0xff]  ;;  %v14037_v47 = vld [vmem:[#allocation42_spill] sm:$0xff] }
 0x3e6   : > { %8356 = vrcp.f32 %v2955_v26  ;;  %v3276_v17 = vpack.c.bf16 %v3053_v13, %v3051_v37  ;;  %v3275_v22 = vpack.c.bf16 %v3052_v6, %v3050_v43  ;;  %v14033_v26 = vld [vmem:[#allocation28_spill] sm:$0xff]  ;;  %v14034_v13 = vld [vmem:[#allocation35_spill] sm:$0xff] }
 0x3e7   : > { %v8345_v42 = vpop.eup %8344  ;;  %8358 = vrcp.f32 %v1783_v14 }
 0x3e8   : > { %3403 = vmatprep.mubr.bf16.mxu1 %v3276_v17  ;;  %v2958_v0 = vpop.xlane.xlu0 %2957  ;;  %v1882_v24 = vmul.f32 %v8345_v42, %v14020_v63  ;;  %v1881_v51 = vmul.f32 %v8345_v42, %v14022_v27  ;;  %v8347_v50 = vpop.eup %8346  ;;  %v14036_v63 = vld [vmem:[#allocation38_spill] sm:$0xff] }
 0x3e9   : > { %v1786_v25 = vpop.xlane.xlu1 %1785  ;;  %3404 = vmatmul.mubr.bf16.gmra.mxu1 %v3275_v22  ;;  %v3055_v16 = vmul.f32 %v8347_v50, %v14023_v5  ;;  %v3054_v30 = vmul.f32 %v8347_v50, %v14025_v57  ;;  %v14039_v5 = vld [vmem:[#allocation43_spill] sm:$0xff] }
 0x3ea   : > { %8360 = vrcp.f32 %v1786_v25  ;;  %v2151_v49 = vpack.c.bf16 %v1882_v24, %v1880_v11  ;;  %v2150_v41 = vpack.c.bf16 %v1881_v51, %v1879_v3  ;;  %v14035_v11 = vld [vmem:[#allocation41_spill] sm:$0xff] }
 0x3eb   : > { %v8349_v19 = vpop.eup %8348  ;;  %8362 = vrcp.f32 %v2958_v0 }
 0x3ec   : > { %3572 = vmatprep.mubr.bf16.mxu0 %v2151_v49  ;;  %v1789_v52 = vpop.xlane.xlu0 %1788  ;;  %v3057_v15 = vmul.f32 %v8349_v19, %v14024_v21  ;;  %v3056_v54 = vmul.f32 %v8349_v19, %v14026_v61  ;;  %v8351_v2 = vpop.eup %8350  ;;  %v14038_v49 = vld [vmem:[#allocation44_spill] sm:$0xff]  ;;  %v14040_v21 = vld [vmem:[#allocation39_spill] sm:$0xff] }
 0x3ed   : > { %v2961_v4 = vpop.xlane.xlu1 %2960  ;;  %3573 = vmatmul.mubr.bf16.gmra.mxu0 %v2150_v41  ;;  %v1884_v39 = vmul.f32 %v8351_v2, %v14027_v60  ;;  %v1883_v7 = vmul.f32 %v8351_v2, %v14029_v23  ;;  %v14042_v2 = vld [vmem:[#allocation46_spill] sm:$0xff] }
 0x3ee   : > { %8364 = vrcp.f32 %v2961_v4  ;;  %v3278_v1 = vpack.c.bf16 %v3057_v15, %v3055_v16  ;;  %v3277_v29 = vpack.c.bf16 %v3056_v54, %v3054_v30  ;;  %v14041_v15 = vld [vmem:[#allocation45_spill] sm:$0xff] }
 0x3ef   : > { %v8353_v12 = vpop.eup %8352  ;;  %8366 = vrcp.f32 %v1789_v52 }
 0x3f0   : > { %3411 = vmatprep.mubr.bf16.mxu1 %v3278_v1  ;;  %v2964_v48 = vpop.xlane.xlu0 %2963  ;;  %v1886_v8 = vmul.f32 %v8353_v12, %v14028_v9  ;;  %v1885_v59 = vmul.f32 %v8353_v12, %v14030_v35  ;;  %v8355_v53 = vpop.eup %8354 }
 0x3f1   : > { %v1792_v45 = vpop.xlane.xlu1 %1791  ;;  %3412 = vmatmul.mubr.bf16.gmra.mxu1 %v3277_v29  ;;  %v3059_v37 = vmul.f32 %v8355_v53, %v14031_v34  ;;  %v3058_v20 = vmul.f32 %v8355_v53, %v14033_v26  ;;  %v14046_v53 = vld [vmem:[#allocation47_spill] sm:$0xff] }
 0x3f2   : > { %8368 = vrcp.f32 %v1792_v45  ;;  %v2153_v62 = vpack.c.bf16 %v1886_v8, %v1884_v39  ;;  %v2152_v32 = vpack.c.bf16 %v1885_v59, %v1883_v7  ;;  %v14043_v45 = vld [vmem:[#allocation50_spill] sm:$0xff]  ;;  %v14044_v39 = vld [vmem:[#allocation48_spill] sm:$0xff] }
 0x3f3   : > { %v8357_v56 = vpop.eup %8356  ;;  %8370 = vrcp.f32 %v2964_v48  ;;  %v14045_v8 = vld [vmem:[#allocation52_spill] sm:$0xff] }
 0x3f4   : > { %3580 = vmatprep.mubr.bf16.mxu0 %v2153_v62  ;;  %v1795_v10 = vpop.xlane.xlu0 %1794  ;;  %v3061_v14 = vmul.f32 %v8357_v56, %v14032_v58  ;;  %v3060_v55 = vmul.f32 %v8357_v56, %v14034_v13  ;;  %v8359_v43 = vpop.eup %8358 }
 0x3f5   : > { %v2967_v18 = vpop.xlane.xlu1 %2966  ;;  %3581 = vmatmul.mubr.bf16.gmra.mxu0 %v2152_v32  ;;  %v1888_v0 = vmul.f32 %v8359_v43, %v14035_v11  ;;  %v1887_v24 = vmul.f32 %v8359_v43, %v14036_v63 }
 0x3f6   : > { %8372 = vrcp.f32 %v2967_v18  ;;  %v3280_v46 = vpack.c.bf16 %v3061_v14, %v3059_v37  ;;  %v3279_v6 = vpack.c.bf16 %v3060_v55, %v3058_v20  ;;  %v14047_v18 = vld [vmem:[#allocation51_spill] sm:$0xff]  ;;  %v14048_v37 = vld [vmem:[#allocation49_spill] sm:$0xff] }
 0x3f7   : > { %v8361_v17 = vpop.eup %8360  ;;  %8374 = vrcp.f32 %v1795_v10  ;;  %v14049_v14 = vld [vmem:[#allocation53_spill] sm:$0xff] }
 0x3f8   : > { %v8363_v22 = vpop.eup %8362  ;;  %3419 = vmatprep.mubr.bf16.mxu1 %v3280_v46  ;;  %v2970_v42 = vpop.xlane.xlu0 %2969  ;;  %v1890_v25 = vmul.f32 %v8361_v17, %v10496_v44  ;;  %v1889_v3 = vmul.f32 %v8361_v17, %v14037_v47 }
 0x3f9   : > { %v1798_v38 = vpop.xlane.xlu1 %1797  ;;  %3420 = vmatmul.mubr.bf16.gmra.mxu1 %v3279_v6  ;;  %v3063_v41 = vmul.f32 %v8363_v22, %v14038_v49  ;;  %v3062_v44 = vmul.f32 %v8363_v22, %v14040_v21 }
 0x3fa   : > { %8376 = vrcp.f32 %v1798_v38  ;;  %v2155_v27 = vpack.c.bf16 %v1890_v25, %v1888_v0  ;;  %v2154_v51 = vpack.c.bf16 %v1889_v3, %v1887_v24  ;;  %v14050_v24 = vld [vmem:[#allocation57_spill] sm:$0xff]  ;;  %v14051_v3 = vld [vmem:[#allocation56_spill] sm:$0xff] }
 0x3fb   : > { %v8365_v50 = vpop.eup %8364  ;;  %8378 = vrcp.f32 %v2970_v42 }
 0x3fc   : > { %v8367_v19 = vpop.eup %8366  ;;  %3588 = vmatprep.mubr.bf16.mxu0 %v2155_v27  ;;  %v1801_v52 = vpop.xlane.xlu0 %1800  ;;  %v3065_v16 = vmul.f32 %v8365_v50, %v14039_v5  ;;  %v3064_v57 = vmul.f32 %v8365_v50, %v14041_v15  ;;  %v14055_v5 = vld [vmem:[#allocation55_spill] sm:$0xff] }
 0x3fd   : > { %v2973_v4 = vpop.xlane.xlu1 %2972  ;;  %3589 = vmatmul.mubr.bf16.gmra.mxu0 %v2154_v51  ;;  %v1892_v1 = vmul.f32 %v8367_v19, %v14042_v2  ;;  %v1891_v9 = vmul.f32 %v8367_v19, %v14044_v39  ;;  %v14058_v2 = vld [vmem:[#allocation65_spill] sm:$0xff] }
 0x3fe   : > { %8380 = vrcp.f32 %v2973_v4  ;;  %v3282_v30 = vpack.c.bf16 %v3065_v16, %v3063_v41  ;;  %v3281_v61 = vpack.c.bf16 %v3064_v57, %v3062_v44  ;;  %v14053_v41 = vld [vmem:[#allocation60_spill] sm:$0xff] }
 0x3ff   : > { %v8369_v54 = vpop.eup %8368  ;;  %8382 = vrcp.f32 %v1801_v52  ;;  %v14054_v52 = vld [vmem:[#allocation64_spill] sm:$0xff] }
 0x400   : > { %v8371_v29 = vpop.eup %8370  ;;  %3427 = vmatprep.mubr.bf16.mxu1 %v3282_v30  ;;  %v2976_v12 = vpop.xlane.xlu0 %2975  ;;  %v1894_v60 = vmul.f32 %v8369_v54, %v14043_v45  ;;  %v1893_v23 = vmul.f32 %v8369_v54, %v14045_v8 }
 0x401   : > { %v1804_v48 = vpop.xlane.xlu1 %1803  ;;  %3428 = vmatmul.mubr.bf16.gmra.mxu1 %v3281_v61  ;;  %v3067_v62 = vmul.f32 %v8371_v29, %v14046_v53  ;;  %v3066_v58 = vmul.f32 %v8371_v29, %v14048_v37  ;;  %v14057_v61 = vld [vmem:[#allocation61_spill] sm:$0xff]  ;;  %v14059_v29 = vld [vmem:[#allocation58_spill] sm:$0xff] }
 0x402   : > { %8384 = vrcp.f32 %v1804_v48  ;;  %v2157_v7 = vpack.c.bf16 %v1894_v60, %v1892_v1  ;;  %v2156_v35 = vpack.c.bf16 %v1893_v23, %v1891_v9  ;;  %v14060_v48 = vld [vmem:[#allocation62_spill] sm:$0xff] }
 0x403   : > { %v8373_v59 = vpop.eup %8372  ;;  %8386 = vrcp.f32 %v2976_v12 }
 0x404   : > { %v8375_v32 = vpop.eup %8374  ;;  %3596 = vmatprep.mubr.bf16.mxu0 %v2157_v7  ;;  %v1807_v56 = vpop.xlane.xlu0 %1806  ;;  %v3069_v34 = vmul.f32 %v8373_v59, %v14047_v18  ;;  %v3068_v26 = vmul.f32 %v8373_v59, %v14049_v14  ;;  %v14061_v7 = vld [vmem:[#allocation68_spill] sm:$0xff] }
 0x405   : > { %v2979_v10 = vpop.xlane.xlu1 %2978  ;;  %3597 = vmatmul.mubr.bf16.gmra.mxu0 %v2156_v35  ;;  %v1896_v43 = vmul.f32 %v8375_v32, %v10544_v36  ;;  %v1895_v22 = vmul.f32 %v8375_v32, %v10540_v33  ;;  %v14062_v59 = vld [vmem:[#allocation72_spill] sm:$0xff] }
 0x406   : > { %8388 = vrcp.f32 %v2979_v10  ;;  %v3284_v20 = vpack.c.bf16 %v3069_v34, %v3067_v62  ;;  %v3283_v13 = vpack.c.bf16 %v3068_v26, %v3066_v58  ;;  %v14063_v62 = vld [vmem:[#allocation63_spill] sm:$0xff]  ;;  %v14065_v58 = vld [vmem:[#allocation69_spill] sm:$0xff] }
 0x407   : > { %v8377_v55 = vpop.eup %8376  ;;  %8390 = vrcp.f32 %v1807_v56  ;;  %v14064_v56 = vld [vmem:[#allocation67_spill] sm:$0xff]  ;;  %v14066_v26 = vld [vmem:[#allocation73_spill] sm:$0xff] }
 0x408   : > { %3435 = vmatprep.mubr.bf16.mxu1 %v3284_v20  ;;  %v2982_v46 = vpop.xlane.xlu0 %2981  ;;  %v1898_v17 = vmul.f32 %v8377_v55, %v10560_v28  ;;  %v1897_v42 = vmul.f32 %v8377_v55, %v10556_v31  ;;  %v8379_v38 = vpop.eup %8378  ;;  %v14052_v28 = vld [vmem:[#allocation54_spill] sm:$0xff] }
 0x409   : > { %v1810_v6 = vpop.xlane.xlu1 %1809  ;;  %3436 = vmatmul.mubr.bf16.gmra.mxu1 %v3283_v13  ;;  %v3071_v36 = vmul.f32 %v8379_v38, %v10554_v40  ;;  %v3070_v27 = vmul.f32 %v8379_v38, %v14051_v3  ;;  %v14056_v40 = vld [vmem:[#allocation59_spill] sm:$0xff]  ;;  %v14067_v13 = vld [vmem:[#allocation66_spill] sm:$0xff] }
 0x40a   : > { %8392 = vrcp.f32 %v1810_v6  ;;  %v2159_v11 = vpack.c.bf16 %v1898_v17, %v1896_v43  ;;  %v2158_v0 = vpack.c.bf16 %v1897_v42, %v1895_v22  ;;  %v14068_v43 = vld [vmem:[#allocation70_spill] sm:$0xff] }
 0x40b   : > { %v8381_v25 = vpop.eup %8380  ;;  %8394 = vrcp.f32 %v2982_v46 }
 0x40c   : > { %3604 = vmatprep.mubr.bf16.mxu0 %v2159_v11  ;;  %v3073_v47 = vmul.f32 %v8381_v25, %v14050_v24  ;;  %v3072_v51 = vmul.f32 %v8381_v25, %v14052_v28  ;;  %v8383_v33 = vpop.eup %8382 }
 0x40d   : > { %v2985_v63 = vpop.xlane.xlu1 %2984  ;;  %3605 = vmatmul.mubr.bf16.gmra.mxu0 %v2158_v0  ;;  %v1900_v19 = vmul.f32 %v8383_v33, %v14053_v41  ;;  %v1899_v16 = vmul.f32 %v8383_v33, %v14055_v5 }
 0x40e   : > { %8396 = vrcp.f32 %v2985_v63  ;;  %v3286_v31 = vpack.c.bf16 %v3073_v47, %v3071_v36  ;;  %v3285_v50 = vpack.c.bf16 %v3072_v51, %v3070_v27 }
 0x40f   : > { %v8385_v49 = vpop.eup %8384 }
 0x410   : > { %3443 = vmatprep.mubr.bf16.mxu1 %v3286_v31  ;;  %v1902_v4 = vmul.f32 %v8385_v49, %v14054_v52  ;;  %v1901_v21 = vmul.f32 %v8385_v49, %v14056_v40  ;;  %v8387_v44 = vpop.eup %8386  ;;  %v8526_v49 = vld [vmem:[%s8633_s29] sm:$0xff] }
 0x411   : > { %3444 = vmatmul.mubr.bf16.gmra.mxu1 %v3285_v50  ;;  %v3075_v54 = vmul.f32 %v8387_v44, %v14057_v61  ;;  %v3074_v12 = vmul.f32 %v8387_v44, %v14059_v29  ;;  %v10755_v52 = vld [vmem:[%s13359_s4 + $0x3] ss:$0 sm:$0xff] }
 0x412   : > { %v2161_v15 = vpack.c.bf16 %v1902_v4, %v1900_v19  ;;  %v2160_v57 = vpack.c.bf16 %v1901_v21, %v1899_v16  ;;  %v8527_v16 = vld [vmem:[%s8633_s29 + $0x8] sm:$0xff] }
 0x413   : > { %v8389_v30 = vpop.eup %8388 }
 0x414   : > { %3612 = vmatprep.mubr.bf16.mxu0 %v2161_v15  ;;  %v3077_v1 = vmul.f32 %v8389_v30, %v14058_v2  ;;  %v3076_v45 = vmul.f32 %v8389_v30, %v14060_v48  ;;  %v8391_v60 = vpop.eup %8390 }
 0x415   : > { %3613 = vmatmul.mubr.bf16.gmra.mxu0 %v2160_v57  ;;  %v1904_v35 = vmul.f32 %v8391_v60, %v14061_v7  ;;  %v1903_v32 = vmul.f32 %v8391_v60, %v14063_v62 }
 0x416   : > { %v3288_v39 = vpack.c.bf16 %v3077_v1, %v3075_v54  ;;  %v3287_v9 = vpack.c.bf16 %v3076_v45, %v3074_v12 }
 0x417   : > { %v8393_v8 = vpop.eup %8392 }
 0x418   : > { %v8395_v23 = vpop.eup %8394  ;;  %3451 = vmatprep.mubr.bf16.mxu1 %v3288_v39  ;;  %v1906_v53 = vmul.f32 %v8393_v8, %v14062_v59  ;;  %v1905_v10 = vmul.f32 %v8393_v8, %v14064_v56  ;;  %v8528_v39 = vld [vmem:[%s8633_s29 + $0x10] sm:$0xff] }
 0x419   : > { %3452 = vmatmul.mubr.bf16.gmra.mxu1 %v3287_v9  ;;  %v3079_v14 = vmul.f32 %v8395_v23, %v14065_v58  ;;  %v3078_v55 = vmul.f32 %v8395_v23, %v14067_v13 }
 0x41a   : > { %v2163_v34 = vpack.c.bf16 %v1906_v53, %v1904_v35  ;;  %v2162_v37 = vpack.c.bf16 %v1905_v10, %v1903_v32  ;;  %v8529_v35 = vld [vmem:[%s8633_s29 + $0x18] sm:$0xff] }
 0x41b   : > { %v8397_v18 = vpop.eup %8396 }
 0x41c   : > { %v3081_v20 = vmul.f32 %v8397_v18, %v14066_v26  ;;  %v3080_v46 = vmul.f32 %v8397_v18, %v14068_v43  ;;  %3620 = vmatprep.mubr.bf16.mxu0 %v2163_v34  ;;  %v8530_v43 = vld [vmem:[%s8633_s29 + $0x20] sm:$0xff] }
 0x41d   : > { %3621 = vmatmul.mubr.bf16.gmra.mxu0 %v2162_v37 }
 0x41e   : > { %v3290_v6 = vpack.c.bf16 %v3081_v20, %v3079_v14  ;;  %v3289_v17 = vpack.c.bf16 %v3080_v46, %v3078_v55 }
 0x420   : > { %3459 = vmatprep.mubr.bf16.mxu1 %v3290_v6 }
 0x421   : > { %3460 = vmatmul.mubr.bf16.gmra.mxu1 %v3289_v17 }
 0x461   : > { %v7109_v22 = vpop.f32.mrf.mxu0 }
 0x463   : > { %v7110_v42 = vpop.f32.mrf.mxu0 }
 0x464   : > { %v7111_v63 = vadd.f32 %v7110_v42, %v7109_v22  ;;  %v8531_v42 = vld [vmem:[%s8633_s29 + $0x28] sm:$0xff] }
 0x465   : > { %v6997_v38 = vpop.f32.mrf.mxu1  ;;  %v7112_v11 = vpop.f32.mrf.mxu0 }
 0x467   : > { %v6998_v0 = vpop.f32.mrf.mxu1  ;;  %v7113_v25 = vpop.f32.mrf.mxu0 }
 0x468   : > { %v6999_v36 = vadd.f32 %v6998_v0, %v6997_v38  ;;  %v7114_v51 = vadd.f32 %v7113_v25, %v7112_v11 }
 0x469   : > { %v7000_v24 = vpop.f32.mrf.mxu1 }
 0x46a   : > { %v7115_v47 = vpop.f32.mrf.mxu0  ;;  %v3503_v3 = vadd.f32 %v7111_v63, %v6999_v36 }
 0x46b   : > { %v7001_v27 = vpop.f32.mrf.mxu1 }
 0x46c   : > { %v7116_v28 = vpop.f32.mrf.mxu0  ;;  %v7002_v33 = vadd.f32 %v7001_v27, %v7000_v24  ;;  %v3629_v41 = vadd.f32 %v8526_v49, %v3503_v3  ;;  %v8532_v49 = vld [vmem:[%s8633_s29 + $0x30] sm:$0xff] }
 0x46d   : > { %v7117_v21 = vadd.f32 %v7116_v28, %v7115_v47 }
 0x46e   : > { %v7003_v31 = vpop.f32.mrf.mxu1  ;;  %v7118_v50 = vpop.f32.mrf.mxu0  ;;  %v3506_v19 = vadd.f32 %v7114_v51, %v7002_v33  ;;  %v10759_v30 = vadd.f32 %v10755_v52, %v3629_v41 }
 0x470   : > { %v7004_v4 = vpop.f32.mrf.mxu1  ;;  %v7119_v5 = vpop.f32.mrf.mxu0  ;;  %v3630_v40 = vadd.f32 %v8527_v16, %v3506_v19  ;;  %14069 = vst [vmem:[#allocation71_spill] sm:$0xff] %v10759_v30  ;;  %v8533_v16 = vld [vmem:[%s8633_s29 + $0x38] sm:$0xff] }
 0x471   : > { %v7005_v44 = vadd.f32 %v7004_v4, %v7003_v31  ;;  %v7120_v29 = vadd.f32 %v7119_v5, %v7118_v50 }
 0x472   : > { %v7006_v15 = vpop.f32.mrf.mxu1  ;;  %v10762_v61 = vadd.f32 %v10755_v52, %v3630_v40 }
 0x473   : > { %v7121_v57 = vpop.f32.mrf.mxu0  ;;  %v3511_v54 = vadd.f32 %v7117_v21, %v7005_v44 }
 0x474   : > { %14070 = vst [vmem:[#allocation76_spill] sm:$0xff] %v10762_v61  ;;  %v7007_v2 = vpop.f32.mrf.mxu1  ;;  %v3697_v48 = vpack.c.bf16 %v10762_v61, %v10759_v30 }
 0x475   : > { %v7122_v1 = vpop.f32.mrf.mxu0  ;;  %v7008_v12 = vadd.f32 %v7007_v2, %v7006_v15  ;;  %v3631_v9 = vadd.f32 %v8528_v39, %v3511_v54 }
 0x476   : > { %7394 = vmatprep.mubr.msk.bf16.mxu1 %vm304_vm0, %v3697_v48  ;;  %v7123_v53 = vadd.f32 %v7122_v1, %v7121_v57 }
 0x477   : > { %v7009_v45 = vpop.f32.mrf.mxu1  ;;  %v7124_v60 = vpop.f32.mrf.mxu0  ;;  %v3514_v8 = vadd.f32 %v7120_v29, %v7008_v12  ;;  %v10770_v10 = vadd.f32 %v10755_v52, %v3631_v9 }
 0x479   : > { %v7010_v23 = vpop.f32.mrf.mxu1  ;;  %v7125_v7 = vpop.f32.mrf.mxu0  ;;  %v3632_v59 = vadd.f32 %v8529_v35, %v3514_v8  ;;  %14071 = vst [vmem:[#allocation74_spill] sm:$0xff] %v10770_v10  ;;  %v8534_v8 = vld [vmem:[%s8633_s29 + $0x40] sm:$0xff] }
 0x47a   : > { %v7011_v62 = vadd.f32 %v7010_v23, %v7009_v45  ;;  %v7126_v26 = vadd.f32 %v7125_v7, %v7124_v60 }
 0x47b   : > { %v7012_v32 = vpop.f32.mrf.mxu1  ;;  %v7127_v56 = vpop.f32.mrf.mxu0  ;;  %v10773_v18 = vadd.f32 %v10755_v52, %v3632_v59 }
 0x47c   : > { %v3519_v34 = vadd.f32 %v7123_v53, %v7011_v62  ;;  %v8535_v53 = vld [vmem:[%s8633_s29 + $0x48] sm:$0xff] }
 0x47d   : > { %14072 = vst [vmem:[#allocation77_spill] sm:$0xff] %v10773_v18  ;;  %v7013_v37 = vpop.f32.mrf.mxu1  ;;  %v7128_v58 = vpop.f32.mrf.mxu0  ;;  %v3698_v14 = vpack.c.bf16 %v10773_v18, %v10770_v10 }
 0x47e   : > { %v7014_v20 = vadd.f32 %v7013_v37, %v7012_v32  ;;  %v3633_v46 = vadd.f32 %v8530_v43, %v3519_v34  ;;  %v7129_v11 = vadd.f32 %v7128_v58, %v7127_v56 }
 0x47f   : > { %v7015_v13 = vpop.f32.mrf.mxu1  ;;  %v7130_v55 = vpop.f32.mrf.mxu0  ;;  %7395 = vmatmul.mubr.msk.bf16.vlgmr.msra.gmra.mxu1 %vm304_vm0, %v3698_v14 }
 0x480   : > { %v3522_v6 = vadd.f32 %v7126_v26, %v7014_v20  ;;  %v10781_v36 = vadd.f32 %v10755_v52, %v3633_v46 }
 0x481   : > { %v7016_v17 = vpop.f32.mrf.mxu1  ;;  %v7131_v22 = vpop.f32.mrf.mxu0 }
 0x482   : > { %v3634_v38 = vadd.f32 %v8531_v42, %v3522_v6  ;;  %v7017_v0 = vadd.f32 %v7016_v17, %v7015_v13  ;;  %14073 = vst [vmem:[#allocation75_spill] sm:$0xff] %v10781_v36  ;;  %v7132_v28 = vadd.f32 %v7131_v22, %v7130_v55  ;;  %v8536_v22 = vld [vmem:[%s8633_s29 + $0x50] sm:$0xff] }
 0x483   : > { %v7018_v25 = vpop.f32.mrf.mxu1  ;;  %v7133_v63 = vpop.f32.mrf.mxu0 }
 0x484   : > { %v10784_v24 = vadd.f32 %v10755_v52, %v3634_v38  ;;  %v3527_v47 = vadd.f32 %v7129_v11, %v7017_v0 }
 0x485   : > { %v7019_v3 = vpop.f32.mrf.mxu1  ;;  %v7134_v27 = vpop.f32.mrf.mxu0 }
 0x486   : > { %14074 = vst [vmem:[#allocation78_spill] sm:$0xff] %v10784_v24  ;;  %v7020_v51 = vadd.f32 %v7019_v3, %v7018_v25  ;;  %v3699_v33 = vpack.c.bf16 %v10784_v24, %v10781_v36  ;;  %v3635_v41 = vadd.f32 %v8532_v49, %v3527_v47  ;;  %v7135_v21 = vadd.f32 %v7134_v27, %v7133_v63  ;;  %v8537_v25 = vld [vmem:[%s8633_s29 + $0x58] sm:$0xff] }
 0x487   : > { %v7021_v31 = vpop.f32.mrf.mxu1  ;;  %v7136_v50 = vpop.f32.mrf.mxu0 }
 0x488   : > { %v3530_v19 = vadd.f32 %v7132_v28, %v7020_v51  ;;  %7398 = vmatprep.mubr.msk.bf16.mxu1 %vm304_vm0, %v3699_v33  ;;  %v10792_v54 = vadd.f32 %v10755_v52, %v3635_v41 }
 0x489   : > { %v7022_v4 = vpop.f32.mrf.mxu1  ;;  %v7137_v5 = vpop.f32.mrf.mxu0 }
 0x48a   : > { %v3636_v40 = vadd.f32 %v8533_v16, %v3530_v19  ;;  %v7023_v44 = vadd.f32 %v7022_v4, %v7021_v31  ;;  %14075 = vst [vmem:[#allocation80_spill] sm:$0xff] %v10792_v54  ;;  %v7138_v45 = vadd.f32 %v7137_v5, %v7136_v50 }
 0x48b   : > { %v7024_v15 = vpop.f32.mrf.mxu1  ;;  %v7139_v57 = vpop.f32.mrf.mxu0 }
 0x48c   : > { %v10795_v2 = vadd.f32 %v10755_v52, %v3636_v40  ;;  %v3535_v1 = vadd.f32 %v7135_v21, %v7023_v44  ;;  %v8538_v40 = vld [vmem:[%s8633_s29 + $0x60] sm:$0xff] }
 0x48d   : > { %v7025_v29 = vpop.f32.mrf.mxu1  ;;  %v7140_v12 = vpop.f32.mrf.mxu0 }
 0x48e   : > { %14076 = vst [vmem:[#allocation79_spill] sm:$0xff] %v10795_v2  ;;  %v3700_v48 = vpack.c.bf16 %v10795_v2, %v10792_v54  ;;  %v7026_v60 = vadd.f32 %v7025_v29, %v7024_v15  ;;  %v3637_v23 = vadd.f32 %v8534_v8, %v3535_v1  ;;  %v7141_v32 = vadd.f32 %v7140_v12, %v7139_v57  ;;  %v8539_v1 = vld [vmem:[%s8633_s29 + $0x68] sm:$0xff] }
 0x48f   : > { %v7027_v39 = vpop.f32.mrf.mxu1  ;;  %v7142_v9 = vpop.f32.mrf.mxu0 }
 0x490   : > { %v3538_v7 = vadd.f32 %v7138_v45, %v7026_v60  ;;  %7399 = vmatmul.mubr.msk.bf16.gmra.mxu1 %vm304_vm0, %v3700_v48  ;;  %v10803_v58 = vadd.f32 %v10755_v52, %v3637_v23 }
 0x491   : > { %v7028_v35 = vpop.f32.mrf.mxu1  ;;  %v7143_v59 = vpop.f32.mrf.mxu0 }
 0x492   : > { %v3638_v62 = vadd.f32 %v8535_v53, %v3538_v7  ;;  %v7029_v56 = vadd.f32 %v7028_v35, %v7027_v39  ;;  %14077 = vst [vmem:[#allocation83_spill] sm:$0xff] %v10803_v58  ;;  %v7144_v55 = vadd.f32 %v7143_v59, %v7142_v9 }
 0x493   : > { %v7030_v34 = vpop.f32.mrf.mxu1 }
 0x494   : > { %v10806_v14 = vadd.f32 %v10755_v52, %v3638_v62  ;;  %v3543_v26 = vadd.f32 %v7141_v32, %v7029_v56  ;;  %v8540_v56 = vld [vmem:[%s8633_s29 + $0x70] sm:$0xff] }
 0x495   : > { %v7145_v37 = vpop.f32.mrf.mxu0  ;;  %v7031_v20 = vpop.f32.mrf.mxu1 }
 0x496   : > { %14078 = vst [vmem:[#allocation81_spill] sm:$0xff] %v10806_v14  ;;  %v7032_v43 = vadd.f32 %v7031_v20, %v7030_v34  ;;  %v3701_v46 = vpack.c.bf16 %v10806_v14, %v10803_v58  ;;  %v3639_v42 = vadd.f32 %v8536_v22, %v3543_v26 }
 0x497   : > { %v7146_v13 = vpop.f32.mrf.mxu0 }
 0x498   : > { %v3546_v38 = vadd.f32 %v7144_v55, %v7032_v43  ;;  %7402 = vmatprep.mubr.msk.bf16.mxu1 %vm304_vm0, %v3701_v46  ;;  %v7147_v47 = vadd.f32 %v7146_v13, %v7145_v37  ;;  %v10814_v51 = vadd.f32 %v10755_v52, %v3639_v42  ;;  %v8541_v13 = vld [vmem:[%s8633_s29 + $0x78] sm:$0xff] }
 0x499   : > { %v7033_v6 = vpop.f32.mrf.mxu1  ;;  %v7148_v17 = vpop.f32.mrf.mxu0 }
 0x49a   : > { %v3640_v63 = vadd.f32 %v8537_v25, %v3546_v38  ;;  %14079 = vst [vmem:[#allocation84_spill] sm:$0xff] %v10814_v51 }
 0x49b   : > { %v7034_v11 = vpop.f32.mrf.mxu1  ;;  %v7149_v0 = vpop.f32.mrf.mxu0 }
 0x49c   : > { %v7035_v3 = vadd.f32 %v7034_v11, %v7033_v6  ;;  %v10817_v33 = vadd.f32 %v10755_v52, %v3640_v63  ;;  %v7150_v19 = vadd.f32 %v7149_v0, %v7148_v17 }
 0x49d   : > { %v7036_v27 = vpop.f32.mrf.mxu1  ;;  %v7151_v28 = vpop.f32.mrf.mxu0 }
 0x49e   : > { %14080 = vst [vmem:[#allocation82_spill] sm:$0xff] %v10817_v33  ;;  %v3551_v31 = vadd.f32 %v7147_v47, %v7035_v3  ;;  %v3702_v41 = vpack.c.bf16 %v10817_v33, %v10814_v51 }
 0x49f   : > { %v7037_v50 = vpop.f32.mrf.mxu1  ;;  %v7152_v49 = vpop.f32.mrf.mxu0 }
 0x4a0   : > { %v7038_v4 = vadd.f32 %v7037_v50, %v7036_v27  ;;  %v3641_v21 = vadd.f32 %v8538_v40, %v3551_v31  ;;  %7403 = vmatmul.mubr.msk.bf16.gmra.mxu1 %vm304_vm0, %v3702_v41  ;;  %v7153_v12 = vadd.f32 %v7152_v49, %v7151_v28  ;;  %v8542_v28 = vld [vmem:[%s8633_s29 + $0x80] sm:$0xff] }
 0x4a1   : > { %v7039_v5 = vpop.f32.mrf.mxu1  ;;  %v7154_v16 = vpop.f32.mrf.mxu0 }
 0x4a2   : > { %v3554_v44 = vadd.f32 %v7150_v19, %v7038_v4  ;;  %v10825_v39 = vadd.f32 %v10755_v52, %v3641_v21  ;;  %v8543_v19 = vld [vmem:[%s8633_s29 + $0x88] sm:$0xff] }
 0x4a3   : > { %v7040_v15 = vpop.f32.mrf.mxu1  ;;  %v7155_v57 = vpop.f32.mrf.mxu0 }
 0x4a4   : > { %v3642_v29 = vadd.f32 %v8539_v1, %v3554_v44  ;;  %v7041_v48 = vadd.f32 %v7040_v15, %v7039_v5  ;;  %14081 = vst [vmem:[#allocation88_spill] sm:$0xff] %v10825_v39  ;;  %v7156_v35 = vadd.f32 %v7155_v57, %v7154_v16 }
 0x4a5   : > { %v7042_v45 = vpop.f32.mrf.mxu1  ;;  %v7157_v60 = vpop.f32.mrf.mxu0 }
 0x4a6   : > { %v10828_v9 = vadd.f32 %v10755_v52, %v3642_v29  ;;  %v3559_v8 = vadd.f32 %v7153_v12, %v7041_v48 }
 0x4a7   : > { %v7043_v23 = vpop.f32.mrf.mxu1  ;;  %v7158_v7 = vpop.f32.mrf.mxu0 }
 0x4a8   : > { %14082 = vst [vmem:[#allocation85_spill] sm:$0xff] %v10828_v9  ;;  %v7044_v59 = vadd.f32 %v7043_v23, %v7042_v45  ;;  %v3703_v53 = vpack.c.bf16 %v10828_v9, %v10825_v39  ;;  %v3643_v34 = vadd.f32 %v8540_v56, %v3559_v8  ;;  %v7159_v43 = vadd.f32 %v7158_v7, %v7157_v60  ;;  %v8544_v23 = vld [vmem:[%s8633_s29 + $0x90] sm:$0xff] }
 0x4a9   : > { %v7045_v62 = vpop.f32.mrf.mxu1  ;;  %v7160_v32 = vpop.f32.mrf.mxu0  ;;  %v14101_v39 = vmov 1.0  }
 0x4aa   : > { %v3562_v37 = vadd.f32 %v7156_v35, %v7044_v59  ;;  %7406 = vmatprep.mubr.msk.bf16.mxu1 %vm304_vm0, %v3703_v53  ;;  %v10836_v22 = vadd.f32 %v10755_v52, %v3643_v34 }
 0x4ab   : > { %v7046_v26 = vpop.f32.mrf.mxu1  ;;  %v7161_v20 = vpop.f32.mrf.mxu0 }
 0x4ac   : > { %v3644_v55 = vadd.f32 %v8541_v13, %v3562_v37  ;;  %v7047_v46 = vadd.f32 %v7046_v26, %v7045_v62  ;;  %14083 = vst [vmem:[#allocation86_spill] sm:$0xff] %v10836_v22  ;;  %v7162_v63 = vadd.f32 %v7161_v20, %v7160_v32  ;;  %v8545_v62 = vld [vmem:[%s8633_s29 + $0x98] sm:$0xff] }
 0x4ad   : > { %v7048_v6 = vpop.f32.mrf.mxu1  ;;  %v7163_v17 = vpop.f32.mrf.mxu0 }
 0x4ae   : > { %v10839_v42 = vadd.f32 %v10755_v52, %v3644_v55  ;;  %v3567_v38 = vadd.f32 %v7159_v43, %v7047_v46 }
 0x4af   : > { %v7049_v11 = vpop.f32.mrf.mxu1  ;;  %v7164_v0 = vpop.f32.mrf.mxu0 }
 0x4b0   : > { %14084 = vst [vmem:[#allocation87_spill] sm:$0xff] %v10839_v42  ;;  %v3704_v25 = vpack.c.bf16 %v10839_v42, %v10836_v22  ;;  %v7050_v47 = vadd.f32 %v7049_v11, %v7048_v6  ;;  %v3645_v31 = vadd.f32 %v8542_v28, %v3567_v38  ;;  %v7165_v5 = vadd.f32 %v7164_v0, %v7163_v17  ;;  %v8547_v28 = vld [vmem:[%s8633_s29 + $0xa8] sm:$0xff] }
 0x4b1   : > { %v7051_v3 = vpop.f32.mrf.mxu1  ;;  %v7166_v27 = vpop.f32.mrf.mxu0 }
 0x4b2   : > { %v3570_v50 = vadd.f32 %v7162_v63, %v7050_v47  ;;  %7407 = vmatmul.mubr.msk.bf16.gmra.mxu1 %vm304_vm0, %v3704_v25  ;;  %v10847_v44 = vadd.f32 %v10755_v52, %v3645_v31  ;;  %v8546_v25 = vld [vmem:[%s8633_s29 + $0xa0] sm:$0xff] }
 0x4b3   : > { %v7052_v49 = vpop.f32.mrf.mxu1  ;;  %v7167_v41 = vpop.f32.mrf.mxu0 }
 0x4b4   : > { %v3646_v4 = vadd.f32 %v8543_v19, %v3570_v50  ;;  %v7053_v16 = vadd.f32 %v7052_v49, %v7051_v3  ;;  %14085 = vst [vmem:[#allocation90_spill] sm:$0xff] %v10847_v44  ;;  %v7168_v12 = vadd.f32 %v7167_v41, %v7166_v27 }
 0x4b5   : > { %v7054_v40 = vpop.f32.mrf.mxu1  ;;  %v7169_v21 = vpop.f32.mrf.mxu0 }
 0x4b6   : > { %v10850_v15 = vadd.f32 %v10755_v52, %v3646_v4  ;;  %v3575_v57 = vadd.f32 %v7165_v5, %v7053_v16 }
 0x4b7   : > { %v7055_v1 = vpop.f32.mrf.mxu1  ;;  %v7170_v29 = vpop.f32.mrf.mxu0 }
 0x4b8   : > { %14086 = vst [vmem:[#allocation89_spill] sm:$0xff] %v10850_v15  ;;  %v7056_v48 = vadd.f32 %v7055_v1, %v7054_v40  ;;  %v3705_v45 = vpack.c.bf16 %v10850_v15, %v10847_v44  ;;  %v3647_v7 = vadd.f32 %v8544_v23, %v3575_v57  ;;  %v7171_v56 = vadd.f32 %v7170_v29, %v7169_v21 }
 0x4b9   : > { %v7057_v60 = vpop.f32.mrf.mxu1  ;;  %v7172_v8 = vpop.f32.mrf.mxu0 }
 0x4ba   : > { %v3578_v35 = vadd.f32 %v7168_v12, %v7056_v48  ;;  %7410 = vmatprep.mubr.msk.bf16.mxu1 %vm304_vm0, %v3705_v45  ;;  %v10858_v20 = vadd.f32 %v10755_v52, %v3647_v7  ;;  %v8548_v45 = vld [vmem:[%s8633_s29 + $0xb0] sm:$0xff] }
 0x4bb   : > { %v7058_v59 = vpop.f32.mrf.mxu1  ;;  %v7173_v53 = vpop.f32.mrf.mxu0 }
 0x4bc   : > { %v3648_v32 = vadd.f32 %v8545_v62, %v3578_v35  ;;  %v7059_v34 = vadd.f32 %v7058_v59, %v7057_v60  ;;  %14087 = vst [vmem:[#allocation91_spill] sm:$0xff] %v10858_v20  ;;  %v7174_v17 = vadd.f32 %v7173_v53, %v7172_v8  ;;  %v8549_v35 = vld [vmem:[%s8633_s29 + $0xb8] sm:$0xff] }
 0x4bd   : > { %v7060_v37 = vpop.f32.mrf.mxu1  ;;  %v7175_v26 = vpop.f32.mrf.mxu0 }
 0x4be   : > { %v10861_v13 = vadd.f32 %v10755_v52, %v3648_v32  ;;  %v3583_v55 = vadd.f32 %v7171_v56, %v7059_v34 }
 0x4bf   : > { %v7061_v43 = vpop.f32.mrf.mxu1  ;;  %v7176_v46 = vpop.f32.mrf.mxu0 }
 0x4c0   : > { %14088 = vst [vmem:[#allocation94_spill] sm:$0xff] %v10861_v13  ;;  %v3706_v6 = vpack.c.bf16 %v10861_v13, %v10858_v20  ;;  %v7062_v38 = vadd.f32 %v7061_v43, %v7060_v37  ;;  %v3649_v63 = vadd.f32 %v8546_v25, %v3583_v55  ;;  %v7177_v50 = vadd.f32 %v7176_v46, %v7175_v26 }
 0x4c1   : > { %v7063_v11 = vpop.f32.mrf.mxu1  ;;  %v7178_v0 = vpop.f32.mrf.mxu0 }
 0x4c2   : > { %v3586_v47 = vadd.f32 %v7174_v17, %v7062_v38  ;;  %7411 = vmatmul.mubr.msk.bf16.gmra.mxu1 %vm304_vm0, %v3706_v6  ;;  %v10869_v4 = vadd.f32 %v10755_v52, %v3649_v63 }
 0x4c3   : > { %v7064_v3 = vpop.f32.mrf.mxu1  ;;  %v7179_v27 = vpop.f32.mrf.mxu0 }
 0x4c4   : > { %v3650_v31 = vadd.f32 %v8547_v28, %v3586_v47  ;;  %v7065_v49 = vadd.f32 %v7064_v3, %v7063_v11  ;;  %14089 = vst [vmem:[#allocation93_spill] sm:$0xff] %v10869_v4  ;;  %v7180_v57 = vadd.f32 %v7179_v27, %v7178_v0  ;;  %v8550_v0 = vld [vmem:[%s8633_s29 + $0xc0] sm:$0xff]  ;;  %v8551_v27 = vld [vmem:[%s8633_s29 + $0xc8] sm:$0xff] }
 0x4c5   : > { %v7066_v41 = vpop.f32.mrf.mxu1  ;;  %v7181_v19 = vpop.f32.mrf.mxu0 }
 0x4c6   : > { %v10872_v5 = vadd.f32 %v10755_v52, %v3650_v31  ;;  %v3591_v16 = vadd.f32 %v7177_v50, %v7065_v49 }
 0x4c7   : > { %v7067_v40 = vpop.f32.mrf.mxu1  ;;  %v7182_v21 = vpop.f32.mrf.mxu0 }
 0x4c8   : > { %14090 = vst [vmem:[#allocation96_spill] sm:$0xff] %v10872_v5  ;;  %v7068_v1 = vadd.f32 %v7067_v40, %v7066_v41  ;;  %v3707_v29 = vpack.c.bf16 %v10872_v5, %v10869_v4  ;;  %v3651_v60 = vadd.f32 %v8548_v45, %v3591_v16  ;;  %v7183_v53 = vadd.f32 %v7182_v21, %v7181_v19 }
 0x4c9   : > { %v7069_v12 = vpop.f32.mrf.mxu1  ;;  %v7184_v48 = vpop.f32.mrf.mxu0 }
 0x4ca   : > { %v3594_v8 = vadd.f32 %v7180_v57, %v7068_v1  ;;  %7414 = vmatprep.mubr.msk.bf16.mxu1 %vm304_vm0, %v3707_v29  ;;  %v10880_v34 = vadd.f32 %v10755_v52, %v3651_v60  ;;  %v8552_v60 = vld [vmem:[%s8633_s29 + $0xd0] sm:$0xff] }
 0x4cb   : > { %v7070_v23 = vpop.f32.mrf.mxu1  ;;  %v7185_v7 = vpop.f32.mrf.mxu0 }
 0x4cc   : > { %v3652_v59 = vadd.f32 %v8549_v35, %v3594_v8  ;;  %v7071_v62 = vadd.f32 %v7070_v23, %v7069_v12  ;;  %14091 = vst [vmem:[#allocation92_spill] sm:$0xff] %v10880_v34  ;;  %v7186_v6 = vadd.f32 %v7185_v7, %v7184_v48 }
 0x4cd   : > { %v7072_v32 = vpop.f32.mrf.mxu1  ;;  %v7187_v56 = vpop.f32.mrf.mxu0 }
 0x4ce   : > { %v10883_v37 = vadd.f32 %v10755_v52, %v3652_v59  ;;  %v3599_v26 = vadd.f32 %v7183_v53, %v7071_v62  ;;  %v8553_v59 = vld [vmem:[%s8633_s29 + $0xd8] sm:$0xff] }
 0x4cf   : > { %v7073_v55 = vpop.f32.mrf.mxu1  ;;  %v7188_v43 = vpop.f32.mrf.mxu0 }
 0x4d0   : > { %14092 = vst [vmem:[#allocation95_spill] sm:$0xff] %v10883_v37  ;;  %v3708_v46 = vpack.c.bf16 %v10883_v37, %v10880_v34  ;;  %v7074_v17 = vadd.f32 %v7073_v55, %v7072_v32  ;;  %v3653_v25 = vadd.f32 %v8550_v0, %v3599_v26  ;;  %v7189_v31 = vadd.f32 %v7188_v43, %v7187_v56 }
 0x4d1   : > { %v7075_v38 = vpop.f32.mrf.mxu1  ;;  %v7190_v11 = vpop.f32.mrf.mxu0 }
 0x4d2   : > { %v3602_v63 = vadd.f32 %v7186_v6, %v7074_v17  ;;  %7415 = vmatmul.mubr.msk.bf16.gmra.mxu1 %vm304_vm0, %v3708_v46  ;;  %v10891_v19 = vadd.f32 %v10755_v52, %v3653_v25 }
 0x4d3   : > { %v7076_v47 = vpop.f32.mrf.mxu1  ;;  %v7191_v3 = vpop.f32.mrf.mxu0 }
 0x4d4   : > { %v3654_v28 = vadd.f32 %v8551_v27, %v3602_v63  ;;  %v7077_v50 = vadd.f32 %v7076_v47, %v7075_v38  ;;  %14093 = vst [vmem:[#allocation98_spill] sm:$0xff] %v10891_v19  ;;  %v7192_v1 = vadd.f32 %v7191_v3, %v7190_v11  ;;  %v8554_v47 = vld [vmem:[%s8633_s29 + $0xe0] sm:$0xff] }
 0x4d5   : > { %v7078_v49 = vpop.f32.mrf.mxu1  ;;  %v7193_v41 = vpop.f32.mrf.mxu0 }
 0x4d6   : > { %v10894_v16 = vadd.f32 %v10755_v52, %v3654_v28  ;;  %v3607_v40 = vadd.f32 %v7189_v31, %v7077_v50  ;;  %v8555_v31 = vld [vmem:[%s8633_s29 + $0xe8] sm:$0xff] }
 0x4d7   : > { %v7079_v21 = vpop.f32.mrf.mxu1  ;;  %v7194_v57 = vpop.f32.mrf.mxu0 }
 0x4d8   : > { %14094 = vst [vmem:[#allocation97_spill] sm:$0xff] %v10894_v16  ;;  %v7080_v29 = vadd.f32 %v7079_v21, %v7078_v49  ;;  %v3709_v12 = vpack.c.bf16 %v10894_v16, %v10891_v19  ;;  %v3655_v8 = vadd.f32 %v8552_v60, %v3607_v40  ;;  %v7195_v62 = vadd.f32 %v7194_v57, %v7193_v41 }
 0x4d9   : > { %v7081_v48 = vpop.f32.mrf.mxu1  ;;  %v7196_v45 = vpop.f32.mrf.mxu0 }
 0x4da   : > { %v3610_v23 = vadd.f32 %v7192_v1, %v7080_v29  ;;  %7418 = vmatprep.mubr.msk.bf16.mxu1 %vm304_vm0, %v3709_v12  ;;  %v10902_v55 = vadd.f32 %v10755_v52, %v3655_v8  ;;  %v8556_v8 = vld [vmem:[%s8633_s29 + $0xf0] sm:$0xff] }
 0x4db   : > { %v7082_v7 = vpop.f32.mrf.mxu1  ;;  %v7197_v35 = vpop.f32.mrf.mxu0 }
 0x4dc   : > { %v3656_v53 = vadd.f32 %v8553_v59, %v3610_v23  ;;  %v7083_v32 = vadd.f32 %v7082_v7, %v7081_v48  ;;  %14095 = vst [vmem:[#allocation101_spill] sm:$0xff] %v10902_v55  ;;  %v7198_v11 = vadd.f32 %v7197_v35, %v7196_v45  ;;  %v8557_v35 = vld [vmem:[%s8633_s29 + $0xf8] sm:$0xff]  ;;  %s8570_s29 = smov 96  }
 0x4dd   : > { %v7084_v56 = vpop.f32.mrf.mxu1  ;;  %v7199_v26 = vpop.f32.mrf.mxu0 }
 0x4de   : > { %v10905_v43 = vadd.f32 %v10755_v52, %v3656_v53  ;;  %v3615_v46 = vadd.f32 %v7195_v62, %v7083_v32 }
 0x4df   : > { %v7085_v6 = vpop.f32.mrf.mxu1  ;;  %v7200_v17 = vpop.f32.mrf.mxu0 }
 0x4e0   : > { %14096 = vst [vmem:[#allocation100_spill] sm:$0xff] %v10905_v43  ;;  %v3710_v38 = vpack.c.bf16 %v10905_v43, %v10902_v55  ;;  %v7086_v0 = vadd.f32 %v7085_v6, %v7084_v56  ;;  %v3657_v3 = vadd.f32 %v8554_v47, %v3615_v46  ;;  %v7201_v49 = vadd.f32 %v7200_v17, %v7199_v26  ;;  %v10935_v56 = vld [vmem:[%s13359_s4 + $0x4] ss:$0 sm:$0xff] }
 0x4e1   : > { %v7087_v25 = vpop.f32.mrf.mxu1  ;;  %v7202_v63 = vpop.f32.mrf.mxu0 }
 0x4e2   : > { %v3618_v27 = vadd.f32 %v7198_v11, %v7086_v0  ;;  %7419 = vmatmul.mubr.msk.bf16.gmra.mxu1 %vm304_vm0, %v3710_v38  ;;  %v10913_v57 = vadd.f32 %v10755_v52, %v3657_v3 }
 0x4e3   : > { %v7088_v28 = vpop.f32.mrf.mxu1  ;;  %v7203_v40 = vpop.f32.mrf.mxu0 }
 0x4e4   : > { %v3658_v50 = vadd.f32 %v8555_v31, %v3618_v27  ;;  %v7089_v41 = vadd.f32 %v7088_v28, %v7087_v25  ;;  %14097 = vst [vmem:[#allocation99_spill] sm:$0xff] %v10913_v57  ;;  %v7204_v48 = vadd.f32 %v7203_v40, %v7202_v63 }
 0x4e5   : > { %v7090_v21 = vpop.f32.mrf.mxu1 }
 0x4e6   : > { %v10916_v1 = vadd.f32 %v10755_v52, %v3658_v50  ;;  %v3623_v29 = vadd.f32 %v7201_v49, %v7089_v41 }
 0x4e7   : > { %v7091_v12 = vpop.f32.mrf.mxu1 }
 0x4e8   : > { %14098 = vst [vmem:[#allocation17_spill] sm:$0xff] %v10916_v1  ;;  %v7092_v45 = vadd.f32 %v7091_v12, %v7090_v21  ;;  %v3711_v60 = vpack.c.bf16 %v10916_v1, %v10913_v57  ;;  %v3659_v23 = vadd.f32 %v8556_v8, %v3623_v29 }
 0x4ea   : > { %v3626_v7 = vadd.f32 %v7204_v48, %v7092_v45  ;;  %7422 = vmatprep.mubr.msk.bf16.mxu1 %vm304_vm0, %v3711_v60  ;;  %v10924_v53 = vadd.f32 %v10755_v52, %v3659_v23 }
 0x4ec   : > { %v3660_v59 = vadd.f32 %v8557_v35, %v3626_v7  ;;  %14099 = vst [vmem:[#allocation18_spill] sm:$0xff] %v10924_v53 }
 0x4ee   : > { %v10927_v62 = vadd.f32 %v10755_v52, %v3660_v59 }
 0x4f0   : > { %14100 = vst [vmem:[#allocation23_spill] sm:$0xff] %v10927_v62  ;;  %v3712_v32 = vpack.c.bf16 %v10927_v62, %v10924_v53 }
 0x4f2   : > { %7423 = vmatmul.mubr.msk.bf16.gmra.mxu1 %vm304_vm0, %v3712_v32 }
 0x53f   : > { %v7396_v26 = vpop.f32.mrf.mxu1 }
 0x540   : > { %v10938_v46 = vadd.f32 %v7396_v26, %v10935_v56 }
 0x541   : > { %v3805_v6 = vpop.f32.mrf.mxu1 }
 0x542   : > { %v10941_v17 = vmul.f32 0.70710677, %v10938_v46  ;;  %v10944_v52 = vadd.f32 %v10935_v56, %v3805_v6 }
 0x543   : > { %v7397_v38 = vpop.f32.mrf.mxu1 }
 0x544   : > { %v10947_v11 = vand.u32 2147483647, %v10941_v17  ;;  %v10950_v0 = vmul.f32 0.70710677, %v10944_v52  ;;  %v10953_v25 = vadd.f32 %v7397_v38, %v10935_v56  ;;  %vm3998_vm9 = vcmp.lt.f32.partialorder %v10941_v17, 0.0 }
 0x545   : > { %v3808_v63 = vpop.f32.mrf.mxu1 }
 0x546   : > { %v4094_v47 = vmul.f32 0.3275911, %v10947_v11  ;;  %v10957_v3 = vand.u32 2147483647, %v10950_v0  ;;  %v10960_v27 = vmul.f32 0.70710677, %v10953_v25  ;;  %v10963_v28 = vadd.f32 %v10935_v56, %v3808_v63 }
 0x547   : > { %v4510_v4 = vsub.f32 0.0, %v10947_v11  ;;  %vm3996_vm10 = vcmp.lt.f32.partialorder %v10950_v0, 0.0 }
 0x548   : > { %v4126_v31 = vadd.f32 1.0, %v4094_v47  ;;  %v4092_v50 = vmul.f32 0.3275911, %v10957_v3  ;;  %v10967_v49 = vand.u32 2147483647, %v10960_v27  ;;  %vm3999_vm11 = vcmp.lt.f32.partialorder %v10960_v27, 0.0 }
 0x549   : > { %v10970_v41 = vmul.f32 0.70710677, %v10963_v28  ;;  %v4031_v33 = vsel %vm3999_vm11, -1.0, %v14101_v39 }
 0x54a   : > { %v4124_v40 = vadd.f32 1.0, %v4092_v50  ;;  %v4095_v21 = vmul.f32 0.3275911, %v10967_v49  ;;  %8398 = vrcp.f32 %v4126_v31 }
 0x54b   : > { %v10974_v29 = vand.u32 2147483647, %v10970_v41  ;;  %vm3997_vm12 = vcmp.lt.f32.partialorder %v10970_v41, 0.0 }
 0x54c   : > { %8400 = vrcp.f32 %v4124_v40  ;;  %v4127_v12 = vadd.f32 1.0, %v4095_v21 }
 0x54d   : > { %v4093_v48 = vmul.f32 0.3275911, %v10974_v29 }
 0x54e   : > { %8402 = vrcp.f32 %v4127_v12 }
 0x54f   : > { %v4125_v60 = vadd.f32 1.0, %v4093_v48 }
 0x550   : > { %v7400_v45 = vpop.f32.mrf.mxu1 }
 0x551   : > { %v10978_v8 = vadd.f32 %v7400_v45, %v10935_v56  ;;  %8404 = vrcp.f32 %v4125_v60 }
 0x552   : > { %v3821_v23 = vpop.f32.mrf.mxu1 }
 0x553   : > { %v10981_v7 = vmul.f32 0.70710677, %v10978_v8  ;;  %v10984_v35 = vadd.f32 %v10935_v56, %v3821_v23  ;;  %v11124_v14 = vmul.f32 0.5, %v10978_v8 }
 0x554   : > { %v7401_v59 = vpop.f32.mrf.mxu1 }
 0x555   : > { %v10987_v32 = vadd.f32 %v7401_v59, %v10935_v56  ;;  %v10990_v26 = vmul.f32 0.70710677, %v10984_v35  ;;  %v10993_v6 = vand.u32 2147483647, %v10981_v7  ;;  %vm4002_vm13 = vcmp.lt.f32.partialorder %v10981_v7, 0.0 }
 0x556   : > { %v3824_v31 = vpop.f32.mrf.mxu1 }
 0x557   : > { %v10996_v38 = vand.u32 2147483647, %v10990_v26  ;;  %v10999_v63 = vmul.f32 0.70710677, %v10987_v32  ;;  %v11001_v47 = vpop.eup %8398  ;;  %v4098_v40 = vmul.f32 0.3275911, %v10993_v6  ;;  %v11014_v60 = vadd.f32 %v10935_v56, %v3824_v31 }
 0x558   : > { %v4222_v45 = vmul.f32 1.0614054, %v11001_v47  ;;  %vm4000_vm14 = vcmp.lt.f32.partialorder %v10990_v26, 0.0 }
 0x559   : > { %v11003_v50 = vpop.eup %8400  ;;  %v4096_v21 = vmul.f32 0.3275911, %v10996_v38  ;;  %v11008_v12 = vand.u32 2147483647, %v10999_v63  ;;  %v4130_v62 = vadd.f32 1.0, %v4098_v40  ;;  %vm4003_vm15 = vcmp.lt.f32.partialorder %v10999_v63, 0.0 }
 0x55a   : > { %v4220_v23 = vmul.f32 1.0614054, %v11003_v50  ;;  %v4254_v57 = vadd.f32 -1.4531521, %v4222_v45  ;;  %v11020_v43 = vmul.f32 0.70710677, %v11014_v60 }
 0x55b   : > { %v11010_v48 = vpop.eup %8402  ;;  %v4128_v53 = vadd.f32 1.0, %v4096_v21  ;;  %v4099_v1 = vmul.f32 0.3275911, %v11008_v12  ;;  %8406 = vrcp.f32 %v4130_v62  ;;  %v4508_v62 = vsub.f32 0.0, %v10957_v3 }
 0x55c   : > { %v4223_v59 = vmul.f32 1.0614054, %v11010_v48  ;;  %v4252_v16 = vadd.f32 -1.4531521, %v4220_v23  ;;  %v4286_v34 = vmul.f32 %v11001_v47, %v4254_v57  ;;  %v11027_v40 = vand.u32 2147483647, %v11020_v43 }
 0x55d   : > { %8408 = vrcp.f32 %v4128_v53  ;;  %v4131_v31 = vadd.f32 1.0, %v4099_v1  ;;  %v4511_v1 = vsub.f32 0.0, %v10967_v49  ;;  %v4540_v15 = vmul.f32 %v4508_v62, %v10957_v3 }
 0x55e   : > { %v11022_v55 = vpop.eup %8404  ;;  %v4255_v19 = vadd.f32 -1.4531521, %v4223_v59  ;;  %v4284_v21 = vmul.f32 %v11003_v50, %v4252_v16  ;;  %v4318_v57 = vadd.f32 1.4214138, %v4286_v34  ;;  %v4097_v59 = vmul.f32 0.3275911, %v11027_v40 }
 0x55f   : > { %v4221_v5 = vmul.f32 1.0614054, %v11022_v55  ;;  %8410 = vrcp.f32 %v4131_v31  ;;  %v4543_v44 = vmul.f32 %v4511_v1, %v10967_v49  ;;  %v4572_v3 = vmul.f32 1.442695, %v4540_v15 }
 0x560   : > { %v7404_v37 = vpop.f32.mrf.mxu1  ;;  %v4287_v23 = vmul.f32 %v11010_v48, %v4255_v19  ;;  %v4316_v13 = vadd.f32 1.4214138, %v4284_v21  ;;  %v4350_v19 = vmul.f32 %v11001_v47, %v4318_v57  ;;  %v4129_v31 = vadd.f32 1.0, %v4097_v59 }
 0x561   : > { %v11031_v45 = vadd.f32 %v7404_v37, %v10935_v56  ;;  %v4253_v53 = vadd.f32 -1.4531521, %v4221_v5  ;;  %v4542_v37 = vmul.f32 %v4510_v4, %v10947_v11  ;;  %v4509_v4 = vsub.f32 0.0, %v10974_v29 }
 0x562   : > { %v4319_v16 = vadd.f32 1.4214138, %v4287_v23  ;;  %v4348_v5 = vmul.f32 %v11003_v50, %v4316_v13  ;;  %v4382_v62 = vadd.f32 -0.28449672, %v4350_v19  ;;  %v4578_v49 = vmul.f32 1.442695, %v4543_v44 }
 0x563   : > { %v11039_v20 = vmul.f32 0.70710677, %v11031_v45  ;;  %v4285_v42 = vmul.f32 %v11022_v55, %v4253_v53  ;;  %v4576_v21 = vmul.f32 1.442695, %v4542_v37  ;;  %8412 = vrcp.f32 %v4129_v31 }
 0x564   : > { %v4351_v22 = vmul.f32 %v11010_v48, %v4319_v16  ;;  %v4380_v57 = vadd.f32 -0.28449672, %v4348_v5  ;;  %v4541_v59 = vmul.f32 %v4509_v4, %v10974_v29  ;;  %v4414_v15 = vmul.f32 %v11001_v47, %v4382_v62  ;;  %v3837_v29 = vpop.f32.mrf.mxu1 }
 0x565   : > { %v11048_v34 = vand.u32 2147483647, %v11039_v20  ;;  %v4317_v1 = vadd.f32 1.4214138, %v4285_v42  ;;  %8414 = vpow2.f32 %v4576_v21  ;;  %v11067_v21 = vmul.f32 0.5, %v10938_v46 }
 0x566   : > { %v4383_v53 = vadd.f32 -0.28449672, %v4351_v22  ;;  %8416 = vpow2.f32 %v4572_v3  ;;  %v4412_v44 = vmul.f32 %v11003_v50, %v4380_v57  ;;  %v4574_v22 = vmul.f32 1.442695, %v4541_v59 }
 0x567   : > { %v4102_v13 = vmul.f32 0.3275911, %v11048_v34  ;;  %8418 = vpow2.f32 %v4578_v49  ;;  %v4349_v42 = vmul.f32 %v11022_v55, %v4317_v1  ;;  %v4446_v62 = vadd.f32 0.2548296, %v4414_v15 }
 0x568   : > { %v11052_v11 = vpop.eup %8406  ;;  %v4415_v31 = vmul.f32 %v11010_v48, %v4383_v53  ;;  %v11072_v49 = vmul.f32 0.5, %v10944_v52  ;;  %v4444_v57 = vadd.f32 0.2548296, %v4412_v44  ;;  %v4514_v59 = vsub.f32 0.0, %v10993_v6 }
 0x569   : > { %v4226_v37 = vmul.f32 1.0614054, %v11052_v11  ;;  %v4134_v19 = vadd.f32 1.0, %v4102_v13  ;;  %v4381_v1 = vadd.f32 -0.28449672, %v4349_v42  ;;  %v11076_v13 = vadd.f32 %v10935_v56, %v3837_v29 }
 0x56a   : > { %v11054_v23 = vpop.eup %8408  ;;  %v4447_v53 = vadd.f32 0.2548296, %v4415_v31  ;;  %v4478_v0 = vmul.f32 %v11001_v47, %v4446_v62  ;;  %v11086_v44 = vmul.f32 0.5, %v10953_v25  ;;  %vm4001_vm2 = vcmp.lt.f32.partialorder %v11020_v43, 0.0 }
 0x56b   : > { %v4224_v16 = vmul.f32 1.0614054, %v11054_v23  ;;  %v4258_v5 = vadd.f32 -1.4531521, %v4226_v37  ;;  %8420 = vrcp.f32 %v4134_v19  ;;  %v13581_v37 = vmov 1.0  }
 0x56c   : > { %v11060_v9 = vpop.eup %8410  ;;  %8422 = vpow2.f32 %v4574_v22  ;;  %v4030_v17 = vsel %vm3998_vm9, -1.0, %v13581_v37  ;;  %v4028_v42 = vsel %vm3996_vm10, -1.0, %v13581_v37  ;;  %v4413_v19 = vmul.f32 %v11022_v55, %v4381_v1 }
 0x56d   : > { %v4256_v4 = vadd.f32 -1.4531521, %v4224_v16  ;;  %v4227_v3 = vmul.f32 1.0614054, %v11060_v9  ;;  %v4290_v46 = vmul.f32 %v11052_v11, %v4258_v5  ;;  %v4512_v16 = vsub.f32 0.0, %v10996_v38 }
 0x56e   : > { %v4476_v22 = vmul.f32 %v11003_v50, %v4444_v57  ;;  %v11094_v5 = vmul.f32 0.5, %v10963_v28  ;;  %v11097_v29 = vmul.f32 0.70710677, %v11076_v13  ;;  %v4479_v47 = vmul.f32 %v11010_v48, %v4447_v53 }
 0x56f   : > { %v4288_v52 = vmul.f32 %v11054_v23, %v4256_v4  ;;  %v4259_v15 = vadd.f32 -1.4531521, %v4227_v3  ;;  %v4322_v25 = vadd.f32 1.4214138, %v4290_v46  ;;  %v4546_v4 = vmul.f32 %v4514_v59, %v10993_v6  ;;  %v7405_v3 = vpop.f32.mrf.mxu1 }
 0x570   : > { %v11089_v31 = vpop.eup %8412  ;;  %v4544_v50 = vmul.f32 %v4512_v16, %v10996_v38  ;;  %v4515_v28 = vsub.f32 0.0, %v11008_v12  ;;  %v4445_v51 = vadd.f32 0.2548296, %v4413_v19  ;;  %v11110_v6 = vsel %vm3997_vm12, -1.0, %v14101_v39 }
 0x571   : > { %v4320_v1 = vadd.f32 1.4214138, %v4288_v52  ;;  %v4291_v27 = vmul.f32 %v11060_v9, %v4259_v15  ;;  %v4225_v48 = vmul.f32 1.0614054, %v11089_v31  ;;  %v11113_v38 = vand.u32 2147483647, %v11097_v29 }
 0x572   : > { %v8415_v62 = vpop.eup %8414  ;;  %v11116_v59 = vadd.f32 %v7405_v3, %v10935_v56  ;;  %v4354_v16 = vmul.f32 %v11052_v11, %v4322_v25  ;;  %v4584_v15 = vmul.f32 1.442695, %v4546_v4  ;;  %v4580_v19 = vmul.f32 1.442695, %v4544_v50 }
 0x573   : > { %v8417_v57 = vpop.eup %8416  ;;  %v4638_v37 = vmul.f32 %v8415_v62, %v4478_v0  ;;  %v4352_v0 = vmul.f32 %v11054_v23, %v4320_v1  ;;  %v4547_v41 = vmul.f32 %v4515_v28, %v11008_v12  ;;  %v4257_v3 = vadd.f32 -1.4531521, %v4225_v48 }
 0x574   : > { %v8419_v53 = vpop.eup %8418  ;;  %v4636_v46 = vmul.f32 %v8417_v57, %v4476_v22  ;;  %v4323_v22 = vadd.f32 1.4214138, %v4291_v27  ;;  %v4477_v57 = vmul.f32 %v11022_v55, %v4445_v51  ;;  %v4100_v7 = vmul.f32 0.3275911, %v11113_v38  ;;  %v3840_v27 = vpop.f32.mrf.mxu1 }
 0x575   : > { %v4639_v52 = vmul.f32 %v8419_v53, %v4479_v47  ;;  %v4670_v62 = vsub.f32 1.0, %v4638_v37  ;;  %v11127_v47 = vsel %vm4002_vm13, -1.0, %v14101_v39  ;;  %v11131_v25 = vmul.f32 0.70710677, %v11116_v59 }
 0x576   : > { %v4668_v58 = vsub.f32 1.0, %v4636_v46  ;;  %v4386_v12 = vadd.f32 -0.28449672, %v4354_v16  ;;  %8424 = vpow2.f32 %v4584_v15  ;;  %v11136_v51 = vmul.f32 0.5, %v10984_v35 }
 0x577   : > { %v4671_v1 = vsub.f32 1.0, %v4639_v52  ;;  %v4384_v8 = vadd.f32 -0.28449672, %v4352_v0  ;;  %8426 = vpow2.f32 %v4580_v19  ;;  %v4355_v37 = vmul.f32 %v11060_v9, %v4323_v22 }
 0x578   : > { %v11133_v4 = vpop.eup %8420  ;;  %v4586_v50 = vmul.f32 1.442695, %v4547_v41  ;;  %v4702_v28 = vmul.f32 %v4670_v62, %v4030_v17  ;;  %v4289_v53 = vmul.f32 %v11089_v31, %v4257_v3  ;;  %v4513_v46 = vsub.f32 0.0, %v11027_v40 }
 0x579   : > { %v8423_v55 = vpop.eup %8422  ;;  %v4700_v2 = vmul.f32 %v4668_v58, %v4028_v42  ;;  %v4230_v52 = vmul.f32 1.0614054, %v11133_v4  ;;  %v4132_v16 = vadd.f32 1.0, %v4100_v7  ;;  %v11143_v35 = vand.u32 2147483647, %v11131_v25 }
 0x57a   : > { %v4637_v48 = vmul.f32 %v8423_v55, %v4477_v57  ;;  %v4703_v15 = vmul.f32 %v4671_v1, %v4031_v33  ;;  %v4418_v0 = vmul.f32 %v11052_v11, %v4386_v12  ;;  %v11148_v19 = vadd.f32 %v10935_v56, %v3840_v27 }
 0x57b   : > { %v4416_v17 = vmul.f32 %v11054_v23, %v4384_v8  ;;  %v4387_v22 = vadd.f32 -0.28449672, %v4355_v37  ;;  %v4103_v58 = vmul.f32 0.3275911, %v11143_v35  ;;  %8428 = vpow2.f32 %v4586_v50 }
 0x57c   : > { %v4669_v42 = vsub.f32 1.0, %v4637_v48  ;;  %v4321_v41 = vadd.f32 1.4214138, %v4289_v53  ;;  %v4545_v62 = vmul.f32 %v4513_v46, %v11027_v40  ;;  %v4734_v33 = vadd.f32 1.0, %v4702_v28  ;;  %v7408_v40 = vpop.f32.mrf.mxu1 }
 0x57d   : > { %v4732_v57 = vadd.f32 1.0, %v4700_v2  ;;  %v4262_v3 = vadd.f32 -1.4531521, %v4230_v52  ;;  %8430 = vrcp.f32 %v4132_v16  ;;  %v4735_v7 = vadd.f32 1.0, %v4703_v15 }
 0x57e   : > { %v4450_v1 = vadd.f32 0.2548296, %v4418_v0  ;;  %v4135_v12 = vadd.f32 1.0, %v4103_v58  ;;  %v11155_v55 = vmul.f32 0.70710677, %v11148_v19  ;;  %v11160_v8 = vsel %vm4000_vm14, -1.0, %v14101_v39 }
 0x57f   : > { %v4448_v37 = vadd.f32 0.2548296, %v4416_v17  ;;  %v11163_v50 = vmul.f32 0.5, %v10987_v32  ;;  %v4419_v2 = vmul.f32 %v11060_v9, %v4387_v22  ;;  %v4701_v27 = vmul.f32 %v4669_v42, %v11110_v6  ;;  %v3853_v17 = vpop.f32.mrf.mxu1 }
 0x580   : > { %v11170_v28 = vsel %vm4003_vm15, -1.0, %v14101_v39  ;;  %v4353_v26 = vmul.f32 %v11089_v31, %v4321_v41  ;;  %v4766_v48 = vmul.f32 %v4734_v33, %v11067_v21  ;;  %v11176_v53 = vmul.f32 %v4732_v57, %v11072_v49 }
 0x581   : > { %v4582_v32 = vmul.f32 1.442695, %v4545_v62  ;;  %v4294_v46 = vmul.f32 %v11133_v4, %v4262_v3  ;;  %v4767_v52 = vmul.f32 %v4735_v7, %v11086_v44  ;;  %v4482_v6 = vmul.f32 %v11052_v11, %v4450_v1 }
 0x582   : > { %8432 = vrcp.f32 %v4135_v12  ;;  %v11182_v63 = vand.u32 2147483647, %v11155_v55  ;;  %v4480_v15 = vmul.f32 %v11054_v23, %v4448_v37  ;;  %v4451_v0 = vadd.f32 0.2548296, %v4419_v2  ;;  %v7409_v12 = vpop.f32.mrf.mxu1 }
 0x583   : > { %v8425_v16 = vpop.eup %8424  ;;  %v11186_v21 = vmul.f32 0.5, %v11014_v60  ;;  %v4518_v49 = vsub.f32 0.0, %v11048_v34  ;;  %v4733_v58 = vadd.f32 1.0, %v4701_v27  ;;  %v11192_v11 = vsel %vm4001_vm2, -1.0, %v14101_v39 }
 0x584   : > { %v8427_v22 = vpop.eup %8426  ;;  %v4385_v44 = vadd.f32 -0.28449672, %v4353_v26  ;;  %v11195_v42 = vadd.f32 %v7408_v40, %v10935_v56  ;;  %v4832_v41 = vrot.slane %v4766_v48, 7  ;;  %8434 = vpow2.f32 %v4582_v32 }
 0x585   : > { %vm4006_vm3 = vcmp.lt.f32.partialorder %v11039_v20, 0.0  ;;  %v4326_v60 = vadd.f32 1.4214138, %v4294_v46  ;;  %v4829_v23 = vrot.slane %v11176_v53, 7  ;;  %v4833_v62 = vrot.slane %v4767_v52, 7 }
 0x586   : > { %v4642_v33 = vmul.f32 %v8425_v16, %v4482_v6  ;;  %v4101_v57 = vmul.f32 0.3275911, %v11182_v63  ;;  %v4925_v3 = vrot.slane %v4767_v52, 6  ;;  %v4640_v7 = vmul.f32 %v8427_v22, %v4480_v15 }
 0x587   : > { %v4483_v43 = vmul.f32 %v11060_v9, %v4451_v0  ;;  %v4550_v1 = vmul.f32 %v4518_v49, %v11048_v34  ;;  %v4765_v37 = vmul.f32 %v4733_v58, %v11094_v5  ;;  %v4417_v2 = vmul.f32 %v11089_v31, %v4385_v44  ;;  %v3856_v49 = vpop.f32.mrf.mxu1 }
 0x588   : > { %v11205_v40 = vmul.f32 0.5, %v11031_v45  ;;  %v11208_v27 = vmul.f32 0.70710677, %v11195_v42  ;;  %v8429_v26 = vpop.eup %8428  ;;  %v11213_v32 = vsel %vm4006_vm3, -1.0, %v14101_v39  ;;  %v4358_v9 = vmul.f32 %v11133_v4, %v4326_v60 }
 0x589   : > { %v11217_v34 = vmul.f32 0.5, %v11076_v13  ;;  %v11220_v5 = vadd.f32 %v10935_v56, %v3853_v17  ;;  %v11225_v45 = vsel %vm4828_vm1, %v4766_v48, %v4832_v41  ;;  %v11229_v52 = vsel %vm4828_vm1, %v11176_v53, %v4829_v23  ;;  %v7412_v24 = vpop.f32.mrf.mxu1 }
 0x58a   : > { %v11222_v46 = vpop.eup %8430  ;;  %14102 = vst [vmem:[#allocation10_spill] sm:$0xff] %v11225_v45  ;;  %14103 = vst [vmem:[#allocation11_spill] sm:$0xff] %v11229_v52  ;;  %v4674_v20 = vsub.f32 1.0, %v4642_v33  ;;  %vm4004_vm4 = vcmp.lt.f32.partialorder %v11097_v29, 0.0  ;;  %v4133_v6 = vadd.f32 1.0, %v4101_v57  ;;  %v11233_v16 = vsel %vm4828_vm1, %v4833_v62, %v4925_v3 }
 0x58b   : > { %v4672_v13 = vsub.f32 1.0, %v4640_v7  ;;  %v4643_v15 = vmul.f32 %v8429_v26, %v4483_v43  ;;  %v4592_v0 = vmul.f32 1.442695, %v4550_v1  ;;  %v4830_v17 = vrot.slane %v4765_v37, 7 }
 0x58c   : > { %v4449_v22 = vadd.f32 0.2548296, %v4417_v2  ;;  %v11236_v48 = vand.u32 2147483647, %v11208_v27  ;;  %v11239_v58 = vadd.f32 %v7409_v12, %v10935_v56  ;;  %v11242_v53 = vsel %vm4828_vm1, %v4832_v41, %v4833_v62 }
 0x58d   : > { %14104 = vst [vmem:[#allocation24_spill] sm:$0xff] %v11242_v53  ;;  %v4390_v44 = vadd.f32 -0.28449672, %v4358_v9  ;;  %v4228_v60 = vmul.f32 1.0614054, %v11222_v46  ;;  %v4706_v3 = vmul.f32 %v4674_v20, %v11127_v47  ;;  %8436 = vrcp.f32 %v4133_v6 }
 0x58e   : > { %v11246_v33 = vmul.f32 0.70710677, %v11220_v5  ;;  %v11251_v7 = vadd.f32 %v10935_v56, %v3856_v49  ;;  %v4924_v1 = vrot.slane %v4765_v37, 6  ;;  %v4704_v41 = vmul.f32 %v4672_v13, %v11160_v8 }
 0x58f   : > { %v11253_v43 = vpop.eup %8432  ;;  %v4675_v62 = vsub.f32 1.0, %v4643_v15  ;;  %8438 = vpow2.f32 %v4592_v0  ;;  %v11257_v12 = vsel %vm4828_vm1, %v4829_v23, %v4830_v17  ;;  %v4481_v2 = vmul.f32 %v11089_v31, %v4449_v22 }
 0x590   : > { %14105 = vst [vmem:[#allocation30_spill] sm:$0xff] %v11257_v12  ;;  %v4106_v26 = vmul.f32 0.3275911, %v11236_v48  ;;  %v11262_v47 = vmul.f32 0.70710677, %v11239_v58  ;;  %v4422_v9 = vmul.f32 %v11133_v4, %v4390_v44  ;;  %v7461_v8 = vpack.i.bf16 %v11242_v53, %v11225_v45 }
 0x591   : > { %v4260_v20 = vadd.f32 -1.4531521, %v4228_v60  ;;  %v11266_v6 = vand.u32 2147483647, %v11246_v33  ;;  %v8435_v37 = vpop.eup %8434  ;;  %v4738_v13 = vadd.f32 1.0, %v4706_v3  ;;  %v4516_v23 = vsub.f32 0.0, %v11113_v38 }
 0x592   : > { %v4231_v31 = vmul.f32 1.0614054, %v11253_v43  ;;  %v11273_v15 = vmul.f32 0.70710677, %v11251_v7  ;;  %v4736_v49 = vadd.f32 1.0, %v4704_v41  ;;  %v4707_v22 = vmul.f32 %v4675_v62, %v11170_v28  ;;  %7462 = vrot.lane.b32.xlu1 %v7461_v8, %s8570_s29 }
 0x593   : > { %v7471_v44 = vpack.i.bf16 %v11257_v12, %v11229_v52  ;;  %v11281_v60 = vsel %vm4828_vm1, %v4830_v17, %v4924_v1  ;;  %v4641_v3 = vmul.f32 %v8435_v37, %v4481_v2  ;;  %v4138_v57 = vadd.f32 1.0, %v4106_v26 }
 0x594   : > { %v11284_v54 = vand.u32 2147483647, %v11262_v47  ;;  %v4454_v36 = vadd.f32 0.2548296, %v4422_v9  ;;  %v11289_v28 = vsel %vm4004_vm4, -1.0, %v14101_v39  ;;  %v4292_v41 = vmul.f32 %v11222_v46, %v4260_v20 }
 0x595   : > { %v4104_v62 = vmul.f32 0.3275911, %v11266_v6  ;;  %7472 = vrot.lane.b32.xlu0 %v7471_v44, %s8571_s25  ;;  %v11295_v17 = vmul.f32 %v4738_v13, %v11124_v14  ;;  %v4548_v1 = vmul.f32 %v4516_v23, %v11113_v38  ;;  %v4263_v2 = vadd.f32 -1.4531521, %v4231_v31 }
 0x596   : > { %v11299_v26 = vand.u32 2147483647, %v11273_v15  ;;  %v11303_v9 = vmul.f32 %v4736_v49, %v11136_v51  ;;  %v4739_v20 = vadd.f32 1.0, %v4707_v22  ;;  %v11306_v37 = vadd.f32 %v7412_v24, %v10935_v56  ;;  %7467 = vrot.lane.b32.xlu1 %v7461_v8, %s8571_s25 }
 0x597   : > { %v4673_v0 = vsub.f32 1.0, %v4641_v3  ;;  %8440 = vrcp.f32 %v4138_v57  ;;  %v4107_v14 = vmul.f32 0.3275911, %v11284_v54  ;;  %v4486_v38 = vmul.f32 %v11133_v4, %v4454_v36 }
 0x598   : > { %v4324_v13 = vadd.f32 1.4214138, %v4292_v41  ;;  %v11312_v23 = vmul.f32 0.5, %v11116_v59  ;;  %v4136_v31 = vadd.f32 1.0, %v4104_v62  ;;  %v4838_v51 = vrot.slane %v11295_v17, 7 }
 0x599   : > { %v4588_v49 = vmul.f32 1.442695, %v4548_v1  ;;  %v4295_v22 = vmul.f32 %v11253_v43, %v4263_v2  ;;  %v4105_v24 = vmul.f32 0.3275911, %v11299_v26  ;;  %v4771_v3 = vmul.f32 %v4739_v20, %v11163_v50 }
 0x59a   : > { %v11317_v29 = vpop.eup %8436  ;;  %v4519_v36 = vsub.f32 0.0, %v11143_v35  ;;  %v11323_v4 = vmul.f32 0.70710677, %v11306_v37  ;;  %v4705_v41 = vmul.f32 %v4673_v0, %v11192_v11  ;;  %v4139_v62 = vadd.f32 1.0, %v4107_v14 }
 0x59b   : > { %v5191_v1 = vrot.slane %v11242_v53, 2  ;;  %v4356_v44 = vmul.f32 %v11222_v46, %v4324_v13  ;;  %vm4007_vm6 = vcmp.lt.f32.partialorder %v11131_v25, 0.0  ;;  %8442 = vrcp.f32 %v4136_v31 }
 0x59c   : > { %v8439_v59 = vpop.eup %8438  ;;  %v4327_v57 = vadd.f32 1.4214138, %v4295_v22  ;;  %v4229_v50 = vmul.f32 1.0614054, %v11317_v29  ;;  %v4137_v20 = vadd.f32 1.0, %v4105_v24  ;;  %v5190_v18 = vrot.slane %v11225_v45, 2 }
 0x59d   : > { %v4646_v2 = vmul.f32 %v8439_v59, %v4486_v38  ;;  %v4839_v10 = vrot.slane %v4771_v3, 7  ;;  %v4927_v61 = vrot.slane %v4771_v3, 6  ;;  %v4551_v11 = vmul.f32 %v4519_v36, %v11143_v35 }
 0x59e   : > { %v11334_v0 = vand.u32 2147483647, %v11323_v4  ;;  %v4737_v14 = vadd.f32 1.0, %v4705_v41  ;;  %8444 = vrcp.f32 %v4139_v62  ;;  %v11337_v38 = vsel %vm5184_vm5, %v5190_v18, %v5191_v1  ;;  %v3869_v62 = vpop.f32.mrf.mxu1 }
 0x59f   : > { %v14106_v13 = vrot.slane %v11233_v16, 2  ;;  %v11346_v8 = vsel %vm4828_vm1, %v11295_v17, %v4838_v51  ;;  %v4678_v22 = vsub.f32 1.0, %v4646_v2  ;;  %v4388_v24 = vadd.f32 -0.28449672, %v4356_v44 }
 0x5a0   : > { %14107 = vst [vmem:[#allocation14_spill] sm:$0xff] %v11346_v8  ;;  %8446 = vpow2.f32 %v4588_v49  ;;  %v11351_v35 = vsel %vm4007_vm6, -1.0, %v14101_v39  ;;  %v4359_v18 = vmul.f32 %v11253_v43, %v4327_v57  ;;  %v4261_v3 = vadd.f32 -1.4531521, %v4229_v50 }
 0x5a1   : > { %v11342_v31 = vsel %vm5184_vm5, %v5191_v1, %v14106_v13  ;;  %8448 = vrcp.f32 %v4137_v20  ;;  %v4594_v36 = vmul.f32 1.442695, %v4551_v11  ;;  %v4517_v59 = vsub.f32 0.0, %v11182_v63 }
 0x5a2   : > { %v4110_v41 = vmul.f32 0.3275911, %v11334_v0  ;;  %v6087_v17 = vpack.c.bf16 %v11342_v31, %v11337_v38  ;;  %v14108_v44 = vrot.slane %v11303_v9, 7  ;;  %v11365_v49 = vsel %vm4828_vm1, %v4839_v10, %v4927_v61 }
 0x5a3   : > { %14110 = vst [vmem:[#allocation29_spill] sm:$0xff] %v11365_v49  ;;  %v4769_v57 = vmul.f32 %v4737_v14, %v11186_v21  ;;  %v11369_v1 = vmul.f32 0.5, %v11148_v19  ;;  %v11374_v50 = vsel %vm4828_vm1, %v4838_v51, %v4839_v10  ;;  %v4710_v20 = vmul.f32 %v4678_v22, %v11213_v32 }
 0x5a4   : > { %v11362_v25 = vsel %vm4828_vm1, %v11303_v9, %v14108_v44  ;;  %v11371_v2 = vpop.eup %8440  ;;  %14111 = vst [vmem:[#allocation3_spill] sm:$0xff] %v11374_v50  ;;  %v4420_v11 = vmul.f32 %v11222_v46, %v4388_v24  ;;  %v11379_v13 = vmul.f32 0.5, %v11195_v42  ;;  %6780 = vmatprep.mubr.msk.bf16.mxu0 %vm304_vm0, %v6087_v17  ;;  %v4391_v61 = vadd.f32 -0.28449672, %v4359_v18  ;;  %v7413_v18 = vpop.f32.mrf.mxu1 }
 0x5a5   : > { %14109 = vst [vmem:[#allocation20_spill] sm:$0xff] %v11362_v25  ;;  %vm4005_vm7 = vcmp.lt.f32.partialorder %v11155_v55, 0.0  ;;  %v4293_v19 = vmul.f32 %v11317_v29, %v4261_v3  ;;  %v11385_v21 = vadd.f32 %v10935_v56, %v3869_v62  ;;  %8450 = vpow2.f32 %v4594_v36 }
 0x5a6   : > { %v4549_v32 = vmul.f32 %v4517_v59, %v11182_v63  ;;  %v4142_v51 = vadd.f32 1.0, %v4110_v41  ;;  %v4836_v14 = vrot.slane %v4769_v57, 7  ;;  %v4926_v22 = vrot.slane %v4769_v57, 6 }
 0x5a7   : > { %v4234_v42 = vmul.f32 1.0614054, %v11371_v2  ;;  %v4522_v24 = vsub.f32 0.0, %v11236_v48  ;;  %v4742_v17 = vadd.f32 1.0, %v4710_v20  ;;  %v4452_v44 = vadd.f32 0.2548296, %v4420_v11 }
 0x5a8   : > { %vm4010_vm8 = vcmp.lt.f32.partialorder %v11208_v27, 0.0  ;;  %v11393_v3 = vpop.eup %8442  ;;  %v4423_v62 = vmul.f32 %v11253_v43, %v4391_v61  ;;  %v11399_v63 = vsel %vm4005_vm7, -1.0, %v14101_v39  ;;  %v4325_v36 = vadd.f32 1.4214138, %v4293_v19 }
 0x5a9   : > { %v11402_v59 = vmul.f32 0.70710677, %v11385_v21  ;;  %v4590_v41 = vmul.f32 1.442695, %v4549_v32  ;;  %v11405_v57 = vmul.f32 0.5, %v11220_v5  ;;  %vm4008_vm9 = vcmp.lt.f32.partialorder %v11246_v33, 0.0 }
 0x5aa   : > { %8452 = vrcp.f32 %v4142_v51  ;;  %v11409_v27 = vsel %vm4828_vm1, %v4836_v14, %v4926_v22  ;;  %v11412_v20 = vsel %vm4010_vm8, -1.0, %v14101_v39  ;;  %v4266_v55 = vadd.f32 -1.4531521, %v4234_v42 }
 0x5ab   : > { %14112 = vst [vmem:[#allocation15_spill] sm:$0xff] %v11405_v57  ;;  %14113 = vst [vmem:[#allocation21_spill] sm:$0xff] %v11409_v27  ;;  %v4554_v11 = vmul.f32 %v4522_v24, %v11236_v48  ;;  %v11415_v61 = vpop.eup %8444  ;;  %v14114_v19 = vrot.slane %v11303_v9, 7  ;;  %v11423_v5 = vmul.f32 %v4742_v17, %v11205_v40  ;;  %v4484_v51 = vmul.f32 %v11222_v46, %v4452_v44 }
 0x5ac   : > { %v4232_v22 = vmul.f32 1.0614054, %v11393_v3  ;;  %v4455_v30 = vadd.f32 0.2548296, %v4423_v62  ;;  %v4357_v42 = vmul.f32 %v11317_v29, %v4325_v36  ;;  %v4520_v48 = vsub.f32 0.0, %v11266_v6 }
 0x5ad   : > { %v11420_v32 = vsel %vm4828_vm1, %v14114_v19, %v4836_v14  ;;  %v8447_v10 = vpop.eup %8446  ;;  %v11430_v24 = vand.u32 2147483647, %v11402_v59  ;;  %8454 = vpow2.f32 %v4590_v41  ;;  %v11439_v46 = vsel %vm4008_vm9, -1.0, %v14101_v39 }
 0x5ae   : > { %14115 = vst [vmem:[#allocation2_spill] sm:$0xff] %v11420_v32  ;;  %v11432_v9 = vpop.eup %8448  ;;  %v4298_v17 = vmul.f32 %v11371_v2, %v4266_v55  ;;  %v4600_v44 = vmul.f32 1.442695, %v4554_v11  ;;  %v4235_v62 = vmul.f32 1.0614054, %v11415_v61  ;;  %v11444_v36 = vadd.f32 %v7413_v18, %v10935_v56 }
 0x5af   : > { %vm5018_vm10 = vcmask 1046528   ;;  %v4644_v14 = vmul.f32 %v8447_v10, %v4484_v51  ;;  %v4264_v57 = vadd.f32 -1.4531521, %v4232_v22  ;;  %v4108_v41 = vmul.f32 0.3275911, %v11430_v24 }
 0x5b0   : > { %v4487_v40 = vmul.f32 %v11253_v43, %v4455_v30  ;;  %v4389_v33 = vadd.f32 -0.28449672, %v4357_v42  ;;  %v4552_v27 = vmul.f32 %v4520_v48, %v11266_v6  ;;  %v4233_v55 = vmul.f32 1.0614054, %v11432_v9 }
 0x5b1   : > { %v11452_v11 = vmul.f32 0.5, %v11239_v58  ;;  %vm4011_vm11 = vcmp.lt.f32.partialorder %v11262_v47, 0.0  ;;  %v4523_v18 = vsub.f32 0.0, %v11284_v54  ;;  %v11457_v19 = vmul.f32 0.5, %v11251_v7  ;;  %v3872_v47 = vpop.f32.mrf.mxu1 }
 0x5b2   : > { %v8451_v10 = vpop.eup %8450  ;;  %v4330_v51 = vadd.f32 1.4214138, %v4298_v17  ;;  %8456 = vpow2.f32 %v4600_v44  ;;  %v4267_v22 = vadd.f32 -1.4531521, %v4235_v62  ;;  %v11460_v30 = vmul.f32 0.70710677, %v11444_v36 }
 0x5b3   : > { %14116 = vst [vmem:[#allocation6_spill] sm:$0xff] %v11452_v11  ;;  %14117 = vst [vmem:[#allocation26_spill] sm:$0xff] %v11457_v19  ;;  %v14119_v43 = vrot.slane %v11423_v5, 7  ;;  %v4676_v6 = vsub.f32 1.0, %v4644_v14  ;;  %v4296_v42 = vmul.f32 %v11393_v3, %v4264_v57  ;;  %v4140_v48 = vadd.f32 1.0, %v4108_v41 }
 0x5b4   : > { %14118 = vst [vmem:[#allocation5_spill] sm:$0xff] %v11460_v30  ;;  %v4647_v11 = vmul.f32 %v8451_v10, %v4487_v40  ;;  %v4421_v7 = vmul.f32 %v11317_v29, %v4389_v33  ;;  %v4596_v19 = vmul.f32 1.442695, %v4552_v27  ;;  %v4265_v17 = vadd.f32 -1.4531521, %v4233_v55 }
 0x5b5   : > { %v11466_v58 = vsel %vm4828_vm1, %v11423_v5, %v14119_v43  ;;  %v11473_v44 = vsel %vm4011_vm11, -1.0, %v14101_v39  ;;  %v4555_v62 = vmul.f32 %v4523_v18, %v11284_v54  ;;  %vm4009_vm12 = vcmp.lt.f32.partialorder %v11273_v15, 0.0 }
 0x5b6   : > { %14120 = vst [vmem:[#allocation7_spill] sm:$0xff] %v11466_v58  ;;  %v4521_v43 = vsub.f32 0.0, %v11299_v26  ;;  %v4362_v57 = vmul.f32 %v11371_v2, %v4330_v51  ;;  %v4299_v40 = vmul.f32 %v11415_v61, %v4267_v22  ;;  %v11483_v27 = vand.u32 2147483647, %v11460_v30 }
 0x5b7   : > { %v11478_v14 = vpop.eup %8452  ;;  %v5025_v41 = vrot.slane %v11242_v53, 1  ;;  %v4708_v33 = vmul.f32 %v4676_v6, %v11289_v28  ;;  %v4328_v55 = vadd.f32 1.4214138, %v4296_v42  ;;  %8458 = vrcp.f32 %v4140_v48 }
 0x5b8   : > { %v5024_v54 = vrot.slane %v11225_v45, 1  ;;  %v4679_v18 = vsub.f32 1.0, %v4647_v11  ;;  %v4453_v10 = vadd.f32 0.2548296, %v4421_v7  ;;  %v4297_v58 = vmul.f32 %v11432_v9, %v4265_v17 }
 0x5b9   : > { %v4111_v51 = vmul.f32 0.3275911, %v11483_v27  ;;  %v4238_v22 = vmul.f32 1.0614054, %v11478_v14  ;;  %v14121_v49 = vrot.slane %v11233_v16, 1  ;;  %v11496_v28 = vadd.f32 %v10935_v56, %v3872_v47 }
 0x5ba   : > { %v5026_v30 = vsel %vm5018_vm10, %v5024_v54, %v5025_v41  ;;  %v8455_v6 = vpop.eup %8454  ;;  %v4394_v42 = vadd.f32 -0.28449672, %v4362_v57  ;;  %8460 = vpow2.f32 %v4596_v19  ;;  %v4331_v11 = vadd.f32 1.4214138, %v4299_v40 }
 0x5bb   : > { %v5028_v53 = vsel %vm5018_vm10, %v5025_v41, %v14121_v49  ;;  %v4553_v48 = vmul.f32 %v4521_v43, %v11299_v26  ;;  %v4360_v7 = vmul.f32 %v11393_v3, %v4328_v55  ;;  %v4143_v17 = vadd.f32 1.0, %v4111_v51 }
 0x5bc   : > { %v7481_v45 = vpack.i.bf16 %v5028_v53, %v5026_v30  ;;  %v4740_v32 = vadd.f32 1.0, %v4708_v33  ;;  %v4602_v25 = vmul.f32 1.442695, %v4555_v62  ;;  %v11503_v16 = vsel %vm4009_vm12, -1.0, %v14101_v39 }
 0x5bd   : > { %v4329_v49 = vadd.f32 1.4214138, %v4297_v58  ;;  %v4711_v56 = vmul.f32 %v4679_v18, %v11351_v35  ;;  %v4485_v57 = vmul.f32 %v11317_v29, %v4453_v10  ;;  %v4270_v19 = vadd.f32 -1.4531521, %v4238_v22 }
 0x5be   : > { %7482 = vrot.lane.b32.xlu0 %v7481_v45, %s8572_s27  ;;  %7477 = vrot.lane.b32.xlu1 %v7481_v45, %s8573_s28  ;;  %v11510_v53 = vmul.f32 0.70710677, %v11496_v28  ;;  %v4426_v26 = vmul.f32 %v11371_v2, %v4394_v42  ;;  %v4363_v15 = vmul.f32 %v11415_v61, %v4331_v11  ;;  %v4598_v30 = vmul.f32 1.442695, %v4553_v48 }
 0x5bf   : > { %vm4014_vm13 = vcmp.lt.f32.partialorder %v11323_v4, 0.0  ;;  %v11515_v35 = vpop.eup %8456  ;;  %v4392_v29 = vadd.f32 -0.28449672, %v4360_v7  ;;  %8462 = vrcp.f32 %v4143_v17  ;;  %v7491_v58 = vpack.i.bf16 %v11342_v31, %v11337_v38 }
 0x5c0   : > { %8464 = vpow2.f32 %v4602_v25  ;;  %v4361_v62 = vmul.f32 %v11432_v9, %v4329_v49  ;;  %v4526_v43 = vsub.f32 0.0, %v11334_v0  ;;  %v11522_v40 = vand.u32 2147483647, %v11510_v53 }
 0x5c1   : > { %v11525_v41 = vmul.f32 %v4740_v32, %v11217_v34  ;;  %v4743_v47 = vadd.f32 1.0, %v4711_v56  ;;  %v4645_v33 = vmul.f32 %v8455_v6, %v4485_v57  ;;  %v4302_v55 = vmul.f32 %v11478_v14, %v4270_v19  ;;  %v7416_v32 = vpop.f32.mrf.mxu1 }
 0x5c2   : > { %7487 = vrot.lane.b32.xlu0 %v7481_v45, %s8574_s30  ;;  %7492 = vrot.lane.b32.xlu1 %v7491_v58, %s8575_s6  ;;  %v4458_v38 = vadd.f32 0.2548296, %v4426_v26  ;;  %v4395_v31 = vadd.f32 -0.28449672, %v4363_v15  ;;  %v11531_v25 = vmul.f32 0.5, %v11306_v37  ;;  %v11536_v34 = vsel %vm4014_vm13, -1.0, %v14101_v39 }
 0x5c3   : > { %v4424_v54 = vmul.f32 %v11393_v3, %v4392_v29  ;;  %8466 = vpow2.f32 %v4598_v30  ;;  %v5186_v18 = vrot.slane %v11257_v12, 2  ;;  %v4393_v10 = vadd.f32 -0.28449672, %v4361_v62  ;;  %v3885_v56 = vpop.f32.mrf.mxu1  ;;  %v11560_v15 = vld [vmem:[%s13359_s4 + $0x4] ss:$0 sm:$0xff] }
 0x5c4   : > { %v11540_v45 = vpop.eup %8458  ;;  %v4558_v51 = vmul.f32 %v4526_v43, %v11334_v0  ;;  %v4109_v22 = vmul.f32 0.3275911, %v11522_v40  ;;  %v5185_v37 = vrot.slane %v11229_v52, 2  ;;  %v4841_v6 = vrot.slane %v11525_v41, 7 }
 0x5c5   : > { %v11547_v4 = vmul.f32 %v4743_v47, %v11312_v23  ;;  %v4677_v42 = vsub.f32 1.0, %v4645_v33  ;;  %v4334_v11 = vadd.f32 1.4214138, %v4302_v55  ;;  %v4490_v48 = vmul.f32 %v11371_v2, %v4458_v38 }
 0x5c6   : > { %7497 = vrot.lane.b32.xlu0 %v7491_v58, %s8576_s7  ;;  %v4427_v7 = vmul.f32 %v11415_v61, %v4395_v31  ;;  %v5187_v0 = vsel %vm5184_vm5, %v5185_v37, %v5186_v18  ;;  %v14122_v17 = vrot.slane %v11281_v60, 2  ;;  %v4456_v19 = vadd.f32 0.2548296, %v4424_v54 }
 0x5c7   : > { %v8461_v57 = vpop.eup %8460  ;;  %v4236_v23 = vmul.f32 1.0614054, %v11540_v45  ;;  %v11563_v2 = vadd.f32 %v11560_v15, %v7416_v32  ;;  %v4425_v30 = vmul.f32 %v11432_v9, %v4393_v10  ;;  %v4141_v29 = vadd.f32 1.0, %v4109_v22 }
 0x5c8   : > { %v5189_v49 = vsel %vm5184_vm5, %v5186_v18, %v14122_v17  ;;  %v5019_v58 = vrot.slane %v11229_v52, 1  ;;  %v5020_v62 = vrot.slane %v11257_v12, 1  ;;  %v4366_v43 = vmul.f32 %v11478_v14, %v4334_v11  ;;  %v7417_v11 = vpop.f32.mrf.mxu1 }
 0x5c9   : > { %v7506_v26 = vpack.i.bf16 %v5189_v49, %v5187_v0  ;;  %v4608_v47 = vmul.f32 1.442695, %v4558_v51  ;;  %v11571_v33 = vmul.f32 0.70710677, %v11563_v2  ;;  %v11574_v55 = vadd.f32 %v11560_v15, %v3885_v56 }
 0x5ca   : > { %v4845_v38 = vrot.slane %v11547_v4, 7  ;;  %v4929_v31 = vrot.slane %v11547_v4, 6  ;;  %v4459_v32 = vadd.f32 0.2548296, %v4427_v7  ;;  %v5021_v54 = vsel %vm5018_vm10, %v5019_v58, %v5020_v62 }
 0x5cb   : > { %7507 = vrot.lane.b32.xlu1 %v7506_v26, %s8576_s7  ;;  %v4709_v18 = vmul.f32 %v4677_v42, %v11399_v63  ;;  %v4268_v10 = vadd.f32 -1.4531521, %v4236_v23  ;;  %v11581_v51 = vand.u32 2147483647, %v11571_v33  ;;  %v14123_v22 = vrot.slane %v11281_v60, 1 }
 0x5cc   : > { %v11586_v0 = vpop.eup %8462  ;;  %v4650_v17 = vmul.f32 %v11515_v35, %v4490_v48  ;;  %v4488_v4 = vmul.f32 %v11393_v3, %v4456_v19  ;;  %v4457_v7 = vadd.f32 0.2548296, %v4425_v30  ;;  %8468 = vrcp.f32 %v4141_v29 }
 0x5cd   : > { %v5023_v37 = vsel %vm5018_vm10, %v5020_v62, %v14123_v22  ;;  %v8465_v49 = vpop.eup %8464  ;;  %v4398_v56 = vadd.f32 -0.28449672, %v4366_v43  ;;  %v4114_v63 = vmul.f32 0.3275911, %v11581_v51  ;;  %v11592_v23 = vmul.f32 0.70710677, %v11574_v55 }
 0x5ce   : > { %v7501_v42 = vpack.i.bf16 %v5023_v37, %v5021_v54  ;;  %v11598_v60 = vsel %vm4828_vm1, %v11525_v41, %v4841_v6  ;;  %v4491_v35 = vmul.f32 %v11415_v61, %v4459_v32  ;;  %v11602_v3 = vadd.f32 %v11560_v15, %v7417_v11 }
 0x5cf   : > { %14124 = vst [vmem:[#allocation13_spill] sm:$0xff] %v11598_v60  ;;  %8470 = vpow2.f32 %v4608_v47  ;;  %v4300_v48 = vmul.f32 %v11540_v45, %v4268_v10  ;;  %v4239_v19 = vmul.f32 1.0614054, %v11586_v0  ;;  %v11608_v30 = vand.u32 2147483647, %v11592_v23 }
 0x5d0   : > { %7502 = vrot.lane.b32.xlu0 %v7501_v42, %s8573_s28  ;;  %v8467_v29 = vpop.eup %8466  ;;  %v11611_v58 = vsel %vm4828_vm1, %v4845_v38, %v4929_v31  ;;  %v4741_v62 = vadd.f32 1.0, %v4709_v18  ;;  %v4682_v43 = vsub.f32 1.0, %v4650_v17  ;;  %v4648_v61 = vmul.f32 %v8461_v57, %v4488_v4  ;;  %7512 = vrot.lane.b32.xlu1 %v7501_v42, %s8574_s30  ;;  %v3888_v42 = vpop.f32.mrf.mxu1 }
 0x5d1   : > { %v4489_v47 = vmul.f32 %v11432_v9, %v4457_v7  ;;  %v4430_v32 = vmul.f32 %v11478_v14, %v4398_v56  ;;  %v4146_v54 = vadd.f32 1.0, %v4114_v63  ;;  %v4651_v10 = vmul.f32 %v8465_v49, %v4491_v35 }
 0x5d2   : > { %v4524_v22 = vsub.f32 0.0, %v11430_v24  ;;  %v4112_v37 = vmul.f32 0.3275911, %v11608_v30  ;;  %v11619_v11 = vmul.f32 0.70710677, %v11602_v3  ;;  %v11622_v31 = vmul.f32 0.5, %v11385_v21 }
 0x5d3   : > { %v4332_v18 = vadd.f32 1.4214138, %v4300_v48  ;;  %v11625_v57 = vmul.f32 0.5, %v11444_v36  ;;  %v4271_v17 = vadd.f32 -1.4531521, %v4239_v19  ;;  %v14125_v9 = vrot.slane %v11423_v5, 7 }
 0x5d4   : > { %7517 = vrot.lane.b32.xlu0 %v7506_v26, %s8575_s6  ;;  %v11635_v49 = vmul.f32 %v4741_v62, %v11369_v1  ;;  %v4714_v21 = vmul.f32 %v4682_v43, %v11412_v20  ;;  %v4649_v56 = vmul.f32 %v8467_v29, %v4489_v47  ;;  %v4462_v63 = vadd.f32 0.2548296, %v4430_v32 }
 0x5d5   : > { %v11631_v4 = vsel %vm4828_vm1, %v14125_v9, %v4845_v38  ;;  %8472 = vrcp.f32 %v4146_v54  ;;  %v11639_v36 = vand.u32 2147483647, %v11619_v11  ;;  %v4680_v26 = vsub.f32 1.0, %v4648_v61 }
 0x5d6   : > { %14126 = vst [vmem:[#allocation27_spill] sm:$0xff] %v11631_v4  ;;  %v4683_v35 = vsub.f32 1.0, %v4651_v10  ;;  %v4556_v5 = vmul.f32 %v4524_v22, %v11430_v24  ;;  %v4144_v38 = vadd.f32 1.0, %v4112_v37  ;;  %vm4012_vm14 = vcmp.lt.f32.partialorder %v11402_v59, 0.0  ;;  %v14134_v59 = vld [vmem:[#allocation26_spill] sm:$0xff] }
 0x5d7   : > { %v4364_v48 = vmul.f32 %v11540_v45, %v4332_v18  ;;  %v4303_v1 = vmul.f32 %v11586_v0, %v4271_v17  ;;  %v4527_v20 = vsub.f32 0.0, %v11483_v27  ;;  %v7526_v19 = vpack.i.bf16 %v11374_v50, %v11346_v8 }
 0x5d8   : > { %v4842_v62 = vrot.slane %v11635_v49, 7  ;;  %v4746_v43 = vadd.f32 1.0, %v4714_v21  ;;  %v11651_v61 = vadd.f32 %v11560_v15, %v3888_v42  ;;  %v4681_v47 = vsub.f32 1.0, %v4649_v56  ;;  %v14128_v42 = vld [vmem:[#allocation2_spill] sm:$0xff] }
 0x5d9   : > { %v11653_v24 = vpop.eup %8468  ;;  %v4494_v32 = vmul.f32 %v11478_v14, %v4462_v63  ;;  %v4115_v54 = vmul.f32 0.3275911, %v11639_v36  ;;  %7527 = vrot.lane.b32.xlu1 %v7526_v19, %s8571_s25  ;;  %v4928_v10 = vrot.slane %v11635_v49, 6  ;;  %v4712_v22 = vmul.f32 %v4680_v26, %v11439_v46  ;;  %7522 = vrot.lane.b32.xlu0 %v7526_v19, %s8570_s29  ;;  %v14127_v46 = vld [vmem:[#allocation20_spill] sm:$0xff] }
 0x5da   : > { %v4604_v37 = vmul.f32 1.442695, %v4556_v5  ;;  %8474 = vrcp.f32 %v4144_v38  ;;  %v4715_v18 = vmul.f32 %v4683_v35, %v11473_v44  ;;  %v4396_v17 = vadd.f32 -0.28449672, %v4364_v48 }
 0x5db   : > { %v4335_v9 = vadd.f32 1.4214138, %v4303_v1  ;;  %v4559_v21 = vmul.f32 %v4527_v20, %v11483_v27  ;;  %v11664_v14 = vmul.f32 %v4746_v43, %v11379_v13  ;;  %v4237_v63 = vmul.f32 1.0614054, %v11653_v24 }
 0x5dc   : > { %v8471_v56 = vpop.eup %8470  ;;  %v11668_v49 = vmul.f32 0.70710677, %v11651_v61  ;;  %v7536_v26 = vpack.i.bf16 %v14128_v42, %v14127_v46  ;;  %v4713_v44 = vmul.f32 %v4681_v47, %v11503_v16  ;;  %v4147_v5 = vadd.f32 1.0, %v4115_v54 }
 0x5dd   : > { %v4654_v35 = vmul.f32 %v8471_v56, %v4494_v32  ;;  %v4744_v38 = vadd.f32 1.0, %v4712_v22  ;;  %8476 = vpow2.f32 %v4604_v37  ;;  %v5034_v27 = vrot.slane %v11346_v8, 1  ;;  %v14129_v32 = vld [vmem:[#allocation29_spill] sm:$0xff] }
 0x5de   : > { %7537 = vrot.lane.b32.xlu1 %v7536_v26, %s8571_s25  ;;  %v5035_v13 = vrot.slane %v11374_v50, 1  ;;  %v4747_v48 = vadd.f32 1.0, %v4715_v18  ;;  %v4428_v1 = vmul.f32 %v11540_v45, %v4396_v17  ;;  %v4367_v20 = vmul.f32 %v11586_v0, %v4335_v9  ;;  %7532 = vrot.lane.b32.xlu0 %v7536_v26, %s8570_s29 }
 0x5df   : > { %v4610_v19 = vmul.f32 1.442695, %v4559_v21  ;;  %v4269_v43 = vadd.f32 -1.4531521, %v4237_v63  ;;  %v11680_v16 = vand.u32 2147483647, %v11668_v49  ;;  %8478 = vrcp.f32 %v4147_v5 }
 0x5e0   : > { %v5036_v47 = vsel %vm5018_vm10, %v5034_v27, %v5035_v13  ;;  %v14130_v54 = vrot.slane %v14129_v32, 1  ;;  %v4745_v37 = vadd.f32 1.0, %v4713_v44  ;;  %v4686_v56 = vsub.f32 1.0, %v4654_v35  ;;  %v14132_v21 = vld [vmem:[#allocation15_spill] sm:$0xff]  ;;  %v14133_v35 = vld [vmem:[#allocation6_spill] sm:$0xff] }
 0x5e1   : > { %v11691_v9 = vsel %vm4828_vm1, %v4841_v6, %v4842_v62  ;;  %v4776_v63 = vmul.f32 %v4744_v38, %v14132_v21  ;;  %v11697_v26 = vsel %vm4012_vm14, -1.0, %v14101_v39  ;;  %v11700_v27 = vsel %vm4828_vm1, %v4842_v62, %v4928_v10  ;;  %v14135_v21 = vld [vmem:[#allocation5_spill] sm:$0xff] }
 0x5e2   : > { %v5038_v22 = vsel %vm5018_vm10, %v5035_v13, %v14130_v54  ;;  %v11686_v17 = vpop.eup %8472  ;;  %14131 = vst [vmem:[#allocation4_spill] sm:$0xff] %v11691_v9  ;;  %v4850_v44 = vrot.slane %v11664_v14, 7  ;;  %v4779_v5 = vmul.f32 %v4747_v48, %v14133_v35  ;;  %v4399_v13 = vadd.f32 -0.28449672, %v4367_v20 }
 0x5e3   : > { %v7541_v18 = vpack.i.bf16 %v5038_v22, %v5036_v47  ;;  %v4460_v41 = vadd.f32 0.2548296, %v4428_v1  ;;  %8480 = vpow2.f32 %v4610_v19  ;;  %v4301_v6 = vmul.f32 %v11653_v24, %v4269_v43 }
 0x5e4   : > { %v4113_v38 = vmul.f32 0.3275911, %v11680_v16  ;;  %v4777_v47 = vmul.f32 %v4745_v37, %v14134_v59  ;;  %v4718_v62 = vmul.f32 %v4686_v56, %v11536_v34  ;;  %v4242_v10 = vmul.f32 1.0614054, %v11686_v17 }
 0x5e5   : > { %7542 = vrot.lane.b32.xlu1 %v7541_v18, %s8573_s28  ;;  %7552 = vrot.lane.b32.xlu0 %v7541_v18, %s8574_s30  ;;  %v4847_v20 = vrot.slane %v4776_v63, 7  ;;  %v4525_v1 = vsub.f32 0.0, %v11522_v40  ;;  %v4851_v43 = vrot.slane %v4779_v5, 7  ;;  %v4931_v22 = vrot.slane %v4779_v5, 6 }
 0x5e6   : > { %vm4015_vm15 = vcmp.lt.f32.partialorder %v14135_v21, 0.0  ;;  %v4431_v35 = vmul.f32 %v11586_v0, %v4399_v13  ;;  %v11721_v34 = vsel %vm4828_vm1, %v11664_v14, %v4850_v44  ;;  %v4492_v37 = vmul.f32 %v11540_v45, %v4460_v41 }
 0x5e7   : > { %v11714_v19 = vpop.eup %8474  ;;  %14136 = vst [vmem:[#allocation12_spill] sm:$0xff] %v11721_v34  ;;  %v4333_v56 = vadd.f32 1.4214138, %v4301_v6  ;;  %v4145_v59 = vadd.f32 1.0, %v4113_v38  ;;  %v4848_v48 = vrot.slane %v4777_v47, 7  ;;  %v4930_v54 = vrot.slane %v4777_v47, 6 }
 0x5e8   : > { %v4750_v29 = vadd.f32 1.0, %v4718_v62  ;;  %v4274_v7 = vadd.f32 -1.4531521, %v4242_v10  ;;  %v11725_v5 = vsel %vm4828_vm1, %v4776_v63, %v4847_v20  ;;  %v11728_v21 = vsel %vm4015_vm15, -1.0, %v14101_v39 }
 0x5e9   : > { %7547 = vrot.lane.b32.xlu1 %v7541_v18, %s8572_s27  ;;  %14137 = vst [vmem:[#allocation22_spill] sm:$0xff] %v11725_v5  ;;  %v4557_v18 = vmul.f32 %v4525_v1, %v11522_v40  ;;  %v4240_v13 = vmul.f32 1.0614054, %v11714_v19  ;;  %v11733_v52 = vsel %vm4828_vm1, %v4851_v43, %v4931_v22  ;;  %v4463_v45 = vadd.f32 0.2548296, %v4431_v35 }
 0x5ea   : > { %v8477_v14 = vpop.eup %8476  ;;  %v11736_v41 = vmul.f32 0.5, %v11496_v28  ;;  %vm4013_vm2 = vcmp.lt.f32.partialorder %v11510_v53, 0.0  ;;  %v4365_v63 = vmul.f32 %v11653_v24, %v4333_v56  ;;  %v4530_v38 = vsub.f32 0.0, %v11581_v51  ;;  %v7420_v56 = vpop.f32.mrf.mxu1 }
 0x5eb   : > { %v4652_v6 = vmul.f32 %v8477_v14, %v4492_v37  ;;  %8482 = vrcp.f32 %v4145_v59  ;;  %v11742_v40 = vsel %vm4828_vm1, %v4850_v44, %v4851_v43  ;;  %v11745_v47 = vsel %vm4828_vm1, %v4848_v48, %v4930_v54 }
 0x5ec   : > { %14138 = vst [vmem:[#allocation9_spill] sm:$0xff] %v11742_v40  ;;  %14139 = vst [vmem:[#allocation19_spill] sm:$0xff] %v11745_v47  ;;  %v11748_v62 = vmul.f32 %v4750_v29, %v11531_v25  ;;  %v4306_v28 = vmul.f32 %v11686_v17, %v4274_v7  ;;  %v11751_v10 = vpop.eup %8478  ;;  %v4606_v22 = vmul.f32 1.442695, %v4557_v18  ;;  %v4272_v35 = vadd.f32 -1.4531521, %v4240_v13 }
 0x5ed   : > { %v4528_v37 = vsub.f32 0.0, %v11608_v30  ;;  %v11757_v43 = vsel %vm4828_vm1, %v4847_v20, %v4848_v48  ;;  %v4495_v54 = vmul.f32 %v11586_v0, %v4463_v45  ;;  %v11763_v25 = vsel %vm4013_vm2, -1.0, %v14101_v39 }
 0x5ee   : > { %14140 = vst [vmem:[#allocation25_spill] sm:$0xff] %v11757_v43  ;;  %v4684_v29 = vsub.f32 1.0, %v4652_v6  ;;  %v4397_v59 = vadd.f32 -0.28449672, %v4365_v63  ;;  %v4562_v18 = vmul.f32 %v4530_v38, %v11581_v51  ;;  %v13607_v14 = vrot.slane %v11748_v62, 7 }
 0x5ef   : > { %v4338_v44 = vadd.f32 1.4214138, %v4306_v28  ;;  %v4243_v48 = vmul.f32 1.0614054, %v11751_v10  ;;  %v11770_v20 = vadd.f32 %v11560_v15, %v7420_v56  ;;  %8484 = vpow2.f32 %v4606_v22 }
 0x5f0   : > { %v8481_v13 = vpop.eup %8480  ;;  %v4304_v53 = vmul.f32 %v11714_v19, %v4272_v35  ;;  %v4560_v45 = vmul.f32 %v4528_v37, %v11608_v30  ;;  %v11776_v63 = vmul.f32 0.5, %v11563_v2  ;;  %vm4018_vm3 = vcmp.lt.f32.partialorder %v11571_v33, 0.0 }
 0x5f1   : > { %v4655_v6 = vmul.f32 %v8481_v13, %v4495_v54  ;;  %v11780_v51 = vmul.f32 0.5, %v11574_v55  ;;  %v4716_v38 = vmul.f32 %v4684_v29, %v11697_v26  ;;  %v4429_v28 = vmul.f32 %v11653_v24, %v4397_v59  ;;  %v3901_v55 = vpop.f32.mrf.mxu1 }
 0x5f2   : > { %v4616_v56 = vmul.f32 1.442695, %v4562_v18  ;;  %vm4016_vm4 = vcmp.lt.f32.partialorder %v11592_v23, 0.0  ;;  %v11789_v30 = vsel %vm4828_vm1, %v11748_v62, %v13607_v14  ;;  %v4370_v2 = vmul.f32 %v11686_v17, %v4338_v44 }
 0x5f3   : > { %14141 = vst [vmem:[#allocation32_spill] sm:$0xff] %v11789_v30  ;;  %v4275_v22 = vadd.f32 -1.4531521, %v4243_v48  ;;  %v11793_v35 = vmul.f32 0.70710677, %v11770_v20  ;;  %vm4019_vm6 = vcmp.lt.f32.partialorder %v11619_v11, 0.0  ;;  %v7421_v0 = vpop.f32.mrf.mxu1 }
 0x5f4   : > { %v4336_v37 = vadd.f32 1.4214138, %v4304_v53  ;;  %v4612_v26 = vmul.f32 1.442695, %v4560_v45  ;;  %v4531_v54 = vsub.f32 0.0, %v11639_v36  ;;  %v4687_v23 = vsub.f32 1.0, %v4655_v6 }
 0x5f5   : > { %v11800_v29 = vsel %vm4018_vm3, -1.0, %v14101_v39  ;;  %v11803_v59 = vsel %vm4016_vm4, -1.0, %v14101_v39  ;;  %v11806_v44 = vmul.f32 0.5, %v11602_v3  ;;  %v4748_v18 = vadd.f32 1.0, %v4716_v38  ;;  %v3904_v14 = vpop.f32.mrf.mxu1 }
 0x5f6   : > { %v4461_v13 = vadd.f32 0.2548296, %v4429_v28  ;;  %8486 = vpow2.f32 %v4616_v56  ;;  %v11809_v48 = vmul.f32 0.5, %v11651_v61  ;;  %v4402_v53 = vadd.f32 -0.28449672, %v4370_v2 }
 0x5f7   : > { %v11814_v45 = vsel %vm4019_vm6, -1.0, %v14101_v39  ;;  %v4307_v33 = vmul.f32 %v11751_v10, %v4275_v22  ;;  %v11818_v6 = vand.u32 2147483647, %v11793_v35  ;;  %v4368_v3 = vmul.f32 %v11714_v19, %v4336_v37 }
 0x5f8   : > { %v11811_v11 = vpop.eup %8482  ;;  %8488 = vpow2.f32 %v4612_v26  ;;  %v4563_v38 = vmul.f32 %v4531_v54, %v11639_v36  ;;  %v11823_v61 = vadd.f32 %v11560_v15, %v3901_v55  ;;  %v4719_v28 = vmul.f32 %v4687_v23, %v11728_v21 }
 0x5f9   : > { %v4529_v56 = vsub.f32 0.0, %v11680_v16  ;;  %v5200_v2 = vrot.slane %v11346_v8, 2  ;;  %v5201_v22 = vrot.slane %v11374_v50, 2  ;;  %v11830_v7 = vmul.f32 %v4748_v18, %v11622_v31 }
 0x5fa   : > { %v4493_v1 = vmul.f32 %v11653_v24, %v4461_v13  ;;  %v4241_v37 = vmul.f32 1.0614054, %v11811_v11  ;;  %v11835_v36 = vadd.f32 %v11560_v15, %v7421_v0  ;;  %v4434_v55 = vmul.f32 %v11686_v17, %v4402_v53 }
 0x5fb   : > { %v4339_v26 = vadd.f32 1.4214138, %v4307_v33  ;;  %v4118_v21 = vmul.f32 0.3275911, %v11818_v6  ;;  %v11840_v54 = vsel %vm5184_vm5, %v5200_v2, %v5201_v22  ;;  %v4400_v23 = vadd.f32 -0.28449672, %v4368_v3 }
 0x5fc   : > { %14142 = vst [vmem:[#allocation8_spill] sm:$0xff] %v11840_v54  ;;  %vm4017_vm7 = vcmp.lt.f32.partialorder %v11668_v49, 0.0  ;;  %v11844_v31 = vmul.f32 0.70710677, %v11823_v61  ;;  %v14143_v24 = vrot.slane %v14129_v32, 2  ;;  %v8485_v0 = vpop.eup %8484  ;;  %v4751_v13 = vadd.f32 1.0, %v4719_v28 }
 0x5fd   : > { %v4618_v53 = vmul.f32 1.442695, %v4563_v38  ;;  %v4561_v33 = vmul.f32 %v4529_v56, %v11680_v16  ;;  %v4653_v3 = vmul.f32 %v8485_v0, %v4493_v1  ;;  %v4273_v8 = vadd.f32 -1.4531521, %v4241_v37 }
 0x5fe   : > { %v11849_v18 = vsel %vm5184_vm5, %v5201_v22, %v14143_v24  ;;  %v11855_v50 = vmul.f32 0.70710677, %v11835_v36  ;;  %v13613_v12 = vrot.slane %v11830_v7, 7  ;;  %v4466_v32 = vadd.f32 0.2548296, %v4434_v55 }
 0x5ff   : > { %14144 = vst [vmem:[#allocation16_spill] sm:$0xff] %v11849_v18  ;;  %v7561_v2 = vpack.i.bf16 %v11849_v18, %v11840_v54  ;;  %v4371_v22 = vmul.f32 %v11751_v10, %v4339_v26  ;;  %v4150_v24 = vadd.f32 1.0, %v4118_v21  ;;  %v4432_v38 = vmul.f32 %v11714_v19, %v4400_v23 }
 0x600   : > { %v11862_v16 = vand.u32 2147483647, %v11844_v31  ;;  %v11865_v28 = vadd.f32 %v11560_v15, %v3904_v14  ;;  %v5030_v1 = vrot.slane %v14128_v42, 1  ;;  %v4783_v56 = vmul.f32 %v4751_v13, %v11625_v57 }
 0x601   : > { %7562 = vrot.lane.b32.xlu0 %v7561_v2, %s8576_s7  ;;  %7557 = vrot.lane.b32.xlu1 %v7561_v2, %s8575_s6  ;;  %8490 = vpow2.f32 %v4618_v53  ;;  %v11873_v37 = vsel %vm4017_vm7, -1.0, %v14101_v39  ;;  %v4614_v55 = vmul.f32 1.442695, %v4561_v33  ;;  %v4685_v26 = vsub.f32 1.0, %v4653_v3 }
 0x602   : > { %v4305_v21 = vmul.f32 %v11811_v11, %v4273_v8  ;;  %v11877_v23 = vand.u32 2147483647, %v11855_v50  ;;  %v5029_v14 = vrot.slane %v14127_v46, 1  ;;  %v11884_v57 = vsel %vm4828_vm1, %v11830_v7, %v13613_v12 }
 0x603   : > { %v8487_v0 = vpop.eup %8486  ;;  %14145 = vst [vmem:[#allocation33_spill] sm:$0xff] %v11884_v57  ;;  %v4498_v49 = vmul.f32 %v11686_v17, %v4466_v32  ;;  %v4403_v13 = vadd.f32 -0.28449672, %v4371_v22  ;;  %8492 = vrcp.f32 %v4150_v24  ;;  %v4464_v53 = vadd.f32 0.2548296, %v4432_v38  ;;  %v14146_v32 = vld [vmem:[#allocation21_spill] sm:$0xff] }
 0x604   : > { %v4116_v33 = vmul.f32 0.3275911, %v11862_v16  ;;  %v11889_v8 = vmul.f32 0.70710677, %v11865_v28  ;;  %v5031_v2 = vsel %vm5018_vm10, %v5029_v14, %v5030_v1  ;;  %v4857_v18 = vrot.slane %v4783_v56, 7 }
 0x605   : > { %v8489_v3 = vpop.eup %8488  ;;  %v4933_v54 = vrot.slane %v4783_v56, 6  ;;  %8494 = vpow2.f32 %v4614_v55  ;;  %vm4022_vm8 = vcmp.lt.f32.partialorder %v11793_v35, 0.0  ;;  %v4717_v12 = vmul.f32 %v4685_v26, %v11763_v25  ;;  %v7424_v26 = vpop.f32.mrf.mxu1 }
 0x606   : > { %v4337_v57 = vadd.f32 1.4214138, %v4305_v21  ;;  %v4119_v17 = vmul.f32 0.3275911, %v11877_v23  ;;  %v14147_v22 = vrot.slane %v14146_v32, 1  ;;  %v4435_v38 = vmul.f32 %v11751_v10, %v4403_v13 }
 0x607   : > { %v11900_v30 = vmul.f32 0.5, %v11770_v20  ;;  %v4534_v14 = vsub.f32 0.0, %v11818_v6  ;;  %v4658_v55 = vmul.f32 %v8487_v0, %v4498_v49  ;;  %v4496_v35 = vmul.f32 %v11714_v19, %v4464_v53 }
 0x608   : > { %v5033_v24 = vsel %vm5018_vm10, %v5030_v1, %v14147_v22  ;;  %v4148_v47 = vadd.f32 1.0, %v4116_v33  ;;  %v11905_v25 = vand.u32 2147483647, %v11889_v8  ;;  %v14148_v21 = vrot.slane %v11748_v62, 7 }
 0x609   : > { %v7576_v56 = vpack.i.bf16 %v5033_v24, %v5031_v2  ;;  %v11913_v13 = vsel %vm4022_vm8, -1.0, %v14101_v39  ;;  %v11916_v20 = vmul.f32 0.5, %v11823_v61  ;;  %v11920_v19 = vsel %vm4828_vm1, %v4857_v18, %v4933_v54  ;;  %v3917_v54 = vpop.f32.mrf.mxu1 }
 0x60a   : > { %v11910_v1 = vsel %vm4828_vm1, %v14148_v21, %v4857_v18  ;;  %v4749_v0 = vadd.f32 1.0, %v4717_v12  ;;  %v4369_v49 = vmul.f32 %v11811_v11, %v4337_v57  ;;  %v4151_v53 = vadd.f32 1.0, %v4119_v17 }
 0x60b   : > { %14149 = vst [vmem:[#allocation37_spill] sm:$0xff] %v11910_v1  ;;  %7577 = vrot.lane.b32.xlu0 %v7576_v56, %s8574_s30  ;;  %v4467_v33 = vadd.f32 0.2548296, %v4435_v38  ;;  %v4566_v62 = vmul.f32 %v4534_v14, %v11818_v6  ;;  %7567 = vrot.lane.b32.xlu1 %v7576_v56, %s8573_s28  ;;  %v5195_v2 = vrot.slane %v14127_v46, 2  ;;  %v5196_v22 = vrot.slane %v14128_v42, 2 }
 0x60c   : > { %v4690_v61 = vsub.f32 1.0, %v4658_v55  ;;  %v4656_v24 = vmul.f32 %v8489_v3, %v4496_v35  ;;  %8496 = vrcp.f32 %v4148_v47  ;;  %v4117_v21 = vmul.f32 0.3275911, %v11905_v25 }
 0x60d   : > { %v11929_v12 = vsel %vm5184_vm5, %v5195_v2, %v5196_v22  ;;  %v14151_v18 = vrot.slane %v14146_v32, 2  ;;  %v11937_v6 = vadd.f32 %v11560_v15, %v7424_v26  ;;  %v4781_v38 = vmul.f32 %v4749_v0, %v11736_v41 }
 0x60e   : > { %14150 = vst [vmem:[#allocation31_spill] sm:$0xff] %v11929_v12  ;;  %v8491_v17 = vpop.eup %8490  ;;  %v4401_v14 = vadd.f32 -0.28449672, %v4369_v49  ;;  %8498 = vrcp.f32 %v4151_v53  ;;  %v4499_v55 = vmul.f32 %v11751_v10, %v4467_v33  ;;  %v11949_v35 = vadd.f32 %v11560_v15, %v3917_v54  ;;  %v7425_v33 = vpop.f32.mrf.mxu1 }
 0x60f   : > { %v11934_v57 = vsel %vm5184_vm5, %v5196_v22, %v14151_v18  ;;  %14153 = vst [vmem:[#allocation36_spill] sm:$0xff] %v11937_v6  ;;  %7572 = vrot.lane.b32.xlu1 %v7576_v56, %s8572_s27  ;;  %v11946_v32 = vmul.f32 0.70710677, %v11937_v6  ;;  %v4624_v0 = vmul.f32 1.442695, %v4566_v62  ;;  %vm4020_vm9 = vcmp.lt.f32.partialorder %v11844_v31, 0.0 }
 0x610   : > { %14152 = vst [vmem:[#allocation34_spill] sm:$0xff] %v11934_v57  ;;  %v7586_v47 = vpack.i.bf16 %v11934_v57, %v11929_v12  ;;  %14154 = vst [vmem:[#allocation40_spill] sm:$0xff] %v11949_v35  ;;  %v11951_v26 = vpop.eup %8492  ;;  %v4149_v49 = vadd.f32 1.0, %v4117_v21  ;;  %v4722_v10 = vmul.f32 %v4690_v61, %v11800_v29  ;;  %v4688_v53 = vsub.f32 1.0, %v4656_v24  ;;  %v14155_v18 = vld [vmem:[#allocation7_spill] sm:$0xff] }
 0x611   : > { %v11958_v56 = vand.u32 2147483647, %v11946_v32  ;;  %v4854_v22 = vrot.slane %v4781_v38, 7  ;;  %v4433_v54 = vmul.f32 %v11811_v11, %v4401_v14  ;;  %v7591_v41 = vpack.i.bf16 %v11631_v4, %v14155_v18 }
 0x612   : > { %7587 = vrot.lane.b32.xlu0 %v7586_v47, %s8576_s7  ;;  %v8495_v2 = vpop.eup %8494  ;;  %v11964_v62 = vmul.f32 0.70710677, %v11949_v35  ;;  %v4932_v21 = vrot.slane %v4781_v38, 6  ;;  %v4659_v3 = vmul.f32 %v8491_v17, %v4499_v55  ;;  %v4246_v46 = vmul.f32 1.0614054, %v11951_v26 }
 0x613   : > { %v4122_v29 = vmul.f32 0.3275911, %v11958_v56  ;;  %7582 = vrot.lane.b32.xlu1 %v7586_v47, %s8575_s6  ;;  %v4532_v61 = vsub.f32 0.0, %v11862_v16  ;;  %8500 = vrcp.f32 %v4149_v49  ;;  %v11975_v14 = vadd.f32 %v11560_v15, %v7425_v33 }
 0x614   : > { %v11972_v24 = vand.u32 2147483647, %v11964_v62  ;;  %v4754_v42 = vadd.f32 1.0, %v4722_v10  ;;  %v4720_v17 = vmul.f32 %v4688_v53, %v11803_v59  ;;  %v11981_v38 = vsel %vm4020_vm9, -1.0, %v14101_v39 }
 0x615   : > { %14156 = vst [vmem:[#allocation28_spill] sm:$0xff] %v11975_v14  ;;  %v4154_v47 = vadd.f32 1.0, %v4122_v29  ;;  %v4465_v55 = vadd.f32 0.2548296, %v4433_v54  ;;  %v4535_v49 = vsub.f32 0.0, %v11877_v23  ;;  %v11987_v57 = vpack.i.bf16 %v11691_v9, %v11598_v60 }
 0x616   : > { %7592 = vrot.lane.b32.xlu0 %v7591_v41, %s8570_s29  ;;  %v4120_v35 = vmul.f32 0.3275911, %v11972_v24  ;;  %v11990_v33 = vsel %vm4828_vm1, %v4854_v22, %v4932_v21  ;;  %v4691_v10 = vsub.f32 1.0, %v4659_v3  ;;  %v4278_v59 = vadd.f32 -1.4531521, %v4246_v46 }
 0x617   : > { %14157 = vst [vmem:[#allocation35_spill] sm:$0xff] %v11990_v33  ;;  %8502 = vrcp.f32 %v4154_v47  ;;  %v4564_v31 = vmul.f32 %v4532_v61, %v11862_v16  ;;  %v11996_v54 = vmul.f32 0.70710677, %v11975_v14  ;;  %v14158_v12 = vrot.slane %v11830_v7, 7  ;;  %7597 = vrot.lane.b32.xlu1 %v7591_v41, %s8571_s25 }
 0x618   : > { %8504 = vpow2.f32 %v4624_v0  ;;  %v4152_v53 = vadd.f32 1.0, %v4120_v35  ;;  %v12006_v46 = vmul.f32 %v4754_v42, %v11776_v63  ;;  %v4752_v3 = vadd.f32 1.0, %v4720_v17  ;;  %v3920_v0 = vpop.f32.mrf.mxu1 }
 0x619   : > { %v11998_v29 = vpop.eup %8496  ;;  %v12003_v21 = vsel %vm4828_vm1, %v14158_v12, %v4854_v22  ;;  %v4497_v35 = vmul.f32 %v11811_v11, %v4465_v55  ;;  %v4567_v61 = vmul.f32 %v4535_v49, %v11877_v23  ;;  %v4723_v7 = vmul.f32 %v4691_v10, %v11814_v45 }
 0x61a   : > { %7602 = vrot.lane.b32.xlu0 %v11987_v57, %s8570_s29  ;;  %14159 = vst [vmem:[#allocation41_spill] sm:$0xff] %v12003_v21  ;;  %8506 = vrcp.f32 %v4152_v53  ;;  %v4310_v12 = vmul.f32 %v11951_v26, %v4278_v59  ;;  %v12017_v42 = vand.u32 2147483647, %v11996_v54  ;;  %v4244_v63 = vmul.f32 1.0614054, %v11998_v29 }
 0x61b   : > { %v12011_v47 = vpop.eup %8498  ;;  %v4620_v22 = vmul.f32 1.442695, %v4564_v31  ;;  %v12022_v11 = vmul.f32 0.5, %v11835_v36  ;;  %v12025_v23 = vadd.f32 %v11560_v15, %v3920_v0  ;;  %v13624_v17 = vrot.slane %v12006_v46, 7  ;;  %7607 = vrot.lane.b32.xlu1 %v11987_v57, %s8571_s25 }
 0x61c   : > { %v12029_v45 = vmul.f32 %v4752_v3, %v11780_v51  ;;  %vm4023_vm11 = vcmp.lt.f32.partialorder %v11855_v50, 0.0  ;;  %v4123_v55 = vmul.f32 0.3275911, %v12017_v42  ;;  %v4657_v49 = vmul.f32 %v8495_v2, %v4497_v35 }
 0x61d   : > { %14160 = vst [vmem:[#allocation38_spill] sm:$0xff] %v12025_v23  ;;  %v4247_v41 = vmul.f32 1.0614054, %v12011_v47  ;;  %v4626_v10 = vmul.f32 1.442695, %v4567_v61  ;;  %v4755_v36 = vadd.f32 1.0, %v4723_v7  ;;  %8508 = vpow2.f32 %v4620_v22 }
 0x61e   : > { %v12035_v59 = vmul.f32 0.70710677, %v12025_v23  ;;  %v4342_v31 = vadd.f32 1.4214138, %v4310_v12  ;;  %v4155_v15 = vadd.f32 1.0, %v4123_v55  ;;  %v5045_v53 = vrot.slane %v11631_v4, 1 }
 0x61f   : > { %v4276_v0 = vadd.f32 -1.4531521, %v4244_v63  ;;  %v5044_v3 = vrot.slane %v14155_v18, 1  ;;  %v12048_v2 = vsel %vm4828_vm1, %v12006_v46, %v13624_v17  ;;  %v12054_v61 = vsel %vm4023_vm11, -1.0, %v14101_v39 }
 0x620   : > { %v12039_v51 = vand.u32 2147483647, %v12035_v59  ;;  %v12042_v14 = vpop.eup %8500  ;;  %14161 = vst [vmem:[#allocation42_spill] sm:$0xff] %v12048_v2  ;;  %8510 = vrcp.f32 %v4155_v15  ;;  %v4689_v7 = vsub.f32 1.0, %v4657_v49  ;;  %v4279_v12 = vadd.f32 -1.4531521, %v4247_v41 }
 0x621   : > { %v5046_v22 = vsel %vm5018_vm10, %v5044_v3, %v5045_v53  ;;  %v4787_v55 = vmul.f32 %v4755_v36, %v11806_v44  ;;  %v4374_v16 = vmul.f32 %v11951_v26, %v4342_v31  ;;  %v14162_v17 = vrot.slane %v11611_v58, 1 }
 0x622   : > { %v4121_v63 = vmul.f32 0.3275911, %v12039_v51  ;;  %v4308_v50 = vmul.f32 %v11998_v29, %v4276_v0  ;;  %8512 = vpow2.f32 %v4626_v10  ;;  %v4245_v49 = vmul.f32 1.0614054, %v12042_v14 }
 0x623   : > { %v5048_v35 = vsel %vm5018_vm10, %v5045_v53, %v14162_v17  ;;  %v12070_v3 = vmul.f32 0.5, %v11865_v28  ;;  %v5211_v17 = vrot.slane %v11631_v4, 2  ;;  %v14164_v31 = vrot.slane %v12029_v45, 7 }
 0x624   : > { %v12063_v2 = vpop.eup %8502  ;;  %v4153_v41 = vadd.f32 1.0, %v4121_v63  ;;  %v7621_v36 = vpack.i.bf16 %v5048_v35, %v5046_v22  ;;  %v4311_v53 = vmul.f32 %v12011_v47, %v4279_v12  ;;  %v5210_v28 = vrot.slane %v14155_v18, 2 }
 0x625   : > { %v12067_v15 = vpop.eup %8504  ;;  %14163 = vst [vmem:[#allocation44_spill] sm:$0xff] %v12070_v3  ;;  %v4250_v44 = vmul.f32 1.0614054, %v12063_v2  ;;  %v12080_v10 = vsel %vm4828_vm1, %v12029_v45, %v14164_v31  ;;  %v4863_v63 = vrot.slane %v4787_v55, 7  ;;  %v4721_v35 = vmul.f32 %v4689_v7, %v11873_v37 }
 0x626   : > { %14165 = vst [vmem:[#allocation43_spill] sm:$0xff] %v12080_v10  ;;  %8514 = vrcp.f32 %v4153_v41  ;;  %v4406_v22 = vadd.f32 -0.28449672, %v4374_v16  ;;  %vm4021_vm12 = vcmp.lt.f32.partialorder %v11889_v8, 0.0  ;;  %7622 = vrot.lane.b32.xlu0 %v7621_v36, %s8574_s30  ;;  %v4340_v57 = vadd.f32 1.4214138, %v4308_v50  ;;  %7612 = vrot.lane.b32.xlu1 %v7621_v36, %s8573_s28 }
 0x627   : > { %v12084_v0 = vpop.eup %8506  ;;  %v4277_v4 = vadd.f32 -1.4531521, %v4245_v49  ;;  %v12090_v31 = vsel %vm5184_vm5, %v5210_v28, %v5211_v17  ;;  %v14167_v12 = vrot.slane %v11611_v58, 2  ;;  %v4935_v18 = vrot.slane %v4787_v55, 6 }
 0x628   : > { %14166 = vst [vmem:[#allocation39_spill] sm:$0xff] %v12090_v31  ;;  %v4282_v10 = vadd.f32 -1.4531521, %v4250_v44  ;;  %v4343_v16 = vadd.f32 1.4214138, %v4311_v53  ;;  %v5039_v7 = vrot.slane %v11598_v60, 1  ;;  %v4438_v28 = vmul.f32 %v11951_v26, %v4406_v22 }
 0x629   : > { %v12095_v41 = vsel %vm5184_vm5, %v5211_v17, %v14167_v12  ;;  %v4248_v8 = vmul.f32 1.0614054, %v12084_v0  ;;  %v5040_v50 = vrot.slane %v11691_v9, 1  ;;  %v4753_v49 = vadd.f32 1.0, %v4721_v35 }
 0x62a   : > { %14168 = vst [vmem:[#allocation45_spill] sm:$0xff] %v12095_v41  ;;  %v7631_v37 = vpack.i.bf16 %v12095_v41, %v12090_v31  ;;  %v12104_v58 = vsel %vm4021_vm12, -1.0, %v14101_v39  ;;  %v4533_v17 = vsub.f32 0.0, %v11905_v25  ;;  %v4372_v55 = vmul.f32 %v11998_v29, %v4340_v57  ;;  %v12115_v22 = vpop.eup %8508  ;;  %7617 = vrot.lane.b32.xlu1 %v7621_v36, %s8572_s27 }
 0x62b   : > { %v4309_v44 = vmul.f32 %v12042_v14, %v4277_v4  ;;  %v5041_v53 = vsel %vm5018_vm10, %v5039_v7, %v5040_v50  ;;  %v14169_v12 = vrot.slane %v11700_v27, 1  ;;  %v14170_v41 = vrot.slane %v12006_v46, 7 }
 0x62c   : > { %7632 = vrot.lane.b32.xlu0 %v7631_v37, %s8576_s7  ;;  %v4314_v23 = vmul.f32 %v12063_v2, %v4282_v10  ;;  %v12126_v4 = vsel %vm4828_vm1, %v4863_v63, %v4935_v18  ;;  %v4375_v57 = vmul.f32 %v12011_v47, %v4343_v16  ;;  %v4280_v7 = vadd.f32 -1.4531521, %v4248_v8 }
 0x62d   : > { %v5043_v35 = vsel %vm5018_vm10, %v5040_v50, %v14169_v12  ;;  %v12120_v31 = vsel %vm4828_vm1, %v14170_v41, %v4863_v63  ;;  %v12123_v33 = vpop.eup %8510  ;;  %v5206_v50 = vrot.slane %v11691_v9, 2  ;;  %v4470_v12 = vadd.f32 0.2548296, %v4438_v28 }
 0x62e   : > { %14171 = vst [vmem:[#allocation46_spill] sm:$0xff] %v12120_v31  ;;  %v7636_v3 = vpack.i.bf16 %v5043_v35, %v5041_v53  ;;  %v4565_v6 = vmul.f32 %v4533_v17, %v11905_v25  ;;  %v4538_v46 = vsub.f32 0.0, %v11958_v56  ;;  %v4251_v41 = vmul.f32 1.0614054, %v12123_v33  ;;  %7627 = vrot.lane.b32.xlu1 %v7631_v37, %s8575_s6 }
 0x62f   : > { %v4404_v10 = vadd.f32 -0.28449672, %v4372_v55  ;;  %v4341_v53 = vadd.f32 1.4214138, %v4309_v44  ;;  %v4539_v18 = vsub.f32 0.0, %v12017_v42  ;;  %v5205_v63 = vrot.slane %v11598_v60, 2  ;;  %v12137_v16 = vpop.eup %8512 }
 0x630   : > { %7637 = vrot.lane.b32.xlu0 %v7636_v3, %s8573_s28  ;;  %v4346_v8 = vadd.f32 1.4214138, %v4314_v23  ;;  %v4283_v28 = vadd.f32 -1.4531521, %v4251_v41  ;;  %v4407_v35 = vadd.f32 -0.28449672, %v4375_v57  ;;  %v4312_v25 = vmul.f32 %v12084_v0, %v4280_v7 }
 0x631   : > { %v12141_v17 = vsel %vm5184_vm5, %v5205_v63, %v5206_v50  ;;  %v14172_v9 = vrot.slane %v11700_v27, 2  ;;  %v4570_v60 = vmul.f32 %v4538_v46, %v11958_v56  ;;  %v4536_v23 = vsub.f32 0.0, %v11972_v24  ;;  %v8005_v46 = vld [vmem:[%s13358_s3 + $0x38] sm:$0xff]  }
 0x632   : > { %v4315_v57 = vmul.f32 %v12123_v33, %v4283_v28  ;;  %v4502_v7 = vmul.f32 %v11951_v26, %v4470_v12  ;;  %v4373_v27 = vmul.f32 %v12042_v14, %v4341_v53  ;;  %v4378_v41 = vmul.f32 %v12063_v2, %v4346_v8  ;;  %v12166_v28 = vpop.permute.xlu1 %7462  ;;  %7642 = vrot.lane.b32.xlu1 %v7636_v3, %s8572_s27 }
 0x633   : > { %v12146_v36 = vsel %vm5184_vm5, %v5206_v50, %v14172_v9  ;;  %v12148_v55 = vpop.eup %8514  ;;  %v4571_v9 = vmul.f32 %v4539_v18, %v12017_v42  ;;  %v4436_v26 = vmul.f32 %v11998_v29, %v4404_v10  ;;  %v4439_v37 = vmul.f32 %v12011_v47, %v4407_v35 }
 0x634   : > { %7647 = vrot.lane.b32.xlu0 %v7636_v3, %s8574_s30  ;;  %v4249_v50 = vmul.f32 1.0614054, %v12148_v55  ;;  %v4347_v63 = vadd.f32 1.4214138, %v4315_v57  ;;  %v7656_v56 = vpack.i.bf16 %v12146_v36, %v12141_v17  ;;  %v4622_v12 = vmul.f32 1.442695, %v4565_v6 }
 0x635   : > { %v4344_v42 = vadd.f32 1.4214138, %v4312_v25  ;;  %v4632_v53 = vmul.f32 1.442695, %v4570_v60  ;;  %v4568_v18 = vmul.f32 %v4536_v23, %v11972_v24  ;;  %v12174_v57 = vmul.f32 %v4753_v49, %v11809_v48  ;;  %v8006_v48 = vld [vmem:[%s13358_s3 + $0x30] sm:$0xff]   ;;  %v12189_v25 = vpop.permute.xlu0 %7472 }
 0x636   : > { %v4281_v8 = vadd.f32 -1.4531521, %v4249_v50  ;;  %v12177_v44 = vmul.f32 %v12067_v15, %v4502_v7  ;;  %v4405_v31 = vadd.f32 -0.28449672, %v4373_v27  ;;  %v4379_v10 = vmul.f32 %v12123_v33, %v4347_v63  ;;  %7652 = vrot.lane.b32.xlu1 %v7656_v56, %s8575_s6 }
 0x637   : > { %v13638_v35 = vmov 0   ;;  %v4410_v60 = vadd.f32 -0.28449672, %v4378_v41  ;;  %v4634_v6 = vmul.f32 1.442695, %v4571_v9  ;;  %v7661_v24 = vpack.i.bf16 %v11742_v40, %v11721_v34  ;;  %v12194_v9 = vpop.permute.xlu1 %7467 }
 0x638   : > { %7657 = vrot.lane.b32.xlu0 %v7656_v56, %s8576_s7  ;;  %6238 = vmatprep.subr.bf16.mxu0 %v13638_v35  ;;  %v4468_v3 = vadd.f32 0.2548296, %v4436_v26  ;;  %8516 = vpow2.f32 %v4622_v12  ;;  %v4376_v15 = vmul.f32 %v12084_v0, %v4344_v42  ;;  %v5055_v49 = vrot.slane %v11742_v40, 1  ;;  %v8007_v56 = vld [vmem:[%s13358_s3 + $0x28] sm:$0xff]  }
 0x639   : > { %6239 = vmatpush1.bf16.msra.mxu0 %v8005_v46  ;;  %v4471_v23 = vadd.f32 0.2548296, %v4439_v37  ;;  %8518 = vpow2.f32 %v4632_v53  ;;  %v4628_v7 = vmul.f32 1.442695, %v4568_v18  ;;  %v4313_v27 = vmul.f32 %v12148_v55, %v4281_v8 }
 0x63a   : > { %6240 = vmatprep.subr.bf16.mxu0 %v13638_v35  ;;  %v4437_v50 = vmul.f32 %v12042_v14, %v4405_v31  ;;  %v4411_v41 = vadd.f32 -0.28449672, %v4379_v10  ;;  %v4537_v63 = vsub.f32 0.0, %v12039_v51  ;;  %v5054_v46 = vrot.slane %v11721_v34, 1  ;;  %7667 = vrot.lane.b32.xlu1 %v7661_v24, %s8571_s25 }
 0x63b   : > { %v4442_v26 = vmul.f32 %v12063_v2, %v4410_v60  ;;  %8520 = vpow2.f32 %v4634_v6  ;;  %v7671_v37 = vpack.i.bf16 %v11757_v43, %v11725_v5  ;;  %v4408_v12 = vadd.f32 -0.28449672, %v4376_v15 }
 0x63c   : > { %7662 = vrot.lane.b32.xlu0 %v7661_v24, %s8570_s29  ;;  %v5056_v42 = vsel %vm5018_vm10, %v5054_v46, %v5055_v49  ;;  %v14173_v31 = vrot.slane %v11733_v52, 1  ;;  %v5221_v18 = vrot.slane %v11742_v40, 2  ;;  %v4694_v8 = vsub.f32 1.0, %v12177_v44  ;;  %v12218_v46 = vpop.permute.xlu0 %7482 }
 0x63d   : > { %6241 = vmatpush1.bf16.msra.mxu0 %v8006_v48  ;;  %v4500_v10 = vmul.f32 %v11998_v29, %v4468_v3  ;;  %v4503_v60 = vmul.f32 %v12011_v47, %v4471_v23  ;;  %v4345_v6 = vadd.f32 1.4214138, %v4313_v27  ;;  %v4469_v48 = vadd.f32 0.2548296, %v4437_v50  ;;  %v8008_v29 = vld [vmem:[%s13358_s3 + $0x20] sm:$0xff]   ;;  %v12224_v47 = vpop.permute.xlu1 %7477 }
 0x63e   : > { %v5058_v53 = vsel %vm5018_vm10, %v5055_v49, %v14173_v31  ;;  %6242 = vmatprep.subr.bf16.mxu0 %v13638_v35  ;;  %8522 = vpow2.f32 %v4628_v7  ;;  %v4443_v15 = vmul.f32 %v12123_v33, %v4411_v41  ;;  %v5220_v49 = vrot.slane %v11721_v34, 2  ;;  %7677 = vrot.lane.b32.xlu1 %v7671_v37, %s8571_s25 }
 0x63f   : > { %v4474_v31 = vadd.f32 0.2548296, %v4442_v26  ;;  %v4569_v44 = vmul.f32 %v4537_v63, %v12039_v51  ;;  %v7691_v35 = vpack.i.bf16 %v5058_v53, %v5056_v42  ;;  %v4440_v24 = vmul.f32 %v12084_v0, %v4408_v12 }
 0x640   : > { %7672 = vrot.lane.b32.xlu0 %v7671_v37, %s8570_s29  ;;  %v12228_v3 = vsel %vm5184_vm5, %v5220_v49, %v5221_v18  ;;  %v14174_v23 = vrot.slane %v11733_v52, 2  ;;  %v5050_v51 = vrot.slane %v11757_v43, 1  ;;  %v14175_v27 = vmov 0  }
 0x641   : > { %6243 = vmatpush1.bf16.msra.mxu0 %v8007_v56  ;;  %v4860_v50 = vrot.slane %v12174_v57, 7  ;;  %v4934_v41 = vrot.slane %v12174_v57, 6  ;;  %v4660_v63 = vmul.f32 %v12115_v22, %v4500_v10  ;;  %v4377_v26 = vmul.f32 %v12148_v55, %v4345_v6  ;;  %v8009_v57 = vld [vmem:[%s13358_s3 + $0x18] sm:$0xff]  }
 0x642   : > { %v12233_v7 = vsel %vm5184_vm5, %v5221_v18, %v14174_v23  ;;  %6244 = vmatprep.subr.bf16.mxu0 %v14175_v27  ;;  %v4726_v52 = vmul.f32 %v4694_v8, %v11913_v13  ;;  %v4663_v56 = vmul.f32 %v12137_v16, %v4503_v60  ;;  %v4475_v12 = vadd.f32 0.2548296, %v4443_v15  ;;  %v14176_v16 = vld [vmem:[#allocation19_spill] sm:$0xff]  ;;  %7682 = vrot.lane.b32.xlu1 %v7691_v35, %s8573_s28 }
 0x643   : > { %v5049_v42 = vrot.slane %v11725_v5, 1  ;;  %v4501_v53 = vmul.f32 %v12042_v14, %v4469_v48  ;;  %v4506_v18 = vmul.f32 %v12063_v2, %v4474_v31  ;;  %v7701_v22 = vpack.i.bf16 %v12233_v7, %v12228_v3  ;;  %v12258_v14 = vpop.permute.xlu0 %7487 }
 0x644   : > { %7692 = vrot.lane.b32.xlu0 %v7691_v35, %s8574_s30  ;;  %v4472_v37 = vadd.f32 0.2548296, %v4440_v24  ;;  %v4630_v10 = vmul.f32 1.442695, %v4569_v44  ;;  %v14177_v8 = vrot.slane %v14176_v16, 1  ;;  %v14178_v48 = vrot.slane %v12029_v45, 7  ;;  %v12268_v44 = vpop.permute.xlu1 %7492 }
 0x645   : > { %6245 = vmatpush1.bf16.msra.mxu0 %v8008_v29  ;;  %v5051_v13 = vsel %vm5018_vm10, %v5049_v42, %v5050_v51  ;;  %v8517_v2 = vpop.eup %8516  ;;  %v4692_v49 = vsub.f32 1.0, %v4660_v63  ;;  %v4409_v31 = vadd.f32 -0.28449672, %v4377_v26  ;;  %v12271_v24 = vsel %vm4828_vm1, %v4860_v50, %v4934_v41  ;;  %v8010_v63 = vld [vmem:[%s13358_s3 + $0x10] sm:$0xff]  }
 0x646   : > { %v5053_v60 = vsel %vm5018_vm10, %v5050_v51, %v14177_v8  ;;  %6246 = vmatprep.subr.bf16.mxu0 %v14175_v27  ;;  %v12264_v15 = vsel %vm4828_vm1, %v14178_v48, %v4860_v50  ;;  %v8519_v29 = vpop.eup %8518  ;;  %v4758_v23 = vadd.f32 1.0, %v4726_v52  ;;  %v4695_v51 = vsub.f32 1.0, %v4663_v56  ;;  %7687 = vrot.lane.b32.xlu1 %v7691_v35, %s8572_s27 }
 0x647   : > { %14179 = vst [vmem:[#allocation50_spill] sm:$0xff] %v12264_v15  ;;  %v4507_v42 = vmul.f32 %v12123_v33, %v4475_v12  ;;  %v4661_v45 = vmul.f32 %v8517_v2, %v4501_v53  ;;  %v4666_v8 = vmul.f32 %v8519_v29, %v4506_v18  ;;  %v7706_v48 = vpack.i.bf16 %v5053_v60, %v5051_v13  ;;  %v12290_v12 = vpop.permute.xlu0 %7497 }
 0x648   : > { %7702 = vrot.lane.b32.xlu0 %v7701_v22, %s8576_s7  ;;  %v8521_v26 = vpop.eup %8520  ;;  %vm4026_vm13 = vcmp.lt.f32.partialorder %v11946_v32, 0.0  ;;  %v4504_v6 = vmul.f32 %v12084_v0, %v4472_v37  ;;  %8524 = vpow2.f32 %v4630_v10  ;;  %v5216_v50 = vrot.slane %v11757_v43, 2  ;;  %v8011_v37 = vld [vmem:[%s13358_s3 + $0x8] sm:$0xff]  }
 0x649   : > { %6247 = vmatpush1.bf16.msra.mxu0 %v8009_v57  ;;  %v4724_v33 = vmul.f32 %v4692_v49, %v11981_v38  ;;  %vm4024_vm14 = vcmp.lt.f32.partialorder %v11964_v62, 0.0  ;;  %vm4027_vm15 = vcmp.lt.f32.partialorder %v11996_v54, 0.0  ;;  %v4441_v41 = vmul.f32 %v12148_v55, %v4409_v31  ;;  %v7508_v57 = vpop.permute.xlu1 %7507  ;;  %v8012_v54 = vld [vmem:[%s13358_s3] sm:$0xff]  }
 0x64a   : > { %6248 = vmatprep.subr.bf16.mxu0 %v14175_v27  ;;  %v4727_v52 = vmul.f32 %v4695_v51, %v12054_v61  ;;  %v4667_v0 = vmul.f32 %v8521_v26, %v4507_v42  ;;  %vm4025_vm2 = vcmp.lt.f32.partialorder %v12035_v59, 0.0  ;;  %v5215_v56 = vrot.slane %v11725_v5, 2  ;;  %7697 = vrot.lane.b32.xlu1 %v7701_v22, %s8575_s6  ;;  %v14182_v42 = vld [vmem:[#allocation32_spill] sm:$0xff] }
 0x64b   : > { %v8523_v38 = vpop.eup %8522  ;;  %v4693_v53 = vsub.f32 1.0, %v4661_v45  ;;  %v4698_v18 = vsub.f32 1.0, %v4666_v8  ;;  %v12296_v35 = vmul.f32 %v4758_v23, %v11900_v30  ;;  %v14181_v13 = vrot.slane %v14176_v16, 2 }
 0x64c   : > { %7707 = vrot.lane.b32.xlu0 %v7706_v48, %s8573_s28  ;;  %v12298_v61 = vmul.f32 %v8523_v38, %v4504_v6  ;;  %v12301_v10 = vsel %vm5184_vm5, %v5215_v56, %v5216_v50  ;;  %v12309_v2 = vadd.f32 1.0, %v4724_v33  ;;  %v4058_v49 = vsel %vm4026_vm13, -1.0, %v14101_v39 }
 0x64d   : > { %6249 = vmatpush1.bf16.msra.mxu0 %v8010_v63  ;;  %14180 = vst [vmem:[#allocation48_spill] sm:$0xff] %v12301_v10  ;;  %v12306_v60 = vsel %vm5184_vm5, %v5216_v50, %v14181_v13  ;;  %v12317_v30 = vsel %vm4024_vm14, -1.0, %v14101_v39  ;;  %v4473_v6 = vadd.f32 0.2548296, %v4441_v41  ;;  %v12321_v16 = vadd.f32 1.0, %v4727_v52  ;;  %v7513_v50 = vpop.permute.xlu1 %7512 }
 0x64e   : > { %6250 = vmatprep.subr.bf16.mxu0 %v14175_v27  ;;  %v4059_v31 = vsel %vm4027_vm15, -1.0, %v14101_v39  ;;  %v4699_v29 = vsub.f32 1.0, %v4667_v0  ;;  %v12329_v32 = vsel %vm4025_vm2, -1.0, %v14101_v39  ;;  %v12332_v62 = vmul.f32 %v4693_v53, %v12104_v58  ;;  %v14183_v39 = vld [vmem:[#allocation33_spill] sm:$0xff]  ;;  %v7503_v58 = vpop.permute.xlu0 %7502  ;;  %7712 = vrot.lane.b32.xlu1 %v7706_v48, %s8572_s27 }
 0x64f   : > { %v12334_v23 = vmul.f32 %v4698_v18, %v4058_v49  ;;  %v7726_v22 = vpack.i.bf16 %v12306_v60, %v12301_v10  ;;  %v7731_v59 = vpack.i.bf16 %v11910_v1, %v14182_v42  ;;  %v12346_v45 = vpack.i.bf16 %v12003_v21, %v14183_v39  ;;  %v14185_v49 = vld [vmem:[#allocation11_spill] sm:$0xff] }
 0x650   : > { %7717 = vrot.lane.b32.xlu0 %v7706_v48, %s8574_s30  ;;  %v4505_v8 = vmul.f32 %v12148_v55, %v4473_v6  ;;  %v7465_v63 = vunpack.i.h.bf16 %v12166_v28  ;;  %v7464_v26 = vunpack.i.l.bf16 %v12166_v28  ;;  %v12354_v33 = vmul.f32 %v4699_v29, %v4059_v31  ;;  %v8013_v48 = vld [vmem:[%s13358_s3 + $0x40] sm:$0xff]  }
 0x651   : > { %6251 = vmatpush1.bf16.msra.mxu0 %v8011_v37  ;;  %v5064_v41 = vrot.slane %v14182_v42, 1  ;;  %v5065_v52 = vrot.slane %v11910_v1, 1  ;;  %v7475_v0 = vunpack.i.h.bf16 %v12189_v25  ;;  %v7474_v56 = vunpack.i.l.bf16 %v12189_v25  ;;  %v14184_v25 = vld [vmem:[#allocation30_spill] sm:$0xff] }
 0x652   : > { %6252 = vmatprep.subr.bf16.mxu0 %v14175_v27  ;;  %vm5890_vm3 = vcmask 261120   ;;  %v7505_v55 = vunpack.i.h.bf16 %v7503_v58  ;;  %v7504_v38 = vunpack.i.l.bf16 %v7503_v58  ;;  %v7510_v28 = vunpack.i.h.bf16 %v7508_v57  ;;  %7722 = vrot.lane.b32.xlu1 %v7726_v22, %s8575_s6  ;;  %v7518_v58 = vpop.permute.xlu0 %7517 }
 0x653   : > { %v7509_v53 = vunpack.i.l.bf16 %v7508_v57  ;;  %vm5921_vm4 = vcmask 392192   ;;  %v7515_v18 = vunpack.i.h.bf16 %v7513_v50  ;;  %vm5954_vm6 = vcmask 523264  }
 0x654   : > { %7727 = vrot.lane.b32.xlu0 %v7726_v22, %s8576_s7  ;;  %v5861_v13 = vsel %vm304_vm0, %v14184_v25, %v7505_v55  ;;  %v5860_v6 = vsel %vm304_vm0, %v14185_v49, %v7504_v38  ;;  %v7514_v31 = vunpack.i.l.bf16 %v7513_v50  ;;  %v5066_v57 = vsel %vm5018_vm10, %v5064_v41, %v5065_v52 }
 0x655   : > { %6253 = vmatpush1.bf16.msra.mxu0 %v8012_v54  ;;  %v8525_v37 = vpop.eup %8524  ;;  %v12372_v54 = vsel %vm5890_vm3, %v5861_v13, %v7510_v28  ;;  %v14186_v22 = vrot.slane %v11920_v19, 1  ;;  %v5231_v55 = vrot.slane %v11910_v1, 2  ;;  %vm5987_vm7 = vcmask 654336  }
 0x656   : > { %6268 = vmatprep.subr.bf16.mxu0 %v14175_v27  ;;  %v4665_v29 = vmul.f32 %v8525_v37, %v4505_v8  ;;  %v12375_v27 = vsel %vm5890_vm3, %v5860_v6, %v7509_v53  ;;  %v5923_v8 = vsel %vm5921_vm4, %v12372_v54, %v7475_v0  ;;  %7737 = vrot.lane.b32.xlu1 %v7731_v59, %s8571_s25  ;;  %vm6020_vm8 = vcmask 785408  }
 0x657   : > { %v5068_v51 = vsel %vm5018_vm10, %v5065_v52, %v14186_v22  ;;  %v5922_v38 = vsel %vm5921_vm4, %v12375_v27, %v7474_v56  ;;  %v5956_v41 = vsel %vm5954_vm6, %v5923_v8, %v7515_v18  ;;  %v5230_v52 = vrot.slane %v14182_v42, 2  ;;  %v12415_v22 = vpop.permute.xlu1 %7527 }
 0x658   : > { %7732 = vrot.lane.b32.xlu0 %v7731_v59, %s8570_s29  ;;  %v5955_v50 = vsel %vm5954_vm6, %v5922_v38, %v7514_v31  ;;  %v7520_v28 = vunpack.i.h.bf16 %v7518_v58  ;;  %v7519_v53 = vunpack.i.l.bf16 %v7518_v58  ;;  %v4697_v56 = vsub.f32 1.0, %v4665_v29 }
 0x659   : > { %6269 = vmatpush2.bf16.msra.mxu0 %v8013_v48  ;;  %v7761_v37 = vpack.i.bf16 %v5068_v51, %v5066_v57  ;;  %v7485_v0 = vunpack.i.h.bf16 %v12218_v46  ;;  %vm6053_vm9 = vcmask 916480   ;;  %v12393_v48 = vsel %vm5184_vm5, %v5230_v52, %v5231_v55  ;;  %v14195_v52 = vld [vmem:[#allocation34_spill] sm:$0xff] }
 0x65a   : > { %14187 = vst [vmem:[#allocation52_spill] sm:$0xff] %v12393_v48  ;;  %v7484_v18 = vunpack.i.l.bf16 %v12218_v46  ;;  %v5988_v25 = vsel %vm5987_vm7, %v5955_v50, %v7519_v53  ;;  %v5989_v13 = vsel %vm5987_vm7, %v5956_v41, %v7520_v28  ;;  %v14188_v59 = vrot.slane %v11920_v19, 2  ;;  %7747 = vrot.lane.b32.xlu1 %v12346_v45, %s8571_s25  ;;  %v14192_v41 = vld [vmem:[#allocation35_spill] sm:$0xff]  ;;  %v14196_v53 = vld [vmem:[#allocation44_spill] sm:$0xff] }
 0x65b   : > { %v5060_v6 = vrot.slane %v12003_v21, 1  ;;  %v6021_v51 = vsel %vm6020_vm8, %v5988_v25, %v7464_v26  ;;  %v6022_v31 = vsel %vm6020_vm8, %v5989_v13, %v7465_v63  ;;  %v4757_v29 = vadd.f32 1.0, %v12332_v62  ;;  %v14198_v13 = vld [vmem:[#allocation28_spill] sm:$0xff] }
 0x65c   : > { %7742 = vrot.lane.b32.xlu0 %v12346_v45, %s8570_s29  ;;  %v12401_v49 = vsel %vm5184_vm5, %v5231_v55, %v14188_v59  ;;  %v14190_v46 = vsub.f32 1.0, %v12298_v61  ;;  %v6054_v19 = vsel %vm6053_vm9, %v6021_v51, %v7484_v18  ;;  %v6055_v58 = vsel %vm6053_vm9, %v6022_v31, %v7485_v0  ;;  %v14191_v55 = vld [vmem:[#allocation36_spill] sm:$0xff] }
 0x65d   : > { %14189 = vst [vmem:[#allocation47_spill] sm:$0xff] %v12401_v49  ;;  %v12419_v63 = vmul.f32 %v12309_v2, %v11916_v20  ;;  %v4729_v62 = vmul.f32 %v4697_v56, %v12329_v32  ;;  %v5059_v61 = vrot.slane %v14183_v39, 1  ;;  %v4791_v26 = vmul.f32 %v12321_v16, %v12022_v11  ;;  %v14194_v32 = vld [vmem:[#allocation31_spill] sm:$0xff]  ;;  %v14197_v16 = vld [vmem:[#allocation40_spill] sm:$0xff] }
 0x65e   : > { %v4728_v57 = vmul.f32 %v14190_v46, %v12317_v30  ;;  %v6086_v30 = vpack.c.bf16 %v6055_v58, %v6054_v19  ;;  %v3962_v45 = vmul.f32 0.5, %v14191_v55  ;;  %v7771_v38 = vpack.i.bf16 %v12401_v49, %v12393_v48  ;;  %7752 = vrot.lane.b32.xlu1 %v7761_v37, %s8573_s28  ;;  %v14199_v19 = vld [vmem:[#allocation38_spill] sm:$0xff] }
 0x65f   : > { %v4763_v8 = vadd.f32 1.0, %v12354_v33  ;;  %v5061_v50 = vsel %vm5018_vm10, %v5059_v61, %v5060_v6  ;;  %v14193_v20 = vrot.slane %v14192_v41, 1  ;;  %v6089_v28 = vpack.c.bf16 %v14195_v52, %v14194_v32 }
 0x660   : > { %7762 = vrot.lane.b32.xlu0 %v7761_v37, %s8574_s30  ;;  %6271 = vmatmul.mubr.bf16.vlgmr.msra.gmra.mxu0 %v6086_v30  ;;  %v4789_v56 = vmul.f32 %v4757_v29, %v14196_v53  ;;  %v4762_v11 = vadd.f32 1.0, %v12334_v23  ;;  %v3960_v0 = vmul.f32 0.5, %v14197_v16  ;;  %v4760_v18 = vadd.f32 1.0, %v4728_v57  ;;  %v12444_v23 = vpop.permute.xlu1 %7537 }
 0x661   : > { %v5063_v2 = vsel %vm5018_vm10, %v5060_v6, %v14193_v20  ;;  %v4868_v33 = vrot.slane %v12296_v35, 7  ;;  %v4865_v25 = vrot.slane %v12419_v63, 7  ;;  %v3963_v59 = vmul.f32 0.5, %v14198_v13  ;;  %6781 = vmatprep.mubr.msk.bf16.mxu0 %vm304_vm0, %v6089_v28 }
 0x662   : > { %v4761_v6 = vadd.f32 1.0, %v4729_v62  ;;  %v4869_v51 = vrot.slane %v4791_v26, 7  ;;  %v4937_v31 = vrot.slane %v4791_v26, 6  ;;  %v7776_v29 = vpack.i.bf16 %v5063_v2, %v5061_v50  ;;  %7757 = vrot.lane.b32.xlu1 %v7761_v37, %s8572_s27  ;;  %v12457_v2 = vpop.permute.xlu0 %7522 }
 0x663   : > { %v4795_v57 = vmul.f32 %v4763_v8, %v3963_v59  ;;  %v3961_v58 = vmul.f32 0.5, %v14199_v19  ;;  %v5226_v61 = vrot.slane %v12003_v21, 2  ;;  %v4866_v30 = vrot.slane %v4789_v56, 7 }
 0x664   : > { %7772 = vrot.lane.b32.xlu0 %v7771_v38, %s8576_s7  ;;  %v4936_v55 = vrot.slane %v4789_v56, 6  ;;  %v4794_v20 = vmul.f32 %v4762_v11, %v3962_v45  ;;  %v4792_v32 = vmul.f32 %v4760_v18, %v3960_v0  ;;  %v12454_v26 = vsel %vm4828_vm1, %v12296_v35, %v4868_v33  ;;  %v12482_v18 = vpop.permute.xlu1 %7542 }
 0x665   : > { %v4793_v50 = vmul.f32 %v4761_v6, %v3961_v58  ;;  %v5225_v8 = vrot.slane %v14183_v39, 2  ;;  %v12461_v52 = vsel %vm4828_vm1, %v12419_v63, %v4865_v25  ;;  %v12464_v45 = vsel %vm4828_vm1, %v4869_v51, %v4937_v31  ;;  %v14201_v58 = vld [vmem:[#allocation46_spill] sm:$0xff] }
 0x666   : > { %v4875_v28 = vrot.slane %v4795_v57, 7  ;;  %v4939_v37 = vrot.slane %v4795_v57, 6  ;;  %v14200_v35 = vrot.slane %v14192_v41, 2  ;;  %v12475_v11 = vsel %vm4828_vm1, %v4868_v33, %v4869_v51  ;;  %7767 = vrot.lane.b32.xlu1 %v7771_v38, %s8575_s6 }
 0x667   : > { %v12467_v53 = vsel %vm5184_vm5, %v5225_v8, %v5226_v61  ;;  %v12478_v16 = vsel %vm4828_vm1, %v4866_v30, %v4936_v55  ;;  %v4874_v63 = vrot.slane %v4794_v20, 7  ;;  %v4871_v0 = vrot.slane %v4792_v32, 7  ;;  %v12499_v55 = vpop.permute.xlu0 %7532 }
 0x668   : > { %7777 = vrot.lane.b32.xlu0 %v7776_v29, %s8573_s28  ;;  %v12472_v56 = vsel %vm5184_vm5, %v5226_v61, %v14200_v35  ;;  %v4872_v13 = vrot.slane %v4793_v50, 7  ;;  %v4938_v59 = vrot.slane %v4793_v50, 6  ;;  %v7480_v41 = vunpack.i.h.bf16 %v12224_v47 }
 0x669   : > { %v7479_v6 = vunpack.i.l.bf16 %v12224_v47  ;;  %v5253_v33 = vrot.slane %v12464_v45, 2  ;;  %v7796_v51 = vpack.i.bf16 %v12472_v56, %v12467_v53  ;;  %v12492_v57 = vsel %vm4828_vm1, %v4865_v25, %v4866_v30 }
 0x66a   : > { %v5248_v38 = vrot.slane %v12478_v16, 2  ;;  %v12496_v19 = vsel %vm4828_vm1, %v4875_v28, %v4939_v37  ;;  %v5075_v61 = vrot.slane %v14201_v58, 1  ;;  %v12502_v47 = vsel %vm4828_vm1, %v4794_v20, %v4874_v63  ;;  %7782 = vrot.lane.b32.xlu1 %v7776_v29, %s8572_s27  ;;  %v14202_v37 = vld [vmem:[#allocation24_spill] sm:$0xff]  ;;  %v14203_v20 = vld [vmem:[#allocation10_spill] sm:$0xff] }
 0x66b   : > { %v12505_v50 = vsel %vm4828_vm1, %v4792_v32, %v4871_v0  ;;  %v7470_v8 = vunpack.i.h.bf16 %v12194_v9  ;;  %v7469_v25 = vunpack.i.l.bf16 %v12194_v9  ;;  %v12512_v30 = vsel %vm4828_vm1, %v4872_v13, %v4938_v59  ;;  %v14204_v32 = vld [vmem:[#allocation42_spill] sm:$0xff]  ;;  %v12529_v59 = vpop.permute.xlu1 %7547  ;;  %v12549_v21 = vpop.permute.xlu0 %7552 }
 0x66c   : > { %7787 = vrot.lane.b32.xlu0 %v7776_v29, %s8574_s30  ;;  %v12516_v35 = vsel %vm304_vm0, %v14202_v37, %v7480_v41  ;;  %v12520_v31 = vsel %vm304_vm0, %v14203_v20, %v7479_v6  ;;  %v5074_v46 = vrot.slane %v14204_v32, 1  ;;  %v12524_v62 = vsel %vm4828_vm1, %v4874_v63, %v4875_v28 }
 0x66d   : > { %v5552_v9 = vrot.slane %v12496_v19, 2  ;;  %v7801_v29 = vpack.i.bf16 %v14201_v58, %v14204_v32  ;;  %v7490_v42 = vunpack.i.h.bf16 %v12258_v14  ;;  %v7489_v41 = vunpack.i.l.bf16 %v12258_v14  ;;  %v14206_v14 = vld [vmem:[#allocation43_spill] sm:$0xff] }
 0x66e   : > { %v5076_v37 = vsel %vm5018_vm10, %v5074_v46, %v5075_v61  ;;  %v14205_v6 = vrot.slane %v12126_v4, 1  ;;  %v12538_v28 = vsel %vm4828_vm1, %v4871_v0, %v4872_v13  ;;  %v5258_v63 = vrot.slane %v12512_v30, 2  ;;  %7792 = vrot.lane.b32.xlu1 %v7796_v51, %s8575_s6 }
 0x66f   : > { %v5925_v1 = vsel %vm5921_vm4, %v12372_v54, %v7470_v8  ;;  %v5924_v39 = vsel %vm5921_vm4, %v12375_v27, %v7469_v25  ;;  %v7811_v46 = vpack.i.bf16 %v12264_v15, %v14206_v14  ;;  %v5241_v0 = vrot.slane %v14201_v58, 2 }
 0x670   : > { %7797 = vrot.lane.b32.xlu0 %v7796_v51, %s8576_s7  ;;  %v5078_v20 = vsel %vm5018_vm10, %v5075_v61, %v14205_v6  ;;  %v5236_v61 = vrot.slane %v12264_v15, 2  ;;  %v5251_v6 = vrot.slane %v12475_v11, 2  ;;  %v5069_v54 = vrot.slane %v14206_v14, 1 }
 0x671   : > { %v7826_v13 = vpack.i.bf16 %v5078_v20, %v5076_v37  ;;  %v5240_v27 = vrot.slane %v14204_v32, 2  ;;  %v5246_v8 = vrot.slane %v12492_v57, 2  ;;  %v5070_v51 = vrot.slane %v12264_v15, 1 }
 0x672   : > { %7807 = vrot.lane.b32.xlu1 %v7801_v29, %s8571_s25  ;;  %v5235_v37 = vrot.slane %v14206_v14, 2  ;;  %v5250_v20 = vrot.slane %v12454_v26, 2  ;;  %v14208_v32 = vrot.slane %v12126_v4, 2  ;;  %v5256_v15 = vrot.slane %v12538_v28, 2 }
 0x673   : > { %v12560_v25 = vpop.permute.xlu1 %7557  ;;  %v12567_v34 = vsel %vm5184_vm5, %v5240_v27, %v5241_v0  ;;  %v14209_v14 = vrot.slane %v12271_v24, 2  ;;  %v12588_v4 = vsel %vm5184_vm5, %v5251_v6, %v5253_v33  ;;  %v12596_v58 = vsel %vm5184_vm5, %v5246_v8, %v5248_v38 }
 0x674   : > { %7802 = vrot.lane.b32.xlu0 %v7801_v29, %s8570_s29  ;;  %14207 = vst [vmem:[#allocation51_spill] sm:$0xff] %v12567_v34  ;;  %v12572_v40 = vsel %vm5184_vm5, %v5241_v0, %v14208_v32  ;;  %v5245_v29 = vrot.slane %v12461_v52, 2  ;;  %v12577_v5 = vsel %vm5184_vm5, %v5235_v37, %v5236_v61  ;;  %v12585_v27 = vsel %vm5184_vm5, %v5250_v20, %v5251_v6  ;;  %v12590_v32 = vpop.permute.xlu0 %7562 }
 0x675   : > { %v12582_v43 = vsel %vm5184_vm5, %v5236_v61, %v14209_v14  ;;  %v5255_v37 = vrot.slane %v12505_v50, 2  ;;  %v5549_v10 = vrot.slane %v12502_v47, 2  ;;  %v5550_v14 = vrot.slane %v12524_v62, 2 }
 0x676   : > { %v12593_v0 = vsel %vm5184_vm5, %v5245_v29, %v5246_v8  ;;  %7817 = vrot.lane.b32.xlu1 %v7811_v46, %s8571_s25  ;;  %v12613_v8 = vsel %vm5184_vm5, %v5256_v15, %v5258_v63  ;;  %v7535_v63 = vunpack.i.h.bf16 %v12499_v55  ;;  %v5071_v20 = vsel %vm5018_vm10, %v5069_v54, %v5070_v51 }
 0x677   : > { %v12610_v6 = vsel %vm5184_vm5, %v5255_v37, %v5256_v15  ;;  %v12622_v33 = vsel %vm5184_vm5, %v5549_v10, %v5550_v14  ;;  %v12625_v61 = vsel %vm5184_vm5, %v5550_v14, %v5552_v9  ;;  %v14210_v38 = vrot.slane %v12271_v24, 1 }
 0x678   : > { %7812 = vrot.lane.b32.xlu0 %v7811_v46, %s8570_s29  ;;  %v5957_v46 = vsel %vm5954_vm6, %v5924_v39, %v7489_v41  ;;  %v7534_v48 = vunpack.i.l.bf16 %v12499_v55  ;;  %v5958_v9 = vsel %vm5954_vm6, %v5925_v1, %v7490_v42  ;;  %v12645_v39 = vpack.c.bf16 %v12625_v61, %v12622_v33 }
 0x679   : > { %v5073_v10 = vsel %vm5018_vm10, %v5070_v51, %v14210_v38  ;;  %v7495_v41 = vunpack.i.h.bf16 %v12268_v44  ;;  %v7494_v24 = vunpack.i.l.bf16 %v12268_v44  ;;  %v7500_v54 = vunpack.i.h.bf16 %v12290_v12 }
 0x67a   : > { %7822 = vrot.lane.b32.xlu1 %v7826_v13, %s8572_s27  ;;  %14211 = vst [vmem:[#allocation49_spill] sm:$0xff] %v12645_v39  ;;  %v7499_v55 = vunpack.i.l.bf16 %v12290_v12  ;;  %v7540_v42 = vunpack.i.h.bf16 %v12444_v23  ;;  %v7846_v51 = vpack.i.bf16 %v5073_v10, %v5071_v20  ;;  %v7831_v38 = vpack.i.bf16 %v12572_v40, %v12567_v34 }
 0x67b   : > { %v5990_v15 = vsel %vm5987_vm7, %v5957_v46, %v7494_v24  ;;  %v5991_v37 = vsel %vm5987_vm7, %v5958_v9, %v7495_v41  ;;  %v5894_v10 = vsel %vm5890_vm3, %v12516_v35, %v7500_v54  ;;  %v7524_v34 = vunpack.i.l.bf16 %v12457_v2  ;;  %v14213_v54 = vld [vmem:[#allocation16_spill] sm:$0xff] }
 0x67c   : > { %7827 = vrot.lane.b32.xlu0 %v7826_v13, %s8574_s30  ;;  %v6023_v49 = vsel %vm6020_vm8, %v5990_v15, %v7534_v48  ;;  %v6024_v12 = vsel %vm6020_vm8, %v5991_v37, %v7535_v63  ;;  %v5893_v46 = vsel %vm5890_vm3, %v12520_v31, %v7499_v55  ;;  %v7525_v48 = vunpack.i.h.bf16 %v12457_v2 }
 0x67d   : > { %v12619_v29 = vpop.permute.xlu1 %7567  ;;  %v7578_v1 = vpop.permute.xlu0 %7577  ;;  %v5927_v63 = vsel %vm5921_vm4, %v5894_v10, %v7540_v42  ;;  %v7550_v42 = vunpack.i.h.bf16 %v12529_v59  ;;  %v7881_v10 = vpack.i.bf16 %v12492_v57, %v12461_v52 }
 0x67e   : > { %7832 = vrot.lane.b32.xlu1 %v7831_v38, %s8575_s6  ;;  %v7579_v20 = vunpack.i.l.bf16 %v7578_v1 }
 0x680   : > { %7837 = vrot.lane.b32.xlu0 %v7826_v13, %s8573_s28  ;;  %v7539_v13 = vunpack.i.l.bf16 %v12444_v23  ;;  %v7580_v23 = vunpack.i.h.bf16 %v7578_v1 }
 0x681   : > { %v7573_v14 = vpop.permute.xlu1 %7572 }
 0x682   : > { %v7575_v39 = vunpack.i.h.bf16 %v7573_v14  ;;  %v7574_v44 = vunpack.i.l.bf16 %v7573_v14  ;;  %v5926_v41 = vsel %vm5921_vm4, %v5893_v46, %v7539_v13  ;;  %7842 = vrot.lane.b32.xlu1 %v7831_v38, %s8576_s7  ;;  %v7549_v13 = vunpack.i.l.bf16 %v12529_v59 }
 0x683   : > { %v5959_v31 = vsel %vm5954_vm6, %v5926_v41, %v7579_v20  ;;  %v7866_v38 = vpack.i.bf16 %v12582_v43, %v12577_v5 }
 0x684   : > { %7847 = vrot.lane.b32.xlu0 %v7846_v51, %s8573_s28  ;;  %v6056_v9 = vsel %vm6053_vm9, %v6023_v49, %v7574_v44  ;;  %v6057_v14 = vsel %vm6053_vm9, %v6024_v12, %v7575_v39  ;;  %v5960_v49 = vsel %vm5954_vm6, %v5927_v63, %v7580_v23  ;;  %v7588_v35 = vpop.permute.xlu0 %7587  ;;  %v14212_v39 = vld [vmem:[#allocation8_spill] sm:$0xff] }
 0x685   : > { %v6088_v15 = vpack.c.bf16 %v6057_v14, %v6056_v9  ;;  %v7583_v37 = vpop.permute.xlu1 %7582  ;;  %v6091_v55 = vpack.c.bf16 %v14213_v54, %v14212_v39  ;;  %v5087_v9 = vrot.slane %v12464_v45, 1  ;;  %v5082_v39 = vrot.slane %v12478_v16, 1 }
 0x686   : > { %v7585_v24 = vunpack.i.h.bf16 %v7583_v37  ;;  %v7584_v1 = vunpack.i.l.bf16 %v7583_v37  ;;  %7852 = vrot.lane.b32.xlu1 %v7846_v51, %s8572_s27  ;;  %v14214_v37 = vpack.c.bf16 %v12146_v36, %v12141_v17  ;;  %v7570_v17 = vunpack.i.h.bf16 %v12619_v29 }
 0x687   : > { %6279 = vmatmul.mubr.bf16.gmra.mxu0 %v6088_v15  ;;  %v7569_v36 = vunpack.i.l.bf16 %v12619_v29  ;;  %v5080_v54 = vrot.slane %v12492_v57, 1 }
 0x688   : > { %7857 = vrot.lane.b32.xlu0 %v7846_v51, %s8574_s30  ;;  %v5992_v44 = vsel %vm5987_vm7, %v5959_v31, %v7584_v1  ;;  %v5993_v2 = vsel %vm5987_vm7, %v5960_v49, %v7585_v24  ;;  %6782 = vmatprep.mubr.msk.bf16.mxu0 %vm304_vm0, %v6091_v55  ;;  %v12692_v46 = vpop.permute.xlu0 %7592  ;;  %v5084_v51 = vrot.slane %v12454_v26, 1  ;;  %v7901_v31 = vpack.i.bf16 %v12588_v4, %v12585_v27 }
 0x689   : > { %v6025_v12 = vsel %vm6020_vm8, %v5992_v44, %v7524_v34  ;;  %v6026_v23 = vsel %vm6020_vm8, %v5993_v2, %v7525_v48  ;;  %v5085_v34 = vrot.slane %v12475_v11, 1  ;;  %v7871_v48 = vpack.i.bf16 %v12475_v11, %v12454_v26  ;;  %v12701_v15 = vpop.permute.xlu1 %7597  ;;  %v14215_v44 = vld [vmem:[#allocation2_spill] sm:$0xff]  ;;  %v14216_v2 = vld [vmem:[#allocation20_spill] sm:$0xff] }
 0x68a   : > { %v6058_v59 = vsel %vm6053_vm9, %v6025_v12, %v7549_v13  ;;  %v6059_v20 = vsel %vm6053_vm9, %v6026_v23, %v7550_v42  ;;  %7862 = vrot.lane.b32.xlu1 %v7866_v38, %s8575_s6  ;;  %v7590_v55 = vunpack.i.h.bf16 %v7588_v35  ;;  %v7589_v42 = vunpack.i.l.bf16 %v7588_v35 }
 0x68b   : > { %v6090_v14 = vpack.c.bf16 %v6059_v20, %v6058_v59  ;;  %v5086_v45 = vsel %vm5018_vm10, %v5084_v51, %v5085_v34  ;;  %v5088_v63 = vsel %vm5018_vm10, %v5085_v34, %v5087_v9  ;;  %v5079_v13 = vrot.slane %v12461_v52, 1 }
 0x68c   : > { %7867 = vrot.lane.b32.xlu0 %v7866_v38, %s8576_s7  ;;  %v12711_v41 = vpop.permute.xlu0 %7602  ;;  %v7891_v24 = vpack.i.bf16 %v5088_v63, %v5086_v45  ;;  %v5865_v29 = vsel %vm304_vm0, %v14215_v44, %v7570_v17  ;;  %v5864_v38 = vsel %vm304_vm0, %v14216_v2, %v7569_v36  ;;  %v5083_v59 = vsel %vm5018_vm10, %v5080_v54, %v5082_v39 }
 0x68d   : > { %v12715_v1 = vpop.permute.xlu1 %7607  ;;  %v5081_v16 = vsel %vm5018_vm10, %v5079_v13, %v5080_v54  ;;  %v7545_v35 = vunpack.i.h.bf16 %v12482_v18  ;;  %v7544_v20 = vunpack.i.l.bf16 %v12482_v18  ;;  %v5895_v9 = vsel %vm5890_vm3, %v5864_v38, %v7589_v42  ;;  %v14218_v54 = vld [vmem:[#allocation14_spill] sm:$0xff] }
 0x68e   : > { %7872 = vrot.lane.b32.xlu1 %v7871_v48, %s8570_s29  ;;  %v7530_v34 = vunpack.i.h.bf16 %v12415_v22  ;;  %v7916_v45 = vpack.i.bf16 %v5083_v59, %v5081_v16  ;;  %v5451_v63 = vrot.slane %v12496_v19, 1  ;;  %v7565_v18 = vunpack.i.h.bf16 %v12590_v32 }
 0x68f   : > { %6287 = vmatmul.mubr.bf16.gmra.mxu0 %v6090_v14  ;;  %v7529_v14 = vunpack.i.l.bf16 %v12415_v22  ;;  %v7564_v17 = vunpack.i.l.bf16 %v12590_v32  ;;  %v5866_v19 = vsel %vm304_vm0, %v14218_v54, %v7544_v20  ;;  %v7560_v32 = vunpack.i.h.bf16 %v12560_v25 }
 0x690   : > { %7882 = vrot.lane.b32.xlu0 %v7881_v10, %s8570_s29  ;;  %6783 = vmatprep.mubr.msk.bf16.mxu0 %vm304_vm0, %v14214_v37  ;;  %v7926_v37 = vpack.i.bf16 %v12596_v58, %v12593_v0  ;;  %v5448_v44 = vrot.slane %v12502_v47, 1  ;;  %v7559_v2 = vunpack.i.l.bf16 %v12560_v25  ;;  %v7946_v20 = vpack.i.bf16 %v12538_v28, %v12505_v50 }
 0x691   : > { %v5928_v22 = vsel %vm5921_vm4, %v5895_v9, %v7529_v14  ;;  %v5897_v59 = vsel %vm5890_vm3, %v5866_v19, %v7564_v17  ;;  %v12783_v25 = vpack.i.bf16 %v12524_v62, %v12502_v47  ;;  %v7610_v17 = vunpack.i.h.bf16 %v12715_v1 }
 0x692   : > { %7877 = vrot.lane.b32.xlu1 %v7871_v48, %s8571_s25 }
 0x694   : > { %7887 = vrot.lane.b32.xlu0 %v7881_v10, %s8571_s25  ;;  %v5896_v10 = vsel %vm5890_vm3, %v5865_v29, %v7590_v55  ;;  %v7555_v55 = vunpack.i.h.bf16 %v12549_v21 }
 0x695   : > { %v5929_v36 = vsel %vm5921_vm4, %v5896_v10, %v7530_v34  ;;  %v5449_v10 = vrot.slane %v12524_v62, 1 }
 0x696   : > { %7902 = vrot.lane.b32.xlu1 %v7901_v31, %s8575_s6  ;;  %v5962_v16 = vsel %vm5954_vm6, %v5929_v36, %v7555_v55  ;;  %v7609_v36 = vunpack.i.l.bf16 %v12715_v1 }
 0x697   : > { %v5995_v34 = vsel %vm5987_vm7, %v5962_v16, %v7560_v32  ;;  %v14220_v32 = vld [vmem:[#allocation45_spill] sm:$0xff]  ;;  %v5450_v1 = vsel %vm5018_vm10, %v5448_v44, %v5449_v10  ;;  %v7594_v44 = vunpack.i.l.bf16 %v12692_v46 }
 0x698   : > { %7892 = vrot.lane.b32.xlu0 %v7891_v24, %s8572_s27  ;;  %v12719_v49 = vpop.permute.xlu0 %7622  ;;  %v12734_v23 = vpop.permute.xlu1 %7612 }
 0x69a   : > { %7912 = vrot.lane.b32.xlu1 %v7901_v31, %s8576_s7  ;;  %v14217_v31 = vld [vmem:[#allocation3_spill] sm:$0xff] }
 0x69b   : > { %v5867_v39 = vsel %vm304_vm0, %v14217_v31, %v7545_v35  ;;  %v7605_v35 = vunpack.i.h.bf16 %v12711_v41 }
 0x69c   : > { %7897 = vrot.lane.b32.xlu0 %v7891_v24, %s8574_s30  ;;  %v12748_v48 = vpop.permute.xlu1 %7617  ;;  %v5898_v29 = vsel %vm5890_vm3, %v5867_v39, %v7565_v18  ;;  %v5090_v18 = vrot.slane %v12538_v28, 1 }
 0x69d   : > { %v6028_v62 = vsel %vm6020_vm8, %v5995_v34, %v7605_v35  ;;  %v5452_v35 = vsel %vm5018_vm10, %v5449_v10, %v5451_v63  ;;  %v5931_v34 = vsel %vm5921_vm4, %v5898_v29, %v7610_v17  ;;  %v7619_v10 = vunpack.i.l.bf16 %v12748_v48 }
 0x69e   : > { %v12732_v12 = vpop.permute.xlu0 %7632  ;;  %7917 = vrot.lane.b32.xlu1 %v7916_v45, %s8572_s27  ;;  %v7956_v29 = vpack.i.bf16 %v5452_v35, %v5450_v1 }
 0x6a0   : > { %7907 = vrot.lane.b32.xlu0 %v7891_v24, %s8573_s28  ;;  %v5092_v24 = vrot.slane %v12512_v30, 1  ;;  %v7554_v30 = vunpack.i.l.bf16 %v12549_v21  ;;  %v12767_v13 = vpop.permute.xlu1 %7627  ;;  %v7604_v21 = vunpack.i.l.bf16 %v12711_v41 }
 0x6a2   : > { %v12746_v51 = vpop.permute.xlu0 %7637  ;;  %v5961_v38 = vsel %vm5954_vm6, %v5928_v22, %v7554_v30  ;;  %7922 = vrot.lane.b32.xlu1 %v7916_v45, %s8574_s30  ;;  %v14219_v30 = vld [vmem:[#allocation39_spill] sm:$0xff] }
 0x6a3   : > { %v5994_v9 = vsel %vm5987_vm7, %v5961_v38, %v7559_v2  ;;  %v6095_v2 = vpack.c.bf16 %v14220_v32, %v14219_v30  ;;  %v7640_v30 = vunpack.i.h.bf16 %v12746_v51  ;;  %v7639_v32 = vunpack.i.l.bf16 %v12746_v51 }
 0x6a4   : > { %7927 = vrot.lane.b32.xlu0 %v7926_v37, %s8575_s6  ;;  %v7643_v41 = vpop.permute.xlu1 %7642  ;;  %v6027_v31 = vsel %vm6020_vm8, %v5994_v9, %v7604_v21  ;;  %v5093_v9 = vsel %vm5018_vm10, %v5090_v18, %v5092_v24 }
 0x6a5   : > { %v7645_v22 = vunpack.i.h.bf16 %v7643_v41  ;;  %v7644_v47 = vunpack.i.l.bf16 %v7643_v41 }
 0x6a6   : > { %v7648_v42 = vpop.permute.xlu0 %7647  ;;  %7932 = vrot.lane.b32.xlu1 %v7916_v45, %s8573_s28  ;;  %v5930_v45 = vsel %vm5921_vm4, %v5897_v59, %v7609_v36  ;;  %v7620_v59 = vunpack.i.h.bf16 %v12748_v48 }
 0x6a7   : > { %v7650_v39 = vunpack.i.h.bf16 %v7648_v42  ;;  %v7649_v54 = vunpack.i.l.bf16 %v7648_v42  ;;  %v6060_v19 = vsel %vm6053_vm9, %v6027_v31, %v7644_v47  ;;  %v6061_v55 = vsel %vm6053_vm9, %v6028_v62, %v7645_v22 }
 0x6a8   : > { %7937 = vrot.lane.b32.xlu0 %v7926_v37, %s8576_s7  ;;  %v5089_v37 = vrot.slane %v12505_v50, 1  ;;  %v6092_v38 = vpack.c.bf16 %v6061_v55, %v6060_v19  ;;  %v7653_v21 = vpop.permute.xlu1 %7652  ;;  %v7595_v47 = vunpack.i.h.bf16 %v12692_v46  ;;  %v7976_v19 = vpack.i.bf16 %v12613_v8, %v12610_v6 }
 0x6a9   : > { %v7655_v41 = vunpack.i.h.bf16 %v7653_v21  ;;  %v7654_v22 = vunpack.i.l.bf16 %v7653_v21  ;;  %v5963_v31 = vsel %vm5954_vm6, %v5930_v45, %v7649_v54  ;;  %v5964_v62 = vsel %vm5954_vm6, %v5931_v34, %v7650_v39  ;;  %v14224_v45 = vld [vmem:[#allocation13_spill] sm:$0xff] }
 0x6aa   : > { %v12788_v14 = vpop.permute.xlu0 %7657  ;;  %v5091_v42 = vsel %vm5018_vm10, %v5089_v37, %v5090_v18  ;;  %6295 = vmatmul.mubr.bf16.gmra.mxu0 %v6092_v38  ;;  %7942 = vrot.lane.b32.xlu1 %v12783_v25, %s8570_s29  ;;  %v14221_v38 = vld [vmem:[#allocation48_spill] sm:$0xff]  ;;  %v5868_v34 = vsel %vm304_vm0, %v14224_v45, %v7639_v32  ;;  %v14226_v32 = vld [vmem:[#allocation7_spill] sm:$0xff] }
 0x6ab   : > { %v5996_v63 = vsel %vm5987_vm7, %v5963_v31, %v7654_v22  ;;  %v5997_v24 = vsel %vm5987_vm7, %v5964_v62, %v7655_v41  ;;  %6784 = vmatprep.mubr.msk.bf16.mxu0 %vm304_vm0, %v6095_v2  ;;  %v7961_v17 = vpack.i.bf16 %v5093_v9, %v5091_v42  ;;  %v7660_v2 = vunpack.i.h.bf16 %v12788_v14  ;;  %v14223_v9 = vld [vmem:[#allocation4_spill] sm:$0xff] }
 0x6ac   : > { %7947 = vrot.lane.b32.xlu0 %v7946_v20, %s8570_s29  ;;  %v6029_v46 = vsel %vm6020_vm8, %v5996_v63, %v7594_v44  ;;  %v6030_v37 = vsel %vm6020_vm8, %v5997_v24, %v7595_v47  ;;  %v7659_v1 = vunpack.i.l.bf16 %v12788_v14  ;;  %v14222_v21 = vpack.c.bf16 %v12306_v60, %v14221_v38 }
 0x6ad   : > { %v6062_v36 = vsel %vm6053_vm9, %v6029_v46, %v7619_v10  ;;  %v6063_v39 = vsel %vm6053_vm9, %v6030_v37, %v7620_v59  ;;  %v5869_v51 = vsel %vm304_vm0, %v14223_v9, %v7640_v30  ;;  %v7600_v60 = vunpack.i.h.bf16 %v12701_v15 }
 0x6ae   : > { %v12803_v16 = vpop.permute.xlu0 %7662  ;;  %7962 = vrot.lane.b32.xlu1 %v7961_v17, %s8572_s27  ;;  %v6094_v55 = vpack.c.bf16 %v6063_v39, %v6062_v36  ;;  %v5899_v14 = vsel %vm5890_vm3, %v5868_v34, %v7659_v1  ;;  %v5900_v41 = vsel %vm5890_vm3, %v5869_v51, %v7660_v2  ;;  %v7599_v22 = vunpack.i.l.bf16 %v12701_v15 }
 0x6af   : > { %v5933_v62 = vsel %vm5921_vm4, %v5900_v41, %v7600_v60  ;;  %v7625_v63 = vunpack.i.h.bf16 %v12719_v49  ;;  %v7624_v24 = vunpack.i.l.bf16 %v12719_v49  ;;  %v7614_v15 = vunpack.i.l.bf16 %v12734_v23 }
 0x6b0   : > { %7952 = vrot.lane.b32.xlu0 %v7946_v20, %s8571_s25  ;;  %v12826_v20 = vpop.permute.xlu1 %7667  ;;  %v5932_v31 = vsel %vm5921_vm4, %v5899_v14, %v7599_v22  ;;  %v7630_v36 = vunpack.i.h.bf16 %v12767_v13  ;;  %v7629_v49 = vunpack.i.l.bf16 %v12767_v13 }
 0x6b1   : > { %v5965_v46 = vsel %vm5954_vm6, %v5932_v31, %v7624_v24  ;;  %v5966_v37 = vsel %vm5954_vm6, %v5933_v62, %v7625_v63 }
 0x6b2   : > { %v12823_v18 = vpop.permute.xlu0 %7672  ;;  %6303 = vmatmul.mubr.bf16.gmra.mxu0 %v6094_v55  ;;  %7967 = vrot.lane.b32.xlu1 %v7961_v17, %s8574_s30  ;;  %v14225_v55 = vld [vmem:[#allocation27_spill] sm:$0xff]  ;;  %v5999_v13 = vsel %vm5987_vm7, %v5966_v37, %v7630_v36 }
 0x6b3   : > { %6785 = vmatprep.mubr.msk.bf16.mxu0 %vm304_vm0, %v14222_v21  ;;  %v7674_v39 = vunpack.i.l.bf16 %v12823_v18 }
 0x6b4   : > { %7957 = vrot.lane.b32.xlu0 %v7956_v29, %s8572_s27  ;;  %v12834_v54 = vpop.permute.xlu1 %7677 }
 0x6b5   : > { %v7679_v38 = vunpack.i.l.bf16 %v12834_v54 }
 0x6b6   : > { %v12832_v48 = vpop.permute.xlu0 %7692  ;;  %7972 = vrot.lane.b32.xlu1 %v12783_v25, %s8571_s25  ;;  %v7615_v25 = vunpack.i.h.bf16 %v12734_v23  ;;  %v7635_v23 = vunpack.i.h.bf16 %v12732_v12 }
 0x6b8   : > { %7977 = vrot.lane.b32.xlu0 %v7976_v19, %s8575_s6  ;;  %v12850_v42 = vpop.permute.xlu1 %7682  ;;  %v5871_v30 = vsel %vm304_vm0, %v14225_v55, %v7615_v25 }
 0x6b9   : > { %v5902_v22 = vsel %vm5890_vm3, %v5871_v30, %v7635_v23 }
 0x6ba   : > { %v12848_v35 = vpop.permute.xlu0 %7702  ;;  %7982 = vrot.lane.b32.xlu1 %v7961_v17, %s8573_s28  ;;  %v7675_v17 = vunpack.i.h.bf16 %v12823_v18  ;;  %v7680_v18 = vunpack.i.h.bf16 %v12834_v54 }
 0x6bc   : > { %7987 = vrot.lane.b32.xlu0 %v7976_v19, %s8576_s7  ;;  %v12865_v44 = vpop.permute.xlu1 %7687  ;;  %v7634_v19 = vunpack.i.l.bf16 %v12732_v12  ;;  %v6032_v51 = vsel %vm6020_vm8, %v5999_v13, %v7675_v17  ;;  %v5935_v24 = vsel %vm5921_vm4, %v5902_v22, %v7680_v18  ;;  %v14227_v17 = vpack.c.bf16 %v12233_v7, %v12228_v3 }
 0x6bd   : > { %v7689_v23 = vunpack.i.l.bf16 %v12865_v44 }
 0x6be   : > { %v12863_v47 = vpop.permute.xlu0 %7707 }
 0x6bf   : > { %v7710_v13 = vunpack.i.h.bf16 %v12863_v47 }
 0x6c0   : > { %7992 = vrot.lane.b32.xlu0 %v7956_v29, %s8574_s30  ;;  %v12875_v10 = vpop.permute.xlu1 %7697  ;;  %v7996_v29 = vpack.i.bf16 %v12625_v61, %v12622_v33  ;;  %v5870_v33 = vsel %vm304_vm0, %v14226_v32, %v7614_v15  ;;  %v5998_v61 = vsel %vm5987_vm7, %v5965_v46, %v7629_v49  ;;  %v7664_v46 = vunpack.i.l.bf16 %v12803_v16  ;;  %s13189_s30 = scalar_lea.vmem %s13360_s5, %s6798_s26 }
 0x6c1   : > { %v6031_v9 = vsel %vm6020_vm8, %v5998_v61, %v7674_v39  ;;  %v5901_v60 = vsel %vm5890_vm3, %v5870_v33, %v7634_v19  ;;  %v7690_v39 = vunpack.i.h.bf16 %v12865_v44 }
 0x6c2   : > { %v7718_v59 = vpop.permute.xlu0 %7717  ;;  %7997 = vrot.lane.b32.xlu1 %v7996_v29, %s8575_s6  ;;  %v5934_v63 = vsel %vm5921_vm4, %v5901_v60, %v7679_v38  ;;  %v14228_v38 = vpack.c.bf16 %v12472_v56, %v12467_v53  ;;  %v7669_v53 = vunpack.i.l.bf16 %v12826_v20 }
 0x6c3   : > { %v7720_v45 = vunpack.i.h.bf16 %v7718_v59  ;;  %v7719_v34 = vunpack.i.l.bf16 %v7718_v59  ;;  %v7665_v59 = vunpack.i.h.bf16 %v12803_v16 }
 0x6c4   : > { %v7713_v1 = vpop.permute.xlu1 %7712 }
 0x6c5   : > { %v7715_v21 = vunpack.i.h.bf16 %v7713_v1  ;;  %v7714_v12 = vunpack.i.l.bf16 %v7713_v1  ;;  %v5967_v37 = vsel %vm5954_vm6, %v5934_v63, %v7719_v34  ;;  %v5968_v29 = vsel %vm5954_vm6, %v5935_v24, %v7720_v45  ;;  %v14230_v45 = vld [vmem:[#allocation22_spill] sm:$0xff] }
 0x6c6   : > { %v7728_v2 = vpop.permute.xlu0 %7727  ;;  %v7709_v1 = vunpack.i.l.bf16 %v12863_v47  ;;  %v7685_v63 = vunpack.i.h.bf16 %v12850_v42  ;;  %v7684_v24 = vunpack.i.l.bf16 %v12850_v42 }
 0x6c7   : > { %v6064_v14 = vsel %vm6053_vm9, %v6031_v9, %v7714_v12  ;;  %v6065_v41 = vsel %vm6053_vm9, %v6032_v51, %v7715_v21  ;;  %v7730_v44 = vunpack.i.h.bf16 %v7728_v2  ;;  %v7729_v18 = vunpack.i.l.bf16 %v7728_v2  ;;  %v14229_v9 = vld [vmem:[#allocation25_spill] sm:$0xff] }
 0x6c8   : > { %v6096_v31 = vpack.c.bf16 %v6065_v41, %v6064_v14  ;;  %v7723_v54 = vpop.permute.xlu1 %7722  ;;  %v5873_v51 = vsel %vm304_vm0, %v14229_v9, %v7710_v13  ;;  %v5872_v34 = vsel %vm304_vm0, %v14230_v45, %v7709_v1  ;;  %v7670_v2 = vunpack.i.h.bf16 %v12826_v20 }
 0x6c9   : > { %v7725_v25 = vunpack.i.h.bf16 %v7723_v54  ;;  %v7724_v15 = vunpack.i.l.bf16 %v7723_v54  ;;  %v5903_v47 = vsel %vm5890_vm3, %v5872_v34, %v7729_v18  ;;  %v5904_v14 = vsel %vm5890_vm3, %v5873_v51, %v7730_v44 }
 0x6ca   : > { %v12902_v62 = vpop.permute.xlu0 %7732  ;;  %6311 = vmatmul.mubr.bf16.gmra.mxu0 %v6096_v31  ;;  %v5936_v60 = vsel %vm5921_vm4, %v5903_v47, %v7669_v53  ;;  %v5937_v22 = vsel %vm5921_vm4, %v5904_v14, %v7670_v2  ;;  %v7695_v31 = vunpack.i.h.bf16 %v12832_v48  ;;  %v7694_v54 = vunpack.i.l.bf16 %v12832_v48 }
 0x6cb   : > { %v6000_v36 = vsel %vm5987_vm7, %v5967_v37, %v7724_v15  ;;  %v6001_v49 = vsel %vm5987_vm7, %v5968_v29, %v7725_v25  ;;  %6786 = vmatprep.mubr.msk.bf16.mxu0 %vm304_vm0, %v14227_v17  ;;  %v7699_v37 = vunpack.i.l.bf16 %v12875_v10  ;;  %v7704_v48 = vunpack.i.l.bf16 %v12848_v35  ;;  %v14231_v17 = vld [vmem:[#allocation9_spill] sm:$0xff] }
 0x6cc   : > { %v6033_v16 = vsel %vm6020_vm8, %v6000_v36, %v7664_v46  ;;  %v6034_v19 = vsel %vm6020_vm8, %v6001_v49, %v7665_v59  ;;  %v12920_v30 = vpop.permute.xlu1 %7737  ;;  %v5969_v20 = vsel %vm5954_vm6, %v5936_v60, %v7694_v54  ;;  %v5970_v59 = vsel %vm5954_vm6, %v5937_v22, %v7695_v31 }
 0x6cd   : > { %v6066_v32 = vsel %vm6053_vm9, %v6033_v16, %v7689_v23  ;;  %v6067_v33 = vsel %vm6053_vm9, %v6034_v19, %v7690_v39  ;;  %v7700_v46 = vunpack.i.h.bf16 %v12875_v10  ;;  %v7705_v49 = vunpack.i.h.bf16 %v12848_v35  ;;  %v14232_v39 = vld [vmem:[#allocation12_spill] sm:$0xff] }
 0x6ce   : > { %v7743_v55 = vpop.permute.xlu0 %7742  ;;  %v6098_v7 = vpack.c.bf16 %v6067_v33, %v6066_v32  ;;  %v5875_v42 = vsel %vm304_vm0, %v14231_v17, %v7685_v63  ;;  %v5874_v23 = vsel %vm304_vm0, %v14232_v39, %v7684_v24  ;;  %v6002_v16 = vsel %vm5987_vm7, %v5969_v20, %v7699_v37  ;;  %v14233_v20 = vld [vmem:[#allocation47_spill] sm:$0xff] }
 0x6cf   : > { %v7745_v29 = vunpack.i.h.bf16 %v7743_v55  ;;  %v7744_v36 = vunpack.i.l.bf16 %v7743_v55  ;;  %v6003_v19 = vsel %vm5987_vm7, %v5970_v59, %v7700_v46  ;;  %v5905_v51 = vsel %vm5890_vm3, %v5874_v23, %v7704_v48  ;;  %v14234_v59 = vld [vmem:[#allocation52_spill] sm:$0xff] }
 0x6d0   : > { %v7748_v3 = vpop.permute.xlu1 %7747  ;;  %v5906_v45 = vsel %vm5890_vm3, %v5875_v42, %v7705_v49  ;;  %v7735_v22 = vunpack.i.h.bf16 %v12902_v62  ;;  %v7734_v31 = vunpack.i.l.bf16 %v12902_v62  ;;  %v14235_v46 = vpack.c.bf16 %v14233_v20, %v14234_v59  ;;  %v14239_v20 = vld [vmem:[#allocation37_spill] sm:$0xff]  ;;  %v14240_v59 = vld [vmem:[#allocation32_spill] sm:$0xff] }
 0x6d1   : > { %v7749_v10 = vunpack.i.l.bf16 %v7748_v3  ;;  %v6035_v1 = vsel %vm6020_vm8, %v6002_v16, %v7744_v36  ;;  %v6036_v35 = vsel %vm6020_vm8, %v6003_v19, %v7745_v29 }
 0x6d2   : > { %v12924_v61 = vpop.permute.xlu0 %7762  ;;  %6319 = vmatmul.mubr.bf16.gmra.mxu0 %v6098_v7  ;;  %v7750_v7 = vunpack.i.h.bf16 %v7748_v3 }
 0x6d3   : > { %6787 = vmatprep.mubr.msk.bf16.mxu0 %vm304_vm0, %v14228_v38  ;;  %v5938_v14 = vsel %vm5921_vm4, %v5905_v51, %v7749_v10 }
 0x6d4   : > { %v12934_v12 = vpop.permute.xlu1 %7752  ;;  %v5939_v2 = vsel %vm5921_vm4, %v5906_v45, %v7750_v7 }
 0x6d6   : > { %v12932_v21 = vpop.permute.xlu0 %7772 }
 0x6d8   : > { %v7758_v41 = vpop.permute.xlu1 %7757 }
 0x6d9   : > { %v7760_v37 = vunpack.i.h.bf16 %v7758_v41  ;;  %v7759_v29 = vunpack.i.l.bf16 %v7758_v41 }
 0x6da   : > { %v12944_v56 = vpop.permute.xlu0 %7777 }
 0x6db   : > { %v7780_v19 = vunpack.i.h.bf16 %v12944_v56  ;;  %v7779_v41 = vunpack.i.l.bf16 %v12944_v56 }
 0x6dc   : > { %v12952_v15 = vpop.permute.xlu1 %7767 }
 0x6de   : > { %v7788_v25 = vpop.permute.xlu0 %7787 }
 0x6df   : > { %v7790_v44 = vunpack.i.h.bf16 %v7788_v25  ;;  %v7789_v18 = vunpack.i.l.bf16 %v7788_v25 }
 0x6e0   : > { %v7783_v33 = vpop.permute.xlu1 %7782 }
 0x6e1   : > { %v7785_v13 = vunpack.i.h.bf16 %v7783_v33  ;;  %v7784_v55 = vunpack.i.l.bf16 %v7783_v33  ;;  %v5971_v54 = vsel %vm5954_vm6, %v5938_v14, %v7789_v18  ;;  %v5972_v63 = vsel %vm5954_vm6, %v5939_v2, %v7790_v44  ;;  %v14238_v44 = vld [vmem:[#allocation33_spill] sm:$0xff] }
 0x6e2   : > { %v7798_v32 = vpop.permute.xlu0 %7797  ;;  %v14236_v33 = vpack.c.bf16 %v12582_v43, %v12577_v5  ;;  %v5876_v18 = vsel %vm304_vm0, %v14238_v44, %v7779_v41  ;;  %v7740_v43 = vunpack.i.h.bf16 %v12920_v30  ;;  %v7755_v14 = vunpack.i.h.bf16 %v12934_v12 }
 0x6e3   : > { %v6068_v38 = vsel %vm6053_vm9, %v6035_v1, %v7784_v55  ;;  %v6069_v9 = vsel %vm6053_vm9, %v6036_v35, %v7785_v13  ;;  %v7800_v7 = vunpack.i.h.bf16 %v7798_v32  ;;  %v7799_v10 = vunpack.i.l.bf16 %v7798_v32  ;;  %v14237_v1 = vld [vmem:[#allocation41_spill] sm:$0xff] }
 0x6e4   : > { %v6100_v34 = vpack.c.bf16 %v6069_v9, %v6068_v38  ;;  %v7793_v3 = vpop.permute.xlu1 %7792  ;;  %v5877_v35 = vsel %vm304_vm0, %v14237_v1, %v7780_v19  ;;  %v7739_v32 = vunpack.i.l.bf16 %v12920_v30  ;;  %v7754_v2 = vunpack.i.l.bf16 %v12934_v12 }
 0x6e5   : > { %v7795_v53 = vunpack.i.h.bf16 %v7793_v3  ;;  %v7794_v60 = vunpack.i.l.bf16 %v7793_v3  ;;  %v5907_v38 = vsel %vm5890_vm3, %v5876_v18, %v7799_v10  ;;  %v5908_v56 = vsel %vm5890_vm3, %v5877_v35, %v7800_v7 }
 0x6e6   : > { %v12972_v47 = vpop.permute.xlu0 %7802  ;;  %6327 = vmatmul.mubr.bf16.gmra.mxu0 %v6100_v34  ;;  %v5940_v51 = vsel %vm5921_vm4, %v5907_v38, %v7739_v32  ;;  %v5941_v45 = vsel %vm5921_vm4, %v5908_v56, %v7740_v43  ;;  %v7765_v34 = vunpack.i.h.bf16 %v12924_v61  ;;  %v7764_v3 = vunpack.i.l.bf16 %v12924_v61 }
 0x6e7   : > { %v6004_v24 = vsel %vm5987_vm7, %v5971_v54, %v7794_v60  ;;  %v6005_v25 = vsel %vm5987_vm7, %v5972_v63, %v7795_v53  ;;  %6788 = vmatprep.mubr.msk.bf16.mxu0 %vm304_vm0, %v14235_v46  ;;  %v7770_v63 = vunpack.i.h.bf16 %v12952_v15  ;;  %v7774_v61 = vunpack.i.l.bf16 %v12932_v21 }
 0x6e8   : > { %v6037_v36 = vsel %vm6020_vm8, %v6004_v24, %v7734_v31  ;;  %v6038_v62 = vsel %vm6020_vm8, %v6005_v25, %v7735_v22  ;;  %v12988_v48 = vpop.permute.xlu1 %7807  ;;  %v5973_v54 = vsel %vm5954_vm6, %v5940_v51, %v7764_v3  ;;  %v5974_v30 = vsel %vm5954_vm6, %v5941_v45, %v7765_v34  ;;  %v14241_v3 = vld [vmem:[#allocation51_spill] sm:$0xff] }
 0x6e9   : > { %v6070_v17 = vsel %vm6053_vm9, %v6037_v36, %v7759_v29  ;;  %v6071_v42 = vsel %vm6053_vm9, %v6038_v62, %v7760_v37  ;;  %v7769_v24 = vunpack.i.l.bf16 %v12952_v15  ;;  %v7775_v25 = vunpack.i.h.bf16 %v12932_v21 }
 0x6ea   : > { %v7813_v49 = vpop.permute.xlu0 %7812  ;;  %v6102_v16 = vpack.c.bf16 %v6071_v42, %v6070_v17  ;;  %v5879_v12 = vsel %vm304_vm0, %v14239_v20, %v7755_v14  ;;  %v5878_v46 = vsel %vm304_vm0, %v14240_v59, %v7754_v2  ;;  %v6007_v62 = vsel %vm5987_vm7, %v5974_v30, %v7770_v63 }
 0x6eb   : > { %v7815_v22 = vunpack.i.h.bf16 %v7813_v49  ;;  %v7814_v31 = vunpack.i.l.bf16 %v7813_v49  ;;  %v6006_v36 = vsel %vm5987_vm7, %v5973_v54, %v7769_v24  ;;  %v5909_v44 = vsel %vm5890_vm3, %v5878_v46, %v7774_v61 }
 0x6ec   : > { %v7818_v23 = vpop.permute.xlu1 %7817  ;;  %v5910_v18 = vsel %vm5890_vm3, %v5879_v12, %v7775_v25  ;;  %v7805_v32 = vunpack.i.h.bf16 %v12972_v47  ;;  %v7804_v51 = vunpack.i.l.bf16 %v12972_v47  ;;  %v14242_v14 = vpack.c.bf16 %v12572_v40, %v14241_v3 }
 0x6ed   : > { %v6039_v15 = vsel %vm6020_vm8, %v6006_v36, %v7814_v31  ;;  %v6040_v42 = vsel %vm6020_vm8, %v6007_v62, %v7815_v22  ;;  %v7819_v21 = vunpack.i.l.bf16 %v7818_v23  ;;  %v14244_v62 = vld [vmem:[#allocation43_spill] sm:$0xff] }
 0x6ee   : > { %v12992_v39 = vpop.permute.xlu0 %7827  ;;  %6335 = vmatmul.mubr.bf16.gmra.mxu0 %v6102_v16  ;;  %v7820_v16 = vunpack.i.h.bf16 %v7818_v23 }
 0x6ef   : > { %6789 = vmatprep.mubr.msk.bf16.mxu0 %vm304_vm0, %v14236_v33  ;;  %v5942_v38 = vsel %vm5921_vm4, %v5909_v44, %v7819_v21 }
 0x6f0   : > { %v13002_v55 = vpop.permute.xlu1 %7822  ;;  %v5943_v56 = vsel %vm5921_vm4, %v5910_v18, %v7820_v16 }
 0x6f1   : > { %v7825_v2 = vunpack.i.h.bf16 %v13002_v55 }
 0x6f2   : > { %v13000_v13 = vpop.permute.xlu0 %7837 }
 0x6f4   : > { %v13012_v5 = vpop.permute.xlu1 %7832 }
 0x6f5   : > { %v7834_v44 = vunpack.i.l.bf16 %v13012_v5 }
 0x6f6   : > { %v13010_v9 = vpop.permute.xlu0 %7847 }
 0x6f7   : > { %v7850_v30 = vunpack.i.h.bf16 %v13010_v9  ;;  %v7849_v63 = vunpack.i.l.bf16 %v13010_v9 }
 0x6f8   : > { %v13022_v60 = vpop.permute.xlu1 %7842 }
 0x6f9   : > { %v5880_v9 = vsel %vm304_vm0, %v14244_v62, %v7849_v63 }
 0x6fa   : > { %v7858_v53 = vpop.permute.xlu0 %7857 }
 0x6fb   : > { %v7860_v19 = vunpack.i.h.bf16 %v7858_v53  ;;  %v7859_v41 = vunpack.i.l.bf16 %v7858_v53  ;;  %v7824_v53 = vunpack.i.l.bf16 %v13002_v55 }
 0x6fc   : > { %v7853_v29 = vpop.permute.xlu1 %7852 }
 0x6fd   : > { %v7855_v49 = vunpack.i.h.bf16 %v7853_v29  ;;  %v7854_v17 = vunpack.i.l.bf16 %v7853_v29  ;;  %v5975_v45 = vsel %vm5954_vm6, %v5942_v38, %v7859_v41  ;;  %v5976_v34 = vsel %vm5954_vm6, %v5943_v56, %v7860_v19  ;;  %v14243_v29 = vld [vmem:[#allocation50_spill] sm:$0xff] }
 0x6fe   : > { %v7868_v37 = vpop.permute.xlu0 %7867  ;;  %v5881_v36 = vsel %vm304_vm0, %v14243_v29, %v7850_v30  ;;  %v7840_v56 = vunpack.i.h.bf16 %v13000_v13 }
 0x6ff   : > { %v6072_v33 = vsel %vm6053_vm9, %v6039_v15, %v7854_v17  ;;  %v6073_v7 = vsel %vm6053_vm9, %v6040_v42, %v7855_v49  ;;  %v7870_v25 = vunpack.i.h.bf16 %v7868_v37  ;;  %v7869_v61 = vunpack.i.l.bf16 %v7868_v37 }
 0x700   : > { %v6104_v10 = vpack.c.bf16 %v6073_v7, %v6072_v33  ;;  %v7863_v35 = vpop.permute.xlu1 %7862  ;;  %v7810_v37 = vunpack.i.h.bf16 %v12988_v48  ;;  %v7809_v15 = vunpack.i.l.bf16 %v12988_v48  ;;  %v14245_v42 = vpack.c.bf16 %v12596_v58, %v12593_v0 }
 0x701   : > { %v7865_v43 = vunpack.i.h.bf16 %v7863_v35  ;;  %v7864_v23 = vunpack.i.l.bf16 %v7863_v35  ;;  %v5911_v49 = vsel %vm5890_vm3, %v5880_v9, %v7869_v61  ;;  %v5912_v17 = vsel %vm5890_vm3, %v5881_v36, %v7870_v25 }
 0x702   : > { %v13040_v1 = vpop.permute.xlu0 %7882  ;;  %6343 = vmatmul.mubr.bf16.gmra.mxu0 %v6104_v10  ;;  %v5944_v19 = vsel %vm5921_vm4, %v5911_v49, %v7809_v15  ;;  %v5945_v41 = vsel %vm5921_vm4, %v5912_v17, %v7810_v37  ;;  %v7830_v33 = vunpack.i.h.bf16 %v12992_v39  ;;  %v7829_v7 = vunpack.i.l.bf16 %v12992_v39 }
 0x703   : > { %6790 = vmatprep.mubr.msk.bf16.mxu0 %vm304_vm0, %v14242_v14  ;;  %v6008_v22 = vsel %vm5987_vm7, %v5975_v45, %v7864_v23  ;;  %v6009_v31 = vsel %vm5987_vm7, %v5976_v34, %v7865_v43  ;;  %v7835_v0 = vunpack.i.h.bf16 %v13012_v5  ;;  %v7885_v18 = vunpack.i.h.bf16 %v13040_v1 }
 0x704   : > { %v13060_v47 = vpop.permute.xlu1 %7872  ;;  %v6041_v40 = vsel %vm6020_vm8, %v6008_v22, %v7804_v51  ;;  %v6042_v24 = vsel %vm6020_vm8, %v6009_v31, %v7805_v32  ;;  %v5977_v10 = vsel %vm5954_vm6, %v5944_v19, %v7829_v7  ;;  %v5978_v48 = vsel %vm5954_vm6, %v5945_v41, %v7830_v33  ;;  %v14247_v31 = vld [vmem:[#allocation42_spill] sm:$0xff] }
 0x705   : > { %v6074_v55 = vsel %vm6053_vm9, %v6041_v40, %v7824_v53  ;;  %v6075_v20 = vsel %vm6053_vm9, %v6042_v24, %v7825_v2  ;;  %v7884_v38 = vunpack.i.l.bf16 %v13040_v1  ;;  %v7839_v39 = vunpack.i.l.bf16 %v13000_v13  ;;  %v14246_v53 = vld [vmem:[#allocation46_spill] sm:$0xff] }
 0x706   : > { %v13058_v54 = vpop.permute.xlu0 %7887  ;;  %v6106_v46 = vpack.c.bf16 %v6075_v20, %v6074_v55  ;;  %v6010_v43 = vsel %vm5987_vm7, %v5977_v10, %v7834_v44  ;;  %v6011_v23 = vsel %vm5987_vm7, %v5978_v48, %v7835_v0  ;;  %v7845_v32 = vunpack.i.h.bf16 %v13022_v60 }
 0x707   : > { %v7844_v51 = vunpack.i.l.bf16 %v13022_v60  ;;  %v6043_v14 = vsel %vm6020_vm8, %v6010_v43, %v7884_v38  ;;  %v6044_v1 = vsel %vm6020_vm8, %v6011_v23, %v7885_v18  ;;  %v7890_v2 = vunpack.i.h.bf16 %v13058_v54 }
 0x708   : > { %v13070_v59 = vpop.permute.xlu1 %7877  ;;  %v7889_v13 = vunpack.i.l.bf16 %v13058_v54  ;;  %v5883_v22 = vsel %vm304_vm0, %v14246_v53, %v7840_v56  ;;  %v5882_v30 = vsel %vm304_vm0, %v14247_v31, %v7839_v39  ;;  %v7875_v20 = vunpack.i.h.bf16 %v13060_v47 }
 0x709   : > { %v5913_v40 = vsel %vm5890_vm3, %v5882_v30, %v7844_v51  ;;  %v5914_v24 = vsel %vm5890_vm3, %v5883_v22, %v7845_v32  ;;  %v7874_v54 = vunpack.i.l.bf16 %v13060_v47  ;;  %v14248_v47 = vpack.c.bf16 %v12588_v4, %v12585_v27 }
 0x70a   : > { %v13068_v12 = vpop.permute.xlu0 %7892  ;;  %6351 = vmatmul.mubr.bf16.gmra.mxu0 %v6106_v46  ;;  %v5946_v36 = vsel %vm5921_vm4, %v5913_v40, %v7889_v13  ;;  %v5947_v62 = vsel %vm5921_vm4, %v5914_v24, %v7890_v2  ;;  %v7880_v19 = vunpack.i.h.bf16 %v13070_v59  ;;  %v7879_v41 = vunpack.i.l.bf16 %v13070_v59 }
 0x70b   : > { %6791 = vmatprep.mubr.msk.bf16.mxu0 %vm304_vm0, %v14245_v42  ;;  %v7895_v17 = vunpack.i.h.bf16 %v13068_v12  ;;  %v7894_v37 = vunpack.i.l.bf16 %v13068_v12  ;;  %v14249_v30 = vpack.c.bf16 %v12613_v8, %v12610_v6 }
 0x70c   : > { %v13086_v21 = vpop.permute.xlu1 %7902 }
 0x70d   : > { %v7905_v2 = vunpack.i.h.bf16 %v13086_v21  ;;  %v7904_v13 = vunpack.i.l.bf16 %v13086_v21 }
 0x70e   : > { %v13084_v16 = vpop.permute.xlu0 %7897 }
 0x70f   : > { %v7900_v12 = vunpack.i.h.bf16 %v13084_v16  ;;  %v7899_v0 = vunpack.i.l.bf16 %v13084_v16 }
 0x710   : > { %v13096_v58 = vpop.permute.xlu1 %7912 }
 0x711   : > { %v7915_v22 = vunpack.i.h.bf16 %v13096_v58  ;;  %v7914_v31 = vunpack.i.l.bf16 %v13096_v58 }
 0x712   : > { %v13094_v35 = vpop.permute.xlu0 %7907 }
 0x713   : > { %v7910_v16 = vunpack.i.h.bf16 %v13094_v35 }
 0x714   : > { %v7918_v34 = vpop.permute.xlu1 %7917 }
 0x715   : > { %v7920_v3 = vunpack.i.h.bf16 %v7918_v34  ;;  %v7919_v5 = vunpack.i.l.bf16 %v7918_v34 }
 0x716   : > { %v7928_v45 = vpop.permute.xlu0 %7927 }
 0x717   : > { %v6076_v60 = vsel %vm6053_vm9, %v6043_v14, %v7919_v5  ;;  %v6077_v63 = vsel %vm6053_vm9, %v6044_v1, %v7920_v3  ;;  %v7930_v9 = vunpack.i.h.bf16 %v7928_v45  ;;  %v7929_v49 = vunpack.i.l.bf16 %v7928_v45 }
 0x718   : > { %v6108_v25 = vpack.c.bf16 %v6077_v63, %v6076_v60  ;;  %v7923_v55 = vpop.permute.xlu1 %7922  ;;  %v7909_v3 = vunpack.i.l.bf16 %v13094_v35  ;;  %v5887_v63 = vsel %vm304_vm0, %v12475_v11, %v7910_v16 }
 0x719   : > { %v7925_v46 = vunpack.i.h.bf16 %v7923_v55  ;;  %v7924_v29 = vunpack.i.l.bf16 %v7923_v55 }
 0x71a   : > { %v7938_v61 = vpop.permute.xlu0 %7937  ;;  %6359 = vmatmul.mubr.bf16.gmra.mxu0 %v6108_v25  ;;  %v5886_v58 = vsel %vm304_vm0, %v12454_v26, %v7909_v3 }
 0x71b   : > { %v5979_v15 = vsel %vm5954_vm6, %v5946_v36, %v7924_v29  ;;  %v5980_v42 = vsel %vm5954_vm6, %v5947_v62, %v7925_v46  ;;  %6792 = vmatprep.mubr.msk.bf16.mxu0 %vm304_vm0, %v14248_v47  ;;  %v7940_v38 = vunpack.i.h.bf16 %v7938_v61  ;;  %v7939_v27 = vunpack.i.l.bf16 %v7938_v61 }
 0x71c   : > { %v6012_v33 = vsel %vm5987_vm7, %v5979_v15, %v7929_v49  ;;  %v6013_v7 = vsel %vm5987_vm7, %v5980_v42, %v7930_v9  ;;  %v7933_v48 = vpop.permute.xlu1 %7932  ;;  %v5917_v26 = vsel %vm5890_vm3, %v5886_v58, %v7914_v31  ;;  %v5918_v47 = vsel %vm5890_vm3, %v5887_v63, %v7915_v22 }
 0x71d   : > { %v7935_v44 = vunpack.i.h.bf16 %v7933_v48  ;;  %v7934_v18 = vunpack.i.l.bf16 %v7933_v48  ;;  %v6045_v4 = vsel %vm6020_vm8, %v6012_v33, %v7874_v54  ;;  %v6046_v56 = vsel %vm6020_vm8, %v6013_v7, %v7875_v20  ;;  %v14250_v7 = vld [vmem:[#allocation71_spill] sm:$0xff] }
 0x71e   : > { %v7948_v10 = vpop.permute.xlu0 %7947  ;;  %v6078_v43 = vsel %vm6053_vm9, %v6045_v4, %v7894_v37  ;;  %v6079_v23 = vsel %vm6053_vm9, %v6046_v56, %v7895_v17 }
 0x71f   : > { %v5885_v59 = vsel %vm304_vm0, %v12492_v57, %v7935_v44  ;;  %v5884_v39 = vsel %vm304_vm0, %v12461_v52, %v7934_v18  ;;  %v6110_v34 = vpack.c.bf16 %v6079_v23, %v6078_v43  ;;  %v13157_v52 = vld [vmem:[%s13359_s4 + $0x5] ss:$0 sm:$0xff]  ;;  %v7950_v61 = vunpack.i.h.bf16 %v7948_v10  ;;  %v14251_v43 = vld [vmem:[#allocation49_spill] sm:$0xff] }
 0x720   : > { %v5915_v32 = vsel %vm5890_vm3, %v5884_v39, %v7939_v27  ;;  %v5916_v51 = vsel %vm5890_vm3, %v5885_v59, %v7940_v38  ;;  %v13152_v14 = vpop.permute.xlu1 %7942  ;;  %v6272_v1 = vpop.f32.mrf.mxu0  ;;  %v7949_v55 = vunpack.i.l.bf16 %v7948_v10 }
 0x721   : > { %v5948_v5 = vsel %vm5921_vm4, %v5915_v32, %v7879_v41  ;;  %v5949_v57 = vsel %vm5921_vm4, %v5916_v51, %v7880_v19  ;;  %v6273_v25 = vadd.f32 %v13157_v52, %v6272_v1  ;;  %v7945_v19 = vunpack.i.h.bf16 %v13152_v14  ;;  %v14252_v1 = vld [vmem:[#allocation76_spill] sm:$0xff] }
 0x722   : > { %v7953_v45 = vpop.permute.xlu0 %7952  ;;  %6367 = vmatmul.mubr.bf16.gmra.mxu0 %v6110_v34  ;;  %v5981_v53 = vsel %vm5954_vm6, %v5948_v5, %v7899_v0  ;;  %v5982_v35 = vsel %vm5954_vm6, %v5949_v57, %v7900_v12  ;;  %v6274_v60 = vpop.f32.mrf.mxu0  ;;  %v7944_v4 = vunpack.i.l.bf16 %v13152_v14 }
 0x723   : > { %6793 = vmatprep.mubr.msk.bf16.mxu0 %vm304_vm0, %v14249_v30  ;;  %v6014_v21 = vsel %vm5987_vm7, %v5981_v53, %v7904_v13  ;;  %v6015_v24 = vsel %vm5987_vm7, %v5982_v35, %v7905_v2  ;;  %v7955_v6 = vunpack.i.h.bf16 %v7953_v45  ;;  %vm6399_vm1 = vcmp.ge.f32.partialorder %v6273_v25, 0.0 }
 0x724   : > { %v7963_v8 = vpop.permute.xlu1 %7962  ;;  %v6275_v20 = vpop.f32.mrf.mxu0  ;;  %v6431_v11 = vmul.f32 0.1, %v6273_v25  ;;  %v7954_v29 = vunpack.i.l.bf16 %v7953_v45  ;;  %v6047_v36 = vsel %vm6020_vm8, %v6014_v21, %v7949_v55  ;;  %v6048_v62 = vsel %vm6020_vm8, %v6015_v24, %v7950_v61 }
 0x725   : > { %v7965_v54 = vunpack.i.h.bf16 %v7963_v8  ;;  %v7964_v46 = vunpack.i.l.bf16 %v7963_v8  ;;  %v6276_v9 = vadd.f32 %v13157_v52, %v6275_v20  ;;  %v5951_v44 = vsel %vm5921_vm4, %v5918_v47, %v7955_v6 }
 0x726   : > { %v13171_v40 = vpop.permute.xlu0 %7957  ;;  %v6277_v49 = vpop.f32.mrf.mxu0  ;;  %v6463_v42 = vsel %vm6399_vm1, %v6273_v25, %v6431_v11  ;;  %v5950_v18 = vsel %vm5921_vm4, %v5917_v26, %v7954_v29 }
 0x727   : > { %v6081_v17 = vsel %vm6053_vm9, %v6048_v62, %v7965_v54  ;;  %v6080_v37 = vsel %vm6053_vm9, %v6047_v36, %v7964_v46  ;;  %v6495_v10 = vadd.f32 %v6463_v42, %v14250_v7  ;;  %vm6400_vm5 = vcmp.ge.f32.partialorder %v6276_v9, 0.0  ;;  %v14253_v7 = vld [vmem:[#allocation74_spill] sm:$0xff] }
 0x728   : > { %v6112_v41 = vpack.c.bf16 %v6081_v17, %v6080_v37  ;;  %v7968_v33 = vpop.permute.xlu1 %7967  ;;  %v6432_v0 = vmul.f32 0.1, %v6276_v9  ;;  %v7960_v16 = vunpack.i.h.bf16 %v13171_v40  ;;  %v7959_v32 = vunpack.i.l.bf16 %v13171_v40 }
 0x729   : > { %v7970_v48 = vunpack.i.h.bf16 %v7968_v33  ;;  %v7969_v12 = vunpack.i.l.bf16 %v7968_v33  ;;  %6527 = vst.msk [vmem:[%s13189_s30] sm:$0xff] %vm304_vm0, %v6495_v10 }
 0x72a   : > { %v7978_v15 = vpop.permute.xlu0 %7977  ;;  %6375 = vmatmul.mubr.bf16.gmra.mxu0 %v6112_v41  ;;  %v6464_v23 = vsel %vm6400_vm5, %v6276_v9, %v6432_v0 }
 0x72b   : > { %v7980_v38 = vunpack.i.h.bf16 %v7978_v15  ;;  %v7979_v27 = vunpack.i.l.bf16 %v7978_v15  ;;  %v5984_v56 = vsel %vm5954_vm6, %v5951_v44, %v7970_v48  ;;  %v5983_v59 = vsel %vm5954_vm6, %v5950_v18, %v7969_v12  ;;  %6794 = vmatprep.mubr.msk.bf16.mxu0 %vm304_vm0, %v14251_v43  ;;  %v14254_v18 = vld [vmem:[#allocation77_spill] sm:$0xff] }
 0x72c   : > { %v7973_v34 = vpop.permute.xlu1 %7972  ;;  %v6496_v2 = vadd.f32 %v6464_v23, %v14252_v1 }
 0x72d   : > { %v6017_v51 = vsel %vm5987_vm7, %v5984_v56, %v7980_v38  ;;  %v6016_v45 = vsel %vm5987_vm7, %v5983_v59, %v7979_v27  ;;  %v7975_v63 = vunpack.i.h.bf16 %v7973_v34  ;;  %v7974_v40 = vunpack.i.l.bf16 %v7973_v34 }
 0x72e   : > { %v7988_v39 = vpop.permute.xlu0 %7987  ;;  %v6049_v3 = vsel %vm6020_vm8, %v6016_v45, %v7944_v4  ;;  %v6050_v5 = vsel %vm6020_vm8, %v6017_v51, %v7945_v19  ;;  %6528 = vst.msk [vmem:[%s13189_s30 + $0x8] sm:$0xff] %vm304_vm0, %v6496_v2  ;;  %v14256_v45 = vld [vmem:[#allocation78_spill] sm:$0xff] }
 0x72f   : > { %v6082_v57 = vsel %vm6053_vm9, %v6049_v3, %v7959_v32  ;;  %v6083_v14 = vsel %vm6053_vm9, %v6050_v5, %v7960_v16  ;;  %v7990_v30 = vunpack.i.h.bf16 %v7988_v39  ;;  %v7989_v60 = vunpack.i.l.bf16 %v7988_v39 }
 0x730   : > { %v6114_v13 = vpack.c.bf16 %v6083_v14, %v6082_v57  ;;  %v7983_v53 = vpop.permute.xlu1 %7982 }
 0x731   : > { %v7985_v22 = vunpack.i.h.bf16 %v7983_v53  ;;  %v7984_v31 = vunpack.i.l.bf16 %v7983_v53  ;;  %v14257_v53 = vld [vmem:[#allocation80_spill] sm:$0xff] }
 0x732   : > { %v7993_v35 = vpop.permute.xlu0 %7992  ;;  %6383 = vmatmul.mubr.bf16.gmra.mxu0 %v6114_v13 }
 0x733   : > { %v5889_v21 = vsel %vm304_vm0, %v12538_v28, %v7985_v22  ;;  %v5888_v24 = vsel %vm304_vm0, %v12505_v50, %v7984_v31  ;;  %6795 = vmatprep.mubr.msk.bf16.mxu0 %vm304_vm0, %v14251_v43  ;;  %v7995_v25 = vunpack.i.h.bf16 %v7993_v35  ;;  %v7994_v58 = vunpack.i.l.bf16 %v7993_v35  ;;  %v14255_v43 = vld [vmem:[#allocation75_spill] sm:$0xff] }
 0x734   : > { %v5920_v61 = vsel %vm5890_vm3, %v5889_v21, %v7990_v30  ;;  %v5919_v55 = vsel %vm5890_vm3, %v5888_v24, %v7989_v60  ;;  %v7998_v6 = vpop.permute.xlu1 %7997 }
 0x735   : > { %v8000_v8 = vunpack.i.h.bf16 %v7998_v6  ;;  %v7999_v20 = vunpack.i.l.bf16 %v7998_v6  ;;  %v5952_v54 = vsel %vm5921_vm4, %v5919_v55, %v7974_v40  ;;  %v5953_v46 = vsel %vm5921_vm4, %v5920_v61, %v7975_v63  ;;  %v14258_v40 = vld [vmem:[#allocation79_spill] sm:$0xff] }
 0x736   : > { %v5985_v28 = vsel %vm5954_vm6, %v5952_v54, %v7994_v58  ;;  %v5986_v50 = vsel %vm5954_vm6, %v5953_v46, %v7995_v25  ;;  %v14259_v6 = vld [vmem:[#allocation83_spill] sm:$0xff] }
 0x737   : > { %v6018_v11 = vsel %vm5987_vm7, %v5985_v28, %v7999_v20  ;;  %v6019_v29 = vsel %vm5987_vm7, %v5986_v50, %v8000_v8  ;;  %v14260_v28 = vld [vmem:[#allocation81_spill] sm:$0xff] }
 0x738   : > { %v6051_v36 = vsel %vm6020_vm8, %v6018_v11, %v7944_v4  ;;  %v6052_v62 = vsel %vm6020_vm8, %v6019_v29, %v7945_v19 }
 0x739   : > { %v6084_v9 = vsel %vm6053_vm9, %v6051_v36, %v7959_v32  ;;  %v6085_v49 = vsel %vm6053_vm9, %v6052_v62, %v7960_v16 }
 0x73a   : > { %v6116_v26 = vpack.c.bf16 %v6085_v49, %v6084_v9 }
 0x73c   : > { %6391 = vmatmul.mubr.bf16.gmra.mxu0 %v6116_v26 }
 0x747   : > { %v6280_v17 = vpop.f32.mrf.mxu0 }
 0x748   : > { %v6281_v37 = vadd.f32 %v13157_v52, %v6280_v17  ;;  %v14261_v17 = vld [vmem:[#allocation84_spill] sm:$0xff] }
 0x749   : > { %v6282_v15 = vpop.f32.mrf.mxu0 }
 0x74a   : > { %vm6401_vm10 = vcmp.ge.f32.partialorder %v6281_v37, 0.0  ;;  %v6433_v42 = vmul.f32 0.1, %v6281_v37 }
 0x74b   : > { %v6283_v47 = vpop.f32.mrf.mxu0 }
 0x74c   : > { %v6465_v41 = vsel %vm6401_vm10, %v6281_v37, %v6433_v42  ;;  %v6284_v33 = vadd.f32 %v13157_v52, %v6283_v47 }
 0x74d   : > { %v6497_v19 = vadd.f32 %v6465_v41, %v14253_v7  ;;  %v6285_v10 = vpop.f32.mrf.mxu0  ;;  %v14262_v7 = vld [vmem:[#allocation82_spill] sm:$0xff] }
 0x74e   : > { %vm6402_vm11 = vcmp.ge.f32.partialorder %v6284_v33, 0.0  ;;  %v6434_v48 = vmul.f32 0.1, %v6284_v33 }
 0x74f   : > { %6529 = vst.msk [vmem:[%s13189_s30 + $0x10] sm:$0xff] %vm304_vm0, %v6497_v19  ;;  %v6288_v12 = vpop.f32.mrf.mxu0 }
 0x750   : > { %v6466_v0 = vsel %vm6402_vm11, %v6284_v33, %v6434_v48  ;;  %v6289_v44 = vadd.f32 %v13157_v52, %v6288_v12 }
 0x751   : > { %v6498_v38 = vadd.f32 %v6466_v0, %v14254_v18  ;;  %v6290_v27 = vpop.f32.mrf.mxu0  ;;  %v14263_v18 = vld [vmem:[#allocation88_spill] sm:$0xff] }
 0x752   : > { %vm6403_vm12 = vcmp.ge.f32.partialorder %v6289_v44, 0.0  ;;  %v6435_v4 = vmul.f32 0.1, %v6289_v44 }
 0x753   : > { %6530 = vst.msk [vmem:[%s13189_s30 + $0x18] sm:$0xff] %vm304_vm0, %v6498_v38  ;;  %v6291_v56 = vpop.f32.mrf.mxu0 }
 0x754   : > { %v6467_v59 = vsel %vm6403_vm12, %v6289_v44, %v6435_v4  ;;  %v6292_v39 = vadd.f32 %v13157_v52, %v6291_v56 }
 0x755   : > { %v6499_v23 = vadd.f32 %v6467_v59, %v14255_v43  ;;  %v6293_v16 = vpop.f32.mrf.mxu0  ;;  %v14264_v59 = vld [vmem:[#allocation85_spill] sm:$0xff] }
 0x756   : > { %vm6404_vm13 = vcmp.ge.f32.partialorder %v6292_v39, 0.0  ;;  %v6436_v32 = vmul.f32 0.1, %v6292_v39 }
 0x757   : > { %6531 = vst.msk [vmem:[%s13189_s30 + $0x20] sm:$0xff] %vm304_vm0, %v6499_v23 }
 0x758   : > { %v6468_v51 = vsel %vm6404_vm13, %v6292_v39, %v6436_v32 }
 0x759   : > { %v6500_v34 = vadd.f32 %v6468_v51, %v14256_v45 }
 0x75b   : > { %6532 = vst.msk [vmem:[%s13189_s30 + $0x28] sm:$0xff] %vm304_vm0, %v6500_v34 }
 0x76a   : > { %v6296_v3 = vpop.f32.mrf.mxu0 }
 0x76b   : > { %v6297_v5 = vadd.f32 %v13157_v52, %v6296_v3  ;;  %v14265_v3 = vld [vmem:[#allocation86_spill] sm:$0xff] }
 0x76c   : > { %v6298_v57 = vpop.f32.mrf.mxu0 }
 0x76d   : > { %vm6405_vm14 = vcmp.ge.f32.partialorder %v6297_v5, 0.0  ;;  %v6437_v14 = vmul.f32 0.1, %v6297_v5 }
 0x76e   : > { %v6299_v1 = vpop.f32.mrf.mxu0 }
 0x76f   : > { %v6469_v2 = vsel %vm6405_vm14, %v6297_v5, %v6437_v14  ;;  %v6300_v13 = vadd.f32 %v13157_v52, %v6299_v1 }
 0x770   : > { %v6501_v35 = vadd.f32 %v6469_v2, %v14257_v53  ;;  %v6301_v22 = vpop.f32.mrf.mxu0  ;;  %v14266_v53 = vld [vmem:[#allocation87_spill] sm:$0xff] }
 0x771   : > { %vm6406_vm15 = vcmp.ge.f32.partialorder %v6300_v13, 0.0  ;;  %v6438_v31 = vmul.f32 0.1, %v6300_v13 }
 0x772   : > { %6533 = vst.msk [vmem:[%s13189_s30 + $0x30] sm:$0xff] %vm304_vm0, %v6501_v35  ;;  %v6304_v30 = vpop.f32.mrf.mxu0 }
 0x773   : > { %v6470_v60 = vsel %vm6406_vm15, %v6300_v13, %v6438_v31  ;;  %v6305_v63 = vadd.f32 %v13157_v52, %v6304_v30 }
 0x774   : > { %v6502_v21 = vadd.f32 %v6470_v60, %v14258_v40  ;;  %v6306_v24 = vpop.f32.mrf.mxu0  ;;  %v14267_v40 = vld [vmem:[#allocation90_spill] sm:$0xff] }
 0x775   : > { %vm6407_vm2 = vcmp.ge.f32.partialorder %v6305_v63, 0.0  ;;  %v6439_v25 = vmul.f32 0.1, %v6305_v63 }
 0x776   : > { %6534 = vst.msk [vmem:[%s13189_s30 + $0x38] sm:$0xff] %vm304_vm0, %v6502_v21  ;;  %v6307_v58 = vpop.f32.mrf.mxu0 }
 0x777   : > { %v6471_v61 = vsel %vm6407_vm2, %v6305_v63, %v6439_v25  ;;  %v6308_v55 = vadd.f32 %v13157_v52, %v6307_v58 }
 0x778   : > { %v6503_v8 = vadd.f32 %v6471_v61, %v14259_v6  ;;  %v6309_v20 = vpop.f32.mrf.mxu0  ;;  %v14268_v61 = vld [vmem:[#allocation89_spill] sm:$0xff] }
 0x779   : > { %vm6408_vm3 = vcmp.ge.f32.partialorder %v6308_v55, 0.0  ;;  %v6440_v54 = vmul.f32 0.1, %v6308_v55 }
 0x77a   : > { %6535 = vst.msk [vmem:[%s13189_s30 + $0x40] sm:$0xff] %vm304_vm0, %v6503_v8 }
 0x77b   : > { %v6472_v46 = vsel %vm6408_vm3, %v6308_v55, %v6440_v54 }
 0x77c   : > { %v6504_v50 = vadd.f32 %v6472_v46, %v14260_v28 }
 0x77e   : > { %6536 = vst.msk [vmem:[%s13189_s30 + $0x48] sm:$0xff] %vm304_vm0, %v6504_v50 }
 0x78a   : > { %v6312_v11 = vpop.f32.mrf.mxu0 }
 0x78b   : > { %v6313_v29 = vadd.f32 %v13157_v52, %v6312_v11  ;;  %v14269_v11 = vld [vmem:[#allocation91_spill] sm:$0xff] }
 0x78c   : > { %v6314_v36 = vpop.f32.mrf.mxu0 }
 0x78d   : > { %vm6409_vm4 = vcmp.ge.f32.partialorder %v6313_v29, 0.0  ;;  %v6441_v62 = vmul.f32 0.1, %v6313_v29 }
 0x78e   : > { %v6315_v9 = vpop.f32.mrf.mxu0 }
 0x78f   : > { %v6473_v49 = vsel %vm6409_vm4, %v6313_v29, %v6441_v62  ;;  %v6316_v26 = vadd.f32 %v13157_v52, %v6315_v9 }
 0x790   : > { %v6505_v37 = vadd.f32 %v6473_v49, %v14261_v17  ;;  %v6317_v15 = vpop.f32.mrf.mxu0  ;;  %v14270_v17 = vld [vmem:[#allocation94_spill] sm:$0xff] }
 0x791   : > { %vm6410_vm6 = vcmp.ge.f32.partialorder %v6316_v26, 0.0  ;;  %v6442_v42 = vmul.f32 0.1, %v6316_v26 }
 0x792   : > { %6537 = vst.msk [vmem:[%s13189_s30 + $0x50] sm:$0xff] %vm304_vm0, %v6505_v37  ;;  %v6320_v47 = vpop.f32.mrf.mxu0 }
 0x793   : > { %v6474_v41 = vsel %vm6410_vm6, %v6316_v26, %v6442_v42  ;;  %v6321_v33 = vadd.f32 %v13157_v52, %v6320_v47 }
 0x794   : > { %v6506_v19 = vadd.f32 %v6474_v41, %v14262_v7  ;;  %v6322_v10 = vpop.f32.mrf.mxu0  ;;  %v14271_v7 = vld [vmem:[#allocation93_spill] sm:$0xff] }
 0x795   : > { %vm6411_vm7 = vcmp.ge.f32.partialorder %v6321_v33, 0.0  ;;  %v6443_v48 = vmul.f32 0.1, %v6321_v33 }
 0x796   : > { %6538 = vst.msk [vmem:[%s13189_s30 + $0x58] sm:$0xff] %vm304_vm0, %v6506_v19  ;;  %v6323_v12 = vpop.f32.mrf.mxu0 }
 0x797   : > { %v6475_v0 = vsel %vm6411_vm7, %v6321_v33, %v6443_v48  ;;  %v6324_v44 = vadd.f32 %v13157_v52, %v6323_v12 }
 0x798   : > { %v6507_v38 = vadd.f32 %v6475_v0, %v14263_v18  ;;  %v6325_v27 = vpop.f32.mrf.mxu0  ;;  %v14272_v0 = vld [vmem:[#allocation96_spill] sm:$0xff] }
 0x799   : > { %vm6412_vm8 = vcmp.ge.f32.partialorder %v6324_v44, 0.0  ;;  %v6444_v4 = vmul.f32 0.1, %v6324_v44 }
 0x79a   : > { %6539 = vst.msk [vmem:[%s13189_s30 + $0x60] sm:$0xff] %vm304_vm0, %v6507_v38 }
 0x79b   : > { %v6476_v56 = vsel %vm6412_vm8, %v6324_v44, %v6444_v4 }
 0x79c   : > { %v6508_v39 = vadd.f32 %v6476_v56, %v14264_v59 }
 0x79e   : > { %6540 = vst.msk [vmem:[%s13189_s30 + $0x68] sm:$0xff] %vm304_vm0, %v6508_v39 }
 0x7a6   : > { %v6328_v43 = vpop.f32.mrf.mxu0 }
 0x7a7   : > { %v6329_v23 = vadd.f32 %v13157_v52, %v6328_v43  ;;  %v14273_v43 = vld [vmem:[#allocation92_spill] sm:$0xff] }
 0x7a8   : > { %v6330_v16 = vpop.f32.mrf.mxu0 }
 0x7a9   : > { %vm6413_vm9 = vcmp.ge.f32.partialorder %v6329_v23, 0.0  ;;  %v6445_v32 = vmul.f32 0.1, %v6329_v23 }
 0x7aa   : > { %v6331_v51 = vpop.f32.mrf.mxu0 }
 0x7ab   : > { %v6477_v45 = vsel %vm6413_vm9, %v6329_v23, %v6445_v32  ;;  %v6332_v34 = vadd.f32 %v13157_v52, %v6331_v51 }
 0x7ac   : > { %v6509_v5 = vadd.f32 %v6477_v45, %v14265_v3  ;;  %v6333_v57 = vpop.f32.mrf.mxu0  ;;  %v14274_v3 = vld [vmem:[#allocation95_spill] sm:$0xff] }
 0x7ad   : > { %vm6414_vm1 = vcmp.ge.f32.partialorder %v6332_v34, 0.0  ;;  %v6446_v14 = vmul.f32 0.1, %v6332_v34 }
 0x7ae   : > { %6541 = vst.msk [vmem:[%s13189_s30 + $0x70] sm:$0xff] %vm304_vm0, %v6509_v5  ;;  %v6336_v1 = vpop.f32.mrf.mxu0 }
 0x7af   : > { %v6478_v2 = vsel %vm6414_vm1, %v6332_v34, %v6446_v14  ;;  %v6337_v13 = vadd.f32 %v13157_v52, %v6336_v1 }
 0x7b0   : > { %v6510_v35 = vadd.f32 %v6478_v2, %v14266_v53  ;;  %v6338_v22 = vpop.f32.mrf.mxu0  ;;  %v14275_v53 = vld [vmem:[#allocation98_spill] sm:$0xff] }
 0x7b1   : > { %vm6415_vm5 = vcmp.ge.f32.partialorder %v6337_v13, 0.0  ;;  %v6447_v31 = vmul.f32 0.1, %v6337_v13 }
 0x7b2   : > { %6542 = vst.msk [vmem:[%s13189_s30 + $0x78] sm:$0xff] %vm304_vm0, %v6510_v35  ;;  %v6339_v30 = vpop.f32.mrf.mxu0 }
 0x7b3   : > { %v6479_v60 = vsel %vm6415_vm5, %v6337_v13, %v6447_v31  ;;  %v6340_v63 = vadd.f32 %v13157_v52, %v6339_v30 }
 0x7b4   : > { %v6511_v21 = vadd.f32 %v6479_v60, %v14267_v40  ;;  %v6341_v24 = vpop.f32.mrf.mxu0 }
 0x7b5   : > { %vm6416_vm10 = vcmp.ge.f32.partialorder %v6340_v63, 0.0  ;;  %v6448_v25 = vmul.f32 0.1, %v6340_v63 }
 0x7b6   : > { %6543 = vst.msk [vmem:[%s13189_s30 + $0x80] sm:$0xff] %vm304_vm0, %v6511_v21 }
 0x7b7   : > { %v6480_v58 = vsel %vm6416_vm10, %v6340_v63, %v6448_v25  ;;  %v14276_v63 = vld [vmem:[#allocation97_spill] sm:$0xff] }
 0x7b8   : > { %v6512_v55 = vadd.f32 %v6480_v58, %v14268_v61 }
 0x7ba   : > { %6544 = vst.msk [vmem:[%s13189_s30 + $0x88] sm:$0xff] %vm304_vm0, %v6512_v55 }
 0x7c2   : > { %v6344_v6 = vpop.f32.mrf.mxu0 }
 0x7c3   : > { %v6345_v8 = vadd.f32 %v13157_v52, %v6344_v6  ;;  %v14277_v6 = vld [vmem:[#allocation101_spill] sm:$0xff] }
 0x7c4   : > { %v6346_v20 = vpop.f32.mrf.mxu0 }
 0x7c5   : > { %vm6417_vm11 = vcmp.ge.f32.partialorder %v6345_v8, 0.0  ;;  %v6449_v54 = vmul.f32 0.1, %v6345_v8 }
 0x7c6   : > { %v6347_v46 = vpop.f32.mrf.mxu0 }
 0x7c7   : > { %v6481_v28 = vsel %vm6417_vm11, %v6345_v8, %v6449_v54  ;;  %v6348_v50 = vadd.f32 %v13157_v52, %v6347_v46 }
 0x7c8   : > { %v6513_v29 = vadd.f32 %v6481_v28, %v14269_v11  ;;  %v6349_v36 = vpop.f32.mrf.mxu0  ;;  %v14278_v11 = vld [vmem:[#allocation100_spill] sm:$0xff] }
 0x7c9   : > { %vm6418_vm12 = vcmp.ge.f32.partialorder %v6348_v50, 0.0  ;;  %v6450_v62 = vmul.f32 0.1, %v6348_v50 }
 0x7ca   : > { %6545 = vst.msk [vmem:[%s13189_s30 + $0x90] sm:$0xff] %vm304_vm0, %v6513_v29  ;;  %v6352_v9 = vpop.f32.mrf.mxu0 }
 0x7cb   : > { %v6482_v49 = vsel %vm6418_vm12, %v6348_v50, %v6450_v62  ;;  %v6353_v26 = vadd.f32 %v13157_v52, %v6352_v9 }
 0x7cc   : > { %v6514_v37 = vadd.f32 %v6482_v49, %v14270_v17  ;;  %v6354_v15 = vpop.f32.mrf.mxu0  ;;  %v14279_v17 = vld [vmem:[#allocation99_spill] sm:$0xff] }
 0x7cd   : > { %vm6419_vm13 = vcmp.ge.f32.partialorder %v6353_v26, 0.0  ;;  %v6451_v42 = vmul.f32 0.1, %v6353_v26 }
 0x7ce   : > { %6546 = vst.msk [vmem:[%s13189_s30 + $0x98] sm:$0xff] %vm304_vm0, %v6514_v37  ;;  %v6355_v47 = vpop.f32.mrf.mxu0 }
 0x7cf   : > { %v6483_v41 = vsel %vm6419_vm13, %v6353_v26, %v6451_v42  ;;  %v6356_v33 = vadd.f32 %v13157_v52, %v6355_v47 }
 0x7d0   : > { %v6515_v19 = vadd.f32 %v6483_v41, %v14271_v7  ;;  %v6357_v10 = vpop.f32.mrf.mxu0  ;;  %v14280_v41 = vld [vmem:[#allocation17_spill] sm:$0xff] }
 0x7d1   : > { %vm6420_vm14 = vcmp.ge.f32.partialorder %v6356_v33, 0.0  ;;  %v6452_v48 = vmul.f32 0.1, %v6356_v33 }
 0x7d2   : > { %6547 = vst.msk [vmem:[%s13189_s30 + $0xa0] sm:$0xff] %vm304_vm0, %v6515_v19 }
 0x7d3   : > { %v6484_v12 = vsel %vm6420_vm14, %v6356_v33, %v6452_v48 }
 0x7d4   : > { %v6516_v44 = vadd.f32 %v6484_v12, %v14272_v0 }
 0x7d6   : > { %6548 = vst.msk [vmem:[%s13189_s30 + $0xa8] sm:$0xff] %vm304_vm0, %v6516_v44 }
 0x7da   : > { %v6360_v18 = vpop.f32.mrf.mxu0 }
 0x7db   : > { %v6361_v38 = vadd.f32 %v13157_v52, %v6360_v18  ;;  %v14281_v18 = vld [vmem:[#allocation18_spill] sm:$0xff] }
 0x7dc   : > { %v6362_v27 = vpop.f32.mrf.mxu0 }
 0x7dd   : > { %vm6421_vm15 = vcmp.ge.f32.partialorder %v6361_v38, 0.0  ;;  %v6453_v4 = vmul.f32 0.1, %v6361_v38 }
 0x7de   : > { %v6363_v56 = vpop.f32.mrf.mxu0 }
 0x7df   : > { %v6485_v59 = vsel %vm6421_vm15, %v6361_v38, %v6453_v4  ;;  %v6364_v39 = vadd.f32 %v13157_v52, %v6363_v56 }
 0x7e0   : > { %v6517_v23 = vadd.f32 %v6485_v59, %v14273_v43  ;;  %v6365_v16 = vpop.f32.mrf.mxu0  ;;  %v14282_v59 = vld [vmem:[#allocation23_spill] sm:$0xff] }
 0x7e1   : > { %vm6422_vm2 = vcmp.ge.f32.partialorder %v6364_v39, 0.0  ;;  %v6454_v32 = vmul.f32 0.1, %v6364_v39 }
 0x7e2   : > { %6549 = vst.msk [vmem:[%s13189_s30 + $0xb0] sm:$0xff] %vm304_vm0, %v6517_v23  ;;  %v6368_v51 = vpop.f32.mrf.mxu0 }
 0x7e3   : > { %v6486_v45 = vsel %vm6422_vm2, %v6364_v39, %v6454_v32  ;;  %v6369_v34 = vadd.f32 %v13157_v52, %v6368_v51 }
 0x7e4   : > { %v6518_v5 = vadd.f32 %v6486_v45, %v14274_v3  ;;  %v6370_v57 = vpop.f32.mrf.mxu0 }
 0x7e5   : > { %vm6423_vm3 = vcmp.ge.f32.partialorder %v6369_v34, 0.0  ;;  %v6455_v14 = vmul.f32 0.1, %v6369_v34 }
 0x7e6   : > { %6550 = vst.msk [vmem:[%s13189_s30 + $0xb8] sm:$0xff] %vm304_vm0, %v6518_v5  ;;  %v6371_v1 = vpop.f32.mrf.mxu0 }
 0x7e7   : > { %v6487_v2 = vsel %vm6423_vm3, %v6369_v34, %v6455_v14  ;;  %v6372_v13 = vadd.f32 %v13157_v52, %v6371_v1 }
 0x7e8   : > { %v6519_v35 = vadd.f32 %v6487_v2, %v14275_v53  ;;  %v6373_v22 = vpop.f32.mrf.mxu0 }
 0x7e9   : > { %vm6424_vm4 = vcmp.ge.f32.partialorder %v6372_v13, 0.0  ;;  %v6456_v31 = vmul.f32 0.1, %v6372_v13 }
 0x7ea   : > { %6551 = vst.msk [vmem:[%s13189_s30 + $0xc0] sm:$0xff] %vm304_vm0, %v6519_v35  ;;  %v6376_v60 = vpop.f32.mrf.mxu0 }
 0x7eb   : > { %v6488_v30 = vsel %vm6424_vm4, %v6372_v13, %v6456_v31  ;;  %v6377_v21 = vadd.f32 %v13157_v52, %v6376_v60 }
 0x7ec   : > { %v6520_v40 = vadd.f32 %v6488_v30, %v14276_v63  ;;  %v6378_v24 = vpop.f32.mrf.mxu0 }
 0x7ed   : > { %vm6425_vm6 = vcmp.ge.f32.partialorder %v6377_v21, 0.0  ;;  %v6457_v25 = vmul.f32 0.1, %v6377_v21 }
 0x7ee   : > { %6552 = vst.msk [vmem:[%s13189_s30 + $0xc8] sm:$0xff] %vm304_vm0, %v6520_v40  ;;  %v6379_v58 = vpop.f32.mrf.mxu0 }
 0x7ef   : > { %v6489_v61 = vsel %vm6425_vm6, %v6377_v21, %v6457_v25  ;;  %v6380_v55 = vadd.f32 %v13157_v52, %v6379_v58 }
 0x7f0   : > { %v6521_v8 = vadd.f32 %v6489_v61, %v14277_v6  ;;  %v6381_v20 = vpop.f32.mrf.mxu0 }
 0x7f1   : > { %vm6426_vm7 = vcmp.ge.f32.partialorder %v6380_v55, 0.0  ;;  %v6458_v54 = vmul.f32 0.1, %v6380_v55 }
 0x7f2   : > { %6553 = vst.msk [vmem:[%s13189_s30 + $0xd0] sm:$0xff] %vm304_vm0, %v6521_v8  ;;  %v6384_v46 = vpop.f32.mrf.mxu0 }
 0x7f3   : > { %v6490_v28 = vsel %vm6426_vm7, %v6380_v55, %v6458_v54  ;;  %v6385_v50 = vadd.f32 %v13157_v52, %v6384_v46 }
 0x7f4   : > { %v6522_v29 = vadd.f32 %v6490_v28, %v14278_v11  ;;  %v6386_v36 = vpop.f32.mrf.mxu0 }
 0x7f5   : > { %vm6427_vm8 = vcmp.ge.f32.partialorder %v6385_v50, 0.0  ;;  %v6459_v62 = vmul.f32 0.1, %v6385_v50 }
 0x7f6   : > { %6554 = vst.msk [vmem:[%s13189_s30 + $0xd8] sm:$0xff] %vm304_vm0, %v6522_v29  ;;  %v6387_v9 = vpop.f32.mrf.mxu0 }
 0x7f7   : > { %v6491_v49 = vsel %vm6427_vm8, %v6385_v50, %v6459_v62  ;;  %v6388_v26 = vadd.f32 %v13157_v52, %v6387_v9 }
 0x7f8   : > { %v6523_v37 = vadd.f32 %v6491_v49, %v14279_v17  ;;  %v6389_v15 = vpop.f32.mrf.mxu0 }
 0x7f9   : > { %vm6428_vm9 = vcmp.ge.f32.partialorder %v6388_v26, 0.0  ;;  %v6460_v42 = vmul.f32 0.1, %v6388_v26 }
 0x7fa   : > { %6555 = vst.msk [vmem:[%s13189_s30 + $0xe0] sm:$0xff] %vm304_vm0, %v6523_v37 }
 0x7fb   : > { %v6492_v47 = vsel %vm6428_vm9, %v6388_v26, %v6460_v42 }
 0x7fc   : > { %v6524_v33 = vadd.f32 %v6492_v47, %v14280_v41  ;;  %v6392_v7 = vpop.f32.mrf.mxu0 }
 0x7fd   : > { %v6393_v19 = vadd.f32 %v13157_v52, %v6392_v7 }
 0x7fe   : > { %6556 = vst.msk [vmem:[%s13189_s30 + $0xe8] sm:$0xff] %vm304_vm0, %v6524_v33  ;;  %v6394_v10 = vpop.f32.mrf.mxu0 }
 0x7ff   : > { %vm6429_vm1 = vcmp.ge.f32.partialorder %v6393_v19, 0.0  ;;  %v6461_v48 = vmul.f32 0.1, %v6393_v19 }
 0x800   : > { %v6395_v12 = vpop.f32.mrf.mxu0 }
 0x801   : > { %v6493_v0 = vsel %vm6429_vm1, %v6393_v19, %v6461_v48  ;;  %v6396_v44 = vadd.f32 %v13157_v52, %v6395_v12 }
 0x802   : > { %v6525_v38 = vadd.f32 %v6493_v0, %v14281_v18  ;;  %v6397_v27 = vpop.f32.mrf.mxu0 }
 0x803   : > { %vm6430_vm5 = vcmp.ge.f32.partialorder %v6396_v44, 0.0  ;;  %v6462_v4 = vmul.f32 0.1, %v6396_v44 }
 0x804   : > { %6557 = vst.msk [vmem:[%s13189_s30 + $0xf0] sm:$0xff] %vm304_vm0, %v6525_v38 }
 0x805   : > { %v6494_v56 = vsel %vm6430_vm5, %v6396_v44, %v6462_v4 }
 0x806   : > { %v6526_v39 = vadd.f32 %v6494_v56, %v14282_v59 }
 0x808   : > { %6558 = vst.msk [vmem:[%s13189_s30 + $0xf8] sm:$0xff] %vm304_vm0, %v6526_v39 }
 0x809 PF: > { %s15_s18 = sadd.s32 1, %s8565_s18  }
 0x80a   : > { %p12_p4 = scmp.ge.s32.totalorder %s15_s18, 4  }
 0x80c   :  { %14 = sbr.rel (!%p12_p4) target bundleno = 1 (0x1), region = 74 }

</bundles_post_ra>
